<compile_context>
chip_gen: v6e
topology: v6e:2x2x1
jax: 0.10.0
libtpu: 0.0.40
codegen_flags: <defaults>
</compile_context>

<pallas_src>
import functools

import numpy as np
import jax
import jax.numpy as jnp
from jax.experimental import pallas as pl
from jax.experimental.pallas import tpu as pltpu


# --------------------------------------------------------------------------
# host-side helpers (mirror the PyTorch reference, shape-static)
# --------------------------------------------------------------------------
def _compute_pad_size_3d(size_dhw, patch_size):
    return tuple((patch_size[i] - size_dhw[i] % patch_size[i]) % patch_size[i]
                 for i in range(3))


def _get_window_and_shift_size(shift_size, size_dhw, window_size):
    window_size = list(window_size)
    shift_size = list(shift_size)
    for i in range(3):
        if size_dhw[i] <= window_size[i]:
            window_size[i] = size_dhw[i]
            shift_size[i] = 0
    return window_size, shift_size


def _relative_position_index(window_size):
    wt, wh, ww = window_size
    coords = np.stack(np.meshgrid(np.arange(wt), np.arange(wh), np.arange(ww),
                                  indexing="ij"))                    # (3, wt, wh, ww)
    coords_flat = coords.reshape(3, -1)
    rel = coords_flat[:, :, None] - coords_flat[:, None, :]          # (3, N, N)
    rel = rel.transpose(1, 2, 0).astype(np.int64)
    rel[:, :, 0] += wt - 1
    rel[:, :, 1] += wh - 1
    rel[:, :, 2] += ww - 1
    rel[:, :, 0] *= (2 * wh - 1) * (2 * ww - 1)
    rel[:, :, 1] *= (2 * ww - 1)
    return rel.sum(-1)                                               # (N, N)


def _compute_attention_mask_3d(padded_size, window_size, shift_size):
    Tp, Hp, Wp = padded_size
    wt, wh, ww = window_size
    attn_mask = np.zeros(padded_size, dtype=np.float32)
    slices = [((0, -window_size[i]),
               (-window_size[i], -shift_size[i]),
               (-shift_size[i], None)) for i in range(3)]
    cnt = 0
    for d in slices[0]:
        for h in slices[1]:
            for w in slices[2]:
                attn_mask[d[0]:d[1], h[0]:h[1], w[0]:w[1]] = cnt
                cnt += 1
    nW = (Tp // wt) * (Hp // wh) * (Wp // ww)
    N = wt * wh * ww
    attn_mask = attn_mask.reshape(Tp // wt, wt, Hp // wh, wh, Wp // ww, ww)
    attn_mask = attn_mask.transpose(0, 2, 4, 1, 3, 5).reshape(nW, N)
    diff = attn_mask[:, None, :] - attn_mask[:, :, None]             # (nW, N, N)
    return np.where(diff != 0, -100.0, 0.0).astype(np.float32)


def _choose_window_block(num_windows, batch, N, C, num_heads, itemsize,
                         target_rows=512, vmem_budget=14 * 1024 * 1024):
    """Largest divisor WB of num_windows s.t. WB*N <= target and VMEM estimate fits."""
    best = 1
    for wb in range(1, num_windows + 1):
        if num_windows % wb:
            continue
        # keep >=2 total grid steps so v7x's two TensorCores both get work
        if batch * (num_windows // wb) < 2 and wb > 1:
            continue
        rows = wb * N
        est = (2 * rows * C * itemsize            # x block (double buffered)
               + 2 * rows * C * itemsize          # out block (double buffered)
               + 2 * wb * N * N * 4               # shift-mask block (double buffered)
               + 2 * num_heads * N * N * 4        # rel-pos bias (grid resident)
               + 2 * (3 * C * C + C * C) * itemsize + 2 * 4 * C * 4   # weights/biases
               + rows * 3 * C * 4                 # qkv intermediate (f32)
               + 2 * rows * C * 4                 # head-concat buffer + proj result
               + 3 * wb * N * N * 4)              # attn / exp / p working set
        if rows <= target_rows and est <= vmem_budget:
            best = wb
    return best


# --------------------------------------------------------------------------
# Pallas kernel: one (batch, window-block) tile per grid step
# --------------------------------------------------------------------------
def _swin_attn_kernel(*refs, num_heads, head_dim, has_mask):
    if has_mask:
        (x_ref, bias_ref, mask_ref, wqkv_ref, bqkv_ref,
         wproj_ref, bproj_ref, o_ref) = refs
    else:
        (x_ref, bias_ref, wqkv_ref, bqkv_ref,
         wproj_ref, bproj_ref, o_ref) = refs
        mask_ref = None

    _, WB, N, C = x_ref.shape
    rows = WB * N
    mdt = wqkv_ref.dtype                          # MXU operand dtype (bf16 or f32)

    # fused QKV projection on the MXU; scale is pre-folded into the Q columns.
    x = x_ref[...].reshape(rows, C)
    qkv = jnp.dot(x, wqkv_ref[...], preferred_element_type=jnp.float32)
    qkv = qkv + bqkv_ref[...]                     # (rows, 3C) f32
    qkv = qkv.reshape(WB, N, 3 * C)

    mask = mask_ref[...] if has_mask else None    # (WB, N, N) f32, head-independent

    dn_qk = (((2,), (2,)), ((0,), (0,)))          # (WB,N,hd) . (WB,N,hd) -> (WB,N,N)
    dn_pv = (((2,), (1,)), ((0,), (0,)))          # (WB,N,N) . (WB,N,hd) -> (WB,N,hd)

    head_outs = []                                # per-head (WB, N, hd) f32 outputs
    for h in range(num_heads):
        lo = h * head_dim
        qh = qkv[:, :, lo:lo + head_dim].astype(mdt)
        kh = qkv[:, :, C + lo:C + lo + head_dim].astype(mdt)
        vh = qkv[:, :, 2 * C + lo:2 * C + lo + head_dim].astype(mdt)

        attn = jax.lax.dot_general(qh, kh, dn_qk,
                                   preferred_element_type=jnp.float32)
        attn = attn + bias_ref[h]                 # rel-pos bias, broadcast over WB
        if has_mask:
            attn = attn + mask                    # shift mask, broadcast over heads

        attn = attn - jnp.max(attn, axis=-1, keepdims=True)
        e = jnp.exp(attn)
        p = e * pl.reciprocal(jnp.sum(e, axis=-1, keepdims=True), approx=True)

        head_outs.append(jax.lax.dot_general(p.astype(mdt), vh, dn_pv,
                                             preferred_element_type=jnp.float32))

    # reassemble heads along the lane dim, then ONE full-K output projection matmul
    # (K = C) instead of num_heads tiny K = head_dim matmuls + VALU accumulation.
    o_all = jnp.concatenate(head_outs, axis=-1).reshape(rows, C)
    y = jnp.dot(o_all.astype(mdt), wproj_ref[...],
                preferred_element_type=jnp.float32)
    y = y + bproj_ref[...]
    o_ref[...] = y.reshape(1, WB, N, C).astype(o_ref.dtype)


# --------------------------------------------------------------------------
# pure-JAX reference for the windowed attention (verification only)
# --------------------------------------------------------------------------
def _ref_attention_windows(xw, bias_mask, qkv_weight, qkv_bias, proj_weight,
                           proj_bias, num_heads):
    Bn, nWn, N, C = xw.shape
    hd = C // num_heads
    x = xw.reshape(Bn * nWn, N, C)
    qkv = x @ qkv_weight.T + qkv_bias
    qkv = qkv.reshape(Bn * nWn, N, 3, num_heads, hd).transpose(2, 0, 3, 1, 4)
    q, k, v = qkv[0] * hd ** -0.5, qkv[1], qkv[2]
    attn = jnp.einsum('bhqd,bhkd->bhqk', q, k)
    attn = attn.reshape(Bn, nWn, num_heads, N, N) + bias_mask[None]
    attn = jax.nn.softmax(attn, axis=-1).reshape(Bn * nWn, num_heads, N, N)
    out = jnp.einsum('bhqk,bhkd->bhqd', attn, v).transpose(0, 2, 1, 3)
    out = out.reshape(Bn, nWn, N, C) @ proj_weight.T + proj_bias
    return out


# --------------------------------------------------------------------------
# full forward (matches ShiftedWindowAttention3d.forward semantics)
# --------------------------------------------------------------------------
@functools.partial(jax.jit,
                   static_argnames=("window_size", "shift_size", "num_heads",
                                    "use_pallas"))
def shifted_window_attention_3d(x, qkv_weight, qkv_bias, proj_weight, proj_bias,
                                rel_pos_table, *, window_size, shift_size,
                                num_heads, use_pallas=True):
    b, t, h, w, c = x.shape
    window_size, shift_size = _get_window_and_shift_size(shift_size, (t, h, w),
                                                         window_size)
    wt, wh, ww = window_size
    N = wt * wh * ww
    shifted = sum(shift_size) > 0

    # window-invariant relative-position bias  (num_heads, N, N), f32
    rpi = _relative_position_index(window_size)
    rel_bias = rel_pos_table.astype(jnp.float32)[jnp.asarray(rpi.reshape(-1))]
    rel_bias = rel_bias.reshape(N, N, num_heads).transpose(2, 0, 1)

    pad = _compute_pad_size_3d((t, h, w), window_size)
    xp = jnp.pad(x, ((0, 0), (0, pad[0]), (0, pad[1]), (0, pad[2]), (0, 0)))
    _, tp, hp, wp, _ = xp.shape

    if shifted:
        xp = jnp.roll(xp, shift=(-shift_size[0], -shift_size[1], -shift_size[2]),
                      axis=(1, 2, 3))

    nT, nH, nW_ = tp // wt, hp // wh, wp // ww
    num_windows = nT * nH * nW_

    # window partition -> (B, num_windows, N, C)
    xw = xp.reshape(b, nT, wt, nH, wh, nW_, ww, c)
    xw = xw.transpose(0, 1, 3, 5, 2, 4, 6, 7).reshape(b, num_windows, N, c)

    # per-window, head-independent shift mask (num_windows, N, N)
    mask = None
    if shifted:
        mask = jnp.asarray(
            _compute_attention_mask_3d((tp, hp, wp), window_size, shift_size))

    head_dim = c // num_heads
    scale = head_dim ** -0.5

    if use_pallas:
        # bf16 inputs -> bf16 MXU operands (f32 accumulation / softmax inside kernel)
        compute_dtype = jnp.bfloat16 if x.dtype == jnp.bfloat16 else jnp.float32
        itemsize = 2 if compute_dtype == jnp.bfloat16 else 4

        # fold 1/sqrt(head_dim) into the Q columns of the fused QKV weight & bias
        col_scale = jnp.concatenate([jnp.full((c,), scale, jnp.float32),
                                     jnp.ones((2 * c,), jnp.float32)])
        wqkv_t = (qkv_weight.astype(jnp.float32).T * col_scale[None, :]
                  ).astype(compute_dtype)                               # (C, 3C)
        wproj_t = proj_weight.astype(jnp.float32).T.astype(compute_dtype)  # (C, C)
        bqkv2d = (qkv_bias.astype(jnp.float32) * col_scale).reshape(1, 3 * c)
        bproj2d = proj_bias.astype(jnp.float32).reshape(1, c)
        xw_in = xw.astype(compute_dtype)

        WB = _choose_window_block(num_windows, b, N, c, num_heads, itemsize)

        kern = functools.partial(_swin_attn_kernel, num_heads=num_heads,
                                 head_dim=head_dim, has_mask=shifted)

        in_specs = [
            pl.BlockSpec((1, WB, N, c), lambda bi, wi: (bi, wi, 0, 0)),
            # constant index_map -> rel-pos bias stays VMEM-resident across the grid
            pl.BlockSpec((num_heads, N, N), lambda bi, wi: (0, 0, 0)),
        ]
        inputs = [xw_in, rel_bias]
        if shifted:
            in_specs.append(pl.BlockSpec((WB, N, N), lambda bi, wi: (wi, 0, 0)))
            inputs.append(mask.astype(jnp.float32))
        in_specs += [
            pl.BlockSpec((c, 3 * c), lambda bi, wi: (0, 0)),
            pl.BlockSpec((1, 3 * c), lambda bi, wi: (0, 0)),
            pl.BlockSpec((c, c), lambda bi, wi: (0, 0)),
            pl.BlockSpec((1, c), lambda bi, wi: (0, 0)),
        ]
        inputs += [wqkv_t, bqkv2d, wproj_t, bproj2d]

        out_w = pl.pallas_call(
            kern,
            out_shape=jax.ShapeDtypeStruct((b, num_windows, N, c), x.dtype),
            grid_spec=pltpu.PrefetchScalarGridSpec(
                num_scalar_prefetch=0,
                grid=(b, num_windows // WB),
                in_specs=in_specs,
                out_specs=pl.BlockSpec((1, WB, N, c),
                                       lambda bi, wi: (bi, wi, 0, 0)),
            ),
            compiler_params=pltpu.CompilerParams(
                dimension_semantics=("parallel", "parallel"),
                vmem_limit_bytes=32 * 1024 * 1024),
        )(*inputs)
    else:
        if shifted:
            bias_mask = rel_bias[None, :, :, :] + mask[:, None, :, :]
        else:
            bias_mask = jnp.broadcast_to(rel_bias[None],
                                         (num_windows, num_heads, N, N))
        out_w = _ref_attention_windows(xw, bias_mask.astype(jnp.float32),
                                       qkv_weight, qkv_bias, proj_weight,
                                       proj_bias, num_heads).astype(x.dtype)

    # window reverse -> (B, Tp, Hp, Wp, C)
    y = out_w.reshape(b, nT, nH, nW_, wt, wh, ww, c)
    y = y.transpose(0, 1, 4, 2, 5, 3, 6, 7).reshape(b, tp, hp, wp, c)

    if shifted:
        y = jnp.roll(y, shift=(shift_size[0], shift_size[1], shift_size[2]),
                     axis=(1, 2, 3))
    return y[:, :t, :h, :w, :]


# --------------------------------------------------------------------------
if __name__ == "__main__":
    B, T, H, W, C = 2, 4, 8, 8, 32
    num_heads = 4
    window_size = (2, 4, 4)
    shift_size = (1, 2, 2)

    key = jax.random.PRNGKey(0)
    k1, k2, k3, k4, k5, k6 = jax.random.split(key, 6)

    qkv_weight = jax.random.normal(k1, (3 * C, C), jnp.float32) * 0.02
    qkv_bias = jax.random.normal(k2, (3 * C,), jnp.float32) * 0.02
    proj_weight = jax.random.normal(k3, (C, C), jnp.float32) * 0.02
    proj_bias = jax.random.normal(k4, (C,), jnp.float32) * 0.02
    table_len = ((2 * window_size[0] - 1) * (2 * window_size[1] - 1)
                 * (2 * window_size[2] - 1))
    rel_pos_table = jax.random.truncated_normal(
        k5, -2.0, 2.0, (table_len, num_heads), jnp.float32) * 0.02

    x = jax.random.normal(k6, (B, T, H, W, C), jnp.float32)

    # shifted-window (SW-MSA) path, f32
    out = shifted_window_attention_3d(x, qkv_weight, qkv_bias, proj_weight,
                                      proj_bias, rel_pos_table,
                                      window_size=window_size,
                                      shift_size=shift_size,
                                      num_heads=num_heads, use_pallas=True)
    out = jax.block_until_ready(out)
    ref = shifted_window_attention_3d(x, qkv_weight, qkv_bias, proj_weight,
                                      proj_bias, rel_pos_table,
                                      window_size=window_size,
                                      shift_size=shift_size,
                                      num_heads=num_heads, use_pallas=False)
    ref = jax.block_until_ready(ref)
    assert out.shape == (B, T, H, W, C)
    np.testing.assert_allclose(np.asarray(out), np.asarray(ref),
                               rtol=1e-3, atol=1e-3)

    # non-shifted (W-MSA) path, f32 (exercises the no-mask kernel variant)
    out_ns = shifted_window_attention_3d(x, qkv_weight, qkv_bias, proj_weight,
                                         proj_bias, rel_pos_table,
                                         window_size=window_size,
                                         shift_size=(0, 0, 0),
                                         num_heads=num_heads, use_pallas=True)
    ref_ns = shifted_window_attention_3d(x, qkv_weight, qkv_bias, proj_weight,
                                         proj_bias, rel_pos_table,
                                         window_size=window_size,
                                         shift_size=(0, 0, 0),
                                         num_heads=num_heads, use_pallas=False)
    np.testing.assert_allclose(np.asarray(jax.block_until_ready(out_ns)),
                               np.asarray(jax.block_until_ready(ref_ns)),
                               rtol=1e-3, atol=1e-3)

    # bf16 activations -> bf16 MXU operand path (loose check vs f32 ref)
    out_bf = shifted_window_attention_3d(
        x.astype(jnp.bfloat16), qkv_weight, qkv_bias, proj_weight, proj_bias,
        rel_pos_table, window_size=window_size, shift_size=shift_size,
        num_heads=num_heads, use_pallas=True)
    out_bf = jax.block_until_ready(out_bf)
    np.testing.assert_allclose(np.asarray(out_bf.astype(jnp.float32)),
                               np.asarray(ref), rtol=1e-1, atol=1e-1)

    print("KERNEL_OK")
</pallas_src>

<mosaic_0001>
module attributes {stable_mosaic.version = 11 : i64} {
  func.func @_swin_attn_kernel(%arg0: i32, %arg1: i32, %arg2: memref<1x8x32x32xf32, #tpu.memory_space<vmem>>, %arg3: memref<4x32x32xf32, #tpu.memory_space<vmem>>, %arg4: memref<8x32x32xf32, #tpu.memory_space<vmem>>, %arg5: memref<32x96xf32, #tpu.memory_space<vmem>>, %arg6: memref<1x96xf32, #tpu.memory_space<vmem>>, %arg7: memref<32x32xf32, #tpu.memory_space<vmem>>, %arg8: memref<1x32xf32, #tpu.memory_space<vmem>>, %arg9: memref<1x8x32x32xf32, #tpu.memory_space<vmem>>) attributes {dimension_semantics = [#tpu.dimension_semantics<parallel>, #tpu.dimension_semantics<parallel>], iteration_bounds = array<i64: 2, 1>, scalar_prefetch = 0 : i64, scratch_operands = 0 : i64, tpu.core_type = #tpu.core_type<tc>, window_params = [{transform_indices = @transform_0, window_bounds = array<i64: 1, 8, 32, 32>}, {pipeline_mode = #tpu.pipeline_mode<synchronous>, transform_indices = @transform_1, window_bounds = array<i64: 4, 32, 32>}, {transform_indices = @transform_2, window_bounds = array<i64: 8, 32, 32>}, {pipeline_mode = #tpu.pipeline_mode<synchronous>, transform_indices = @transform_3, window_bounds = array<i64: 32, 96>}, {pipeline_mode = #tpu.pipeline_mode<synchronous>, transform_indices = @transform_4, window_bounds = array<i64: 1, 96>}, {pipeline_mode = #tpu.pipeline_mode<synchronous>, transform_indices = @transform_5, window_bounds = array<i64: 32, 32>}, {pipeline_mode = #tpu.pipeline_mode<synchronous>, transform_indices = @transform_6, window_bounds = array<i64: 1, 32>}, {transform_indices = @transform_7, window_bounds = array<i64: 1, 8, 32, 32>}]} {
    %c0 = arith.constant 0 : index
    %c0_0 = arith.constant 0 : index
    %c0_1 = arith.constant 0 : index
    %c0_2 = arith.constant 0 : index
    %0 = vector.load %arg2[%c0, %c0_0, %c0_1, %c0_2] : memref<1x8x32x32xf32, #tpu.memory_space<vmem>>, vector<1x8x32x32xf32>
    %1 = vector.shape_cast %0 : vector<1x8x32x32xf32> to vector<256x32xf32>
    %c0_3 = arith.constant 0 : index
    %c0_4 = arith.constant 0 : index
    %2 = vector.load %arg5[%c0_3, %c0_4] : memref<32x96xf32, #tpu.memory_space<vmem>>, vector<32x96xf32>
    %cst = arith.constant dense<0.000000e+00> : vector<256x96xf32>
    %3 = tpu.matmul %1, %2, %cst {dimension_numbers = #tpu.dot_dimension_numbers<[1], [0], [0], [1], [0, 0, 1, 1], [], []>} : vector<256x32xf32>, vector<32x96xf32>, vector<256x96xf32> -> vector<256x96xf32>
    %c0_5 = arith.constant 0 : index
    %c0_6 = arith.constant 0 : index
    %4 = vector.load %arg6[%c0_5, %c0_6] : memref<1x96xf32, #tpu.memory_space<vmem>>, vector<1x96xf32>
    %5 = vector.broadcast %4 : vector<1x96xf32> to vector<256x96xf32>
    %6 = arith.addf %3, %5 : vector<256x96xf32>
    %7 = vector.shape_cast %6 : vector<256x96xf32> to vector<8x32x96xf32>
    %c0_7 = arith.constant 0 : index
    %c0_8 = arith.constant 0 : index
    %c0_9 = arith.constant 0 : index
    %8 = vector.load %arg4[%c0_7, %c0_8, %c0_9] : memref<8x32x32xf32, #tpu.memory_space<vmem>>, vector<8x32x32xf32>
    %9 = vector.extract_strided_slice %7 {offsets = [0, 0, 0], sizes = [8, 32, 8], strides = [1, 1, 1]} : vector<8x32x96xf32> to vector<8x32x8xf32>
    %10 = vector.extract_strided_slice %7 {offsets = [0, 0, 32], sizes = [8, 32, 8], strides = [1, 1, 1]} : vector<8x32x96xf32> to vector<8x32x8xf32>
    %11 = vector.extract_strided_slice %7 {offsets = [0, 0, 64], sizes = [8, 32, 8], strides = [1, 1, 1]} : vector<8x32x96xf32> to vector<8x32x8xf32>
    %cst_10 = arith.constant dense<0.000000e+00> : vector<8x32x32xf32>
    %12 = tpu.matmul %9, %10, %cst_10 {dimension_numbers = #tpu.dot_dimension_numbers<[2], [2], [1], [1], [0, 0, 0, 1, 1, 1], [0], [0]>} : vector<8x32x8xf32>, vector<8x32x8xf32>, vector<8x32x32xf32> -> vector<8x32x32xf32>
    %c0_11 = arith.constant 0 : index
    %c0_12 = arith.constant 0 : index
    %c0_13 = arith.constant 0 : index
    %13 = vector.load %arg3[%c0_11, %c0_12, %c0_13] : memref<4x32x32xf32, #tpu.memory_space<vmem>>, vector<1x32x32xf32>
    %14 = vector.shape_cast %13 : vector<1x32x32xf32> to vector<32x32xf32>
    %15 = vector.shape_cast %14 : vector<32x32xf32> to vector<1x32x32xf32>
    %16 = vector.broadcast %15 : vector<1x32x32xf32> to vector<8x32x32xf32>
    %17 = arith.addf %12, %16 : vector<8x32x32xf32>
    %18 = arith.addf %17, %8 : vector<8x32x32xf32>
    %cst_14 = arith.constant dense<0xFF800000> : vector<8x32xf32>
    %19 = vector.multi_reduction <maximumf>, %18, %cst_14 [2] : vector<8x32x32xf32> to vector<8x32xf32>
    %20 = vector.shape_cast %19 : vector<8x32xf32> to vector<8x32x1xf32>
    %21 = vector.broadcast %20 : vector<8x32x1xf32> to vector<8x32x32xf32>
    %22 = arith.subf %18, %21 : vector<8x32x32xf32>
    %23 = math.exp %22 : vector<8x32x32xf32>
    %cst_15 = arith.constant dense<0.000000e+00> : vector<8x32xf32>
    %24 = vector.multi_reduction <add>, %23, %cst_15 [2] : vector<8x32x32xf32> to vector<8x32xf32>
    %25 = vector.shape_cast %24 : vector<8x32xf32> to vector<8x32x1xf32>
    %26 = tpu.reciprocal %25 {approx = true} : vector<8x32x1xf32> -> vector<8x32x1xf32>
    %27 = vector.broadcast %26 : vector<8x32x1xf32> to vector<8x32x32xf32>
    %28 = arith.mulf %23, %27 : vector<8x32x32xf32>
    %cst_16 = arith.constant dense<0.000000e+00> : vector<8x32x8xf32>
    %29 = tpu.matmul %28, %11, %cst_16 {dimension_numbers = #tpu.dot_dimension_numbers<[2], [1], [1], [2], [0, 0, 0, 1, 1, 2], [0], [0]>} : vector<8x32x32xf32>, vector<8x32x8xf32>, vector<8x32x8xf32> -> vector<8x32x8xf32>
    %30 = vector.extract_strided_slice %7 {offsets = [0, 0, 8], sizes = [8, 32, 8], strides = [1, 1, 1]} : vector<8x32x96xf32> to vector<8x32x8xf32>
    %31 = vector.extract_strided_slice %7 {offsets = [0, 0, 40], sizes = [8, 32, 8], strides = [1, 1, 1]} : vector<8x32x96xf32> to vector<8x32x8xf32>
    %32 = vector.extract_strided_slice %7 {offsets = [0, 0, 72], sizes = [8, 32, 8], strides = [1, 1, 1]} : vector<8x32x96xf32> to vector<8x32x8xf32>
    %cst_17 = arith.constant dense<0.000000e+00> : vector<8x32x32xf32>
    %33 = tpu.matmul %30, %31, %cst_17 {dimension_numbers = #tpu.dot_dimension_numbers<[2], [2], [1], [1], [0, 0, 0, 1, 1, 1], [0], [0]>} : vector<8x32x8xf32>, vector<8x32x8xf32>, vector<8x32x32xf32> -> vector<8x32x32xf32>
    %c1 = arith.constant 1 : index
    %c0_18 = arith.constant 0 : index
    %c0_19 = arith.constant 0 : index
    %34 = vector.load %arg3[%c1, %c0_18, %c0_19] : memref<4x32x32xf32, #tpu.memory_space<vmem>>, vector<1x32x32xf32>
    %35 = vector.shape_cast %34 : vector<1x32x32xf32> to vector<32x32xf32>
    %36 = vector.shape_cast %35 : vector<32x32xf32> to vector<1x32x32xf32>
    %37 = vector.broadcast %36 : vector<1x32x32xf32> to vector<8x32x32xf32>
    %38 = arith.addf %33, %37 : vector<8x32x32xf32>
    %39 = arith.addf %38, %8 : vector<8x32x32xf32>
    %cst_20 = arith.constant dense<0xFF800000> : vector<8x32xf32>
    %40 = vector.multi_reduction <maximumf>, %39, %cst_20 [2] : vector<8x32x32xf32> to vector<8x32xf32>
    %41 = vector.shape_cast %40 : vector<8x32xf32> to vector<8x32x1xf32>
    %42 = vector.broadcast %41 : vector<8x32x1xf32> to vector<8x32x32xf32>
    %43 = arith.subf %39, %42 : vector<8x32x32xf32>
    %44 = math.exp %43 : vector<8x32x32xf32>
    %cst_21 = arith.constant dense<0.000000e+00> : vector<8x32xf32>
    %45 = vector.multi_reduction <add>, %44, %cst_21 [2] : vector<8x32x32xf32> to vector<8x32xf32>
    %46 = vector.shape_cast %45 : vector<8x32xf32> to vector<8x32x1xf32>
    %47 = tpu.reciprocal %46 {approx = true} : vector<8x32x1xf32> -> vector<8x32x1xf32>
    %48 = vector.broadcast %47 : vector<8x32x1xf32> to vector<8x32x32xf32>
    %49 = arith.mulf %44, %48 : vector<8x32x32xf32>
    %cst_22 = arith.constant dense<0.000000e+00> : vector<8x32x8xf32>
    %50 = tpu.matmul %49, %32, %cst_22 {dimension_numbers = #tpu.dot_dimension_numbers<[2], [1], [1], [2], [0, 0, 0, 1, 1, 2], [0], [0]>} : vector<8x32x32xf32>, vector<8x32x8xf32>, vector<8x32x8xf32> -> vector<8x32x8xf32>
    %51 = vector.extract_strided_slice %7 {offsets = [0, 0, 16], sizes = [8, 32, 8], strides = [1, 1, 1]} : vector<8x32x96xf32> to vector<8x32x8xf32>
    %52 = vector.extract_strided_slice %7 {offsets = [0, 0, 48], sizes = [8, 32, 8], strides = [1, 1, 1]} : vector<8x32x96xf32> to vector<8x32x8xf32>
    %53 = vector.extract_strided_slice %7 {offsets = [0, 0, 80], sizes = [8, 32, 8], strides = [1, 1, 1]} : vector<8x32x96xf32> to vector<8x32x8xf32>
    %cst_23 = arith.constant dense<0.000000e+00> : vector<8x32x32xf32>
    %54 = tpu.matmul %51, %52, %cst_23 {dimension_numbers = #tpu.dot_dimension_numbers<[2], [2], [1], [1], [0, 0, 0, 1, 1, 1], [0], [0]>} : vector<8x32x8xf32>, vector<8x32x8xf32>, vector<8x32x32xf32> -> vector<8x32x32xf32>
    %c2 = arith.constant 2 : index
    %c0_24 = arith.constant 0 : index
    %c0_25 = arith.constant 0 : index
    %55 = vector.load %arg3[%c2, %c0_24, %c0_25] : memref<4x32x32xf32, #tpu.memory_space<vmem>>, vector<1x32x32xf32>
    %56 = vector.shape_cast %55 : vector<1x32x32xf32> to vector<32x32xf32>
    %57 = vector.shape_cast %56 : vector<32x32xf32> to vector<1x32x32xf32>
    %58 = vector.broadcast %57 : vector<1x32x32xf32> to vector<8x32x32xf32>
    %59 = arith.addf %54, %58 : vector<8x32x32xf32>
    %60 = arith.addf %59, %8 : vector<8x32x32xf32>
    %cst_26 = arith.constant dense<0xFF800000> : vector<8x32xf32>
    %61 = vector.multi_reduction <maximumf>, %60, %cst_26 [2] : vector<8x32x32xf32> to vector<8x32xf32>
    %62 = vector.shape_cast %61 : vector<8x32xf32> to vector<8x32x1xf32>
    %63 = vector.broadcast %62 : vector<8x32x1xf32> to vector<8x32x32xf32>
    %64 = arith.subf %60, %63 : vector<8x32x32xf32>
    %65 = math.exp %64 : vector<8x32x32xf32>
    %cst_27 = arith.constant dense<0.000000e+00> : vector<8x32xf32>
    %66 = vector.multi_reduction <add>, %65, %cst_27 [2] : vector<8x32x32xf32> to vector<8x32xf32>
    %67 = vector.shape_cast %66 : vector<8x32xf32> to vector<8x32x1xf32>
    %68 = tpu.reciprocal %67 {approx = true} : vector<8x32x1xf32> -> vector<8x32x1xf32>
    %69 = vector.broadcast %68 : vector<8x32x1xf32> to vector<8x32x32xf32>
    %70 = arith.mulf %65, %69 : vector<8x32x32xf32>
    %cst_28 = arith.constant dense<0.000000e+00> : vector<8x32x8xf32>
    %71 = tpu.matmul %70, %53, %cst_28 {dimension_numbers = #tpu.dot_dimension_numbers<[2], [1], [1], [2], [0, 0, 0, 1, 1, 2], [0], [0]>} : vector<8x32x32xf32>, vector<8x32x8xf32>, vector<8x32x8xf32> -> vector<8x32x8xf32>
    %72 = vector.extract_strided_slice %7 {offsets = [0, 0, 24], sizes = [8, 32, 8], strides = [1, 1, 1]} : vector<8x32x96xf32> to vector<8x32x8xf32>
    %73 = vector.extract_strided_slice %7 {offsets = [0, 0, 56], sizes = [8, 32, 8], strides = [1, 1, 1]} : vector<8x32x96xf32> to vector<8x32x8xf32>
    %74 = vector.extract_strided_slice %7 {offsets = [0, 0, 88], sizes = [8, 32, 8], strides = [1, 1, 1]} : vector<8x32x96xf32> to vector<8x32x8xf32>
    %cst_29 = arith.constant dense<0.000000e+00> : vector<8x32x32xf32>
    %75 = tpu.matmul %72, %73, %cst_29 {dimension_numbers = #tpu.dot_dimension_numbers<[2], [2], [1], [1], [0, 0, 0, 1, 1, 1], [0], [0]>} : vector<8x32x8xf32>, vector<8x32x8xf32>, vector<8x32x32xf32> -> vector<8x32x32xf32>
    %c3 = arith.constant 3 : index
    %c0_30 = arith.constant 0 : index
    %c0_31 = arith.constant 0 : index
    %76 = vector.load %arg3[%c3, %c0_30, %c0_31] : memref<4x32x32xf32, #tpu.memory_space<vmem>>, vector<1x32x32xf32>
    %77 = vector.shape_cast %76 : vector<1x32x32xf32> to vector<32x32xf32>
    %78 = vector.shape_cast %77 : vector<32x32xf32> to vector<1x32x32xf32>
    %79 = vector.broadcast %78 : vector<1x32x32xf32> to vector<8x32x32xf32>
    %80 = arith.addf %75, %79 : vector<8x32x32xf32>
    %81 = arith.addf %80, %8 : vector<8x32x32xf32>
    %cst_32 = arith.constant dense<0xFF800000> : vector<8x32xf32>
    %82 = vector.multi_reduction <maximumf>, %81, %cst_32 [2] : vector<8x32x32xf32> to vector<8x32xf32>
    %83 = vector.shape_cast %82 : vector<8x32xf32> to vector<8x32x1xf32>
    %84 = vector.broadcast %83 : vector<8x32x1xf32> to vector<8x32x32xf32>
    %85 = arith.subf %81, %84 : vector<8x32x32xf32>
    %86 = math.exp %85 : vector<8x32x32xf32>
    %cst_33 = arith.constant dense<0.000000e+00> : vector<8x32xf32>
    %87 = vector.multi_reduction <add>, %86, %cst_33 [2] : vector<8x32x32xf32> to vector<8x32xf32>
    %88 = vector.shape_cast %87 : vector<8x32xf32> to vector<8x32x1xf32>
    %89 = tpu.reciprocal %88 {approx = true} : vector<8x32x1xf32> -> vector<8x32x1xf32>
    %90 = vector.broadcast %89 : vector<8x32x1xf32> to vector<8x32x32xf32>
    %91 = arith.mulf %86, %90 : vector<8x32x32xf32>
    %cst_34 = arith.constant dense<0.000000e+00> : vector<8x32x8xf32>
    %92 = tpu.matmul %91, %74, %cst_34 {dimension_numbers = #tpu.dot_dimension_numbers<[2], [1], [1], [2], [0, 0, 0, 1, 1, 2], [0], [0]>} : vector<8x32x32xf32>, vector<8x32x8xf32>, vector<8x32x8xf32> -> vector<8x32x8xf32>
    %93 = tpu.concatenate %29, %50, %71, %92 in 2 : vector<8x32x8xf32>, vector<8x32x8xf32>, vector<8x32x8xf32>, vector<8x32x8xf32> -> vector<8x32x32xf32>
    %94 = vector.shape_cast %93 : vector<8x32x32xf32> to vector<256x32xf32>
    %c0_35 = arith.constant 0 : index
    %c0_36 = arith.constant 0 : index
    %95 = vector.load %arg7[%c0_35, %c0_36] : memref<32x32xf32, #tpu.memory_space<vmem>>, vector<32x32xf32>
    %cst_37 = arith.constant dense<0.000000e+00> : vector<256x32xf32>
    %96 = tpu.matmul %94, %95, %cst_37 {dimension_numbers = #tpu.dot_dimension_numbers<[1], [0], [0], [1], [0, 0, 1, 1], [], []>} : vector<256x32xf32>, vector<32x32xf32>, vector<256x32xf32> -> vector<256x32xf32>
    %c0_38 = arith.constant 0 : index
    %c0_39 = arith.constant 0 : index
    %97 = vector.load %arg8[%c0_38, %c0_39] : memref<1x32xf32, #tpu.memory_space<vmem>>, vector<1x32xf32>
    %98 = vector.broadcast %97 : vector<1x32xf32> to vector<256x32xf32>
    %99 = arith.addf %96, %98 : vector<256x32xf32>
    %100 = vector.shape_cast %99 : vector<256x32xf32> to vector<1x8x32x32xf32>
    %c0_40 = arith.constant 0 : index
    %c0_41 = arith.constant 0 : index
    %c0_42 = arith.constant 0 : index
    %c0_43 = arith.constant 0 : index
    %101 = vector.load %arg9[%c0_40, %c0_41, %c0_42, %c0_43] : memref<1x8x32x32xf32, #tpu.memory_space<vmem>>, vector<1x8x32x32xf32>
    tpu.vector_store %arg9[%c0_40, %c0_41, %c0_42, %c0_43], %100 {strides = array<i32>} : memref<1x8x32x32xf32, #tpu.memory_space<vmem>>, vector<1x8x32x32xf32>,
    return
  }
  func.func @transform_0(%arg0: i32, %arg1: i32) -> (i32, i32, i32, i32) {
    %c0_i32 = arith.constant 0 : i32
    %c0_i32_0 = arith.constant 0 : i32
    %c0_i32_1 = arith.constant 0 : i32
    return %arg0, %arg1, %c0_i32, %c0_i32_0 : i32, i32, i32, i32
  }
  func.func @transform_1(%arg0: i32, %arg1: i32) -> (i32, i32, i32) {
    %c0_i32 = arith.constant 0 : i32
    %c0_i32_0 = arith.constant 0 : i32
    %c0_i32_1 = arith.constant 0 : i32
    %c0_i32_2 = arith.constant 0 : i32
    return %c0_i32, %c0_i32_0, %c0_i32_1 : i32, i32, i32
  }
  func.func @transform_2(%arg0: i32, %arg1: i32) -> (i32, i32, i32) {
    %c0_i32 = arith.constant 0 : i32
    %c0_i32_0 = arith.constant 0 : i32
    %c0_i32_1 = arith.constant 0 : i32
    return %arg1, %c0_i32, %c0_i32_0 : i32, i32, i32
  }
  func.func @transform_3(%arg0: i32, %arg1: i32) -> (i32, i32) {
    %c0_i32 = arith.constant 0 : i32
    %c0_i32_0 = arith.constant 0 : i32
    %c0_i32_1 = arith.constant 0 : i32
    return %c0_i32, %c0_i32_0 : i32, i32
  }
  func.func @transform_4(%arg0: i32, %arg1: i32) -> (i32, i32) {
    %c0_i32 = arith.constant 0 : i32
    %c0_i32_0 = arith.constant 0 : i32
    %c0_i32_1 = arith.constant 0 : i32
    return %c0_i32, %c0_i32_0 : i32, i32
  }
  func.func @transform_5(%arg0: i32, %arg1: i32) -> (i32, i32) {
    %c0_i32 = arith.constant 0 : i32
    %c0_i32_0 = arith.constant 0 : i32
    %c0_i32_1 = arith.constant 0 : i32
    return %c0_i32, %c0_i32_0 : i32, i32
  }
  func.func @transform_6(%arg0: i32, %arg1: i32) -> (i32, i32) {
    %c0_i32 = arith.constant 0 : i32
    %c0_i32_0 = arith.constant 0 : i32
    %c0_i32_1 = arith.constant 0 : i32
    return %c0_i32, %c0_i32_0 : i32, i32
  }
  func.func @transform_7(%arg0: i32, %arg1: i32) -> (i32, i32, i32, i32) {
    %c0_i32 = arith.constant 0 : i32
    %c0_i32_0 = arith.constant 0 : i32
    %c0_i32_1 = arith.constant 0 : i32
    return %arg0, %arg1, %c0_i32, %c0_i32_0 : i32, i32, i32, i32
  }
}

</mosaic_0001>

<bundles_post_ra>
// kernel: shifted_window_attention_3d.1
= control target key start
LH: loop header
LB: loop body
LE: loop exit
PB: predicated region body
PF: predicated region fallthrough
CT: control target
= control target key end

     0   :  { %s13258_s24 = smov 0   ;;  %s13260_s25 = smov 0   ;;  %s18096_s0 = inlined_call_operand.vmem [shape: f32[2,8,32,32], index: 0, kind: input, shape index: {}]   ;;  %s18097_s1 = inlined_call_operand.vmem [shape: f32[4,32,32], index: 1, kind: input, shape index: {}]   ;;  %s18098_s2 = inlined_call_operand.vmem [shape: f32[8,32,32], index: 2, kind: input, shape index: {}]   ;;  %s18099_s3 = inlined_call_operand.vmem [shape: f32[32,96], index: 3, kind: input, shape index: {}]   ;;  %s18100_s4 = inlined_call_operand.vmem [shape: f32[1,96], index: 4, kind: input, shape index: {}]   ;;  %s18101_s5 = inlined_call_operand.vmem [shape: f32[32,32], index: 5, kind: input, shape index: {}]   ;;  %s18102_s6 = inlined_call_operand.vmem [shape: f32[1,32], index: 6, kind: input, shape index: {}]   ;;  %s18103_s7 = inlined_call_operand.vmem [shape: f32[2,8,32,32], index: 7, kind: output, shape index: {}]  }
   0x1   :  { %s13262_s26 = smov 0  }
   0x2 LB: > { %s29_s27 = sadd.s32 1, %s13198_s25  ;;  %p10463_p0 = scmp.ge.s32.totalorder %s13202_s26, 1  ;;  %s13202_s26 = sphi %s13262_s26, %s17_s26   ;;  %s13198_s25 = sphi %s13260_s25, %s18899_s25   ;;  %s13194_s24 = sphi %s13258_s24, %s18898_s24  }
   0x3   : > { %p31_p1 = scmp.ge.s32.totalorder %s29_s27, 2  ;;  %p271_p2 = scmp.lt.s32.totalorder %s13202_s26, 3 }
   0x5   : > { %s18901_s27 = smov (%p31_p1, %s29_s27), 0  ;;  %p272_p3 = pnand %p10463_p0, %p271_p2 }
   0x7   : > { %275 = sbr.rel (%p272_p3) target bundleno = 3375 (0xd2f), region = 48 }
   0xc   : > { %v383_v0 = vld [vmem:[%s18099_s3 + $0x18] sm:$0xff]  ;;  %v382_v1 = vld [vmem:[%s18099_s3 + $0x10] sm:$0xff]  ;;  %p320_p4 = scmp.lt.s32.totalorder %s13194_s24, 1  ;;  %v381_v2 = vld [vmem:[%s18099_s3 + $0x8] sm:$0xff]  ;;  %vm391_vm0 = vcmask 261120   ;;  %vm761_vm1 = vcmask 64512  }
   0xd   : > { %11518 = vmatprep.subr.mxu0 %v383_v0  ;;  %v380_v3 = vld [vmem:[%s18099_s3] sm:$0xff]  ;;  %s13204_s19 = smov 96   ;;  %s13205_s20 = smov 64   ;;  %vm9917_vm2 = vcmask 130048   ;;  %vm9950_vm3 = vcmask 195584  }
   0xe   : > { %11519 = vmatpush3.msra.mxu0 %v383_v0  ;;  %s18903_s24 = smov (!%p320_p4, %s13194_s24), 1  ;;  %v13365_v36 = vld [vmem:[%s18100_s4] ss:$0 sm:$0xff]  ;;  %s13206_s21 = smov 88  }
   0xf   : > { %11520 = vmatprep.subr.mxu0 %v382_v1  ;;  %s10932_s13 = sshll.u32 %s18903_s24, 8  ;;  %s13207_s22 = smov 120  }
  0x10   : > { %11521 = vmatpush3.msra.mxu0 %v382_v1  ;;  %s13296_s16 = scalar_lea.vmem %s18096_s0, %s10932_s13  ;;  %s13210_s12 = smov 112  }
  0x11   : > { %11522 = vmatprep.subr.mxu0 %v381_v2  ;;  %v348_v4 = vld [vmem:[%s13296_s16] sm:$0xff]  ;;  %v349_v5 = vld [vmem:[%s13296_s16 + $0x8] sm:$0xff]  ;;  %v350_v6 = vld [vmem:[%s13296_s16 + $0x10] sm:$0xff]  ;;  %s13213_s28 = smov 104   ;;  %s13214_s15 = smov 40  }
  0x12   : > { %11523 = vmatpush3.msra.mxu0 %v381_v2  ;;  %11526 = vmatprep.mubr.msk.f32.mxu0 %vm391_vm0, %v348_v4  ;;  %v351_v7 = vld [vmem:[%s13296_s16 + $0x18] sm:$0xff]  ;;  %v352_v8 = vld [vmem:[%s13296_s16 + $0x20] sm:$0xff]  ;;  %v353_v9 = vld [vmem:[%s13296_s16 + $0x28] sm:$0xff]  ;;  %s13215_s18 = smov 8   ;;  %s13217_s10 = smov 24  }
  0x13   : > { %11524 = vmatprep.subr.mxu0 %v380_v3  ;;  %v354_v10 = vld [vmem:[%s13296_s16 + $0x30] sm:$0xff]  ;;  %v355_v11 = vld [vmem:[%s13296_s16 + $0x38] sm:$0xff]  ;;  %v356_v12 = vld [vmem:[%s13296_s16 + $0x40] sm:$0xff] }
  0x14   : > { %11525 = vmatpush3.msra.mxu0 %v380_v3  ;;  %v357_v13 = vld [vmem:[%s13296_s16 + $0x48] sm:$0xff]  ;;  %v358_v14 = vld [vmem:[%s13296_s16 + $0x50] sm:$0xff]  ;;  %v359_v15 = vld [vmem:[%s13296_s16 + $0x58] sm:$0xff] }
  0x15   : > { %11527 = vmatmul.mubr.msk.f32.vlgmr.msra.gmra.mxu0 %vm391_vm0, %v349_v5  ;;  %v360_v16 = vld [vmem:[%s13296_s16 + $0x60] sm:$0xff]  ;;  %v361_v17 = vld [vmem:[%s13296_s16 + $0x68] sm:$0xff]  ;;  %v362_v18 = vld [vmem:[%s13296_s16 + $0x70] sm:$0xff] }
  0x16   : > { %11529 = vmatprep.mubr.msk.f32.mxu0 %vm391_vm0, %v350_v6  ;;  %v363_v19 = vld [vmem:[%s13296_s16 + $0x78] sm:$0xff]  ;;  %v364_v20 = vld [vmem:[%s13296_s16 + $0x80] sm:$0xff]  ;;  %v365_v21 = vld [vmem:[%s13296_s16 + $0x88] sm:$0xff] }
  0x17   : > { %v366_v22 = vld [vmem:[%s13296_s16 + $0x90] sm:$0xff]  ;;  %v367_v23 = vld [vmem:[%s13296_s16 + $0x98] sm:$0xff]  ;;  %v368_v24 = vld [vmem:[%s13296_s16 + $0xa0] sm:$0xff] }
  0x18   : > { %v369_v25 = vld [vmem:[%s13296_s16 + $0xa8] sm:$0xff]  ;;  %v370_v26 = vld [vmem:[%s13296_s16 + $0xb0] sm:$0xff]  ;;  %v371_v27 = vld [vmem:[%s13296_s16 + $0xb8] sm:$0xff] }
  0x19   : > { %11530 = vmatmul.mubr.msk.f32.gmra.mxu0 %vm391_vm0, %v351_v7  ;;  %v372_v28 = vld [vmem:[%s13296_s16 + $0xc0] sm:$0xff]  ;;  %v373_v29 = vld [vmem:[%s13296_s16 + $0xc8] sm:$0xff]  ;;  %v374_v30 = vld [vmem:[%s13296_s16 + $0xd0] sm:$0xff] }
  0x1a   : > { %11532 = vmatprep.mubr.msk.f32.mxu0 %vm391_vm0, %v352_v8  ;;  %v375_v31 = vld [vmem:[%s13296_s16 + $0xd8] sm:$0xff]  ;;  %v376_v32 = vld [vmem:[%s13296_s16 + $0xe0] sm:$0xff]  ;;  %v377_v33 = vld [vmem:[%s13296_s16 + $0xe8] sm:$0xff] }
  0x1b   : > { %v378_v34 = vld [vmem:[%s13296_s16 + $0xf0] sm:$0xff]  ;;  %v379_v35 = vld [vmem:[%s13296_s16 + $0xf8] sm:$0xff] }
  0x1d   : > { %11533 = vmatmul.mubr.msk.f32.gmra.mxu0 %vm391_vm0, %v353_v9 }
  0x1e   : > { %11535 = vmatprep.mubr.msk.f32.mxu0 %vm391_vm0, %v354_v10 }
  0x21   : > { %11536 = vmatmul.mubr.msk.f32.gmra.mxu0 %vm391_vm0, %v355_v11 }
  0x22   : > { %11538 = vmatprep.mubr.msk.f32.mxu0 %vm391_vm0, %v356_v12 }
  0x25   : > { %11539 = vmatmul.mubr.msk.f32.gmra.mxu0 %vm391_vm0, %v357_v13 }
  0x26   : > { %11541 = vmatprep.mubr.msk.f32.mxu0 %vm391_vm0, %v358_v14 }
  0x29   : > { %11542 = vmatmul.mubr.msk.f32.gmra.mxu0 %vm391_vm0, %v359_v15 }
  0x2a   : > { %11544 = vmatprep.mubr.msk.f32.mxu0 %vm391_vm0, %v360_v16 }
  0x2d   : > { %11545 = vmatmul.mubr.msk.f32.gmra.mxu0 %vm391_vm0, %v361_v17 }
  0x2e   : > { %11547 = vmatprep.mubr.msk.f32.mxu0 %vm391_vm0, %v362_v18 }
  0x31   : > { %11548 = vmatmul.mubr.msk.f32.gmra.mxu0 %vm391_vm0, %v363_v19 }
  0x32   : > { %11550 = vmatprep.mubr.msk.f32.mxu0 %vm391_vm0, %v364_v20 }
  0x35   : > { %11551 = vmatmul.mubr.msk.f32.gmra.mxu0 %vm391_vm0, %v365_v21 }
  0x36   : > { %11553 = vmatprep.mubr.msk.f32.mxu0 %vm391_vm0, %v366_v22 }
  0x39   : > { %11554 = vmatmul.mubr.msk.f32.gmra.mxu0 %vm391_vm0, %v367_v23 }
  0x3a   : > { %11556 = vmatprep.mubr.msk.f32.mxu0 %vm391_vm0, %v368_v24 }
  0x3d   : > { %11557 = vmatmul.mubr.msk.f32.gmra.mxu0 %vm391_vm0, %v369_v25 }
  0x3e   : > { %11559 = vmatprep.mubr.msk.f32.mxu0 %vm391_vm0, %v370_v26 }
  0x41   : > { %11560 = vmatmul.mubr.msk.f32.gmra.mxu0 %vm391_vm0, %v371_v27 }
  0x42   : > { %11562 = vmatprep.mubr.msk.f32.mxu0 %vm391_vm0, %v372_v28 }
  0x45   : > { %11563 = vmatmul.mubr.msk.f32.gmra.mxu0 %vm391_vm0, %v373_v29 }
  0x46   : > { %11565 = vmatprep.mubr.msk.f32.mxu0 %vm391_vm0, %v374_v30 }
  0x49   : > { %11566 = vmatmul.mubr.msk.f32.gmra.mxu0 %vm391_vm0, %v375_v31 }
  0x4a   : > { %11568 = vmatprep.mubr.msk.f32.mxu0 %vm391_vm0, %v376_v32 }
  0x4d   : > { %11569 = vmatmul.mubr.msk.f32.gmra.mxu0 %vm391_vm0, %v377_v33 }
  0x4e   : > { %11571 = vmatprep.mubr.msk.f32.mxu0 %vm391_vm0, %v378_v34 }
  0x51   : > { %11572 = vmatmul.mubr.msk.f32.gmra.mxu0 %vm391_vm0, %v379_v35 }
  0xd5   : > { %v11528_v37 = vpop.f32.mrf.mxu0 }
  0xd6   : > { %v13368_v38 = vadd.f32 %v11528_v37, %v13365_v36 }
  0xd7   : > { %v554_v39 = vpop.f32.mrf.mxu0 }
  0xd8   : > { %18318 = vst [vmem:[#allocation2_spill] sm:$0xff] %v13368_v38  ;;  %v13371_v40 = vadd.f32 %v13365_v36, %v554_v39  ;;  %755 = vrot.lane.b32.xlu1 %v13368_v38, %s13204_s19 }
  0xd9   : > { %v11531_v41 = vpop.f32.mrf.mxu0 }
  0xda   : > { %18319 = vst [vmem:[#allocation3_spill] sm:$0xff] %v13371_v40  ;;  %v13376_v42 = vadd.f32 %v11531_v41, %v13365_v36  ;;  %11582 = vmatprep.mubr.msk.f32.mxu1 %vm761_vm1, %v13371_v40 }
  0xdb   : > { %v564_v43 = vpop.f32.mrf.mxu0 }
  0xdc   : > { %18320 = vst [vmem:[#allocation4_spill] sm:$0xff] %v13376_v42  ;;  %759 = vrot.lane.b32.xlu0 %v13376_v42, %s13204_s19  ;;  %753 = vrot.lane.b32.xlu1 %v13371_v40, %s13204_s19  ;;  %v13385_v45 = vadd.f32 %v13365_v36, %v564_v43 }
  0xdd   : > { %v11534_v44 = vpop.f32.mrf.mxu0 }
  0xde   : > { %18321 = vst [vmem:[#allocation5_spill] sm:$0xff] %v13385_v45  ;;  %v13398_v52 = vadd.f32 %v11534_v44, %v13365_v36 }
  0xdf   : > { %v574_v46 = vpop.f32.mrf.mxu0 }
  0xe0   : > { %757 = vrot.lane.b32.xlu0 %v13385_v45, %s13204_s19  ;;  %18324 = vst [vmem:[#allocation8_spill] sm:$0xff] %v13398_v52  ;;  %v13403_v54 = vadd.f32 %v13365_v36, %v574_v46 }
  0xe1   : > { %v11537_v47 = vpop.f32.mrf.mxu0 }
  0xe2   : > { %v13390_v48 = vadd.f32 %v11537_v47, %v13365_v36  ;;  %18325 = vst [vmem:[#allocation9_spill] sm:$0xff] %v13403_v54 }
  0xe3   : > { %v584_v49 = vpop.f32.mrf.mxu0 }
  0xe4   : > { %18322 = vst [vmem:[#allocation6_spill] sm:$0xff] %v13390_v48  ;;  %v13393_v50 = vadd.f32 %v13365_v36, %v584_v49  ;;  %873 = vrot.lane.b32.xlu0 %v13390_v48, %s13204_s19 }
  0xe5   : > { %v11540_v51 = vpop.f32.mrf.mxu0 }
  0xe6   : > { %18323 = vst [vmem:[#allocation7_spill] sm:$0xff] %v13393_v50  ;;  %871 = vrot.lane.b32.xlu1 %v13393_v50, %s13204_s19  ;;  %v13418_v60 = vadd.f32 %v11540_v51, %v13365_v36 }
  0xe7   : > { %v594_v53 = vpop.f32.mrf.mxu0 }
  0xe8   : > { %869 = vrot.lane.b32.xlu0 %v13398_v52, %s13204_s19  ;;  %18327 = vst [vmem:[#allocation11_spill] sm:$0xff] %v13418_v60  ;;  %v13423_v62 = vadd.f32 %v13365_v36, %v594_v53 }
  0xe9   : > { %v11543_v55 = vpop.f32.mrf.mxu0 }
  0xea   : > { %v13408_v56 = vadd.f32 %v11543_v55, %v13365_v36  ;;  %867 = vrot.lane.b32.xlu1 %v13403_v54, %s13204_s19  ;;  %18328 = vst [vmem:[#allocation12_spill] sm:$0xff] %v13423_v62 }
  0xeb   : > { %v604_v57 = vpop.f32.mrf.mxu0 }
  0xec   : > { %v13413_v58 = vadd.f32 %v13365_v36, %v604_v57  ;;  %986 = vrot.lane.b32.xlu0 %v13408_v56, %s13204_s19 }
  0xed   : > { %v11546_v59 = vpop.f32.mrf.mxu0 }
  0xee   : > { %18326 = vst [vmem:[#allocation10_spill] sm:$0xff] %v13413_v58  ;;  %984 = vrot.lane.b32.xlu1 %v13413_v58, %s13204_s19  ;;  %v13438_v4 = vadd.f32 %v11546_v59, %v13365_v36 }
  0xef   : > { %v614_v61 = vpop.f32.mrf.mxu0 }
  0xf0   : > { %982 = vrot.lane.b32.xlu0 %v13418_v60, %s13204_s19  ;;  %18330 = vst [vmem:[#allocation14_spill] sm:$0xff] %v13438_v4  ;;  %v13448_v8 = vadd.f32 %v13365_v36, %v614_v61 }
  0xf1   : > { %v11549_v63 = vpop.f32.mrf.mxu0 }
  0xf2   : > { %v13428_v0 = vadd.f32 %v11549_v63, %v13365_v36  ;;  %980 = vrot.lane.b32.xlu1 %v13423_v62, %s13204_s19  ;;  %18331 = vst [vmem:[#allocation15_spill] sm:$0xff] %v13448_v8 }
  0xf3   : > { %v624_v1 = vpop.f32.mrf.mxu0 }
  0xf4   : > { %18329 = vst [vmem:[#allocation13_spill] sm:$0xff] %v13428_v0  ;;  %v13433_v2 = vadd.f32 %v13365_v36, %v624_v1  ;;  %1099 = vrot.lane.b32.xlu0 %v13428_v0, %s13204_s19 }
  0xf5   : > { %v11552_v3 = vpop.f32.mrf.mxu0 }
  0xf6   : > { %1097 = vrot.lane.b32.xlu1 %v13433_v2, %s13204_s19  ;;  %v13463_v13 = vadd.f32 %v11552_v3, %v13365_v36 }
  0xf7   : > { %v634_v5 = vpop.f32.mrf.mxu0 }
  0xf8   : > { %v13443_v6 = vadd.f32 %v13365_v36, %v634_v5  ;;  %1095 = vrot.lane.b32.xlu0 %v13438_v4, %s13204_s19  ;;  %18334 = vst [vmem:[#allocation18_spill] sm:$0xff] %v13463_v13 }
  0xf9   : > { %v11555_v7 = vpop.f32.mrf.mxu0 }
  0xfa   : > { %v13451_v9 = vadd.f32 %v11555_v7, %v13365_v36  ;;  %11638 = vmatprep.mubr.msk.f32.mxu0 %vm761_vm1, %v13443_v6 }
  0xfb   : > { %v644_v10 = vpop.f32.mrf.mxu0 }
  0xfc   : > { %18332 = vst [vmem:[#allocation16_spill] sm:$0xff] %v13451_v9  ;;  %v13456_v11 = vadd.f32 %v13365_v36, %v644_v10  ;;  %1093 = vrot.lane.b32.xlu0 %v13448_v8, %s13204_s19  ;;  %1212 = vrot.lane.b32.xlu1 %v13451_v9, %s13204_s19 }
  0xfd   : > { %v11558_v12 = vpop.f32.mrf.mxu0 }
  0xfe   : > { %18333 = vst [vmem:[#allocation17_spill] sm:$0xff] %v13456_v11  ;;  %v13473_v18 = vadd.f32 %v11558_v12, %v13365_v36 }
  0xff   : > { %v654_v14 = vpop.f32.mrf.mxu0 }
 0x100   : > { %1208 = vrot.lane.b32.xlu0 %v13463_v13, %s13204_s19  ;;  %1210 = vrot.lane.b32.xlu1 %v13456_v11, %s13204_s19  ;;  %v13483_v22 = vadd.f32 %v13365_v36, %v654_v14 }
 0x101   : > { %v11561_v15 = vpop.f32.mrf.mxu0 }
 0x102   : > { %v13470_v16 = vadd.f32 %v11561_v15, %v13365_v36  ;;  %18336 = vst [vmem:[#allocation20_spill] sm:$0xff] %v13483_v22 }
 0x103   : > { %v664_v17 = vpop.f32.mrf.mxu0 }
 0x104   : > { %18335 = vst [vmem:[#allocation19_spill] sm:$0xff] %v13470_v16  ;;  %v13476_v19 = vadd.f32 %v13365_v36, %v664_v17  ;;  %1206 = vrot.lane.b32.xlu0 %v13443_v6, %s13204_s19  ;;  %1325 = vrot.lane.b32.xlu1 %v13470_v16, %s13204_s19 }
 0x105   : > { %v11564_v20 = vpop.f32.mrf.mxu0 }
 0x106   : > { %v13493_v26 = vadd.f32 %v11564_v20, %v13365_v36 }
 0x107   : > { %v674_v21 = vpop.f32.mrf.mxu0 }
 0x108   : > { %1321 = vrot.lane.b32.xlu0 %v13473_v18, %s13204_s19  ;;  %1323 = vrot.lane.b32.xlu1 %v13476_v19, %s13204_s19  ;;  %18338 = vst [vmem:[#allocation22_spill] sm:$0xff] %v13493_v26  ;;  %v13503_v30 = vadd.f32 %v13365_v36, %v674_v21 }
 0x109   : > { %v11567_v23 = vpop.f32.mrf.mxu0 }
 0x10a   : > { %v13490_v24 = vadd.f32 %v11567_v23, %v13365_v36  ;;  %18340 = vst [vmem:[#allocation24_spill] sm:$0xff] %v13503_v30 }
 0x10b   : > { %v684_v25 = vpop.f32.mrf.mxu0 }
 0x10c   : > { %18337 = vst [vmem:[#allocation21_spill] sm:$0xff] %v13490_v24  ;;  %v13496_v27 = vadd.f32 %v13365_v36, %v684_v25  ;;  %1319 = vrot.lane.b32.xlu0 %v13483_v22, %s13204_s19  ;;  %1438 = vrot.lane.b32.xlu1 %v13490_v24, %s13204_s19 }
 0x10d   : > { %v11570_v28 = vpop.f32.mrf.mxu0 }
 0x10e   : > { %18339 = vst [vmem:[#allocation23_spill] sm:$0xff] %v13496_v27  ;;  %v13513_v34 = vadd.f32 %v11570_v28, %v13365_v36 }
 0x10f   : > { %v694_v29 = vpop.f32.mrf.mxu0 }
 0x110   : > { %1434 = vrot.lane.b32.xlu0 %v13493_v26, %s13204_s19  ;;  %1436 = vrot.lane.b32.xlu1 %v13496_v27, %s13204_s19  ;;  %18342 = vst [vmem:[#allocation26_spill] sm:$0xff] %v13513_v34  ;;  %v13523_v37 = vadd.f32 %v13365_v36, %v694_v29 }
 0x111   : > { %v11573_v31 = vpop.f32.mrf.mxu0 }
 0x112   : > { %v13510_v32 = vadd.f32 %v11573_v31, %v13365_v36  ;;  %18344 = vst [vmem:[#allocation28_spill] sm:$0xff] %v13523_v37 }
 0x113   : > { %v704_v33 = vpop.f32.mrf.mxu0 }
 0x114   : > { %18341 = vst [vmem:[#allocation25_spill] sm:$0xff] %v13510_v32  ;;  %1432 = vrot.lane.b32.xlu0 %v13503_v30, %s13204_s19  ;;  %1551 = vrot.lane.b32.xlu1 %v13510_v32, %s13204_s19  ;;  %v13520_v35 = vadd.f32 %v13365_v36, %v704_v33 }
 0x116   : > { %18343 = vst [vmem:[#allocation27_spill] sm:$0xff] %v13520_v35 }
 0x118   : > { %1547 = vrot.lane.b32.xlu0 %v13513_v34, %s13204_s19  ;;  %1549 = vrot.lane.b32.xlu1 %v13520_v35, %s13204_s19 }
 0x11c   : > { %2042 = vrot.lane.b32.xlu0 %v13385_v45, %s13205_s20  ;;  %1545 = vrot.lane.b32.xlu1 %v13523_v37, %s13204_s19  ;;  %s13216_s19 = smov 16  }
 0x120   : > { %2262 = vrot.lane.b32.xlu0 %v13408_v56, %s13205_s20  ;;  %2044 = vrot.lane.b32.xlu1 %v13376_v42, %s13205_s20 }
 0x124   : > { %2151 = vrot.lane.b32.xlu0 %v13393_v50, %s13205_s20  ;;  %2040 = vrot.lane.b32.xlu1 %v13368_v38, %s13205_s20 }
 0x128   : > { %2260 = vrot.lane.b32.xlu0 %v13413_v58, %s13205_s20  ;;  %2038 = vrot.lane.b32.xlu1 %v13371_v40, %s13205_s20 }
 0x12c   : > { %2147 = vrot.lane.b32.xlu0 %v13403_v54, %s13205_s20  ;;  %2153 = vrot.lane.b32.xlu1 %v13390_v48, %s13205_s20 }
 0x130   : > { %2256 = vrot.lane.b32.xlu0 %v13423_v62, %s13205_s20  ;;  %2149 = vrot.lane.b32.xlu1 %v13398_v52, %s13205_s20 }
 0x134   : > { %2369 = vrot.lane.b32.xlu0 %v13433_v2, %s13205_s20  ;;  %2258 = vrot.lane.b32.xlu1 %v13418_v60, %s13205_s20 }
 0x138   : > { %2478 = vrot.lane.b32.xlu0 %v13456_v11, %s13205_s20  ;;  %2371 = vrot.lane.b32.xlu1 %v13428_v0, %s13205_s20 }
 0x13c   : > { %2367 = vrot.lane.b32.xlu0 %v13438_v4, %s13205_s20  ;;  %2480 = vrot.lane.b32.xlu1 %v13451_v9, %s13205_s20 }
 0x140   : > { %2476 = vrot.lane.b32.xlu0 %v13463_v13, %s13205_s20  ;;  %2474 = vrot.lane.b32.xlu1 %v13443_v6, %s13205_s20 }
 0x144   : > { %2365 = vrot.lane.b32.xlu0 %v13448_v8, %s13205_s20  ;;  %2589 = vrot.lane.b32.xlu1 %v13470_v16, %s13205_s20 }
 0x148   : > { %2587 = vrot.lane.b32.xlu0 %v13476_v19, %s13205_s20  ;;  %2698 = vrot.lane.b32.xlu1 %v13490_v24, %s13205_s20 }
 0x14a   : > { %v756_v36 = vpop.permute.xlu1 %755 }
 0x14c   : > { %2696 = vrot.lane.b32.xlu0 %v13496_v27, %s13205_s20  ;;  %2694 = vrot.lane.b32.xlu1 %v13493_v26, %s13205_s20 }
 0x14e   : > { %v760_v39 = vpop.permute.xlu0 %759  ;;  %v754_v43 = vpop.permute.xlu1 %753 }
 0x14f   : > { %11574 = vmatprep.subr.msk.mxu1 %vm761_vm1, %v760_v39 }
 0x150   : > { %11575 = vmatpush3.xpose.msk.msra.mxu1 %vm761_vm1, %v760_v39  ;;  %2585 = vrot.lane.b32.xlu0 %v13473_v18, %s13205_s20 }
 0x151   : > { %2927 = vrot.lane.b32.xlu1 %v13385_v45, %s13206_s21 }
 0x152   : > { %v758_v41 = vpop.permute.xlu0 %757 }
 0x153   : > { %11576 = vmatprep.subr.msk.mxu1 %vm761_vm1, %v758_v41 }
 0x154   : > { %2583 = vrot.lane.b32.xlu0 %v13483_v22, %s13205_s20  ;;  %11577 = vmatpush3.xpose.msk.msra.mxu1 %vm761_vm1, %v758_v41 }
 0x155   : > { %2925 = vrot.lane.b32.xlu1 %v13368_v38, %s13206_s21  ;;  %11578 = vmatprep.subr.msk.mxu1 %vm761_vm1, %v756_v36 }
 0x156   : > { %v874_v44 = vpop.permute.xlu0 %873 }
 0x158   : > { %2692 = vrot.lane.b32.xlu0 %v13503_v30, %s13205_s20  ;;  %11579 = vmatpush3.xpose.msk.msra.mxu1 %vm761_vm1, %v756_v36  ;;  %v872_v46 = vpop.permute.xlu1 %871 }
 0x159   : > { %2923 = vrot.lane.b32.xlu1 %v13371_v40, %s13206_s21  ;;  %11580 = vmatprep.subr.msk.mxu1 %vm761_vm1, %v754_v43 }
 0x15a   : > { %v870_v47 = vpop.permute.xlu0 %869 }
 0x15c   : > { %2807 = vrot.lane.b32.xlu0 %v13510_v32, %s13205_s20  ;;  %11581 = vmatpush3.xpose.msk.msra.mxu1 %vm761_vm1, %v754_v43  ;;  %v868_v49 = vpop.permute.xlu1 %867 }
 0x15d   : > { %2915 = vrot.lane.b32.xlu1 %v13371_v40, %s13207_s22  ;;  %11588 = vmatprep.subr.msk.mxu1 %vm761_vm1, %v874_v44 }
 0x15e   : > { %v987_v51 = vpop.permute.xlu0 %986 }
 0x15f   : > { %11583 = vmatmul.mubr.msk.f32.vlgmr.msra.gmra.mxu1 %vm761_vm1, %v13368_v38 }
 0x160   : > { %2929 = vrot.lane.b32.xlu0 %v13376_v42, %s13206_s21  ;;  %v985_v53 = vpop.permute.xlu1 %984  ;;  %11585 = vmatprep.mubr.msk.f32.mxu1 %vm761_vm1, %v13385_v45 }
 0x161   : > { %3163 = vrot.lane.b32.xlu1 %v13408_v56, %s13206_s21  ;;  %11589 = vmatpush3.xpose.msk.msra.mxu1 %vm761_vm1, %v874_v44 }
 0x162   : > { %11590 = vmatprep.subr.msk.mxu1 %vm761_vm1, %v872_v46  ;;  %v983_v55 = vpop.permute.xlu0 %982 }
 0x163   : > { %11586 = vmatmul.mubr.msk.f32.gmra.mxu1 %vm761_vm1, %v13376_v42 }
 0x164   : > { %2803 = vrot.lane.b32.xlu0 %v13513_v34, %s13205_s20  ;;  %v981_v57 = vpop.permute.xlu1 %980  ;;  %11596 = vmatprep.mubr.msk.f32.mxu1 %vm761_vm1, %v13403_v54 }
 0x165   : > { %3040 = vrot.lane.b32.xlu1 %v13403_v54, %s13206_s21  ;;  %11591 = vmatpush3.xpose.msk.msra.mxu1 %vm761_vm1, %v872_v46 }
 0x166   : > { %11592 = vmatprep.subr.msk.mxu1 %vm761_vm1, %v870_v47  ;;  %v1100_v59 = vpop.permute.xlu0 %1099 }
 0x168   : > { %2801 = vrot.lane.b32.xlu0 %v13523_v37, %s13205_s20  ;;  %v13628_v61 = vpop.permute.xlu1 %1097 }
 0x169   : > { %3032 = vrot.lane.b32.xlu1 %v13403_v54, %s13207_s22  ;;  %11593 = vmatpush3.xpose.msk.msra.mxu1 %vm761_vm1, %v870_v47  ;;  %v720_v54 = vld [vmem:[%s18098_s2 + $0x38] sm:$0xff] }
 0x16a   : > { %11594 = vmatprep.subr.msk.mxu1 %vm761_vm1, %v868_v49  ;;  %v13634_v63 = vpop.permute.xlu0 %1095 }
 0x16c   : > { %3046 = vrot.lane.b32.xlu0 %v13390_v48, %s13206_s21 }
 0x16d   : > { %3280 = vrot.lane.b32.xlu1 %v13428_v0, %s13206_s21  ;;  %11595 = vmatpush3.xpose.msk.msra.mxu1 %vm761_vm1, %v868_v49 }
 0x16e   : > { %11602 = vmatprep.subr.msk.mxu1 %vm761_vm1, %v987_v51  ;;  %v13642_v1 = vpop.permute.xlu0 %1093  ;;  %v1213_v3 = vpop.permute.xlu1 %1212 }
 0x16f   : > { %11630 = vmatprep.subr.msk.mxu0 %vm761_vm1, %v1213_v3 }
 0x170   : > { %11597 = vmatmul.mubr.msk.f32.vlgmr.msra.gmra.mxu1 %vm761_vm1, %v13398_v52  ;;  %3044 = vrot.lane.b32.xlu0 %v13393_v50, %s13206_s21 }
 0x171   : > { %2919 = vrot.lane.b32.xlu1 %v13385_v45, %s13207_s22  ;;  %11599 = vmatprep.mubr.msk.f32.mxu1 %vm761_vm1, %v13393_v50 }
 0x172   : > { %11603 = vmatpush3.xpose.msk.msra.mxu1 %vm761_vm1, %v987_v51  ;;  %11631 = vmatpush3.xpose.msk.msra.mxu0 %vm761_vm1, %v1213_v3  ;;  %v1209_v5 = vpop.permute.xlu0 %1208  ;;  %v1211_v7 = vpop.permute.xlu1 %1210 }
 0x173   : > { %11604 = vmatprep.subr.msk.mxu1 %vm761_vm1, %v985_v53  ;;  %11632 = vmatprep.subr.msk.mxu0 %vm761_vm1, %v1211_v7 }
 0x174   : > { %11600 = vmatmul.mubr.msk.f32.gmra.mxu1 %vm761_vm1, %v13390_v48  ;;  %3042 = vrot.lane.b32.xlu0 %v13398_v52, %s13206_s21 }
 0x175   : > { %3278 = vrot.lane.b32.xlu1 %v13433_v2, %s13206_s21  ;;  %11610 = vmatprep.mubr.msk.f32.mxu1 %vm761_vm1, %v13423_v62 }
 0x176   : > { %11605 = vmatpush3.xpose.msk.msra.mxu1 %vm761_vm1, %v985_v53  ;;  %11633 = vmatpush3.xpose.msk.msra.mxu0 %vm761_vm1, %v1211_v7  ;;  %v1207_v10 = vpop.permute.xlu0 %1206  ;;  %v13667_v12 = vpop.permute.xlu1 %1325  ;;  %v13834_v7 = vld [vmem:[%s18097_s1 + $0x8] sm:$0xff] }
 0x177   : > { %11606 = vmatprep.subr.msk.mxu1 %vm761_vm1, %v983_v55  ;;  %11634 = vmatprep.subr.msk.mxu0 %vm761_vm1, %v1209_v5 }
 0x178   : > { %2917 = vrot.lane.b32.xlu0 %v13368_v38, %s13207_s22 }
 0x179   : > { %3149 = vrot.lane.b32.xlu1 %v13423_v62, %s13207_s22 }
 0x17a   : > { %11607 = vmatpush3.xpose.msk.msra.mxu1 %vm761_vm1, %v983_v55  ;;  %11635 = vmatpush3.xpose.msk.msra.mxu0 %vm761_vm1, %v1209_v5  ;;  %v13677_v14 = vpop.permute.xlu0 %1321  ;;  %v13679_v15 = vpop.permute.xlu1 %1323 }
 0x17b   : > { %11608 = vmatprep.subr.msk.mxu1 %vm761_vm1, %v981_v57  ;;  %11636 = vmatprep.subr.msk.mxu0 %vm761_vm1, %v1207_v10 }
 0x17c   : > { %3161 = vrot.lane.b32.xlu0 %v13413_v58, %s13206_s21 }
 0x17d   : > { %3397 = vrot.lane.b32.xlu1 %v13451_v9, %s13206_s21 }
 0x17e   : > { %11609 = vmatpush3.xpose.msk.msra.mxu1 %vm761_vm1, %v981_v57  ;;  %11637 = vmatpush3.xpose.msk.msra.mxu0 %vm761_vm1, %v1207_v10  ;;  %v1439_v17 = vpop.permute.xlu1 %1438  ;;  %v13691_v20 = vpop.permute.xlu0 %1319 }
 0x17f   : > { %11616 = vmatprep.subr.msk.mxu1 %vm761_vm1, %v1100_v59  ;;  %11658 = vmatprep.subr.msk.mxu0 %vm761_vm1, %v1439_v17 }
 0x180   : > { %3159 = vrot.lane.b32.xlu0 %v13418_v60, %s13206_s21 }
 0x181   : > { %11611 = vmatmul.mubr.msk.f32.vlgmr.msra.gmra.mxu1 %vm761_vm1, %v13418_v60  ;;  %11639 = vmatmul.mubr.msk.f32.vlgmr.msra.gmra.mxu0 %vm761_vm1, %v13463_v13 }
 0x182   : > { %3036 = vrot.lane.b32.xlu1 %v13393_v50, %s13207_s22  ;;  %11613 = vmatprep.mubr.msk.f32.mxu1 %vm761_vm1, %v13413_v58  ;;  %v1437_v21 = vpop.permute.xlu1 %1436  ;;  %v1435_v23 = vpop.permute.xlu0 %1434 }
 0x183   : > { %11617 = vmatpush3.xpose.msk.msra.mxu1 %vm761_vm1, %v1100_v59  ;;  %11641 = vmatprep.mubr.msk.f32.mxu0 %vm761_vm1, %v13456_v11 }
 0x184   : > { %11659 = vmatpush3.xpose.msk.msra.mxu0 %vm761_vm1, %v1439_v17  ;;  %11618 = vmatprep.subr.msk.mxu1 %vm761_vm1, %v13628_v61 }
 0x185   : > { %11614 = vmatmul.mubr.msk.f32.gmra.mxu1 %vm761_vm1, %v13408_v56  ;;  %11642 = vmatmul.mubr.msk.f32.gmra.mxu0 %vm761_vm1, %v13451_v9 }
 0x186   : > { %11660 = vmatprep.subr.msk.mxu0 %vm761_vm1, %v1437_v21  ;;  %3034 = vrot.lane.b32.xlu0 %v13398_v52, %s13207_s22  ;;  %v1552_v25 = vpop.permute.xlu1 %1551  ;;  %v1433_v29 = vpop.permute.xlu0 %1432 }
 0x187   : > { %3395 = vrot.lane.b32.xlu1 %v13456_v11, %s13206_s21  ;;  %11619 = vmatpush3.xpose.msk.msra.mxu1 %vm761_vm1, %v13628_v61 }
 0x188   : > { %11624 = vmatprep.mubr.msk.f32.mxu1 %vm761_vm1, %v13448_v8  ;;  %11661 = vmatpush3.xpose.msk.msra.mxu0 %vm761_vm1, %v1437_v21  ;;  %v13850_v21 = vld [vmem:[%s18097_s1 + $0x18] sm:$0xff] }
 0x189   : > { %11666 = vmatprep.mubr.msk.f32.mxu0 %vm761_vm1, %v13503_v30  ;;  %11620 = vmatprep.subr.msk.mxu1 %vm761_vm1, %v13634_v63 }
 0x18a   : > { %11662 = vmatprep.subr.msk.mxu0 %vm761_vm1, %v1435_v23  ;;  %3157 = vrot.lane.b32.xlu0 %v13423_v62, %s13206_s21  ;;  %v1550_v28 = vpop.permute.xlu1 %1549  ;;  %v1548_v36 = vpop.permute.xlu0 %1547 }
 0x18b   : > { %3266 = vrot.lane.b32.xlu1 %v13448_v8, %s13207_s22  ;;  %11621 = vmatpush3.xpose.msk.msra.mxu1 %vm761_vm1, %v13634_v63 }
 0x18c   : > { %11663 = vmatpush3.xpose.msk.msra.mxu0 %vm761_vm1, %v1435_v23  ;;  %11622 = vmatprep.subr.msk.mxu1 %vm761_vm1, %v13642_v1  ;;  %v713_v23 = vld [vmem:[%s18098_s2] sm:$0xff] }
 0x18d   : > { %11664 = vmatprep.subr.msk.mxu0 %vm761_vm1, %v1433_v29 }
 0x18e   : > { %2921 = vrot.lane.b32.xlu0 %v13376_v42, %s13207_s22  ;;  %v1546_v31 = vpop.permute.xlu1 %1545  ;;  %v2043_v41 = vpop.permute.xlu0 %2042 }
 0x18f   : > { %3514 = vrot.lane.b32.xlu1 %v13470_v16, %s13206_s21  ;;  %11623 = vmatpush3.xpose.msk.msra.mxu1 %vm761_vm1, %v13642_v1 }
 0x190   : > { %11665 = vmatpush3.xpose.msk.msra.mxu0 %vm761_vm1, %v1433_v29  ;;  %11644 = vmatprep.subr.msk.mxu1 %vm761_vm1, %v13667_v12  ;;  %v716_v29 = vld [vmem:[%s18098_s2 + $0x18] sm:$0xff] }
 0x192   : > { %11625 = vmatmul.mubr.msk.f32.vlgmr.msra.gmra.mxu1 %vm761_vm1, %v13438_v4  ;;  %3276 = vrot.lane.b32.xlu0 %v13438_v4, %s13206_s21  ;;  %v2045_v33 = vpop.permute.xlu1 %2044  ;;  %v2263_v46 = vpop.permute.xlu0 %2262 }
 0x193   : > { %11667 = vmatmul.mubr.msk.f32.vlgmr.msra.gmra.mxu0 %vm761_vm1, %v13493_v26  ;;  %2805 = vrot.lane.b32.xlu1 %v13520_v35, %s13205_s20 }
 0x194   : > { %11627 = vmatprep.mubr.msk.f32.mxu1 %vm761_vm1, %v13433_v2  ;;  %11645 = vmatpush3.xpose.msk.msra.mxu1 %vm761_vm1, %v13667_v12  ;;  %v13839_v12 = vld [vmem:[%s18097_s1] sm:$0xff] }
 0x195   : > { %11669 = vmatprep.mubr.msk.f32.mxu0 %vm761_vm1, %v13496_v27  ;;  %11646 = vmatprep.subr.msk.mxu1 %vm761_vm1, %v13679_v15 }
 0x196   : > { %11628 = vmatmul.mubr.msk.f32.gmra.mxu1 %vm761_vm1, %v13428_v0  ;;  %11686 = vmatprep.subr.mxu0 %v2045_v33  ;;  %v2041_v39 = vpop.permute.xlu1 %2040  ;;  %v13797_v47 = vpop.permute.xlu0 %2151 }
 0x197   : > { %11670 = vmatmul.mubr.msk.f32.gmra.mxu0 %vm761_vm1, %v13490_v24  ;;  %3151 = vrot.lane.b32.xlu0 %v13418_v60, %s13207_s22 }
 0x198   : > { %11647 = vmatpush3.xpose.msk.msra.mxu1 %vm761_vm1, %v13679_v15  ;;  %11652 = vmatprep.mubr.msk.f32.mxu1 %vm761_vm1, %v13483_v22 }
 0x199   : > { %11687 = vmatpush3.msra.mxu0 %v2045_v33  ;;  %11648 = vmatprep.subr.msk.mxu1 %vm761_vm1, %v13677_v14  ;;  %v13864_v33 = vld [vmem:[%s18097_s1 + $0x10] sm:$0xff] }
 0x19a   : > { %11688 = vmatprep.subr.mxu0 %v2043_v41  ;;  %v2039_v43 = vpop.permute.xlu1 %2038  ;;  %v2261_v51 = vpop.permute.xlu0 %2260 }
 0x19b   : > { %11689 = vmatpush3.msra.mxu0 %v2043_v41  ;;  %3274 = vrot.lane.b32.xlu0 %v13448_v8, %s13206_s21 }
 0x19c   : > { %11690 = vmatprep.subr.mxu0 %v2041_v39  ;;  %11649 = vmatpush3.xpose.msk.msra.mxu1 %vm761_vm1, %v13677_v14  ;;  %v714_v14 = vld [vmem:[%s18098_s2 + $0x8] sm:$0xff] }
 0x19d   : > { %11691 = vmatpush3.msra.mxu0 %v2041_v39  ;;  %11650 = vmatprep.subr.msk.mxu1 %vm761_vm1, %v13691_v20 }
 0x19e   : > { %11692 = vmatprep.subr.mxu0 %v2039_v43  ;;  %v13781_v44 = vpop.permute.xlu1 %2153  ;;  %v13810_v55 = vpop.permute.xlu0 %2147 }
 0x19f   : > { %3038 = vrot.lane.b32.xlu0 %v13390_v48, %s13207_s22  ;;  %11693 = vmatpush3.msra.mxu0 %v2039_v43 }
 0x1a0   : > { %11651 = vmatpush3.xpose.msk.msra.mxu1 %vm761_vm1, %v13691_v20  ;;  %11700 = vmatprep.subr.mxu0 %v13781_v44 }
 0x1a1   : > { %11672 = vmatprep.subr.msk.mxu1 %vm761_vm1, %v1552_v25 }
 0x1a2   : > { %v13801_v49 = vpop.permute.xlu1 %2149  ;;  %v2257_v59 = vpop.permute.xlu0 %2256 }
 0x1a3   : > { %11653 = vmatmul.mubr.msk.f32.vlgmr.msra.gmra.mxu1 %vm761_vm1, %v13473_v18  ;;  %3393 = vrot.lane.b32.xlu0 %v13463_v13, %s13206_s21 }
 0x1a4   : > { %11655 = vmatprep.mubr.msk.f32.mxu1 %vm761_vm1, %v13476_v19  ;;  %11673 = vmatpush3.xpose.msk.msra.mxu1 %vm761_vm1, %v1552_v25 }
 0x1a5   : > { %11674 = vmatprep.subr.msk.mxu1 %vm761_vm1, %v1550_v28 }
 0x1a6   : > { %v2259_v53 = vpop.permute.xlu1 %2258  ;;  %v13823_v63 = vpop.permute.xlu0 %2369 }
 0x1a7   : > { %11656 = vmatmul.mubr.msk.f32.gmra.mxu1 %vm761_vm1, %v13470_v16 }
 0x1a8   : > { %11675 = vmatpush3.xpose.msk.msra.mxu1 %vm761_vm1, %v1550_v28  ;;  %11680 = vmatprep.mubr.msk.f32.mxu1 %vm761_vm1, %v13523_v37 }
 0x1a9   : > { %11676 = vmatprep.subr.msk.mxu1 %vm761_vm1, %v1548_v36 }
 0x1aa   : > { %v13814_v57 = vpop.permute.xlu1 %2371  ;;  %v13825_v1 = vpop.permute.xlu0 %2478 }
 0x1ab   : > { %18346 = vst [vmem:[#allocation30_spill] sm:$0xff] %v13825_v1  ;;  %v731_v1 = vld [vmem:[%s18098_s2 + $0x90] sm:$0xff] }
 0x1ac   : > { %11677 = vmatpush3.xpose.msk.msra.mxu1 %vm761_vm1, %v1548_v36 }
 0x1ad   : > { %11678 = vmatprep.subr.msk.mxu1 %vm761_vm1, %v1546_v31 }
 0x1ae   : > { %v13820_v61 = vpop.permute.xlu1 %2480  ;;  %v13827_v3 = vpop.permute.xlu0 %2367 }
 0x1af   : > { %18345 = vst [vmem:[#allocation29_spill] sm:$0xff] %v13820_v61 }
 0x1b0   : > { %11679 = vmatpush3.xpose.msk.msra.mxu1 %vm761_vm1, %v1546_v31 }
 0x1b1   : > { %11714 = vmatprep.subr.mxu1 %v2263_v46 }
 0x1b2   : > { %v13829_v5 = vpop.permute.xlu0 %2476 }
 0x1b3   : > { %11681 = vmatmul.mubr.msk.f32.vlgmr.msra.gmra.mxu1 %vm761_vm1, %v13513_v34  ;;  %18347 = vst [vmem:[#allocation31_spill] sm:$0xff] %v13829_v5 }
 0x1b4   : > { %11683 = vmatprep.mubr.msk.f32.mxu1 %vm761_vm1, %v13520_v35  ;;  %11715 = vmatpush3.msra.mxu1 %v2263_v46 }
 0x1b5   : > { %11716 = vmatprep.subr.mxu1 %v2261_v51 }
 0x1b6   : > { %11717 = vmatpush3.msra.mxu1 %v2261_v51  ;;  %v13845_v17 = vpop.permute.xlu0 %2365 }
 0x1b7   : > { %11684 = vmatmul.mubr.msk.f32.gmra.mxu1 %vm761_vm1, %v13510_v32  ;;  %11718 = vmatprep.subr.mxu1 %v2259_v53  ;;  %18348 = vst [vmem:[#allocation32_spill] sm:$0xff] %v13845_v17 }
 0x1b8   : > { %11719 = vmatpush3.msra.mxu1 %v2259_v53 }
 0x1b9   : > { %11720 = vmatprep.subr.mxu1 %v2257_v59 }
 0x1ba   : > { %11721 = vmatpush3.msra.mxu1 %v2257_v59  ;;  %v13876_v59 = vpop.permute.xlu0 %2587 }
 0x1bb   : > { %11742 = vmatprep.subr.mxu1 %v13820_v61  ;;  %18349 = vst [vmem:[#allocation33_spill] sm:$0xff] %v13876_v59 }
 0x21f   : > { %v11584_v10 = vpop.f32.mrf.mxu1 }
 0x220   : > { %v850_v15 = vadd.f32 %v11584_v10, %v13834_v7  ;;  %v715_v10 = vld [vmem:[%s18098_s2 + $0x10] sm:$0xff] }
 0x221   : > { %v844_v20 = vpop.f32.mrf.mxu1 }
 0x222   : > { %v845_v25 = vadd.f32 %v844_v20, %v13839_v12  ;;  %v13856_v28 = vadd.f32 %v850_v15, %v714_v14  ;;  %v13885_v20 = vpop.permute.xlu0 %2696 }
 0x223   : > { %v11587_v31 = vpop.f32.mrf.mxu1  ;;  %18350 = vst [vmem:[#allocation34_spill] sm:$0xff] %v13885_v20 }
 0x224   : > { %v860_v36 = vadd.f32 %v11587_v31, %v13850_v21  ;;  %v1689_v39 = vsel %vm391_vm0, %v13856_v28, -inf  ;;  %v13869_v41 = vadd.f32 %v845_v25, %v713_v23 }
 0x225   : > { %1690 = vmax.xlane.f32.xlu1 %v1689_v39  ;;  %v854_v43 = vpop.f32.mrf.mxu1 }
 0x226   : > { %v13871_v46 = vadd.f32 %v860_v36, %v716_v29  ;;  %v855_v51 = vadd.f32 %v854_v43, %v13864_v33  ;;  %v1686_v53 = vsel %vm391_vm0, %v13869_v41, -inf  ;;  %v718_v29 = vld [vmem:[%s18098_s2 + $0x28] sm:$0xff]  ;;  %v13893_v36 = vpop.permute.xlu1 %2474  ;;  %v717_v43 = vld [vmem:[%s18098_s2 + $0x20] sm:$0xff] }
 0x227   : > { %1687 = vmax.xlane.f32.xlu0 %v1686_v53  ;;  %18351 = vst [vmem:[#allocation35_spill] sm:$0xff] %v13893_v36 }
 0x228   : > { %v1695_v14 = vsel %vm391_vm0, %v13871_v46, -inf  ;;  %v13883_v15 = vadd.f32 %v855_v51, %v715_v10  ;;  %v13898_v51 = vpop.permute.xlu0 %2585 }
 0x229   : > { %18352 = vst [vmem:[#allocation36_spill] sm:$0xff] %v13898_v51 }
 0x22a   : > { %v1692_v23 = vsel %vm391_vm0, %v13883_v15, -inf  ;;  %v13911_v60 = vpop.permute.xlu1 %2589 }
 0x22b   : > { %1696 = vmax.xlane.f32.xlu0 %v1695_v14  ;;  %18353 = vst [vmem:[#allocation37_spill] sm:$0xff] %v13911_v60 }
 0x22c   : > { %v13913_v50 = vpop.permute.xlu0 %2583 }
 0x22d   : > { %18354 = vst [vmem:[#allocation38_spill] sm:$0xff] %v13913_v50 }
 0x22f   : > { %1693 = vmax.xlane.f32.xlu0 %v1692_v23 }
 0x230   : > { %v11598_v25 = vpop.f32.mrf.mxu1  ;;  %v13929_v52 = vpop.permute.xlu0 %2692 }
 0x231   : > { %v963_v31 = vadd.f32 %v11598_v25, %v13834_v7  ;;  %18356 = vst [vmem:[#allocation40_spill] sm:$0xff] %v13929_v52 }
 0x232   : > { %v957_v39 = vpop.f32.mrf.mxu1 }
 0x233   : > { %v958_v53 = vadd.f32 %v957_v39, %v13839_v12  ;;  %v13901_v10 = vadd.f32 %v963_v31, %v718_v29 }
 0x234   : > { %v11601_v14 = vpop.f32.mrf.mxu1  ;;  %v13945_v40 = vpop.permute.xlu0 %2807 }
 0x235   : > { %v973_v23 = vadd.f32 %v11601_v14, %v13850_v21  ;;  %v1701_v8 = vsel %vm391_vm0, %v13901_v10, -inf  ;;  %v13906_v25 = vadd.f32 %v958_v53, %v717_v43  ;;  %v13927_v14 = vpop.permute.xlu1 %2698  ;;  %18358 = vst [vmem:[#allocation42_spill] sm:$0xff] %v13945_v40 }
 0x236   : > { %1702 = vmax.xlane.f32.xlu1 %v1701_v8  ;;  %v967_v62 = vpop.f32.mrf.mxu1  ;;  %v719_v8 = vld [vmem:[%s18098_s2 + $0x30] sm:$0xff]  ;;  %18355 = vst [vmem:[#allocation39_spill] sm:$0xff] %v13927_v14 }
 0x237   : > { %v968_v29 = vadd.f32 %v967_v62, %v13864_v33  ;;  %v1698_v31 = vsel %vm391_vm0, %v13906_v25, -inf  ;;  %v13918_v39 = vadd.f32 %v973_v23, %v720_v54  ;;  %v722_v54 = vld [vmem:[%s18098_s2 + $0x48] sm:$0xff] }
 0x239   : > { %v1707_v43 = vsel %vm391_vm0, %v13918_v39, -inf  ;;  %v13925_v53 = vadd.f32 %v968_v29, %v719_v8  ;;  %v730_v29 = vld [vmem:[%s18098_s2 + $0x88] sm:$0xff] }
 0x23a   : > { %1699 = vmax.xlane.f32.xlu1 %v1698_v31 }
 0x23b   : > { %v1704_v31 = vsel %vm391_vm0, %v13925_v53, -inf }
 0x23e   : > { %1708 = vmax.xlane.f32.xlu1 %v1707_v43  ;;  %v13941_v43 = vpop.permute.xlu1 %2694 }
 0x23f   : > { %18357 = vst [vmem:[#allocation41_spill] sm:$0xff] %v13941_v43 }
 0x241   : > { %v11612_v62 = vpop.f32.mrf.mxu1  ;;  %v11640_v23 = vpop.f32.mrf.mxu0 }
 0x242   : > { %v1076_v38 = vadd.f32 %v11612_v62, %v13834_v7  ;;  %v1302_v42 = vadd.f32 %v11640_v23, %v13834_v7  ;;  %1705 = vmax.xlane.f32.xlu1 %v1704_v31  ;;  %v721_v31 = vld [vmem:[%s18098_s2 + $0x40] sm:$0xff]  ;;  %v13955_v20 = vpop.permute.xlu1 %2927 }
 0x243   : > { %v1070_v8 = vpop.f32.mrf.mxu1  ;;  %v1296_v23 = vpop.f32.mrf.mxu0  ;;  %18359 = vst [vmem:[#allocation43_spill] sm:$0xff] %v13955_v20 }
 0x244   : > { %v13943_v48 = vadd.f32 %v1076_v38, %v722_v54  ;;  %v13947_v52 = vadd.f32 %v1302_v42, %v730_v29  ;;  %v1071_v45 = vadd.f32 %v1070_v8, %v13839_v12  ;;  %v1297_v38 = vadd.f32 %v1296_v23, %v13839_v12  ;;  %v13962_v29 = vpop.permute.xlu0 %2929 }
 0x245   : > { %18360 = vst [vmem:[#allocation44_spill] sm:$0xff] %v13962_v29  ;;  %v11615_v8 = vpop.f32.mrf.mxu1  ;;  %v11643_v43 = vpop.f32.mrf.mxu0 }
 0x246   : > { %v1713_v62 = vsel %vm391_vm0, %v13943_v48, -inf  ;;  %v1737_v54 = vsel %vm391_vm0, %v13947_v52, -inf  ;;  %v13960_v42 = vadd.f32 %v1071_v45, %v721_v31  ;;  %v1086_v40 = vadd.f32 %v11615_v8, %v13850_v21  ;;  %v724_v45 = vld [vmem:[%s18098_s2 + $0x58] sm:$0xff]  ;;  %v13975_v31 = vpop.permute.xlu1 %2925 }
 0x247   : > { %1714 = vmax.xlane.f32.xlu0 %v1713_v62  ;;  %v729_v62 = vld [vmem:[%s18098_s2 + $0x80] sm:$0xff]  ;;  %18361 = vst [vmem:[#allocation45_spill] sm:$0xff] %v13975_v31  ;;  %v1306_v50 = vpop.f32.mrf.mxu0  ;;  %v1312_v8 = vadd.f32 %v11643_v43, %v13850_v21 }
 0x248   : > { %v1710_v20 = vsel %vm391_vm0, %v13960_v42, -inf  ;;  %v13970_v23 = vadd.f32 %v1297_v38, %v729_v62  ;;  %v13977_v29 = vpop.permute.xlu0 %2803  ;;  %v13979_v51 = vadd.f32 %v1086_v40, %v724_v45  ;;  %v726_v38 = vld [vmem:[%s18098_s2 + $0x68] sm:$0xff]  ;;  %v725_v43 = vld [vmem:[%s18098_s2 + $0x60] sm:$0xff] }
 0x249   : > { %18362 = vst [vmem:[#allocation46_spill] sm:$0xff] %v13977_v29 }
 0x24a   : > { %v1734_v59 = vsel %vm391_vm0, %v13970_v23, -inf  ;;  %v13997_v16 = vpop.permute.xlu1 %2923 }
 0x24b   : > { %1738 = vmax.xlane.f32.xlu0 %v1737_v54  ;;  %v1080_v54 = vpop.f32.mrf.mxu1  ;;  %18363 = vst [vmem:[#allocation47_spill] sm:$0xff] %v13997_v16 }
 0x24c   : > { %v1081_v35 = vadd.f32 %v1080_v54, %v13864_v33  ;;  %v728_v54 = vld [vmem:[%s18098_s2 + $0x78] sm:$0xff] }
 0x24f   : > { %1711 = vmax.xlane.f32.xlu0 %v1710_v20  ;;  %v732_v20 = vld [vmem:[%s18098_s2 + $0x98] sm:$0xff] }
 0x250   : > { %v13999_v36 = vadd.f32 %v1312_v8, %v732_v20  ;;  %v723_v8 = vld [vmem:[%s18098_s2 + $0x50] sm:$0xff] }
 0x251   : > { %v14020_v16 = vadd.f32 %v1081_v35, %v723_v8  ;;  %v727_v35 = vld [vmem:[%s18098_s2 + $0x70] sm:$0xff] }
 0x252   : > { %v11626_v62 = vpop.f32.mrf.mxu1 }
 0x253   : > { %v1189_v31 = vadd.f32 %v11626_v62, %v13834_v7  ;;  %v11668_v29 = vpop.f32.mrf.mxu0  ;;  %1735 = vmax.xlane.f32.xlu0 %v1734_v59  ;;  %v1719_v59 = vsel %vm391_vm0, %v13979_v51, -inf  ;;  %v14004_v62 = vpop.permute.xlu0 %2801 }
 0x254   : > { %v1183_v40 = vpop.f32.mrf.mxu1  ;;  %18364 = vst [vmem:[#allocation48_spill] sm:$0xff] %v14004_v62  ;;  %v1307_v62 = vadd.f32 %v1306_v50, %v13864_v33  ;;  %v1528_v8 = vadd.f32 %v11668_v29, %v13834_v7  ;;  %v739_v29 = vld [vmem:[%s18098_s2 + $0xd0] sm:$0xff] }
 0x255   : > { %v13994_v45 = vadd.f32 %v1189_v31, %v726_v38  ;;  %v1184_v37 = vadd.f32 %v1183_v40, %v13839_v12  ;;  %v1522_v14 = vpop.f32.mrf.mxu0 }
 0x256   : > { %v11629_v5 = vpop.f32.mrf.mxu1 }
 0x257   : > { %v1199_v34 = vadd.f32 %v11629_v5, %v13850_v21  ;;  %v1725_v31 = vsel %vm391_vm0, %v13994_v45, -inf  ;;  %1720 = vmax.xlane.f32.xlu0 %v1719_v59  ;;  %v14009_v38 = vadd.f32 %v1184_v37, %v725_v43  ;;  %v11671_v20 = vpop.f32.mrf.mxu0  ;;  %v1743_v5 = vsel %vm391_vm0, %v13999_v36, -inf }
 0x258   : > { %v1193_v40 = vpop.f32.mrf.mxu1  ;;  %1726 = vmax.xlane.f32.xlu1 %v1725_v31  ;;  %v14030_v31 = vpop.permute.xlu1 %2915 }
 0x259   : > { %v14022_v37 = vadd.f32 %v1199_v34, %v728_v54  ;;  %v1194_v43 = vadd.f32 %v1193_v40, %v13864_v33  ;;  %v1722_v59 = vsel %vm391_vm0, %v14009_v38, -inf  ;;  %18365 = vst [vmem:[#allocation49_spill] sm:$0xff] %v14030_v31  ;;  %v1532_v50 = vpop.f32.mrf.mxu0  ;;  %v14035_v34 = vpop.permute.xlu0 %3046  ;;  %v1716_v54 = vsel %vm391_vm0, %v14020_v16, -inf }
 0x25a   : > { %18366 = vst [vmem:[#allocation50_spill] sm:$0xff] %v14035_v34  ;;  %v14040_v40 = vadd.f32 %v1307_v62, %v731_v1  ;;  %v1533_v31 = vadd.f32 %v1532_v50, %v13864_v33  ;;  %v1523_v62 = vadd.f32 %v1522_v14, %v13839_v12  ;;  %v734_v14 = vld [vmem:[%s18098_s2 + $0xa8] sm:$0xff] }
 0x25b   : > { %1744 = vmax.xlane.f32.xlu0 %v1743_v5  ;;  %v738_v5 = vld [vmem:[%s18098_s2 + $0xc8] sm:$0xff]  ;;  %v14048_v61 = vadd.f32 %v1194_v43, %v727_v35  ;;  %v737_v35 = vld [vmem:[%s18098_s2 + $0xc0] sm:$0xff] }
 0x25c   : > { %1723 = vmax.xlane.f32.xlu1 %v1722_v59  ;;  %v1731_v59 = vsel %vm391_vm0, %v14022_v37, -inf  ;;  %v14053_v34 = vpop.permute.xlu1 %3163  ;;  %v14055_v1 = vadd.f32 %v1528_v8, %v738_v5  ;;  %v1740_v50 = vsel %vm391_vm0, %v14040_v40, -inf  ;;  %v14062_v43 = vadd.f32 %v1533_v31, %v739_v29 }
 0x25d   : > { %18367 = vst [vmem:[#allocation51_spill] sm:$0xff] %v14053_v34  ;;  %v1538_v34 = vadd.f32 %v11671_v20, %v13850_v21  ;;  %v14076_v29 = vadd.f32 %v1523_v62, %v737_v35  ;;  %v733_v20 = vld [vmem:[%s18098_s2 + $0xa0] sm:$0xff] }
 0x25e   : > { %v1761_v31 = vsel %vm391_vm0, %v14055_v1, -inf }
 0x25f   : > { %1717 = vmax.xlane.f32.xlu0 %v1716_v54  ;;  %v1728_v54 = vsel %vm391_vm0, %v14048_v61, -inf }
 0x260   : > { %1732 = vmax.xlane.f32.xlu1 %v1731_v59  ;;  %v14067_v59 = vpop.permute.xlu0 %3044 }
 0x261   : > { %18368 = vst [vmem:[#allocation52_spill] sm:$0xff] %v14067_v59 }
 0x263   : > { %v11654_v9 = vpop.f32.mrf.mxu1  ;;  %1741 = vmax.xlane.f32.xlu0 %v1740_v50  ;;  %v740_v50 = vld [vmem:[%s18098_s2 + $0xd8] sm:$0xff] }
 0x264   : > { %v1415_v8 = vadd.f32 %v11654_v9, %v13834_v7  ;;  %1729 = vmax.xlane.f32.xlu1 %v1728_v54  ;;  %v1764_v9 = vsel %vm391_vm0, %v14062_v43, -inf  ;;  %v14086_v54 = vpop.permute.xlu1 %3040  ;;  %v14091_v35 = vpop.permute.xlu0 %3042  ;;  %v14093_v11 = vadd.f32 %v1538_v34, %v740_v50 }
 0x265   : > { %v1409_v5 = vpop.f32.mrf.mxu1  ;;  %18369 = vst [vmem:[#allocation53_spill] sm:$0xff] %v14086_v54  ;;  %18370 = vst [vmem:[#allocation54_spill] sm:$0xff] %v14091_v35 }
 0x266   : > { %v14081_v59 = vadd.f32 %v1415_v8, %v734_v14  ;;  %v1410_v30 = vadd.f32 %v1409_v5, %v13839_v12  ;;  %v1758_v8 = vsel %vm391_vm0, %v14076_v29, -inf  ;;  %v736_v5 = vld [vmem:[%s18098_s2 + $0xb8] sm:$0xff]  ;;  %v1767_v35 = vsel %vm391_vm0, %v14093_v11, -inf }
 0x267   : > { %v11657_v26 = vpop.f32.mrf.mxu1  ;;  %1762 = vmax.xlane.f32.xlu0 %v1761_v31 }
 0x268   : > { %1765 = vmax.xlane.f32.xlu1 %v1764_v9  ;;  %v1425_v14 = vadd.f32 %v11657_v26, %v13850_v21  ;;  %v1749_v9 = vsel %vm391_vm0, %v14081_v59, -inf  ;;  %v14104_v54 = vadd.f32 %v1410_v30, %v733_v20  ;;  %v735_v26 = vld [vmem:[%s18098_s2 + $0xb0] sm:$0xff]  ;;  %v14109_v34 = vpop.permute.xlu1 %3032  ;;  %v14119_v30 = vpop.permute.xlu0 %2917 }
 0x269   : > { %v1419_v62 = vpop.f32.mrf.mxu1  ;;  %18371 = vst [vmem:[#allocation55_spill] sm:$0xff] %v14109_v34  ;;  %18372 = vst [vmem:[#allocation56_spill] sm:$0xff] %v14119_v30 }
 0x26a   : > { %v1420_v31 = vadd.f32 %v1419_v62, %v13864_v33  ;;  %v14111_v50 = vadd.f32 %v1425_v14, %v736_v5  ;;  %v1746_v62 = vsel %vm391_vm0, %v14104_v54, -inf  ;;  %v742_v14 = vld [vmem:[%s18098_s2 + $0xe8] sm:$0xff] }
 0x26b   : > { %1759 = vmax.xlane.f32.xlu0 %v1758_v8 }
 0x26c   : > { %1750 = vmax.xlane.f32.xlu1 %v1749_v9  ;;  %v14117_v0 = vadd.f32 %v1420_v31, %v735_v26  ;;  %v1755_v20 = vsel %vm391_vm0, %v14111_v50, -inf  ;;  %v14128_v9 = vpop.permute.xlu1 %3280  ;;  %v741_v26 = vld [vmem:[%s18098_s2 + $0xe0] sm:$0xff] }
 0x26d   : > { %18373 = vst [vmem:[#allocation57_spill] sm:$0xff] %v14128_v9 }
 0x26e   : > { %v1752_v5 = vsel %vm391_vm0, %v14117_v0, -inf }
 0x26f   : > { %1768 = vmax.xlane.f32.xlu0 %v1767_v35 }
 0x270   : > { %1747 = vmax.xlane.f32.xlu1 %v1746_v62  ;;  %v14134_v62 = vpop.permute.xlu0 %3161 }
 0x271   : > { %18374 = vst [vmem:[#allocation58_spill] sm:$0xff] %v14134_v62 }
 0x273   : > { %v11682_v8 = vpop.f32.mrf.mxu1  ;;  %1756 = vmax.xlane.f32.xlu0 %v1755_v20  ;;  %v744_v20 = vld [vmem:[%s18098_s2 + $0xf8] sm:$0xff] }
 0x274   : > { %v1641_v35 = vadd.f32 %v11682_v8, %v13834_v7  ;;  %1753 = vmax.xlane.f32.xlu1 %v1752_v5 }
 0x275   : > { %v1635_v31 = vpop.f32.mrf.mxu1 }
 0x276   : > { %v14136_v34 = vadd.f32 %v1641_v35, %v742_v14  ;;  %v1636_v30 = vadd.f32 %v1635_v31, %v13839_v12  ;;  %v743_v14 = vld [vmem:[%s18098_s2 + $0xf0] sm:$0xff]  ;;  %v14150_v35 = vpop.permute.xlu1 %2919 }
 0x277   : > { %v11685_v60 = vpop.f32.mrf.mxu1  ;;  %18375 = vst [vmem:[#allocation59_spill] sm:$0xff] %v14150_v35 }
 0x278   : > { %v1651_v9 = vadd.f32 %v11685_v60, %v13850_v21  ;;  %v1773_v7 = vsel %vm391_vm0, %v14136_v34, -inf  ;;  %v14145_v8 = vadd.f32 %v1636_v30, %v741_v26  ;;  %v14157_v21 = vpop.permute.xlu0 %3159 }
 0x279   : > { %v1645_v5 = vpop.f32.mrf.mxu1  ;;  %1774 = vmax.xlane.f32.xlu0 %v1773_v7  ;;  %18376 = vst [vmem:[#allocation60_spill] sm:$0xff] %v14157_v21 }
 0x27a   : > { %v14152_v12 = vadd.f32 %v1651_v9, %v744_v20  ;;  %v1646_v31 = vadd.f32 %v1645_v5, %v13864_v33  ;;  %v1770_v60 = vsel %vm391_vm0, %v14145_v8, -inf  ;;  %v14165_v9 = vpop.permute.xlu1 %3278 }
 0x27b   : > { %1771 = vmax.xlane.f32.xlu1 %v1770_v60  ;;  %18377 = vst [vmem:[#allocation61_spill] sm:$0xff] %v14165_v9 }
 0x27c   : > { %v1779_v30 = vsel %vm391_vm0, %v14152_v12, -inf  ;;  %v14161_v26 = vadd.f32 %v1646_v31, %v743_v14  ;;  %v14167_v20 = vpop.permute.xlu0 %3034 }
 0x27d   : > { %1780 = vmax.xlane.f32.xlu0 %v1779_v30  ;;  %18378 = vst [vmem:[#allocation62_spill] sm:$0xff] %v14167_v20 }
 0x27e   : > { %v1776_v7 = vsel %vm391_vm0, %v14161_v26, -inf  ;;  %v14169_v33 = vpop.permute.xlu1 %3149 }
 0x27f   : > { %1777 = vmax.xlane.f32.xlu1 %v1776_v7  ;;  %18379 = vst [vmem:[#allocation63_spill] sm:$0xff] %v14169_v33 }
 0x280   : > { %v14171_v5 = vpop.permute.xlu0 %3157 }
 0x281   : > { %18380 = vst [vmem:[#allocation64_spill] sm:$0xff] %v14171_v5 }
 0x282   : > { %v14173_v60 = vpop.permute.xlu1 %3397 }
 0x283   : > { %18381 = vst [vmem:[#allocation65_spill] sm:$0xff] %v14173_v60 }
 0x284   : > { %v14175_v21 = vpop.permute.xlu0 %2921 }
 0x285   : > { %18382 = vst [vmem:[#allocation66_spill] sm:$0xff] %v14175_v21 }
 0x286   : > { %v14177_v62 = vpop.permute.xlu1 %3036 }
 0x287   : > { %18383 = vst [vmem:[#allocation67_spill] sm:$0xff] %v14177_v62 }
 0x288   : > { %v14179_v14 = vpop.permute.xlu0 %3276 }
 0x289   : > { %18384 = vst [vmem:[#allocation68_spill] sm:$0xff] %v14179_v14 }
 0x28a   : > { %v14181_v31 = vpop.permute.xlu1 %3395 }
 0x28b   : > { %18385 = vst [vmem:[#allocation69_spill] sm:$0xff] %v14181_v31 }
 0x28c   : > { %v14183_v30 = vpop.permute.xlu0 %3151 }
 0x28d   : > { %18386 = vst [vmem:[#allocation70_spill] sm:$0xff] %v14183_v30 }
 0x28e   : > { %v14185_v7 = vpop.permute.xlu1 %3266 }
 0x28f   : > { %18387 = vst [vmem:[#allocation71_spill] sm:$0xff] %v14185_v7 }
 0x290   : > { %v14187_v9 = vpop.permute.xlu0 %3274 }
 0x291   : > { %18388 = vst [vmem:[#allocation72_spill] sm:$0xff] %v14187_v9 }
 0x292   : > { %v14189_v20 = vpop.permute.xlu1 %3514 }
 0x293   : > { %18389 = vst [vmem:[#allocation73_spill] sm:$0xff] %v14189_v20 }
 0x294   : > { %v14191_v33 = vpop.permute.xlu0 %3038 }
 0x295   : > { %18390 = vst [vmem:[#allocation74_spill] sm:$0xff] %v14191_v33 }
 0x296   : > { %v14193_v5 = vpop.permute.xlu1 %2805 }
 0x297   : > { %18391 = vst [vmem:[#allocation75_spill] sm:$0xff] %v14193_v5 }
 0x298   : > { %v14195_v60 = vpop.permute.xlu0 %3393 }
 0x299   : > { %18392 = vst [vmem:[#allocation76_spill] sm:$0xff] %v14195_v60 }
 0x2ae   : > { %v1691_v21 = vpop.xlane.xlu1 %1690 }
 0x2af   : > { %v1783_v62 = vsub.f32 %v13856_v28, %v1691_v21 }
 0x2b0   : > { %v1688_v14 = vpop.xlane.xlu0 %1687 }
 0x2b1   : > { %v1816_v35 = vmul.f32 1.442695, %v1783_v62  ;;  %v1782_v31 = vsub.f32 %v13869_v41, %v1688_v14 }
 0x2b3   : > { %12572 = vpow2.f32 %v1816_v35  ;;  %v1814_v30 = vmul.f32 1.442695, %v1782_v31 }
 0x2b4   : > { %v1697_v7 = vpop.xlane.xlu0 %1696 }
 0x2b5   : > { %12574 = vpow2.f32 %v1814_v30  ;;  %v1785_v9 = vsub.f32 %v13871_v46, %v1697_v7 }
 0x2b7   : > { %v1820_v20 = vmul.f32 1.442695, %v1785_v9 }
 0x2b8   : > { %v1694_v32 = vpop.xlane.xlu0 %1693 }
 0x2b9   : > { %12576 = vpow2.f32 %v1820_v20  ;;  %v1784_v33 = vsub.f32 %v13883_v15, %v1694_v32 }
 0x2bb   : > { %v1818_v5 = vmul.f32 1.442695, %v1784_v33 }
 0x2bd   : > { %12578 = vpow2.f32 %v1818_v5 }
 0x2bf   : > { %v1703_v60 = vpop.xlane.xlu1 %1702 }
 0x2c0   : > { %v14201_v17 = vpop.eup %12572  ;;  %v1787_v28 = vsub.f32 %v13901_v10, %v1703_v60 }
 0x2c1   : > { %v1881_v41 = vsel %vm391_vm0, %v14201_v17, 0.0 }
 0x2c2   : > { %v14206_v62 = vpop.eup %12574  ;;  %v1824_v35 = vmul.f32 1.442695, %v1787_v28  ;;  %1882 = vadd.xlane.f32.xlu0 %v1881_v41 }
 0x2c3   : > { %v1700_v46 = vpop.xlane.xlu1 %1699  ;;  %v1878_v21 = vsel %vm391_vm0, %v14206_v62, 0.0 }
 0x2c4   : > { %12580 = vpow2.f32 %v1824_v35  ;;  %v1786_v32 = vsub.f32 %v13906_v25, %v1700_v46  ;;  %1879 = vadd.xlane.f32.xlu1 %v1878_v21 }
 0x2c6   : > { %v14211_v15 = vpop.eup %12576  ;;  %v1822_v9 = vmul.f32 1.442695, %v1786_v32 }
 0x2c7   : > { %v1709_v20 = vpop.xlane.xlu1 %1708  ;;  %v1887_v10 = vsel %vm391_vm0, %v14211_v15, 0.0 }
 0x2c8   : > { %12582 = vpow2.f32 %v1822_v9  ;;  %v1789_v33 = vsub.f32 %v13918_v39, %v1709_v20  ;;  %1888 = vadd.xlane.f32.xlu0 %v1887_v10 }
 0x2ca   : > { %v14216_v5 = vpop.eup %12578  ;;  %v1828_v60 = vmul.f32 1.442695, %v1789_v33 }
 0x2cb   : > { %v1706_v14 = vpop.xlane.xlu1 %1705  ;;  %v1884_v31 = vsel %vm391_vm0, %v14216_v5, 0.0 }
 0x2cc   : > { %12584 = vpow2.f32 %v1828_v60  ;;  %v1788_v25 = vsub.f32 %v13925_v53, %v1706_v14  ;;  %1885 = vadd.xlane.f32.xlu1 %v1884_v31 }
 0x2ce   : > { %v1826_v30 = vmul.f32 1.442695, %v1788_v25 }
 0x2d0   : > { %12586 = vpow2.f32 %v1826_v30  ;;  %v1715_v7 = vpop.xlane.xlu0 %1714 }
 0x2d1   : > { %v14221_v28 = vpop.eup %12580  ;;  %v1791_v41 = vsub.f32 %v13943_v48, %v1715_v7 }
 0x2d2   : > { %v1893_v39 = vsel %vm391_vm0, %v14221_v28, 0.0 }
 0x2d3   : > { %v1832_v35 = vmul.f32 1.442695, %v1791_v41  ;;  %1894 = vadd.xlane.f32.xlu1 %v1893_v39 }
 0x2d4   : > { %v1739_v46 = vpop.xlane.xlu0 %1738 }
 0x2d5   : > { %v14226_v21 = vpop.eup %12582  ;;  %12588 = vpow2.f32 %v1832_v35  ;;  %v1799_v32 = vsub.f32 %v13947_v52, %v1739_v46 }
 0x2d6   : > { %v1890_v53 = vsel %vm391_vm0, %v14226_v21, 0.0 }
 0x2d7   : > { %v1848_v9 = vmul.f32 1.442695, %v1799_v32  ;;  %1891 = vadd.xlane.f32.xlu1 %v1890_v53 }
 0x2d8   : > { %v1712_v20 = vpop.xlane.xlu0 %1711 }
 0x2d9   : > { %v14231_v10 = vpop.eup %12584  ;;  %12590 = vpow2.f32 %v1848_v9  ;;  %v1790_v48 = vsub.f32 %v13960_v42, %v1712_v20 }
 0x2da   : > { %v1899_v33 = vsel %vm391_vm0, %v14231_v10, 0.0 }
 0x2db   : > { %v1830_v60 = vmul.f32 1.442695, %v1790_v48  ;;  %1900 = vadd.xlane.f32.xlu1 %v1899_v33 }
 0x2dc   : > { %v1736_v14 = vpop.xlane.xlu0 %1735 }
 0x2dd   : > { %v14236_v31 = vpop.eup %12586  ;;  %12592 = vpow2.f32 %v1830_v60  ;;  %v1798_v52 = vsub.f32 %v13970_v23, %v1736_v14 }
 0x2de   : > { %v1896_v25 = vsel %vm391_vm0, %v14236_v31, 0.0 }
 0x2df   : > { %v1846_v30 = vmul.f32 1.442695, %v1798_v52  ;;  %1897 = vadd.xlane.f32.xlu1 %v1896_v25 }
 0x2e0   : > { %v1721_v7 = vpop.xlane.xlu0 %1720 }
 0x2e1   : > { %12594 = vpow2.f32 %v1846_v30  ;;  %v1727_v41 = vpop.xlane.xlu1 %1726  ;;  %v1793_v42 = vsub.f32 %v13979_v51, %v1721_v7 }
 0x2e2   : > { %v14242_v39 = vpop.eup %12588  ;;  %v1795_v35 = vsub.f32 %v13994_v45, %v1727_v41 }
 0x2e3   : > { %v1836_v46 = vmul.f32 1.442695, %v1793_v42  ;;  %v1905_v32 = vsel %vm391_vm0, %v14242_v39, 0.0 }
 0x2e4   : > { %v1840_v53 = vmul.f32 1.442695, %v1795_v35  ;;  %1906 = vadd.xlane.f32.xlu0 %v1905_v32  ;;  %v1745_v23 = vpop.xlane.xlu0 %1744 }
 0x2e5   : > { %12596 = vpow2.f32 %v1836_v46  ;;  %v1724_v9 = vpop.xlane.xlu1 %1723  ;;  %v1801_v20 = vsub.f32 %v13999_v36, %v1745_v23 }
 0x2e6   : > { %v14248_v48 = vpop.eup %12590  ;;  %12598 = vpow2.f32 %v1840_v53  ;;  %v1794_v51 = vsub.f32 %v14009_v38, %v1724_v9 }
 0x2e7   : > { %v1852_v33 = vmul.f32 1.442695, %v1801_v20  ;;  %v1929_v45 = vsel %vm391_vm0, %v14248_v48, 0.0 }
 0x2e8   : > { %v1838_v60 = vmul.f32 1.442695, %v1794_v51  ;;  %1930 = vadd.xlane.f32.xlu0 %v1929_v45  ;;  %v1718_v14 = vpop.xlane.xlu0 %1717 }
 0x2e9   : > { %12600 = vpow2.f32 %v1852_v33  ;;  %v1733_v52 = vpop.xlane.xlu1 %1732  ;;  %v1792_v25 = vsub.f32 %v14020_v16, %v1718_v14 }
 0x2ea   : > { %v14254_v30 = vpop.eup %12592  ;;  %12602 = vpow2.f32 %v1838_v60  ;;  %v1797_v20 = vsub.f32 %v14022_v37, %v1733_v52 }
 0x2eb   : > { %v1834_v36 = vmul.f32 1.442695, %v1792_v25  ;;  %v1902_v7 = vsel %vm391_vm0, %v14254_v30, 0.0 }
 0x2ec   : > { %1903 = vadd.xlane.f32.xlu0 %v1902_v7  ;;  %v1742_v38 = vpop.xlane.xlu0 %1741 }
 0x2ed   : > { %12604 = vpow2.f32 %v1834_v36  ;;  %v1730_v41 = vpop.xlane.xlu1 %1729  ;;  %v1800_v42 = vsub.f32 %v14040_v40, %v1742_v38  ;;  %v1844_v36 = vmul.f32 1.442695, %v1797_v20 }
 0x2ee   : > { %v14259_v35 = vpop.eup %12594  ;;  %v1796_v37 = vsub.f32 %v14048_v61, %v1730_v41 }
 0x2ef   : > { %v1850_v46 = vmul.f32 1.442695, %v1800_v42  ;;  %v1926_v32 = vsel %vm391_vm0, %v14259_v35, 0.0 }
 0x2f0   : > { %1927 = vadd.xlane.f32.xlu0 %v1926_v32  ;;  %v1763_v16 = vpop.xlane.xlu0 %1762  ;;  %v1842_v61 = vmul.f32 1.442695, %v1796_v37 }
 0x2f1   : > { %12606 = vpow2.f32 %v1850_v46  ;;  %v1766_v53 = vpop.xlane.xlu1 %1765  ;;  %v1807_v23 = vsub.f32 %v14055_v1, %v1763_v16 }
 0x2f2   : > { %v14264_v9 = vpop.eup %12596  ;;  %v1808_v7 = vsub.f32 %v14062_v43, %v1766_v53 }
 0x2f3   : > { %v14267_v51 = vpop.eup %12598  ;;  %v1864_v33 = vmul.f32 1.442695, %v1807_v23  ;;  %v1911_v40 = vsel %vm391_vm0, %v14264_v9, 0.0 }
 0x2f4   : > { %v1917_v45 = vsel %vm391_vm0, %v14267_v51, 0.0  ;;  %1912 = vadd.xlane.f32.xlu0 %v1911_v40  ;;  %v1760_v60 = vpop.xlane.xlu0 %1759  ;;  %v1866_v41 = vmul.f32 1.442695, %v1808_v7 }
 0x2f5   : > { %12608 = vpow2.f32 %v1864_v33  ;;  %v1751_v14 = vpop.xlane.xlu1 %1750  ;;  %1918 = vadd.xlane.f32.xlu1 %v1917_v45  ;;  %v1806_v1 = vsub.f32 %v14076_v29, %v1760_v60 }
 0x2f6   : > { %v14274_v25 = vpop.eup %12600  ;;  %v1803_v43 = vsub.f32 %v14081_v59, %v1751_v14 }
 0x2f7   : > { %v14277_v52 = vpop.eup %12602  ;;  %v1862_v38 = vmul.f32 1.442695, %v1806_v1  ;;  %v1935_v42 = vsel %vm391_vm0, %v14274_v25, 0.0 }
 0x2f8   : > { %v1914_v46 = vsel %vm391_vm0, %v14277_v52, 0.0  ;;  %1936 = vadd.xlane.f32.xlu0 %v1935_v42  ;;  %v1769_v32 = vpop.xlane.xlu0 %1768 }
 0x2f9   : > { %12610 = vpow2.f32 %v1862_v38  ;;  %v1748_v29 = vpop.xlane.xlu1 %1747  ;;  %1915 = vadd.xlane.f32.xlu1 %v1914_v46  ;;  %v1809_v16 = vsub.f32 %v14093_v11, %v1769_v32  ;;  %v1856_v11 = vmul.f32 1.442695, %v1803_v43 }
 0x2fa   : > { %v14285_v23 = vpop.eup %12604  ;;  %12612 = vpow2.f32 %v1844_v36  ;;  %v1802_v53 = vsub.f32 %v14104_v54, %v1748_v29 }
 0x2fb   : > { %v1868_v20 = vmul.f32 1.442695, %v1809_v16  ;;  %v1908_v33 = vsel %vm391_vm0, %v14285_v23, 0.0 }
 0x2fc   : > { %1909 = vadd.xlane.f32.xlu0 %v1908_v33  ;;  %v1757_v40 = vpop.xlane.xlu0 %1756  ;;  %v1854_v36 = vmul.f32 1.442695, %v1802_v53 }
 0x2fd   : > { %12614 = vpow2.f32 %v1868_v20  ;;  %v1754_v45 = vpop.xlane.xlu1 %1753  ;;  %v1805_v1 = vsub.f32 %v14111_v50, %v1757_v40 }
 0x2fe   : > { %v14291_v60 = vpop.eup %12606  ;;  %12616 = vpow2.f32 %v1842_v61  ;;  %v1804_v59 = vsub.f32 %v14117_v0, %v1754_v45 }
 0x2ff   : > { %12618 = vpow2.f32 %v1866_v41  ;;  %v1932_v54 = vsel %vm391_vm0, %v14291_v60, 0.0  ;;  %v1860_v37 = vmul.f32 1.442695, %v1805_v1 }
 0x300   : > { %1933 = vadd.xlane.f32.xlu0 %v1932_v54  ;;  %12620 = vpow2.f32 %v1856_v11  ;;  %v1858_v38 = vmul.f32 1.442695, %v1804_v59 }
 0x301   : > { %12622 = vpow2.f32 %v1854_v36 }
 0x302   : > { %v14297_v14 = vpop.eup %12608  ;;  %v1775_v7 = vpop.xlane.xlu0 %1774  ;;  %12624 = vpow2.f32 %v1860_v37 }
 0x303   : > { %v1811_v42 = vsub.f32 %v14136_v34, %v1775_v7  ;;  %v1953_v50 = vsel %vm391_vm0, %v14297_v14, 0.0  ;;  %12626 = vpow2.f32 %v1858_v38 }
 0x304   : > { %v1772_v46 = vpop.xlane.xlu1 %1771  ;;  %1954 = vadd.xlane.f32.xlu0 %v1953_v50 }
 0x305   : > { %v1810_v0 = vsub.f32 %v14145_v8, %v1772_v46  ;;  %v1872_v29 = vmul.f32 1.442695, %v1811_v42 }
 0x306   : > { %v14303_v32 = vpop.eup %12610 }
 0x307   : > { %v14305_v16 = vpop.eup %12612  ;;  %v1870_v61 = vmul.f32 1.442695, %v1810_v0  ;;  %v1950_v43 = vsel %vm391_vm0, %v14303_v32, 0.0  ;;  %12628 = vpow2.f32 %v1872_v29  ;;  %v1781_v0 = vpop.xlane.xlu0 %1780 }
 0x308   : > { %1951 = vadd.xlane.f32.xlu0 %v1950_v43  ;;  %v1923_v8 = vsel %vm391_vm0, %v14305_v16, 0.0  ;;  %v1778_v29 = vpop.xlane.xlu1 %1777 }
 0x309   : > { %12630 = vpow2.f32 %v1870_v61  ;;  %v1813_v61 = vsub.f32 %v14152_v12, %v1781_v0  ;;  %v1812_v43 = vsub.f32 %v14161_v26, %v1778_v29 }
 0x30a   : > { %v14309_v34 = vpop.eup %12614 }
 0x30b   : > { %v14311_v41 = vpop.eup %12616  ;;  %v1959_v53 = vsel %vm391_vm0, %v14309_v34, 0.0 }
 0x30c   : > { %v14317_v20 = vpop.eup %12618  ;;  %1924 = vadd.xlane.f32.xlu0 %v1923_v8  ;;  %1960 = vadd.xlane.f32.xlu1 %v1959_v53  ;;  %v1920_v45 = vsel %vm391_vm0, %v14311_v41, 0.0  ;;  %v1876_v8 = vmul.f32 1.442695, %v1813_v61  ;;  %v1874_v53 = vmul.f32 1.442695, %v1812_v43 }
 0x30d   : > { %v14319_v33 = vpop.eup %12620  ;;  %v1956_v40 = vsel %vm391_vm0, %v14317_v20, 0.0 }
 0x30e   : > { %v14325_v11 = vpop.eup %12622  ;;  %v1941_v36 = vsel %vm391_vm0, %v14319_v33, 0.0  ;;  %12632 = vpow2.f32 %v1876_v8 }
 0x30f   : > { %v14327_v1 = vpop.eup %12624  ;;  %v1938_v59 = vsel %vm391_vm0, %v14325_v11, 0.0  ;;  %12634 = vpow2.f32 %v1874_v53 }
 0x310   : > { %1957 = vadd.xlane.f32.xlu0 %v1956_v40  ;;  %1921 = vadd.xlane.f32.xlu1 %v1920_v45  ;;  %v14333_v54 = vpop.eup %12626  ;;  %v1947_v38 = vsel %vm391_vm0, %v14327_v1, 0.0 }
 0x311   : > { %v1944_v7 = vsel %vm391_vm0, %v14333_v54, 0.0 }
 0x314   : > { %1942 = vadd.xlane.f32.xlu0 %v1941_v36  ;;  %1939 = vadd.xlane.f32.xlu1 %v1938_v59  ;;  %v14335_v37 = vpop.eup %12628 }
 0x315   : > { %v1965_v46 = vsel %vm391_vm0, %v14335_v37, 0.0 }
 0x316   : > { %v14341_v42 = vpop.eup %12630 }
 0x317   : > { %v1962_v50 = vsel %vm391_vm0, %v14341_v42, 0.0 }
 0x318   : > { %1945 = vadd.xlane.f32.xlu0 %v1944_v7  ;;  %1948 = vadd.xlane.f32.xlu1 %v1947_v38 }
 0x31b   : > { %v14353_v45 = vpop.eup %12632 }
 0x31c   : > { %1963 = vadd.xlane.f32.xlu0 %v1962_v50  ;;  %1966 = vadd.xlane.f32.xlu1 %v1965_v46  ;;  %v14355_v36 = vpop.eup %12634  ;;  %v1971_v12 = vsel %vm391_vm0, %v14353_v45, 0.0 }
 0x31d   : > { %v1968_v7 = vsel %vm391_vm0, %v14355_v36, 0.0 }
 0x32d   : > { %3153 = vrot.lane.b32.xlu1 %v13413_v58, %s13207_s22 }
 0x332   : > { %3268 = vrot.lane.b32.xlu0 %v13438_v4, %s13207_s22 }
 0x34b   : > { %v1883_v40 = vpop.xlane.xlu0 %1882 }
 0x34c   : > { %12636 = vrcp.f32 %v1883_v40 }
 0x34d   : > { %v1880_v59 = vpop.xlane.xlu1 %1879 }
 0x34e   : > { %12638 = vrcp.f32 %v1880_v59 }
 0x351   : > { %1969 = vadd.xlane.f32.xlu0 %v1968_v7  ;;  %1972 = vadd.xlane.f32.xlu1 %v1971_v12  ;;  %v1889_v26 = vpop.xlane.xlu0 %1888  ;;  %v18393_v12 = vld [vmem:[#allocation32_spill] sm:$0xff] }
 0x352   : > { %12640 = vrcp.f32 %v1889_v26 }
 0x355   : > { %v1886_v38 = vpop.xlane.xlu1 %1885 }
 0x356   : > { %12642 = vrcp.f32 %v1886_v38  ;;  %v18394_v38 = vld [vmem:[#allocation25_spill] sm:$0xff] }
 0x359   : > { %v12637_v50 = vpop.eup %12636 }
 0x35a   : > { %v2007_v61 = vmul.f32 %v12637_v50, %v14201_v17  ;;  %v18395_v50 = vld [vmem:[#allocation37_spill] sm:$0xff] }
 0x35b   : > { %v12639_v46 = vpop.eup %12638 }
 0x35c   : > { %v1895_v0 = vpop.xlane.xlu1 %1894  ;;  %v2006_v29 = vmul.f32 %v12639_v46, %v14206_v62  ;;  %v18396_v46 = vld [vmem:[#allocation13_spill] sm:$0xff] }
 0x35d   : > { %12644 = vrcp.f32 %v1895_v0  ;;  %v18397_v0 = vld [vmem:[#allocation17_spill] sm:$0xff] }
 0x35e   : > { %11694 = vmatprep.mubr.msk.f32.mxu0 %vm391_vm0, %v2006_v29  ;;  %v18398_v29 = vld [vmem:[#allocation22_spill] sm:$0xff] }
 0x35f   : > { %11695 = vmatmul.mubr.msk.f32.vlgmr.msra.gmra.mxu0 %vm391_vm0, %v2007_v61  ;;  %v12641_v8 = vpop.eup %12640 }
 0x360   : > { %v1892_v43 = vpop.xlane.xlu1 %1891  ;;  %11701 = vmatpush3.msra.mxu0 %v13781_v44  ;;  %v2009_v44 = vmul.f32 %v12641_v8, %v14211_v15  ;;  %v18399_v8 = vld [vmem:[#allocation24_spill] sm:$0xff] }
 0x361   : > { %12646 = vrcp.f32 %v1892_v43  ;;  %11702 = vmatprep.subr.mxu0 %v13797_v47 }
 0x362   : > { %3512 = vrot.lane.b32.xlu1 %v13476_v19, %s13206_s21  ;;  %11703 = vmatpush3.msra.mxu0 %v13797_v47 }
 0x363   : > { %v12643_v62 = vpop.eup %12642  ;;  %11704 = vmatprep.subr.mxu0 %v13801_v49 }
 0x364   : > { %v1901_v17 = vpop.xlane.xlu1 %1900  ;;  %11705 = vmatpush3.msra.mxu0 %v13801_v49  ;;  %v2008_v53 = vmul.f32 %v12643_v62, %v14216_v5 }
 0x365   : > { %11706 = vmatprep.subr.mxu0 %v13810_v55  ;;  %12648 = vrcp.f32 %v1901_v17 }
 0x366   : > { %3383 = vrot.lane.b32.xlu1 %v13443_v6, %s13207_s22  ;;  %11707 = vmatpush3.msra.mxu0 %v13810_v55 }
 0x367   : > { %3391 = vrot.lane.b32.xlu0 %v13443_v6, %s13206_s21  ;;  %11697 = vmatprep.mubr.msk.f32.mxu0 %vm391_vm0, %v2008_v53 }
 0x368   : > { %11728 = vmatprep.subr.mxu0 %v13814_v57  ;;  %v1898_v47 = vpop.xlane.xlu1 %1897  ;;  %11698 = vmatmul.mubr.msk.f32.gmra.mxu0 %vm391_vm0, %v2009_v44 }
 0x369   : > { %12650 = vrcp.f32 %v1898_v47  ;;  %v18400_v47 = vld [vmem:[#allocation16_spill] sm:$0xff] }
 0x36a   : > { %3631 = vrot.lane.b32.xlu1 %v13490_v24, %s13206_s21  ;;  %v12645_v49 = vpop.eup %12644 }
 0x36b   : > { %3155 = vrot.lane.b32.xlu0 %v13408_v56, %s13207_s22  ;;  %v2011_v40 = vmul.f32 %v12645_v49, %v14221_v28  ;;  %v18401_v49 = vld [vmem:[#allocation29_spill] sm:$0xff] }
 0x36d   : > { %v1907_v55 = vpop.xlane.xlu0 %1906 }
 0x36e   : > { %v12647_v15 = vpop.eup %12646  ;;  %3270 = vrot.lane.b32.xlu1 %v13433_v2, %s13207_s22  ;;  %12652 = vrcp.f32 %v1907_v55  ;;  %v18402_v55 = vld [vmem:[#allocation30_spill] sm:$0xff] }
 0x36f   : > { %3510 = vrot.lane.b32.xlu0 %v13473_v18, %s13206_s21  ;;  %v2010_v5 = vmul.f32 %v12647_v15, %v14226_v21  ;;  %v18404_v15 = vld [vmem:[#allocation31_spill] sm:$0xff] }
 0x371   : > { %v1931_v59 = vpop.xlane.xlu0 %1930  ;;  %11708 = vmatprep.mubr.msk.f32.mxu0 %vm391_vm0, %v2010_v5  ;;  %v18405_v5 = vld [vmem:[#allocation27_spill] sm:$0xff] }
 0x372   : > { %3629 = vrot.lane.b32.xlu1 %v13496_v27, %s13206_s21  ;;  %11709 = vmatmul.mubr.msk.f32.vlgmr.msra.gmra.mxu0 %vm391_vm0, %v2011_v40  ;;  %v12649_v7 = vpop.eup %12648  ;;  %v18406_v40 = vld [vmem:[#allocation35_spill] sm:$0xff] }
 0x373   : > { %3385 = vrot.lane.b32.xlu0 %v13463_v13, %s13207_s22  ;;  %11729 = vmatpush3.msra.mxu0 %v13814_v57  ;;  %v2013_v26 = vmul.f32 %v12649_v7, %v14231_v10 }
 0x374   : > { %11730 = vmatprep.subr.mxu0 %v13823_v63 }
 0x375   : > { %11731 = vmatpush3.msra.mxu0 %v13823_v63  ;;  %v1904_v28 = vpop.xlane.xlu0 %1903 }
 0x376   : > { %v12651_v21 = vpop.eup %12650  ;;  %12654 = vrcp.f32 %v1904_v28  ;;  %3500 = vrot.lane.b32.xlu1 %v13483_v22, %s13207_s22  ;;  %11732 = vmatprep.subr.mxu0 %v13827_v3  ;;  %v18407_v28 = vld [vmem:[#allocation19_spill] sm:$0xff] }
 0x377   : > { %3508 = vrot.lane.b32.xlu0 %v13483_v22, %s13206_s21  ;;  %11733 = vmatpush3.msra.mxu0 %v13827_v3  ;;  %v2012_v57 = vmul.f32 %v12651_v21, %v14236_v31 }
 0x378   : > { %11734 = vmatprep.subr.mxu0 %v18393_v12 }
 0x379   : > { %11735 = vmatpush3.msra.mxu0 %v18393_v12  ;;  %v1928_v63 = vpop.xlane.xlu0 %1927  ;;  %11711 = vmatprep.mubr.msk.f32.mxu0 %vm391_vm0, %v2012_v57  ;;  %v18408_v57 = vld [vmem:[#allocation39_spill] sm:$0xff] }
 0x37a   : > { %3748 = vrot.lane.b32.xlu1 %v18394_v38, %s13206_s21  ;;  %11756 = vmatprep.subr.mxu0 %v18395_v50 }
 0x37b   : > { %3272 = vrot.lane.b32.xlu0 %v18396_v46, %s13207_s22  ;;  %11712 = vmatmul.mubr.msk.f32.gmra.mxu0 %vm391_vm0, %v2013_v26  ;;  %v12653_v10 = vpop.eup %12652 }
 0x37c   : > { %v2015_v53 = vmul.f32 %v12653_v10, %v14242_v39  ;;  %v18403_v39 = vld [vmem:[#allocation26_spill] sm:$0xff] }
 0x37d   : > { %v1913_v3 = vpop.xlane.xlu0 %1912 }
 0x37e   : > { %v1919_v31 = vpop.xlane.xlu1 %1918  ;;  %3387 = vrot.lane.b32.xlu1 %v18397_v0, %s13207_s22 }
 0x37f   : > { %3627 = vrot.lane.b32.xlu0 %v18398_v29, %s13206_s21  ;;  %12656 = vrcp.f32 %v1919_v31 }
 0x381   : > { %v1937_v61 = vpop.xlane.xlu0 %1936 }
 0x382   : > { %v1916_v43 = vpop.xlane.xlu1 %1915  ;;  %3625 = vrot.lane.b32.xlu1 %v18399_v8, %s13206_s21 }
 0x383   : > { %v12655_v62 = vpop.eup %12654  ;;  %12658 = vrcp.f32 %v1916_v43  ;;  %3502 = vrot.lane.b32.xlu0 %v13473_v18, %s13207_s22 }
 0x384   : > { %v2014_v17 = vmul.f32 %v12655_v62, %v14254_v30  ;;  %v18410_v62 = vld [vmem:[#allocation33_spill] sm:$0xff] }
 0x385   : > { %v1910_v44 = vpop.xlane.xlu0 %1909 }
 0x386   : > { %12660 = vrcp.f32 %v1910_v44  ;;  %3617 = vrot.lane.b32.xlu1 %v18399_v8, %s13207_s22  ;;  %11722 = vmatprep.mubr.msk.f32.mxu1 %vm391_vm0, %v2014_v17  ;;  %v18411_v44 = vld [vmem:[#allocation36_spill] sm:$0xff] }
 0x387   : > { %12662 = vrcp.f32 %v1913_v3  ;;  %3389 = vrot.lane.b32.xlu0 %v18400_v47, %s13207_s22  ;;  %11723 = vmatmul.mubr.msk.f32.vlgmr.msra.gmra.mxu1 %vm391_vm0, %v2015_v53  ;;  %v18409_v3 = vld [vmem:[#allocation28_spill] sm:$0xff] }
 0x388   : > { %12664 = vrcp.f32 %v1928_v63  ;;  %11743 = vmatpush3.msra.mxu1 %v18401_v49 }
 0x389   : > { %11744 = vmatprep.subr.mxu1 %v18402_v55  ;;  %v1934_v30 = vpop.xlane.xlu0 %1933  ;;  %12666 = vrcp.f32 %v1931_v59 }
 0x38a   : > { %11745 = vmatpush3.msra.mxu1 %v18402_v55  ;;  %3744 = vrot.lane.b32.xlu1 %v18403_v39, %s13206_s21  ;;  %12668 = vrcp.f32 %v1934_v30 }
 0x38b   : > { %11746 = vmatprep.subr.mxu1 %v18404_v15  ;;  %3746 = vrot.lane.b32.xlu0 %v18405_v5, %s13206_s21  ;;  %12670 = vrcp.f32 %v1937_v61 }
 0x38c   : > { %11747 = vmatpush3.msra.mxu1 %v18404_v15  ;;  %v12657_v21 = vpop.eup %12656  ;;  %v18413_v15 = vld [vmem:[#allocation42_spill] sm:$0xff] }
 0x38d   : > { %11748 = vmatprep.subr.mxu1 %v18406_v40  ;;  %v1955_v7 = vpop.xlane.xlu0 %1954  ;;  %v2019_v26 = vmul.f32 %v12657_v21, %v14267_v51 }
 0x38e   : > { %11749 = vmatpush3.msra.mxu1 %v18406_v40  ;;  %3506 = vrot.lane.b32.xlu1 %v18407_v28, %s13207_s22 }
 0x38f   : > { %11770 = vmatprep.subr.mxu1 %v18408_v57  ;;  %3619 = vrot.lane.b32.xlu0 %v18398_v29, %s13207_s22 }
 0x390   : > { %v12659_v59 = vpop.eup %12658 }
 0x391   : > { %v1952_v12 = vpop.xlane.xlu0 %1951  ;;  %v2018_v63 = vmul.f32 %v12659_v59, %v14277_v52  ;;  %v18414_v59 = vld [vmem:[#allocation34_spill] sm:$0xff] }
 0x392   : > { %12672 = vrcp.f32 %v1952_v12  ;;  %3734 = vrot.lane.b32.xlu1 %v18409_v3, %s13207_s22  ;;  %v18415_v12 = vld [vmem:[#allocation5_spill] sm:$0xff] }
 0x393   : > { %v12661_v31 = vpop.eup %12660  ;;  %12674 = vrcp.f32 %v1955_v7  ;;  %11736 = vmatprep.mubr.msk.f32.mxu0 %vm391_vm0, %v2018_v63  ;;  %3504 = vrot.lane.b32.xlu0 %v13476_v19, %s13207_s22 }
 0x394   : > { %v12663_v61 = vpop.eup %12662  ;;  %11737 = vmatmul.mubr.msk.f32.vlgmr.msra.gmra.mxu0 %vm391_vm0, %v2019_v26  ;;  %v2016_v10 = vmul.f32 %v12661_v31, %v14285_v23  ;;  %v18416_v26 = vld [vmem:[#allocation41_spill] sm:$0xff] }
 0x395   : > { %v12665_v43 = vpop.eup %12664  ;;  %11757 = vmatpush3.msra.mxu0 %v18395_v50  ;;  %v1961_v51 = vpop.xlane.xlu1 %1960  ;;  %v2017_v17 = vmul.f32 %v12663_v61, %v14264_v9  ;;  %v18412_v9 = vld [vmem:[#allocation38_spill] sm:$0xff] }
 0x396   : > { %v1925_v52 = vpop.xlane.xlu0 %1924  ;;  %11758 = vmatprep.subr.mxu0 %v18410_v62  ;;  %3621 = vrot.lane.b32.xlu1 %v13496_v27, %s13207_s22  ;;  %v12667_v53 = vpop.eup %12666  ;;  %12676 = vrcp.f32 %v1961_v51  ;;  %v2022_v23 = vmul.f32 %v12665_v43, %v14259_v35  ;;  %v18418_v43 = vld [vmem:[#allocation3_spill] sm:$0xff]  ;;  %v18419_v51 = vld [vmem:[#allocation44_spill] sm:$0xff] }
 0x397   : > { %11759 = vmatpush3.msra.mxu0 %v18410_v62  ;;  %11725 = vmatprep.mubr.msk.f32.mxu1 %vm391_vm0, %v2016_v10  ;;  %v12669_v50 = vpop.eup %12668  ;;  %12678 = vrcp.f32 %v1925_v52  ;;  %v2023_v30 = vmul.f32 %v12667_v53, %v14248_v48  ;;  %v18417_v10 = vld [vmem:[#allocation40_spill] sm:$0xff]  ;;  %v18420_v53 = vld [vmem:[#allocation43_spill] sm:$0xff] }
 0x398   : > { %11760 = vmatprep.subr.mxu0 %v18411_v44  ;;  %3742 = vrot.lane.b32.xlu0 %v18409_v3, %s13206_s21  ;;  %v12671_v35 = vpop.eup %12670  ;;  %v2024_v40 = vmul.f32 %v12669_v50, %v14291_v60  ;;  %s13208_s21 = smov 56   ;;  %v18422_v50 = vld [vmem:[#allocation4_spill] sm:$0xff] }
 0x399   : > { %11726 = vmatmul.mubr.msk.f32.gmra.mxu1 %vm391_vm0, %v2017_v17  ;;  %11761 = vmatpush3.msra.mxu0 %v18411_v44  ;;  %v1922_v49 = vpop.xlane.xlu1 %1921  ;;  %v2025_v63 = vmul.f32 %v12671_v35, %v14274_v25  ;;  %v18421_v44 = vld [vmem:[#allocation6_spill] sm:$0xff] }
 0x39a   : > { %v1958_v55 = vpop.xlane.xlu0 %1957  ;;  %11750 = vmatprep.mubr.msk.f32.mxu1 %vm391_vm0, %v2022_v23  ;;  %11762 = vmatprep.subr.mxu0 %v18412_v9  ;;  %12680 = vrcp.f32 %v1922_v49 }
 0x39b   : > { %11763 = vmatpush3.msra.mxu0 %v18412_v9  ;;  %12682 = vrcp.f32 %v1958_v55  ;;  %3738 = vrot.lane.b32.xlu1 %v18405_v5, %s13207_s22 }
 0x39c   : > { %11784 = vmatprep.subr.mxu0 %v18413_v15  ;;  %3736 = vrot.lane.b32.xlu0 %v18403_v39, %s13207_s22 }
 0x39d   : > { %11751 = vmatmul.mubr.msk.f32.vlgmr.msra.gmra.mxu1 %vm391_vm0, %v2023_v30  ;;  %v1940_v7 = vpop.xlane.xlu1 %1939  ;;  %v18423_v30 = vld [vmem:[#allocation45_spill] sm:$0xff] }
 0x39e   : > { %v1943_v21 = vpop.xlane.xlu0 %1942  ;;  %11771 = vmatpush3.msra.mxu1 %v18408_v57  ;;  %11753 = vmatprep.mubr.msk.f32.mxu1 %vm391_vm0, %v2024_v40  ;;  %12684 = vrcp.f32 %v1940_v7 }
 0x39f   : > { %v12673_v48 = vpop.eup %12672  ;;  %11772 = vmatprep.subr.mxu1 %v18414_v59  ;;  %12686 = vrcp.f32 %v1943_v21  ;;  %4239 = vrot.lane.b32.xlu1 %v18415_v12, %s13208_s21 }
 0x3a0   : > { %v12675_v60 = vpop.eup %12674  ;;  %11773 = vmatpush3.msra.mxu1 %v18414_v59  ;;  %3623 = vrot.lane.b32.xlu0 %v13490_v24, %s13207_s22  ;;  %v2030_v57 = vmul.f32 %v12673_v48, %v14303_v32  ;;  %v18426_v48 = vld [vmem:[#allocation47_spill] sm:$0xff]  ;;  %v18427_v59 = vld [vmem:[#allocation8_spill] sm:$0xff] }
 0x3a1   : > { %11774 = vmatprep.subr.mxu1 %v18416_v26  ;;  %11754 = vmatmul.mubr.msk.f32.gmra.mxu1 %vm391_vm0, %v2025_v63  ;;  %v1949_v31 = vpop.xlane.xlu1 %1948  ;;  %v2031_v25 = vmul.f32 %v12675_v60, %v14297_v14  ;;  %v18429_v60 = vld [vmem:[#allocation75_spill] sm:$0xff] }
 0x3a2   : > { %v1946_v61 = vpop.xlane.xlu0 %1945  ;;  %11775 = vmatpush3.msra.mxu1 %v18416_v26  ;;  %12688 = vrcp.f32 %v1949_v31  ;;  %11778 = vmatprep.mubr.msk.f32.mxu1 %vm391_vm0, %v2030_v57  ;;  %v18430_v57 = vld [vmem:[#allocation51_spill] sm:$0xff] }
 0x3a3   : > { %11776 = vmatprep.subr.mxu1 %v18417_v10  ;;  %12690 = vrcp.f32 %v1946_v61  ;;  %4235 = vrot.lane.b32.xlu1 %v18418_v43, %s13208_s21  ;;  %v12677_v32 = vpop.eup %12676  ;;  %v18431_v61 = vld [vmem:[#allocation11_spill] sm:$0xff] }
 0x3a4   : > { %11777 = vmatpush3.msra.mxu1 %v18417_v10  ;;  %3740 = vrot.lane.b32.xlu0 %v18394_v38, %s13207_s22  ;;  %v12679_v62 = vpop.eup %12678  ;;  %v2033_v40 = vmul.f32 %v12677_v32, %v14309_v34  ;;  %s13209_s22 = smov 80  }
 0x3a5   : > { %11798 = vmatprep.subr.msk.mxu1 %vm761_vm1, %v18419_v51  ;;  %11779 = vmatmul.mubr.msk.f32.vlgmr.msra.gmra.mxu1 %vm391_vm0, %v2031_v25  ;;  %v1967_v14 = vpop.xlane.xlu1 %1966  ;;  %v2021_v35 = vmul.f32 %v12679_v62, %v14305_v16  ;;  %v18425_v16 = vld [vmem:[#allocation49_spill] sm:$0xff]  ;;  %v18433_v25 = vld [vmem:[#allocation56_spill] sm:$0xff]  ;;  %v18438_v62 = vld [vmem:[#allocation50_spill] sm:$0xff] }
 0x3a6   : > { %v1964_v52 = vpop.xlane.xlu0 %1963  ;;  %11799 = vmatpush3.xpose.msk.msra.mxu1 %vm761_vm1, %v18419_v51  ;;  %v18435_v51 = vld [vmem:[#allocation48_spill] sm:$0xff] }
 0x3a7   : > { %v12681_v17 = vpop.eup %12680  ;;  %11800 = vmatprep.subr.msk.mxu1 %vm761_vm1, %v18420_v53  ;;  %12692 = vrcp.f32 %v1964_v52  ;;  %4350 = vrot.lane.b32.xlu1 %v18421_v44, %s13208_s21  ;;  %v18436_v52 = vld [vmem:[#allocation58_spill] sm:$0xff] }
 0x3a8   : > { %v12683_v23 = vpop.eup %12682  ;;  %4241 = vrot.lane.b32.xlu0 %v18422_v50, %s13208_s21  ;;  %v2020_v49 = vmul.f32 %v12681_v17, %v14311_v41  ;;  %12694 = vrcp.f32 %v1967_v14  ;;  %v18440_v14 = vld [vmem:[#allocation63_spill] sm:$0xff]  ;;  %v18441_v17 = vld [vmem:[#allocation52_spill] sm:$0xff] }
 0x3a9   : > { %v2032_v55 = vmul.f32 %v12683_v23, %v14317_v20  ;;  %v18424_v20 = vld [vmem:[#allocation2_spill] sm:$0xff]  ;;  %v18443_v23 = vld [vmem:[#allocation12_spill] sm:$0xff] }
 0x3aa   : > { %11801 = vmatpush3.xpose.msk.msra.mxu1 %vm761_vm1, %v18420_v53  ;;  %11739 = vmatprep.mubr.msk.f32.mxu0 %vm391_vm0, %v2020_v49  ;;  %v18442_v53 = vld [vmem:[#allocation60_spill] sm:$0xff] }
 0x3ab   : > { %v12685_v9 = vpop.eup %12684  ;;  %11802 = vmatprep.subr.msk.mxu1 %vm761_vm1, %v18423_v30  ;;  %4459 = vrot.lane.b32.xlu1 %v13408_v56, %s13208_s21  ;;  %v18444_v49 = vld [vmem:[#allocation64_spill] sm:$0xff] }
 0x3ac   : > { %v12687_v41 = vpop.eup %12686  ;;  %11781 = vmatprep.mubr.msk.f32.mxu1 %vm391_vm0, %v2032_v55  ;;  %4237 = vrot.lane.b32.xlu0 %v18424_v20, %s13208_s21  ;;  %v2026_v7 = vmul.f32 %v12685_v9, %v14325_v11  ;;  %v18445_v55 = vld [vmem:[#allocation54_spill] sm:$0xff]  ;;  %v18446_v9 = vld [vmem:[#allocation65_spill] sm:$0xff] }
 0x3ad   : > { %v2027_v21 = vmul.f32 %v12687_v41, %v14319_v33  ;;  %11740 = vmatmul.mubr.msk.f32.gmra.mxu0 %vm391_vm0, %v2021_v35  ;;  %11782 = vmatmul.mubr.msk.f32.gmra.mxu1 %vm391_vm0, %v2033_v40  ;;  %v18428_v33 = vld [vmem:[#allocation7_spill] sm:$0xff]  ;;  %v3154_v35 = vpop.permute.xlu1 %3153  ;;  %v18448_v40 = vld [vmem:[#allocation70_spill] sm:$0xff]  ;;  %v18449_v41 = vld [vmem:[#allocation57_spill] sm:$0xff] }
 0x3ae   : > { %11803 = vmatpush3.xpose.msk.msra.mxu1 %vm761_vm1, %v18423_v30  ;;  %11806 = vmatprep.mubr.msk.f32.mxu1 %vm761_vm1, %v18425_v16  ;;  %v18447_v30 = vld [vmem:[#allocation53_spill] sm:$0xff]  ;;  %v18452_v16 = vld [vmem:[#allocation15_spill] sm:$0xff] }
 0x3af   : > { %v12689_v34 = vpop.eup %12688  ;;  %11804 = vmatprep.subr.msk.mxu1 %vm761_vm1, %v18426_v48  ;;  %4346 = vrot.lane.b32.xlu1 %v18427_v59, %s13208_s21 }
 0x3b0   : > { %v12691_v11 = vpop.eup %12690  ;;  %11764 = vmatprep.mubr.msk.f32.mxu0 %vm391_vm0, %v2026_v7  ;;  %4348 = vrot.lane.b32.xlu0 %v18428_v33, %s13208_s21  ;;  %v2029_v26 = vmul.f32 %v12689_v34, %v14327_v1  ;;  %v18434_v1 = vld [vmem:[#allocation59_spill] sm:$0xff]  ;;  %v18450_v7 = vld [vmem:[#allocation69_spill] sm:$0xff]  ;;  %v14652_v34 = vpop.permute.xlu0 %3268 }
 0x3b1   : > { %11765 = vmatmul.mubr.msk.f32.vlgmr.msra.gmra.mxu0 %vm391_vm0, %v2027_v21  ;;  %v2028_v63 = vmul.f32 %v12691_v11, %v14333_v54  ;;  %v18432_v54 = vld [vmem:[#allocation46_spill] sm:$0xff]  ;;  %v18451_v21 = vld [vmem:[#allocation76_spill] sm:$0xff] }
 0x3b2   : > { %11785 = vmatpush3.msra.mxu0 %v18413_v15  ;;  %11805 = vmatpush3.xpose.msk.msra.mxu1 %vm761_vm1, %v18426_v48 }
 0x3b3   : > { %11786 = vmatprep.subr.mxu0 %v18429_v60  ;;  %11826 = vmatprep.subr.msk.mxu1 %vm761_vm1, %v18430_v57 }
 0x3b4   : > { %v12693_v31 = vpop.eup %12692  ;;  %11787 = vmatpush3.msra.mxu0 %v18429_v60  ;;  %4455 = vrot.lane.b32.xlu1 %v18431_v61, %s13208_s21 }
 0x3b5   : > { %11767 = vmatprep.mubr.msk.f32.mxu0 %vm391_vm0, %v2028_v63  ;;  %11788 = vmatprep.subr.mxu0 %v18432_v54  ;;  %v12695_v15 = vpop.eup %12694  ;;  %v2034_v10 = vmul.f32 %v12693_v31, %v14341_v42  ;;  %v18437_v42 = vld [vmem:[#allocation66_spill] sm:$0xff] }
 0x3b6   : > { %11807 = vmatmul.mubr.msk.f32.vlgmr.msra.gmra.mxu1 %vm761_vm1, %v18433_v25  ;;  %4457 = vrot.lane.b32.xlu0 %v13413_v58, %s13208_s21  ;;  %v2035_v32 = vmul.f32 %v12695_v15, %v14335_v37  ;;  %v18439_v37 = vld [vmem:[#allocation9_spill] sm:$0xff] }
 0x3b7   : > { %11768 = vmatmul.mubr.msk.f32.gmra.mxu0 %vm391_vm0, %v2029_v26  ;;  %11809 = vmatprep.mubr.msk.f32.mxu1 %vm761_vm1, %v18434_v1 }
 0x3b8   : > { %11789 = vmatpush3.msra.mxu0 %v18432_v54  ;;  %11827 = vmatpush3.xpose.msk.msra.mxu1 %vm761_vm1, %v18430_v57 }
 0x3b9   : > { %11790 = vmatprep.subr.mxu0 %v18435_v51  ;;  %11828 = vmatprep.subr.msk.mxu1 %vm761_vm1, %v18436_v52 }
 0x3ba   : > { %11791 = vmatpush3.msra.mxu0 %v18435_v51  ;;  %4568 = vrot.lane.b32.xlu1 %v18396_v46, %s13208_s21 }
 0x3bb   : > { %11792 = vmatprep.mubr.msk.f32.mxu0 %vm391_vm0, %v2034_v10  ;;  %11810 = vmatmul.mubr.msk.f32.gmra.mxu1 %vm761_vm1, %v18437_v42 }
 0x3bc   : > { %11812 = vmatprep.subr.msk.mxu0 %vm761_vm1, %v18438_v62  ;;  %4344 = vrot.lane.b32.xlu0 %v18439_v37, %s13208_s21 }
 0x3bd   : > { %11793 = vmatmul.mubr.msk.f32.vlgmr.msra.gmra.mxu0 %vm391_vm0, %v2035_v32  ;;  %11829 = vmatpush3.xpose.msk.msra.mxu1 %vm761_vm1, %v18436_v52 }
 0x3be   : > { %11813 = vmatpush3.xpose.msk.msra.mxu0 %vm761_vm1, %v18438_v62  ;;  %11834 = vmatprep.mubr.msk.f32.mxu1 %vm761_vm1, %v18440_v14 }
 0x3bf   : > { %11814 = vmatprep.subr.msk.mxu0 %vm761_vm1, %v18441_v17  ;;  %11830 = vmatprep.subr.msk.mxu1 %vm761_vm1, %v18442_v53 }
 0x3c0   : > { %4677 = vrot.lane.b32.xlu1 %v18400_v47, %s13208_s21  ;;  %4453 = vrot.lane.b32.xlu0 %v18443_v23, %s13208_s21 }
 0x3c1   : > { %11831 = vmatpush3.xpose.msk.msra.mxu1 %vm761_vm1, %v18442_v53  ;;  %v18456_v53 = vld [vmem:[#allocation61_spill] sm:$0xff] }
 0x3c2   : > { %11815 = vmatpush3.xpose.msk.msra.mxu0 %vm761_vm1, %v18441_v17  ;;  %11832 = vmatprep.subr.msk.mxu1 %vm761_vm1, %v18444_v49  ;;  %v18455_v17 = vld [vmem:[#allocation67_spill] sm:$0xff] }
 0x3c3   : > { %11816 = vmatprep.subr.msk.mxu0 %vm761_vm1, %v18445_v55 }
 0x3c4   : > { %4673 = vrot.lane.b32.xlu1 %v13463_v13, %s13208_s21  ;;  %4566 = vrot.lane.b32.xlu0 %v13433_v2, %s13208_s21 }
 0x3c5   : > { %11833 = vmatpush3.xpose.msk.msra.mxu1 %vm761_vm1, %v18444_v49  ;;  %v18457_v49 = vld [vmem:[#allocation74_spill] sm:$0xff] }
 0x3c6   : > { %11817 = vmatpush3.xpose.msk.msra.mxu0 %vm761_vm1, %v18445_v55  ;;  %11854 = vmatprep.subr.msk.mxu1 %vm761_vm1, %v18446_v9 }
 0x3c7   : > { %11818 = vmatprep.subr.msk.mxu0 %vm761_vm1, %v18447_v30 }
 0x3c8   : > { %4786 = vrot.lane.b32.xlu1 %v18407_v28, %s13208_s21  ;;  %11835 = vmatmul.mubr.msk.f32.vlgmr.msra.gmra.mxu1 %vm761_vm1, %v18448_v40 }
 0x3c9   : > { %4675 = vrot.lane.b32.xlu0 %v18397_v0, %s13208_s21  ;;  %11837 = vmatprep.mubr.msk.f32.mxu1 %vm761_vm1, %v3154_v35  ;;  %v18459_v35 = vld [vmem:[#allocation68_spill] sm:$0xff] }
 0x3ca   : > { %11819 = vmatpush3.xpose.msk.msra.mxu0 %vm761_vm1, %v18447_v30  ;;  %11855 = vmatpush3.xpose.msk.msra.mxu1 %vm761_vm1, %v18446_v9  ;;  %v18458_v30 = vld [vmem:[#allocation71_spill] sm:$0xff] }
 0x3cb   : > { %11840 = vmatprep.subr.msk.mxu0 %vm761_vm1, %v18449_v41  ;;  %11856 = vmatprep.subr.msk.mxu1 %vm761_vm1, %v18450_v7 }
 0x3cc   : > { %4895 = vrot.lane.b32.xlu1 %v13490_v24, %s13208_s21 }
 0x3cd   : > { %4564 = vrot.lane.b32.xlu0 %v13438_v4, %s13208_s21 }
 0x3ce   : > { %11857 = vmatpush3.xpose.msk.msra.mxu1 %vm761_vm1, %v18450_v7  ;;  %v18460_v7 = vld [vmem:[#allocation72_spill] sm:$0xff] }
 0x3cf   : > { %11858 = vmatprep.subr.msk.mxu1 %vm761_vm1, %v18451_v21 }
 0x3d0   : > { %4893 = vrot.lane.b32.xlu1 %v13496_v27, %s13208_s21 }
 0x3d1   : > { %4562 = vrot.lane.b32.xlu0 %v18452_v16, %s13208_s21 }
 0x3d2   : > { %11859 = vmatpush3.xpose.msk.msra.mxu1 %vm761_vm1, %v18451_v21 }
 0x3d4   : > { %5004 = vrot.lane.b32.xlu1 %v18394_v38, %s13208_s21 }
 0x3d5   : > { %4671 = vrot.lane.b32.xlu0 %v13443_v6, %s13208_s21 }
 0x3d8   : > { %5002 = vrot.lane.b32.xlu1 %v18405_v5, %s13208_s21 }
 0x3d9   : > { %4784 = vrot.lane.b32.xlu0 %v13476_v19, %s13208_s21 }
 0x3da   : > { %v1973_v48 = vpop.xlane.xlu1 %1972  ;;  %v1970_v11 = vpop.xlane.xlu0 %1969 }
 0x3db   : > { %12696 = vrcp.f32 %v1973_v48 }
 0x3dc   : > { %5124 = vrot.lane.b32.xlu1 %v18415_v12, %s13209_s22  ;;  %12698 = vrcp.f32 %v1970_v11  ;;  %v18461_v11 = vld [vmem:[#allocation73_spill] sm:$0xff] }
 0x3dd   : > { %4782 = vrot.lane.b32.xlu0 %v13473_v18, %s13208_s21 }
 0x3de   : > { %v14662_v63 = vpop.permute.xlu1 %3512  ;;  %v3392_v60 = vpop.permute.xlu0 %3391 }
 0x3df   : > { %11860 = vmatprep.subr.msk.mxu1 %vm761_vm1, %v3392_v60 }
 0x3e0   : > { %5122 = vrot.lane.b32.xlu1 %v18424_v20, %s13209_s22  ;;  %11861 = vmatpush3.xpose.msk.msra.mxu1 %vm761_vm1, %v3392_v60 }
 0x3e1   : > { %4891 = vrot.lane.b32.xlu0 %v18398_v29, %s13208_s21 }
 0x3e2   : > { %v3384_v57 = vpop.permute.xlu1 %3383  ;;  %v3156_v26 = vpop.permute.xlu0 %3155 }
 0x3e3   : > { %11838 = vmatmul.mubr.msk.f32.gmra.mxu1 %vm761_vm1, %v3156_v26 }
 0x3e4   : > { %5120 = vrot.lane.b32.xlu1 %v18418_v43, %s13209_s22  ;;  %11862 = vmatprep.mubr.msk.f32.mxu1 %vm761_vm1, %v3384_v57 }
 0x3e5   : > { %4780 = vrot.lane.b32.xlu0 %v13483_v22, %s13208_s21 }
 0x3e6   : > { %v3632_v31 = vpop.permute.xlu1 %3631  ;;  %v14676_v54 = vpop.permute.xlu0 %3510 }
 0x3e7   : > { %11882 = vmatprep.subr.msk.mxu1 %vm761_vm1, %v3632_v31 }
 0x3e8   : > { %v12697_v15 = vpop.eup %12696  ;;  %5112 = vrot.lane.b32.xlu1 %v18418_v43, %s13210_s12 }
 0x3e9   : > { %v12699_v25 = vpop.eup %12698  ;;  %4889 = vrot.lane.b32.xlu0 %v18399_v8, %s13208_s21  ;;  %v2037_v51 = vmul.f32 %v12697_v15, %v14353_v45  ;;  %v18454_v45 = vld [vmem:[#allocation62_spill] sm:$0xff] }
 0x3ea   : > { %v3271_v1 = vpop.permute.xlu1 %3270  ;;  %v3386_v10 = vpop.permute.xlu0 %3385  ;;  %v2036_v32 = vmul.f32 %v12699_v25, %v14355_v36  ;;  %v18453_v36 = vld [vmem:[#allocation55_spill] sm:$0xff] }
 0x3eb   : > { %11863 = vmatmul.mubr.msk.f32.vlgmr.msra.gmra.mxu1 %vm761_vm1, %v3386_v10 }
 0x3ec   : > { %5360 = vrot.lane.b32.xlu1 %v13408_v56, %s13209_s22  ;;  %11795 = vmatprep.mubr.msk.f32.mxu0 %vm391_vm0, %v2036_v32 }
 0x3ed   : > { %5126 = vrot.lane.b32.xlu0 %v18422_v50, %s13209_s22  ;;  %11883 = vmatpush3.xpose.msk.msra.mxu1 %vm761_vm1, %v3632_v31 }
 0x3ee   : > { %11796 = vmatmul.mubr.msk.f32.gmra.mxu0 %vm391_vm0, %v2037_v51  ;;  %v3630_v52 = vpop.permute.xlu1 %3629  ;;  %v14693_v42 = vpop.permute.xlu0 %3508 }
 0x3ef   : > { %11820 = vmatprep.mubr.msk.f32.mxu0 %vm761_vm1, %v18453_v36  ;;  %11884 = vmatprep.subr.msk.mxu1 %vm761_vm1, %v3630_v52 }
 0x3f0   : > { %5237 = vrot.lane.b32.xlu1 %v18439_v37, %s13209_s22 }
 0x3f1   : > { %5000 = vrot.lane.b32.xlu0 %v18403_v39, %s13208_s21  ;;  %11885 = vmatpush3.xpose.msk.msra.mxu1 %vm761_vm1, %v3630_v52 }
 0x3f2   : > { %11821 = vmatmul.mubr.msk.f32.vlgmr.msra.gmra.mxu0 %vm761_vm1, %v18454_v45  ;;  %v3501_v62 = vpop.permute.xlu1 %3500  ;;  %v3273_v14 = vpop.permute.xlu0 %3272 }
 0x3f3   : > { %11841 = vmatpush3.xpose.msk.msra.mxu0 %vm761_vm1, %v18449_v41  ;;  %11823 = vmatprep.mubr.msk.f32.mxu0 %vm761_vm1, %v18455_v17 }
 0x3f4   : > { %5229 = vrot.lane.b32.xlu1 %v18439_v37, %s13210_s12  ;;  %11842 = vmatprep.subr.msk.mxu0 %vm761_vm1, %v18456_v53 }
 0x3f5   : > { %4998 = vrot.lane.b32.xlu0 %v18409_v3, %s13208_s21 }
 0x3f6   : > { %11824 = vmatmul.mubr.msk.f32.gmra.mxu0 %vm761_vm1, %v18457_v49  ;;  %v3749_v55 = vpop.permute.xlu1 %3748  ;;  %v3628_v9 = vpop.permute.xlu0 %3627 }
 0x3f7   : > { %11843 = vmatpush3.xpose.msk.msra.mxu0 %vm761_vm1, %v18456_v53  ;;  %11848 = vmatprep.mubr.msk.f32.mxu0 %vm761_vm1, %v18458_v30 }
 0x3f8   : > { %5477 = vrot.lane.b32.xlu1 %v18396_v46, %s13209_s22  ;;  %11844 = vmatprep.subr.msk.mxu0 %vm761_vm1, %v18459_v35 }
 0x3f9   : > { %5243 = vrot.lane.b32.xlu0 %v18421_v44, %s13209_s22  ;;  %11886 = vmatprep.subr.msk.mxu1 %vm761_vm1, %v3628_v9 }
 0x3fa   : > { %11887 = vmatpush3.xpose.msk.msra.mxu1 %vm761_vm1, %v3628_v9  ;;  %v3388_v40 = vpop.permute.xlu1 %3387  ;;  %v3503_v41 = vpop.permute.xlu0 %3502 }
 0x3fb   : > { %11845 = vmatpush3.xpose.msk.msra.mxu0 %vm761_vm1, %v18459_v35  ;;  %11865 = vmatprep.mubr.msk.f32.mxu1 %vm761_vm1, %v3388_v40 }
 0x3fc   : > { %5116 = vrot.lane.b32.xlu1 %v18415_v12, %s13210_s12  ;;  %11846 = vmatprep.subr.msk.mxu0 %vm761_vm1, %v18460_v7 }
 0x3fd   : > { %5241 = vrot.lane.b32.xlu0 %v18428_v33, %s13209_s22 }
 0x3fe   : > { %v3626_v21 = vpop.permute.xlu1 %3625  ;;  %v3390_v48 = vpop.permute.xlu0 %3389 }
 0x3ff   : > { %11847 = vmatpush3.xpose.msk.msra.mxu0 %vm761_vm1, %v18460_v7  ;;  %11866 = vmatmul.mubr.msk.f32.gmra.mxu1 %vm761_vm1, %v3390_v48 }
 0x400   : > { %5475 = vrot.lane.b32.xlu1 %v13433_v2, %s13209_s22  ;;  %11868 = vmatprep.subr.msk.mxu0 %vm761_vm1, %v18461_v11 }
 0x401   : > { %5239 = vrot.lane.b32.xlu0 %v18427_v59, %s13209_s22  ;;  %11888 = vmatprep.subr.msk.mxu1 %vm761_vm1, %v3626_v21 }
 0x402   : > { %11849 = vmatmul.mubr.msk.f32.vlgmr.msra.gmra.mxu0 %vm761_vm1, %v14652_v34  ;;  %11889 = vmatpush3.xpose.msk.msra.mxu1 %vm761_vm1, %v3626_v21  ;;  %v3618_v60 = vpop.permute.xlu1 %3617  ;;  %v3747_v57 = vpop.permute.xlu0 %3746 }
 0x403   : > { %11851 = vmatprep.mubr.msk.f32.mxu0 %vm761_vm1, %v3271_v1  ;;  %11869 = vmatpush3.xpose.msk.msra.mxu0 %vm761_vm1, %v18461_v11 }
 0x404   : > { %5346 = vrot.lane.b32.xlu1 %v18443_v23, %s13210_s12  ;;  %11870 = vmatprep.subr.msk.mxu0 %vm761_vm1, %v14662_v63 }
 0x405   : > { %5114 = vrot.lane.b32.xlu0 %v18424_v20, %s13210_s12  ;;  %11890 = vmatprep.mubr.msk.f32.mxu1 %vm761_vm1, %v3618_v60 }
 0x406   : > { %11852 = vmatmul.mubr.msk.f32.gmra.mxu0 %vm761_vm1, %v3273_v14  ;;  %v3745_v34 = vpop.permute.xlu1 %3744  ;;  %v3620_v26 = vpop.permute.xlu0 %3619 }
 0x407   : > { %11871 = vmatpush3.xpose.msk.msra.mxu0 %vm761_vm1, %v14662_v63  ;;  %11876 = vmatprep.mubr.msk.f32.mxu0 %vm761_vm1, %v3501_v62 }
 0x408   : > { %5594 = vrot.lane.b32.xlu1 %v18400_v47, %s13209_s22  ;;  %11872 = vmatprep.subr.msk.mxu0 %vm761_vm1, %v14676_v54 }
 0x409   : > { %5358 = vrot.lane.b32.xlu0 %v13413_v58, %s13209_s22  ;;  %11891 = vmatmul.mubr.msk.f32.vlgmr.msra.gmra.mxu1 %vm761_vm1, %v3620_v26 }
 0x40a   : > { %v3507_v31 = vpop.permute.xlu1 %3506  ;;  %v3505_v15 = vpop.permute.xlu0 %3504 }
 0x40b   : > { %11873 = vmatpush3.xpose.msk.msra.mxu0 %vm761_vm1, %v14676_v54 }
 0x40c   : > { %5233 = vrot.lane.b32.xlu1 %v18428_v33, %s13210_s12  ;;  %11874 = vmatprep.subr.msk.mxu0 %vm761_vm1, %v14693_v42 }
 0x40d   : > { %5356 = vrot.lane.b32.xlu0 %v18431_v61, %s13209_s22 }
 0x40e   : > { %v3735_v63 = vpop.permute.xlu1 %3734  ;;  %v3743_v25 = vpop.permute.xlu0 %3742 }
 0x40f   : > { %11875 = vmatpush3.xpose.msk.msra.mxu0 %vm761_vm1, %v14693_v42 }
 0x410   : > { %5592 = vrot.lane.b32.xlu1 %v18397_v0, %s13209_s22  ;;  %11896 = vmatprep.subr.msk.mxu0 %vm761_vm1, %v3749_v55 }
 0x411   : > { %5231 = vrot.lane.b32.xlu0 %v18427_v59, %s13210_s12 }
 0x412   : > { %11877 = vmatmul.mubr.msk.f32.vlgmr.msra.gmra.mxu0 %vm761_vm1, %v3503_v41  ;;  %v3622_v54 = vpop.permute.xlu1 %3621  ;;  %v3737_v1 = vpop.permute.xlu0 %3736 }
 0x413   : > { %11879 = vmatprep.mubr.msk.f32.mxu0 %vm761_vm1, %v3505_v15  ;;  %11897 = vmatpush3.xpose.msk.msra.mxu0 %vm761_vm1, %v3749_v55 }
 0x414   : > { %5463 = vrot.lane.b32.xlu1 %v18452_v16, %s13210_s12  ;;  %11898 = vmatprep.subr.msk.mxu0 %vm761_vm1, %v3747_v57 }
 0x415   : > { %5354 = vrot.lane.b32.xlu0 %v18443_v23, %s13209_s22  ;;  %11893 = vmatprep.mubr.msk.f32.mxu1 %vm761_vm1, %v3622_v54 }
 0x416   : > { %11880 = vmatmul.mubr.msk.f32.gmra.mxu0 %vm761_vm1, %v3507_v31  ;;  %v3739_v10 = vpop.permute.xlu1 %3738  ;;  %v3624_v32 = vpop.permute.xlu0 %3623 }
 0x417   : > { %11899 = vmatpush3.xpose.msk.msra.mxu0 %vm761_vm1, %v3747_v57  ;;  %11904 = vmatprep.mubr.msk.f32.mxu0 %vm761_vm1, %v3735_v63 }
 0x418   : > { %5711 = vrot.lane.b32.xlu1 %v18407_v28, %s13209_s22  ;;  %11900 = vmatprep.subr.msk.mxu0 %vm761_vm1, %v3745_v34 }
 0x419   : > { %5118 = vrot.lane.b32.xlu0 %v18422_v50, %s13210_s12  ;;  %11894 = vmatmul.mubr.msk.f32.gmra.mxu1 %vm761_vm1, %v3624_v32 }
 0x41a   : > { %v4240_v51 = vpop.permute.xlu1 %4239  ;;  %v3741_v52 = vpop.permute.xlu0 %3740 }
 0x41b   : > { %11901 = vmatpush3.xpose.msk.msra.mxu0 %vm761_vm1, %v3745_v34 }
 0x41c   : > { %11902 = vmatprep.subr.msk.mxu0 %vm761_vm1, %v3743_v25 }
 0x41d   : > { %5473 = vrot.lane.b32.xlu0 %v13438_v4, %s13209_s22 }
 0x41e   : > { %v4236_v42 = vpop.permute.xlu1 %4235  ;;  %v4242_v36 = vpop.permute.xlu0 %4241 }
 0x41f   : > { %11903 = vmatpush3.xpose.msk.msra.mxu0 %vm761_vm1, %v3743_v25  ;;  %11910 = vmatprep.subr.mxu1 %v4242_v36  ;;  %v14861_v54 = vpop.f32.mrf.mxu0 }
 0x420   : > { %11911 = vmatpush3.msra.mxu1 %v4242_v36  ;;  %18476 = vst [vmem:[#allocation44_spill] sm:$0xff] %v14861_v54 }
 0x421   : > { %5348 = vrot.lane.b32.xlu0 %v18431_v61, %s13210_s12  ;;  %11912 = vmatprep.subr.mxu1 %v4240_v51  ;;  %v14870_v32 = vpop.f32.mrf.mxu0 }
 0x422   : > { %11905 = vmatmul.mubr.msk.f32.vlgmr.msra.gmra.mxu0 %vm761_vm1, %v3737_v1  ;;  %v4351_v45 = vpop.permute.xlu1 %4350  ;;  %11913 = vmatpush3.msra.mxu1 %v4240_v51  ;;  %v4238_v62 = vpop.permute.xlu0 %4237  ;;  %18478 = vst [vmem:[#allocation45_spill] sm:$0xff] %v14870_v32 }
 0x423   : > { %11907 = vmatprep.mubr.msk.f32.mxu0 %vm761_vm1, %v3739_v10  ;;  %11914 = vmatprep.subr.mxu1 %v4238_v62  ;;  %v14868_v10 = vld [vmem:[%s18097_s1 + $0x28] sm:$0xff] }
 0x424   : > { %11924 = vmatprep.subr.mxu0 %v4351_v45  ;;  %11915 = vmatpush3.msra.mxu1 %v4238_v62 }
 0x425   : > { %5471 = vrot.lane.b32.xlu0 %v18452_v16, %s13209_s22  ;;  %11925 = vmatpush3.msra.mxu0 %v4351_v45 }
 0x426   : > { %11908 = vmatmul.mubr.msk.f32.gmra.mxu0 %vm761_vm1, %v3741_v52  ;;  %11916 = vmatprep.subr.mxu1 %v4236_v42  ;;  %v14817_v14 = vpop.permute.xlu1 %4459  ;;  %v4349_v17 = vpop.permute.xlu0 %4348  ;;  %v14875_v52 = vld [vmem:[%s18097_s1 + $0x20] sm:$0xff] }
 0x427   : > { %11917 = vmatpush3.msra.mxu1 %v4236_v42  ;;  %11926 = vmatprep.subr.mxu0 %v4349_v17 }
 0x428   : > { %11938 = vmatprep.subr.mxu1 %v14817_v14  ;;  %11927 = vmatpush3.msra.mxu0 %v4349_v17  ;;  %v14880_v45 = vpop.f32.mrf.mxu0  ;;  %v13084_v17 = vld [vmem:[%s18098_s2 + $0x8] sm:$0xff] }
 0x429   : > { %5235 = vrot.lane.b32.xlu0 %v18421_v44, %s13210_s12  ;;  %18480 = vst [vmem:[#allocation47_spill] sm:$0xff] %v14880_v45  ;;  %v13086_v45 = vld [vmem:[%s18098_s2 + $0x18] sm:$0xff] }
 0x42a   : > { %v4347_v53 = vpop.permute.xlu1 %4346  ;;  %v14822_v49 = vpop.permute.xlu0 %4457 }
 0x42b   : > { %11928 = vmatprep.subr.mxu0 %v4347_v53 }
 0x42c   : > { %11929 = vmatpush3.msra.mxu0 %v4347_v53 }
 0x42d   : > { %5590 = vrot.lane.b32.xlu0 %v13463_v13, %s13209_s22 }
 0x42e   : > { %v14826_v55 = vpop.permute.xlu1 %4455  ;;  %v4345_v9 = vpop.permute.xlu0 %4344 }
 0x42f   : > { %11930 = vmatprep.subr.mxu0 %v4345_v9 }
 0x430   : > { %11931 = vmatpush3.msra.mxu0 %v4345_v9 }
 0x432   : > { %v14828_v30 = vpop.permute.xlu1 %4568  ;;  %v14841_v48 = vpop.permute.xlu0 %4453 }
 0x433   : > { %18462 = vst [vmem:[#allocation32_spill] sm:$0xff] %v14828_v30  ;;  %11952 = vmatprep.subr.mxu0 %v14828_v30 }
 0x436   : > { %v14847_v57 = vpop.permute.xlu0 %4566 }
 0x437   : > { %18470 = vst [vmem:[#allocation36_spill] sm:$0xff] %v14847_v57  ;;  %v13105_v57 = vld [vmem:[%s18098_s2 + $0x70] sm:$0xff] }
 0x43b   : > { %v14853_v31 = vpop.permute.xlu0 %4675 }
 0x43f   : > { %v14859_v25 = vpop.permute.xlu0 %4564 }
 0x440   : > { %18475 = vst [vmem:[#allocation40_spill] sm:$0xff] %v14859_v25 }
 0x443   : > { %v14877_v42 = vpop.permute.xlu0 %4562 }
 0x444   : > { %18479 = vst [vmem:[#allocation49_spill] sm:$0xff] %v14877_v42 }
 0x447   : > { %v14831_v35 = vpop.f32.mrf.mxu1 }
 0x448   : > { %18463 = vst [vmem:[#allocation37_spill] sm:$0xff] %v14831_v35 }
 0x449   : > { %v14833_v40 = vpop.f32.mrf.mxu1 }
 0x44a   : > { %18464 = vst [vmem:[#allocation29_spill] sm:$0xff] %v14833_v40  ;;  %v14908_v40 = vpop.permute.xlu0 %4671 }
 0x459   : > { %v14835_v41 = vpop.f32.mrf.mxu1 }
 0x45a   : > { %18465 = vst [vmem:[#allocation30_spill] sm:$0xff] %v14835_v41  ;;  %v14891_v41 = vld [vmem:[%s18097_s1 + $0x38] sm:$0xff] }
 0x45b   : > { %v14837_v7 = vpop.f32.mrf.mxu1 }
 0x45c   : > { %18466 = vst [vmem:[#allocation31_spill] sm:$0xff] %v14837_v7 }
 0x45d   : > { %v14839_v21 = vpop.f32.mrf.mxu1 }
 0x45e   : > { %18467 = vst [vmem:[#allocation35_spill] sm:$0xff] %v14839_v21 }
 0x45f   : > { %v14843_v11 = vpop.f32.mrf.mxu1 }
 0x460   : > { %18468 = vst [vmem:[#allocation39_spill] sm:$0xff] %v14843_v11 }
 0x461   : > { %v14845_v60 = vpop.f32.mrf.mxu1 }
 0x462   : > { %18469 = vst [vmem:[#allocation33_spill] sm:$0xff] %v14845_v60 }
 0x463   : > { %v14849_v34 = vpop.f32.mrf.mxu1 }
 0x464   : > { %18471 = vst [vmem:[#allocation38_spill] sm:$0xff] %v14849_v34 }
 0x465   : > { %v14851_v26 = vpop.f32.mrf.mxu1 }
 0x466   : > { %18472 = vst [vmem:[#allocation42_spill] sm:$0xff] %v14851_v26 }
 0x467   : > { %v14855_v15 = vpop.f32.mrf.mxu1 }
 0x468   : > { %18473 = vst [vmem:[#allocation34_spill] sm:$0xff] %v14855_v15 }
 0x46d   : > { %v14857_v63 = vpop.f32.mrf.mxu1 }
 0x46e   : > { %18474 = vst [vmem:[#allocation41_spill] sm:$0xff] %v14857_v63 }
 0x46f   : > { %v14863_v1 = vpop.f32.mrf.mxu1 }
 0x470   : > { %18477 = vst [vmem:[#allocation43_spill] sm:$0xff] %v14863_v1 }
 0x476   : > { %v11808_v51 = vpop.f32.mrf.mxu1 }
 0x477   : > { %v3019_v36 = vadd.f32 %v11808_v51, %v14868_v10  ;;  %v14896_v51 = vld [vmem:[%s18097_s1 + $0x30] sm:$0xff] }
 0x478   : > { %v3013_v62 = vpop.f32.mrf.mxu1 }
 0x479   : > { %v14885_v53 = vadd.f32 %v13084_v17, %v3019_v36  ;;  %v3014_v9 = vadd.f32 %v14875_v52, %v3013_v62  ;;  %v13085_v36 = vld [vmem:[%s18098_s2] sm:$0xff]  ;;  %v14905_v62 = vpop.f32.mrf.mxu0 }
 0x47a   : > { %18481 = vst [vmem:[#allocation75_spill] sm:$0xff] %v14905_v62 }
 0x47b   : > { %v11811_v7 = vpop.f32.mrf.mxu1  ;;  %v3886_v35 = vsel %vm391_vm0, %v14885_v53, -inf  ;;  %v14903_v17 = vadd.f32 %v13085_v36, %v3014_v9  ;;  %v14912_v15 = vpop.f32.mrf.mxu0 }
 0x47c   : > { %v3029_v63 = vadd.f32 %v11811_v7, %v14891_v41  ;;  %3887 = vmax.xlane.f32.xlu0 %v3886_v35  ;;  %18482 = vst [vmem:[#allocation51_spill] sm:$0xff] %v14912_v15  ;;  %v14920_v36 = vpop.permute.xlu1 %4677  ;;  %v13087_v35 = vld [vmem:[%s18098_s2 + $0x10] sm:$0xff] }
 0x47d   : > { %v3023_v1 = vpop.f32.mrf.mxu1  ;;  %v3883_v26 = vsel %vm391_vm0, %v14903_v17, -inf  ;;  %v14929_v62 = vpop.f32.mrf.mxu0 }
 0x47e   : > { %v14917_v54 = vadd.f32 %v13086_v45, %v3029_v63  ;;  %v3024_v9 = vadd.f32 %v14896_v51, %v3023_v1  ;;  %3884 = vmax.xlane.f32.xlu1 %v3883_v26  ;;  %18483 = vst [vmem:[#allocation46_spill] sm:$0xff] %v14929_v62  ;;  %v14933_v45 = vpop.permute.xlu0 %4784 }
 0x47f   : > { %18484 = vst [vmem:[#allocation56_spill] sm:$0xff] %v14933_v45  ;;  %v14935_v26 = vpop.f32.mrf.mxu0 }
 0x480   : > { %v14925_v7 = vadd.f32 %v13087_v35, %v3024_v9  ;;  %v3892_v15 = vsel %vm391_vm0, %v14917_v54, -inf  ;;  %18485 = vst [vmem:[#allocation59_spill] sm:$0xff] %v14935_v26  ;;  %v14937_v1 = vpop.permute.xlu1 %4673 }
 0x481   : > { %v14939_v60 = vpop.f32.mrf.mxu0 }
 0x482   : > { %3893 = vmax.xlane.f32.xlu1 %v3892_v15  ;;  %v3889_v63 = vsel %vm391_vm0, %v14925_v7, -inf  ;;  %18486 = vst [vmem:[#allocation48_spill] sm:$0xff] %v14939_v60  ;;  %v14941_v35 = vpop.permute.xlu0 %4782  ;;  %v13089_v60 = vld [vmem:[%s18098_s2 + $0x40] sm:$0xff] }
 0x483   : > { %3890 = vmax.xlane.f32.xlu0 %v3889_v63  ;;  %18487 = vst [vmem:[#allocation58_spill] sm:$0xff] %v14941_v35  ;;  %v14944_v34 = vpop.f32.mrf.mxu0  ;;  %v13088_v63 = vld [vmem:[%s18098_s2 + $0x48] sm:$0xff] }
 0x484   : > { %18488 = vst [vmem:[#allocation66_spill] sm:$0xff] %v14944_v34  ;;  %v14946_v62 = vpop.permute.xlu1 %4786 }
 0x485   : > { %18489 = vst [vmem:[#allocation50_spill] sm:$0xff] %v14946_v62  ;;  %v14961_v34 = vpop.f32.mrf.mxu0 }
 0x486   : > { %18490 = vst [vmem:[#allocation63_spill] sm:$0xff] %v14961_v34  ;;  %v14963_v16 = vpop.permute.xlu0 %4891 }
 0x487   : > { %18491 = vst [vmem:[#allocation52_spill] sm:$0xff] %v14963_v16  ;;  %v14965_v23 = vpop.f32.mrf.mxu0 }
 0x488   : > { %v11836_v9 = vpop.f32.mrf.mxu1  ;;  %18492 = vst [vmem:[#allocation60_spill] sm:$0xff] %v14965_v23 }
 0x489   : > { %v3253_v32 = vadd.f32 %v11836_v9, %v14868_v10 }
 0x48a   : > { %v3247_v15 = vpop.f32.mrf.mxu1 }
 0x48b   : > { %v14951_v11 = vadd.f32 %v13088_v63, %v3253_v32  ;;  %v3248_v26 = vadd.f32 %v14875_v52, %v3247_v15  ;;  %v14967_v32 = vpop.permute.xlu1 %4895  ;;  %v14971_v63 = vpop.f32.mrf.mxu0 }
 0x48c   : > { %18493 = vst [vmem:[#allocation64_spill] sm:$0xff] %v14971_v63 }
 0x48d   : > { %v14957_v21 = vadd.f32 %v13089_v60, %v3248_v26  ;;  %v3910_v9 = vsel %vm391_vm0, %v14951_v11, -inf  ;;  %v14973_v60 = vpop.permute.xlu0 %4780  ;;  %v14977_v37 = vpop.f32.mrf.mxu0 }
 0x48e   : > { %3911 = vmax.xlane.f32.xlu1 %v3910_v9  ;;  %18494 = vst [vmem:[#allocation54_spill] sm:$0xff] %v14973_v60  ;;  %18496 = vst [vmem:[#allocation53_spill] sm:$0xff] %v14977_v37  ;;  %v13090_v37 = vld [vmem:[%s18098_s2 + $0x58] sm:$0xff] }
 0x48f   : > { %v3907_v15 = vsel %vm391_vm0, %v14957_v21, -inf  ;;  %v14975_v26 = vpop.permute.xlu1 %4893  ;;  %v14981_v9 = vpop.f32.mrf.mxu0 }
 0x490   : > { %18495 = vst [vmem:[#allocation65_spill] sm:$0xff] %v14975_v26  ;;  %18498 = vst [vmem:[#allocation57_spill] sm:$0xff] %v14981_v9 }
 0x491   : > { %v14979_v34 = vpop.permute.xlu0 %4889  ;;  %v14985_v23 = vpop.f32.mrf.mxu0 }
 0x492   : > { %3908 = vmax.xlane.f32.xlu1 %v3907_v15  ;;  %18497 = vst [vmem:[#allocation70_spill] sm:$0xff] %v14979_v34  ;;  %18500 = vst [vmem:[#allocation76_spill] sm:$0xff] %v14985_v23 }
 0x493   : > { %v14983_v33 = vpop.permute.xlu1 %5004  ;;  %v14991_v63 = vpop.f32.mrf.mxu0 }
 0x494   : > { %18499 = vst [vmem:[#allocation69_spill] sm:$0xff] %v14983_v33  ;;  %18503 = vst [vmem:[#allocation67_spill] sm:$0xff] %v14991_v63 }
 0x495   : > { %v14987_v61 = vpop.permute.xlu0 %5126  ;;  %v15002_v23 = vpop.f32.mrf.mxu0 }
 0x496   : > { %18501 = vst [vmem:[#allocation55_spill] sm:$0xff] %v14987_v61  ;;  %18505 = vst [vmem:[#allocation74_spill] sm:$0xff] %v15002_v23 }
 0x497   : > { %v14989_v20 = vpop.permute.xlu1 %5002 }
 0x498   : > { %18502 = vst [vmem:[#allocation62_spill] sm:$0xff] %v14989_v20  ;;  %v13091_v20 = vld [vmem:[%s18098_s2 + $0x50] sm:$0xff] }
 0x499   : > { %v15000_v43 = vpop.permute.xlu0 %5000 }
 0x49a   : > { %18504 = vst [vmem:[#allocation61_spill] sm:$0xff] %v15000_v43 }
 0x49b   : > { %v15011_v12 = vpop.permute.xlu1 %5124 }
 0x49c   : > { %18506 = vst [vmem:[#allocation71_spill] sm:$0xff] %v15011_v12 }
 0x49d   : > { %v15018_v43 = vpop.permute.xlu0 %4998 }
 0x49e   : > { %18508 = vst [vmem:[#allocation72_spill] sm:$0xff] %v15018_v43 }
 0x4a3   : > { %v11839_v15 = vpop.f32.mrf.mxu1 }
 0x4a4   : > { %v3263_v59 = vadd.f32 %v11839_v15, %v14891_v41 }
 0x4a5   : > { %v3257_v50 = vpop.f32.mrf.mxu1 }
 0x4a6   : > { %v14997_v44 = vadd.f32 %v13090_v37, %v3263_v59  ;;  %v3258_v9 = vadd.f32 %v14896_v51, %v3257_v50  ;;  %v15013_v37 = vpop.f32.mrf.mxu0 }
 0x4a7   : > { %18507 = vst [vmem:[#allocation68_spill] sm:$0xff] %v15013_v37  ;;  %v15028_v37 = vpop.permute.xlu1 %5122 }
 0x4a8   : > { %v15007_v63 = vadd.f32 %v13091_v20, %v3258_v9  ;;  %v3916_v15 = vsel %vm391_vm0, %v14997_v44, -inf  ;;  %v13092_v20 = vld [vmem:[%s18098_s2 + $0x88] sm:$0xff]  ;;  %18510 = vst [vmem:[#allocation77_spill] sm:$0xff] %v15028_v37 }
 0x4a9   : > { %3917 = vmax.xlane.f32.xlu1 %v3916_v15 }
 0x4aa   : > { %v3913_v23 = vsel %vm391_vm0, %v15007_v63, -inf }
 0x4ab   : > { %v11864_v59 = vpop.f32.mrf.mxu1  ;;  %v15044_v35 = vpop.permute.xlu1 %5120 }
 0x4ac   : > { %v3487_v50 = vadd.f32 %v11864_v59, %v14868_v10  ;;  %v13093_v59 = vld [vmem:[%s18098_s2 + $0x80] sm:$0xff]  ;;  %18513 = vst [vmem:[#allocation80_spill] sm:$0xff] %v15044_v35 }
 0x4ad   : > { %3914 = vmax.xlane.f32.xlu1 %v3913_v23  ;;  %v3481_v33 = vpop.f32.mrf.mxu1 }
 0x4ae   : > { %v15023_v9 = vadd.f32 %v13092_v20, %v3487_v50  ;;  %v15025_v12 = vpop.f32.mrf.mxu0  ;;  %v3482_v15 = vadd.f32 %v14875_v52, %v3481_v33  ;;  %v15039_v20 = vpop.permute.xlu0 %5243 }
 0x4af   : > { %18509 = vst [vmem:[#allocation73_spill] sm:$0xff] %v15025_v12  ;;  %18512 = vst [vmem:[#allocation79_spill] sm:$0xff] %v15039_v20 }
 0x4b0   : > { %v15033_v60 = vadd.f32 %v13093_v59, %v3482_v15  ;;  %v15035_v23 = vpop.f32.mrf.mxu0  ;;  %v3934_v43 = vsel %vm391_vm0, %v15023_v9, -inf  ;;  %v13094_v15 = vld [vmem:[%s18098_s2 + $0x28] sm:$0xff] }
 0x4b1   : > { %18511 = vst [vmem:[#allocation78_spill] sm:$0xff] %v15035_v23  ;;  %3935 = vmax.xlane.f32.xlu1 %v3934_v43 }
 0x4b2   : > { %v11822_v50 = vpop.f32.mrf.mxu0  ;;  %v3931_v37 = vsel %vm391_vm0, %v15033_v60, -inf  ;;  %v15060_v5 = vpop.permute.xlu0 %5241 }
 0x4b3   : > { %v3136_v12 = vadd.f32 %v11822_v50, %v14868_v10  ;;  %v13095_v50 = vld [vmem:[%s18098_s2 + $0x20] sm:$0xff]  ;;  %18514 = vst [vmem:[#allocation81_spill] sm:$0xff] %v15060_v5 }
 0x4b4   : > { %v3130_v33 = vpop.f32.mrf.mxu0 }
 0x4b5   : > { %v15049_v59 = vadd.f32 %v13094_v15, %v3136_v12  ;;  %v3131_v23 = vadd.f32 %v14875_v52, %v3130_v33  ;;  %3932 = vmax.xlane.f32.xlu1 %v3931_v37  ;;  %v15062_v12 = vpop.permute.xlu1 %5112  ;;  %v13096_v37 = vld [vmem:[%s18098_s2 + $0x38] sm:$0xff] }
 0x4b6   : > { %v11825_v43 = vpop.f32.mrf.mxu0  ;;  %18515 = vst [vmem:[#allocation82_spill] sm:$0xff] %v15062_v12 }
 0x4b7   : > { %v15055_v20 = vadd.f32 %v13095_v50, %v3131_v23  ;;  %v3146_v45 = vadd.f32 %v11825_v43, %v14891_v41  ;;  %v3898_v35 = vsel %vm391_vm0, %v15049_v59, -inf  ;;  %v15072_v43 = vpop.permute.xlu0 %5239 }
 0x4b8   : > { %v3140_v3 = vpop.f32.mrf.mxu0  ;;  %3899 = vmax.xlane.f32.xlu0 %v3898_v35  ;;  %18516 = vst [vmem:[#allocation83_spill] sm:$0xff] %v15072_v43  ;;  %v13097_v35 = vld [vmem:[%s18098_s2 + $0x30] sm:$0xff] }
 0x4b9   : > { %v15067_v33 = vadd.f32 %v13096_v37, %v3146_v45  ;;  %v3141_v23 = vadd.f32 %v14896_v51, %v3140_v3  ;;  %v3895_v15 = vsel %vm391_vm0, %v15055_v20, -inf  ;;  %v15082_v3 = vpop.permute.xlu1 %5360 }
 0x4ba   : > { %18517 = vst [vmem:[#allocation84_spill] sm:$0xff] %v15082_v3 }
 0x4bb   : > { %v15077_v50 = vadd.f32 %v13097_v35, %v3141_v23  ;;  %v3904_v5 = vsel %vm391_vm0, %v15067_v33, -inf }
 0x4bc   : > { %3896 = vmax.xlane.f32.xlu0 %v3895_v15  ;;  %v13098_v15 = vld [vmem:[%s18098_s2 + $0x98] sm:$0xff] }
 0x4bd   : > { %v3901_v62 = vsel %vm391_vm0, %v15077_v50, -inf  ;;  %v15108_v39 = vpop.permute.xlu1 %5237 }
 0x4be   : > { %18519 = vst [vmem:[#allocation86_spill] sm:$0xff] %v15108_v39 }
 0x4bf   : > { %v11867_v12 = vpop.f32.mrf.mxu1 }
 0x4c0   : > { %3905 = vmax.xlane.f32.xlu0 %v3904_v5  ;;  %v3497_v45 = vadd.f32 %v11867_v12, %v14891_v41  ;;  %v13099_v12 = vld [vmem:[%s18098_s2 + $0x90] sm:$0xff] }
 0x4c1   : > { %v3491_v37 = vpop.f32.mrf.mxu1 }
 0x4c2   : > { %v11850_v28 = vpop.f32.mrf.mxu0  ;;  %v15087_v43 = vadd.f32 %v13098_v15, %v3497_v45  ;;  %v3492_v23 = vadd.f32 %v14896_v51, %v3491_v37  ;;  %v15100_v45 = vpop.permute.xlu0 %5114 }
 0x4c3   : > { %v3370_v35 = vadd.f32 %v11850_v28, %v14868_v10  ;;  %18518 = vst [vmem:[#allocation85_spill] sm:$0xff] %v15100_v45  ;;  %v13100_v28 = vld [vmem:[%s18098_s2 + $0x68] sm:$0xff] }
 0x4c4   : > { %v3364_v5 = vpop.f32.mrf.mxu0  ;;  %v15096_v3 = vadd.f32 %v13099_v12, %v3492_v23  ;;  %3902 = vmax.xlane.f32.xlu0 %v3901_v62  ;;  %v3940_v42 = vsel %vm391_vm0, %v15087_v43, -inf  ;;  %v13101_v62 = vld [vmem:[%s18098_s2 + $0x60] sm:$0xff] }
 0x4c5   : > { %v15105_v37 = vadd.f32 %v13100_v28, %v3370_v35  ;;  %v3365_v15 = vadd.f32 %v14875_v52, %v3364_v5  ;;  %3941 = vmax.xlane.f32.xlu1 %v3940_v42 }
 0x4c6   : > { %v11853_v47 = vpop.f32.mrf.mxu0  ;;  %v3937_v35 = vsel %vm391_vm0, %v15096_v3, -inf  ;;  %v15121_v28 = vpop.permute.xlu0 %5358 }
 0x4c7   : > { %v15113_v23 = vadd.f32 %v13101_v62, %v3365_v15  ;;  %v3380_v12 = vadd.f32 %v11853_v47, %v14891_v41  ;;  %v3922_v45 = vsel %vm391_vm0, %v15105_v37, -inf  ;;  %18520 = vst [vmem:[#allocation87_spill] sm:$0xff] %v15121_v28  ;;  %v13102_v15 = vld [vmem:[%s18098_s2 + $0x78] sm:$0xff]  ;;  %v15137_v28 = vpop.permute.xlu1 %5229 }
 0x4c8   : > { %v3374_v25 = vpop.f32.mrf.mxu0  ;;  %3923 = vmax.xlane.f32.xlu0 %v3922_v45  ;;  %18521 = vst [vmem:[#allocation88_spill] sm:$0xff] %v15137_v28 }
 0x4c9   : > { %v11892_v42 = vpop.f32.mrf.mxu1  ;;  %3938 = vmax.xlane.f32.xlu1 %v3937_v35  ;;  %v15126_v62 = vadd.f32 %v13102_v15, %v3380_v12  ;;  %v3375_v47 = vadd.f32 %v14896_v51, %v3374_v25  ;;  %v3919_v45 = vsel %vm391_vm0, %v15113_v23, -inf  ;;  %v13103_v35 = vld [vmem:[%s18098_s2 + $0xc8] sm:$0xff]  ;;  %v13104_v12 = vld [vmem:[%s18098_s2 + $0xc0] sm:$0xff] }
 0x4ca   : > { %v3721_v5 = vadd.f32 %v11892_v42, %v14868_v10 }
 0x4cb   : > { %v3715_v39 = vpop.f32.mrf.mxu1 }
 0x4cc   : > { %v15134_v61 = vadd.f32 %v13103_v35, %v3721_v5  ;;  %v3716_v42 = vadd.f32 %v14875_v52, %v3715_v39  ;;  %3920 = vmax.xlane.f32.xlu0 %v3919_v45  ;;  %v15149_v5 = vadd.f32 %v13105_v57, %v3375_v47  ;;  %v3928_v39 = vsel %vm391_vm0, %v15126_v62, -inf  ;;  %v15153_v45 = vpop.permute.xlu0 %5356 }
 0x4cd   : > { %18522 = vst [vmem:[#allocation89_spill] sm:$0xff] %v15153_v45 }
 0x4ce   : > { %v15142_v25 = vadd.f32 %v13104_v12, %v3716_v42  ;;  %v3958_v15 = vsel %vm391_vm0, %v15134_v61, -inf  ;;  %v15157_v12 = vpop.permute.xlu1 %5477  ;;  %v3925_v28 = vsel %vm391_vm0, %v15149_v5, -inf }
 0x4cf   : > { %3959 = vmax.xlane.f32.xlu1 %v3958_v15  ;;  %18523 = vst [vmem:[#allocation90_spill] sm:$0xff] %v15157_v12 }
 0x4d0   : > { %3929 = vmax.xlane.f32.xlu0 %v3928_v39  ;;  %v3955_v42 = vsel %vm391_vm0, %v15142_v25, -inf  ;;  %v15161_v57 = vpop.permute.xlu0 %5231 }
 0x4d1   : > { %18524 = vst [vmem:[#allocation91_spill] sm:$0xff] %v15161_v57 }
 0x4d2   : > { %v11878_v35 = vpop.f32.mrf.mxu0  ;;  %v15163_v15 = vpop.permute.xlu1 %5116 }
 0x4d3   : > { %3956 = vmax.xlane.f32.xlu1 %v3955_v42  ;;  %18525 = vst [vmem:[#allocation92_spill] sm:$0xff] %v15163_v15  ;;  %v3604_v29 = vadd.f32 %v11878_v35, %v14868_v10  ;;  %v13106_v42 = vld [vmem:[%s18098_s2 + $0xd8] sm:$0xff]  ;;  %v13108_v35 = vld [vmem:[%s18098_s2 + $0xd0] sm:$0xff] }
 0x4d4   : > { %v3598_v30 = vpop.f32.mrf.mxu0  ;;  %3926 = vmax.xlane.f32.xlu0 %v3925_v28  ;;  %v15174_v57 = vpop.permute.xlu0 %5354  ;;  %v13107_v15 = vld [vmem:[%s18098_s2 + $0xb8] sm:$0xff] }
 0x4d5   : > { %18526 = vst [vmem:[#allocation93_spill] sm:$0xff] %v15174_v57 }
 0x4d6   : > { %v11881_v47 = vpop.f32.mrf.mxu0 }
 0x4d7   : > { %v3614_v45 = vadd.f32 %v11881_v47, %v14891_v41 }
 0x4d8   : > { %v15200_v26 = vpop.permute.xlu0 %5118 }
 0x4d9   : > { %v11895_v39 = vpop.f32.mrf.mxu1  ;;  %v15179_v47 = vadd.f32 %v13107_v15, %v3614_v45  ;;  %v3599_v45 = vadd.f32 %v14875_v52, %v3598_v30  ;;  %v3608_v15 = vpop.f32.mrf.mxu0  ;;  %18528 = vst [vmem:[#allocation95_spill] sm:$0xff] %v15200_v26  ;;  %v13111_v26 = vld [vmem:[%s18098_s2 + $0xe8] sm:$0xff] }
 0x4da   : > { %v3731_v34 = vadd.f32 %v11895_v39, %v14891_v41  ;;  %v3609_v30 = vadd.f32 %v14896_v51, %v3608_v15  ;;  %v13112_v15 = vld [vmem:[%s18098_s2 + $0xb0] sm:$0xff] }
 0x4db   : > { %v3725_v16 = vpop.f32.mrf.mxu1 }
 0x4dc   : > { %v15171_v12 = vadd.f32 %v13106_v42, %v3731_v34  ;;  %v3726_v28 = vadd.f32 %v14896_v51, %v3725_v16  ;;  %v15188_v42 = vpop.permute.xlu1 %5475  ;;  %v13109_v16 = vld [vmem:[%s18098_s2 + $0xa8] sm:$0xff] }
 0x4dd   : > { %18527 = vst [vmem:[#allocation94_spill] sm:$0xff] %v15188_v42  ;;  %v15193_v57 = vadd.f32 %v13109_v16, %v3604_v29  ;;  %v13110_v29 = vld [vmem:[%s18098_s2 + $0xa0] sm:$0xff] }
 0x4de   : > { %v15184_v39 = vadd.f32 %v13108_v35, %v3726_v28  ;;  %v3964_v34 = vsel %vm391_vm0, %v15171_v12, -inf  ;;  %v3952_v35 = vsel %vm391_vm0, %v15179_v47, -inf  ;;  %v15206_v16 = vadd.f32 %v13110_v29, %v3599_v45 }
 0x4df   : > { %3965 = vmax.xlane.f32.xlu1 %v3964_v34  ;;  %v15224_v29 = vadd.f32 %v13112_v15, %v3609_v30 }
 0x4e0   : > { %v3961_v8 = vsel %vm391_vm0, %v15184_v39, -inf  ;;  %v15211_v46 = vpop.permute.xlu1 %5346 }
 0x4e1   : > { %3962 = vmax.xlane.f32.xlu0 %v3961_v8  ;;  %v3946_v8 = vsel %vm391_vm0, %v15193_v57, -inf  ;;  %18529 = vst [vmem:[#allocation96_spill] sm:$0xff] %v15211_v46 }
 0x4e2   : > { %v11906_v28 = vpop.f32.mrf.mxu0 }
 0x4e3   : > { %v3838_v34 = vadd.f32 %v11906_v28, %v14868_v10  ;;  %3953 = vmax.xlane.f32.xlu1 %v3952_v35 }
 0x4e4   : > { %v3832_v42 = vpop.f32.mrf.mxu0  ;;  %v15236_v0 = vpop.permute.xlu1 %5594 }
 0x4e5   : > { %v15216_v10 = vadd.f32 %v13111_v26, %v3838_v34  ;;  %3947 = vmax.xlane.f32.xlu0 %v3946_v8  ;;  %v3833_v46 = vadd.f32 %v14875_v52, %v3832_v42  ;;  %v3943_v26 = vsel %vm391_vm0, %v15206_v16, -inf  ;;  %v15229_v34 = vpop.permute.xlu0 %5473  ;;  %18531 = vst [vmem:[#allocation98_spill] sm:$0xff] %v15236_v0  ;;  %v13114_v52 = vld [vmem:[%s18098_s2 + $0xe0] sm:$0xff] }
 0x4e6   : > { %v11909_v28 = vpop.f32.mrf.mxu0  ;;  %18530 = vst [vmem:[#allocation97_spill] sm:$0xff] %v15229_v34 }
 0x4e7   : > { %v3848_v35 = vadd.f32 %v11909_v28, %v14891_v41  ;;  %v3970_v45 = vsel %vm391_vm0, %v15216_v10, -inf  ;;  %v13113_v41 = vld [vmem:[%s18098_s2 + $0xf8] sm:$0xff]  ;;  %v15243_v42 = vadd.f32 %v13114_v52, %v3833_v46 }
 0x4e8   : > { %3971 = vmax.xlane.f32.xlu1 %v3970_v45  ;;  %v3842_v28 = vpop.f32.mrf.mxu0  ;;  %v15257_v46 = vpop.permute.xlu1 %5233 }
 0x4e9   : > { %v15234_v8 = vadd.f32 %v13113_v41, %v3848_v35  ;;  %3944 = vmax.xlane.f32.xlu0 %v3943_v26  ;;  %v3843_v45 = vadd.f32 %v14896_v51, %v3842_v28  ;;  %v3949_v35 = vsel %vm391_vm0, %v15224_v29, -inf  ;;  %v15248_v15 = vpop.permute.xlu0 %5348  ;;  %v13115_v26 = vld [vmem:[%s18098_s2 + $0xf0] sm:$0xff]  ;;  %v3967_v34 = vsel %vm391_vm0, %v15243_v42, -inf  ;;  %18533 = vst [vmem:[#allocation100_spill] sm:$0xff] %v15257_v46 }
 0x4ea   : > { %18532 = vst [vmem:[#allocation99_spill] sm:$0xff] %v15248_v15 }
 0x4eb   : > { %v3976_v30 = vsel %vm391_vm0, %v15234_v8, -inf  ;;  %v15253_v41 = vadd.f32 %v13115_v26, %v3843_v45 }
 0x4ec   : > { %3977 = vmax.xlane.f32.xlu1 %v3976_v30  ;;  %v15263_v30 = vpop.permute.xlu1 %5592 }
 0x4ed   : > { %3950 = vmax.xlane.f32.xlu0 %v3949_v35  ;;  %v3973_v51 = vsel %vm391_vm0, %v15253_v41, -inf  ;;  %v15261_v28 = vpop.permute.xlu0 %5471  ;;  %18535 = vst [vmem:[#allocation102_spill] sm:$0xff] %v15263_v30 }
 0x4ee   : > { %18534 = vst [vmem:[#allocation101_spill] sm:$0xff] %v15261_v28 }
 0x4f0   : > { %v15267_v35 = vpop.permute.xlu1 %5463 }
 0x4f1   : > { %3968 = vmax.xlane.f32.xlu0 %v3967_v34  ;;  %v15265_v52 = vpop.permute.xlu0 %5235  ;;  %18537 = vst [vmem:[#allocation104_spill] sm:$0xff] %v15267_v35 }
 0x4f2   : > { %18536 = vst [vmem:[#allocation103_spill] sm:$0xff] %v15265_v52 }
 0x4f4   : > { %v15271_v26 = vpop.permute.xlu1 %5711 }
 0x4f5   : > { %3974 = vmax.xlane.f32.xlu0 %v3973_v51  ;;  %v15269_v45 = vpop.permute.xlu0 %5590  ;;  %18539 = vst [vmem:[#allocation106_spill] sm:$0xff] %v15271_v26 }
 0x4f6   : > { %18538 = vst [vmem:[#allocation105_spill] sm:$0xff] %v15269_v45 }
 0x505   : > { %v3888_v15 = vpop.xlane.xlu0 %3887 }
 0x506   : > { %v3980_v46 = vsub.f32 %v14885_v53, %v3888_v15 }
 0x507   : > { %v3885_v34 = vpop.xlane.xlu1 %3884 }
 0x508   : > { %v4013_v0 = vmul.f32 1.442695, %v3980_v46  ;;  %v3979_v38 = vsub.f32 %v14903_v17, %v3885_v34 }
 0x50a   : > { %12700 = vpow2.f32 %v4013_v0  ;;  %v4011_v28 = vmul.f32 1.442695, %v3979_v38 }
 0x50b   : > { %v3894_v51 = vpop.xlane.xlu1 %3893 }
 0x50c   : > { %12702 = vpow2.f32 %v4011_v28  ;;  %v3982_v30 = vsub.f32 %v14917_v54, %v3894_v51  ;;  %v3891_v52 = vpop.xlane.xlu0 %3890 }
 0x50d   : > { %v3981_v35 = vsub.f32 %v14925_v7, %v3891_v52 }
 0x50e   : > { %v4017_v13 = vmul.f32 1.442695, %v3982_v30 }
 0x50f   : > { %v4015_v45 = vmul.f32 1.442695, %v3981_v35 }
 0x510   : > { %12704 = vpow2.f32 %v4017_v13 }
 0x511   : > { %12706 = vpow2.f32 %v4015_v45 }
 0x517   : > { %v15277_v26 = vpop.eup %12700  ;;  %v3912_v53 = vpop.xlane.xlu1 %3911 }
 0x518   : > { %v3988_v15 = vsub.f32 %v14951_v11, %v3912_v53  ;;  %v4078_v0 = vsel %vm391_vm0, %v15277_v26, 0.0 }
 0x519   : > { %v15282_v38 = vpop.eup %12702  ;;  %4079 = vadd.xlane.f32.xlu1 %v4078_v0 }
 0x51a   : > { %v4029_v17 = vmul.f32 1.442695, %v3988_v15  ;;  %v4075_v54 = vsel %vm391_vm0, %v15282_v38, 0.0 }
 0x51b   : > { %v3909_v7 = vpop.xlane.xlu1 %3908  ;;  %4076 = vadd.xlane.f32.xlu0 %v4075_v54 }
 0x51c   : > { %12708 = vpow2.f32 %v4029_v17  ;;  %v3987_v13 = vsub.f32 %v14957_v21, %v3909_v7 }
 0x51d   : > { %v15287_v46 = vpop.eup %12704 }
 0x51e   : > { %v15289_v28 = vpop.eup %12706  ;;  %v4027_v11 = vmul.f32 1.442695, %v3987_v13  ;;  %v4084_v30 = vsel %vm391_vm0, %v15287_v46, 0.0 }
 0x51f   : > { %4085 = vadd.xlane.f32.xlu1 %v4084_v30  ;;  %v4081_v52 = vsel %vm391_vm0, %v15289_v28, 0.0 }
 0x520   : > { %12710 = vpow2.f32 %v4027_v11  ;;  %4082 = vadd.xlane.f32.xlu0 %v4081_v52 }
 0x529   : > { %v15295_v35 = vpop.eup %12708 }
 0x52a   : > { %v4102_v45 = vsel %vm391_vm0, %v15295_v35, 0.0 }
 0x52b   : > { %4103 = vadd.xlane.f32.xlu1 %v4102_v45 }
 0x52d   : > { %v15299_v21 = vpop.eup %12710 }
 0x52e   : > { %v4099_v34 = vsel %vm391_vm0, %v15299_v21, 0.0 }
 0x52f   : > { %4100 = vadd.xlane.f32.xlu1 %v4099_v34 }
 0x532   : > { %v3918_v51 = vpop.xlane.xlu1 %3917 }
 0x533   : > { %v3990_v53 = vsub.f32 %v14997_v44, %v3918_v51 }
 0x535   : > { %v4033_v15 = vmul.f32 1.442695, %v3990_v53 }
 0x536   : > { %v3915_v0 = vpop.xlane.xlu1 %3914 }
 0x537   : > { %12712 = vpow2.f32 %v4033_v15  ;;  %v3989_v17 = vsub.f32 %v15007_v63, %v3915_v0 }
 0x539   : > { %v4031_v54 = vmul.f32 1.442695, %v3989_v17 }
 0x53a   : > { %v3936_v7 = vpop.xlane.xlu1 %3935 }
 0x53b   : > { %12714 = vpow2.f32 %v4031_v54  ;;  %v3996_v13 = vsub.f32 %v15023_v9, %v3936_v7 }
 0x53d   : > { %v4045_v11 = vmul.f32 1.442695, %v3996_v13 }
 0x53e   : > { %v3933_v30 = vpop.xlane.xlu1 %3932 }
 0x53f   : > { %12716 = vpow2.f32 %v4045_v11  ;;  %v3995_v52 = vsub.f32 %v15033_v60, %v3933_v30 }
 0x541   : > { %v4043_v45 = vmul.f32 1.442695, %v3995_v52  ;;  %v3900_v34 = vpop.xlane.xlu0 %3899 }
 0x542   : > { %v3984_v22 = vsub.f32 %v15049_v59, %v3900_v34 }
 0x543   : > { %12718 = vpow2.f32 %v4043_v45 }
 0x544   : > { %v15308_v44 = vpop.eup %12712  ;;  %v4021_v51 = vmul.f32 1.442695, %v3984_v22 }
 0x545   : > { %v3897_v53 = vpop.xlane.xlu0 %3896  ;;  %v4108_v63 = vsel %vm391_vm0, %v15308_v44, 0.0 }
 0x546   : > { %12720 = vpow2.f32 %v4021_v51  ;;  %v3983_v9 = vsub.f32 %v15055_v20, %v3897_v53  ;;  %4109 = vadd.xlane.f32.xlu1 %v4108_v63 }
 0x548   : > { %v15313_v15 = vpop.eup %12714  ;;  %v4019_v0 = vmul.f32 1.442695, %v3983_v9 }
 0x549   : > { %v3906_v60 = vpop.xlane.xlu0 %3905  ;;  %v4105_v17 = vsel %vm391_vm0, %v15313_v15, 0.0 }
 0x54a   : > { %12722 = vpow2.f32 %v4019_v0  ;;  %v3986_v59 = vsub.f32 %v15067_v33, %v3906_v60  ;;  %4106 = vadd.xlane.f32.xlu1 %v4105_v17 }
 0x54c   : > { %v15318_v22 = vpop.eup %12716  ;;  %v4025_v54 = vmul.f32 1.442695, %v3986_v59 }
 0x54d   : > { %v3903_v7 = vpop.xlane.xlu0 %3902  ;;  %v4126_v13 = vsel %vm391_vm0, %v15318_v22, 0.0 }
 0x54e   : > { %12724 = vpow2.f32 %v4025_v54  ;;  %v3985_v20 = vsub.f32 %v15077_v50, %v3903_v7  ;;  %v3942_v11 = vpop.xlane.xlu1 %3941  ;;  %4127 = vadd.xlane.f32.xlu1 %v4126_v13 }
 0x54f   : > { %v3998_v30 = vsub.f32 %v15087_v43, %v3942_v11 }
 0x550   : > { %v15324_v52 = vpop.eup %12718  ;;  %v4023_v45 = vmul.f32 1.442695, %v3985_v20 }
 0x551   : > { %v4049_v34 = vmul.f32 1.442695, %v3998_v30  ;;  %v3924_v33 = vpop.xlane.xlu0 %3923  ;;  %v4123_v51 = vsel %vm391_vm0, %v15324_v52, 0.0 }
 0x552   : > { %12726 = vpow2.f32 %v4023_v45  ;;  %v3992_v53 = vsub.f32 %v15105_v37, %v3924_v33  ;;  %v3939_v63 = vpop.xlane.xlu1 %3938  ;;  %4124 = vadd.xlane.f32.xlu1 %v4123_v51 }
 0x553   : > { %v15329_v9 = vpop.eup %12720  ;;  %12728 = vpow2.f32 %v4049_v34  ;;  %v3997_v50 = vsub.f32 %v15096_v3, %v3939_v63 }
 0x554   : > { %v4037_v0 = vmul.f32 1.442695, %v3992_v53  ;;  %v4090_v43 = vsel %vm391_vm0, %v15329_v9, 0.0 }
 0x555   : > { %v4047_v60 = vmul.f32 1.442695, %v3997_v50  ;;  %4091 = vadd.xlane.f32.xlu0 %v4090_v43  ;;  %v3921_v17 = vpop.xlane.xlu0 %3920 }
 0x556   : > { %12730 = vpow2.f32 %v4037_v0  ;;  %v3991_v59 = vsub.f32 %v15113_v23, %v3921_v17 }
 0x557   : > { %v15335_v54 = vpop.eup %12722  ;;  %12732 = vpow2.f32 %v4047_v60 }
 0x558   : > { %v4035_v37 = vmul.f32 1.442695, %v3991_v59  ;;  %v3960_v7 = vpop.xlane.xlu1 %3959  ;;  %v4087_v13 = vsel %vm391_vm0, %v15335_v54, 0.0 }
 0x559   : > { %v4004_v3 = vsub.f32 %v15134_v61, %v3960_v7  ;;  %4088 = vadd.xlane.f32.xlu0 %v4087_v13  ;;  %v3930_v20 = vpop.xlane.xlu0 %3929 }
 0x55a   : > { %12734 = vpow2.f32 %v4035_v37  ;;  %v3994_v45 = vsub.f32 %v15126_v62, %v3930_v20 }
 0x55b   : > { %v15340_v11 = vpop.eup %12724  ;;  %v4061_v30 = vmul.f32 1.442695, %v4004_v3 }
 0x55c   : > { %v3957_v34 = vpop.xlane.xlu1 %3956  ;;  %v4096_v23 = vsel %vm391_vm0, %v15340_v11, 0.0  ;;  %v4041_v63 = vmul.f32 1.442695, %v3994_v45 }
 0x55d   : > { %12736 = vpow2.f32 %v4061_v30  ;;  %v4003_v33 = vsub.f32 %v15142_v25, %v3957_v34  ;;  %4097 = vadd.xlane.f32.xlu0 %v4096_v23  ;;  %v3927_v51 = vpop.xlane.xlu0 %3926 }
 0x55e   : > { %v3993_v53 = vsub.f32 %v15149_v5, %v3927_v51 }
 0x55f   : > { %v15347_v61 = vpop.eup %12726  ;;  %v4059_v50 = vmul.f32 1.442695, %v4003_v33 }
 0x560   : > { %v15349_v0 = vpop.eup %12728  ;;  %v4039_v43 = vmul.f32 1.442695, %v3993_v53  ;;  %v4093_v62 = vsel %vm391_vm0, %v15347_v61, 0.0 }
 0x561   : > { %12738 = vpow2.f32 %v4059_v50  ;;  %4094 = vadd.xlane.f32.xlu0 %v4093_v62  ;;  %v4132_v60 = vsel %vm391_vm0, %v15349_v0, 0.0 }
 0x562   : > { %12740 = vpow2.f32 %v4039_v43  ;;  %4133 = vadd.xlane.f32.xlu1 %v4132_v60 }
 0x563   : > { %v15355_v25 = vpop.eup %12730  ;;  %12742 = vpow2.f32 %v4041_v63 }
 0x564   : > { %v15357_v5 = vpop.eup %12732  ;;  %v4114_v17 = vsel %vm391_vm0, %v15355_v25, 0.0 }
 0x565   : > { %4115 = vadd.xlane.f32.xlu0 %v4114_v17  ;;  %v4129_v59 = vsel %vm391_vm0, %v15357_v5, 0.0 }
 0x566   : > { %4130 = vadd.xlane.f32.xlu1 %v4129_v59 }
 0x567   : > { %v15363_v37 = vpop.eup %12734 }
 0x568   : > { %v3966_v7 = vpop.xlane.xlu1 %3965  ;;  %v4111_v13 = vsel %vm391_vm0, %v15363_v37, 0.0 }
 0x569   : > { %v4006_v3 = vsub.f32 %v15171_v12, %v3966_v7  ;;  %4112 = vadd.xlane.f32.xlu0 %v4111_v13 }
 0x56a   : > { %v15368_v20 = vpop.eup %12736  ;;  %v3963_v30 = vpop.xlane.xlu0 %3962 }
 0x56b   : > { %v4065_v45 = vmul.f32 1.442695, %v4006_v3  ;;  %v4005_v34 = vsub.f32 %v15184_v39, %v3963_v30  ;;  %v4150_v23 = vsel %vm391_vm0, %v15368_v20, 0.0 }
 0x56c   : > { %v3954_v33 = vpop.xlane.xlu1 %3953  ;;  %4151 = vadd.xlane.f32.xlu1 %v4150_v23 }
 0x56d   : > { %12744 = vpow2.f32 %v4065_v45  ;;  %v4063_v51 = vmul.f32 1.442695, %v4005_v34  ;;  %v4002_v53 = vsub.f32 %v15179_v47, %v3954_v33 }
 0x56e   : > { %v15374_v63 = vpop.eup %12738  ;;  %v3948_v50 = vpop.xlane.xlu0 %3947 }
 0x56f   : > { %v15376_v12 = vpop.eup %12740  ;;  %12746 = vpow2.f32 %v4063_v51  ;;  %v4000_v43 = vsub.f32 %v15193_v57, %v3948_v50  ;;  %v4147_v39 = vsel %vm391_vm0, %v15374_v63, 0.0  ;;  %v4057_v17 = vmul.f32 1.442695, %v4002_v53 }
 0x570   : > { %v15381_v62 = vpop.eup %12742  ;;  %4148 = vadd.xlane.f32.xlu1 %v4147_v39  ;;  %v4117_v60 = vsel %vm391_vm0, %v15376_v12, 0.0 }
 0x571   : > { %v4053_v59 = vmul.f32 1.442695, %v4000_v43  ;;  %v3972_v47 = vpop.xlane.xlu1 %3971  ;;  %4118 = vadd.xlane.f32.xlu0 %v4117_v60  ;;  %v4120_v57 = vsel %vm391_vm0, %v15381_v62, 0.0 }
 0x572   : > { %v4008_v7 = vsub.f32 %v15216_v10, %v3972_v47  ;;  %v3945_v13 = vpop.xlane.xlu0 %3944 }
 0x573   : > { %12748 = vpow2.f32 %v4053_v59  ;;  %v3999_v3 = vsub.f32 %v15206_v16, %v3945_v13 }
 0x574   : > { %4121 = vadd.xlane.f32.xlu1 %v4120_v57  ;;  %12750 = vpow2.f32 %v4057_v17  ;;  %v4069_v30 = vmul.f32 1.442695, %v4008_v7 }
 0x575   : > { %v4051_v45 = vmul.f32 1.442695, %v3999_v3 }
 0x576   : > { %v3951_v34 = vpop.xlane.xlu0 %3950 }
 0x577   : > { %12752 = vpow2.f32 %v4051_v45  ;;  %v4001_v23 = vsub.f32 %v15224_v29, %v3951_v34  ;;  %v3978_v34 = vpop.xlane.xlu1 %3977 }
 0x578   : > { %12754 = vpow2.f32 %v4069_v30 }
 0x579   : > { %v4055_v33 = vmul.f32 1.442695, %v4001_v23 }
 0x57a   : > { %v15390_v51 = vpop.eup %12744  ;;  %v3969_v10 = vpop.xlane.xlu0 %3968 }
 0x57b   : > { %12756 = vpow2.f32 %v4055_v33  ;;  %v4007_v53 = vsub.f32 %v15243_v42, %v3969_v10  ;;  %v4156_v16 = vsel %vm391_vm0, %v15390_v51, 0.0 }
 0x57c   : > { %v15395_v50 = vpop.eup %12746  ;;  %4157 = vadd.xlane.f32.xlu1 %v4156_v16 }
 0x57d   : > { %v4067_v43 = vmul.f32 1.442695, %v4007_v53  ;;  %v4153_v39 = vsel %vm391_vm0, %v15395_v50, 0.0  ;;  %v4010_v53 = vsub.f32 %v15234_v8, %v3978_v34 }
 0x57e   : > { %4154 = vadd.xlane.f32.xlu0 %v4153_v39  ;;  %v3975_v23 = vpop.xlane.xlu0 %3974 }
 0x57f   : > { %12758 = vpow2.f32 %v4067_v43  ;;  %v4073_v39 = vmul.f32 1.442695, %v4010_v53 }
 0x580   : > { %v15399_v29 = vpop.eup %12748 }
 0x581   : > { %v4138_v60 = vsel %vm391_vm0, %v15399_v29, 0.0  ;;  %v15403_v17 = vpop.eup %12750 }
 0x582   : > { %4139 = vadd.xlane.f32.xlu1 %v4138_v60  ;;  %v4144_v59 = vsel %vm391_vm0, %v15403_v17, 0.0  ;;  %v4009_v60 = vsub.f32 %v15253_v41, %v3975_v23 }
 0x584   : > { %v15405_v42 = vpop.eup %12752 }
 0x585   : > { %v4135_v47 = vsel %vm391_vm0, %v15405_v42, 0.0  ;;  %v15411_v7 = vpop.eup %12754 }
 0x586   : > { %4145 = vadd.xlane.f32.xlu1 %v4144_v59  ;;  %4136 = vadd.xlane.f32.xlu0 %v4135_v47  ;;  %v4162_v3 = vsel %vm391_vm0, %v15411_v7, 0.0  ;;  %v4071_v59 = vmul.f32 1.442695, %v4009_v60  ;;  %v18540_v60 = vld [vmem:[#allocation20_spill] sm:$0xff] }
 0x588   : > { %v15413_v13 = vpop.eup %12756 }
 0x589   : > { %v4141_v57 = vsel %vm391_vm0, %v15413_v13, 0.0 }
 0x58a   : > { %4163 = vadd.xlane.f32.xlu1 %v4162_v3  ;;  %4142 = vadd.xlane.f32.xlu0 %v4141_v57 }
 0x58c   : > { %v15419_v30 = vpop.eup %12758 }
 0x58d   : > { %v4159_v45 = vsel %vm391_vm0, %v15419_v30, 0.0 }
 0x58e   : > { %4160 = vadd.xlane.f32.xlu0 %v4159_v45 }
 0x59b   : > { %5350 = vrot.lane.b32.xlu1 %v13413_v58, %s13210_s12 }
 0x5a2   : > { %v4080_v33 = vpop.xlane.xlu1 %4079 }
 0x5a3   : > { %12760 = vrcp.f32 %v4080_v33 }
 0x5a4   : > { %v4077_v10 = vpop.xlane.xlu0 %4076  ;;  %5465 = vrot.lane.b32.xlu0 %v13438_v4, %s13210_s12 }
 0x5a5   : > { %12762 = vrcp.f32 %v4077_v10 }
 0x5a8   : > { %v4086_v16 = vpop.xlane.xlu1 %4085 }
 0x5a9   : > { %12764 = vrcp.f32 %v4086_v16  ;;  %v4083_v43 = vpop.xlane.xlu0 %4082 }
 0x5aa   : > { %12766 = vrcp.f32 %v4083_v43 }
 0x5ab   : > { %12768 = vpow2.f32 %v4073_v39 }
 0x5ac   : > { %12770 = vpow2.f32 %v4071_v59  ;;  %v18541_v59 = vld [vmem:[#allocation18_spill] sm:$0xff] }
 0x5b0   : > { %v12761_v47 = vpop.eup %12760 }
 0x5b1   : > { %v4204_v45 = vmul.f32 %v12761_v47, %v15277_v26 }
 0x5b2   : > { %v12763_v3 = vpop.eup %12762 }
 0x5b3   : > { %v4203_v57 = vmul.f32 %v12763_v3, %v15282_v38 }
 0x5b4   : > { %v4104_v33 = vpop.xlane.xlu1 %4103 }
 0x5b5   : > { %11918 = vmatprep.mubr.msk.f32.mxu1 %vm391_vm0, %v4203_v57  ;;  %12772 = vrcp.f32 %v4104_v33  ;;  %v18542_v57 = vld [vmem:[#allocation25_spill] sm:$0xff] }
 0x5b6   : > { %v12765_v8 = vpop.eup %12764  ;;  %11919 = vmatmul.mubr.msk.f32.vlgmr.msra.gmra.mxu1 %vm391_vm0, %v4204_v45 }
 0x5b7   : > { %v12767_v34 = vpop.eup %12766  ;;  %11939 = vmatpush3.msra.mxu1 %v14817_v14  ;;  %v4206_v41 = vmul.f32 %v12765_v8, %v15287_v46 }
 0x5b8   : > { %v4101_v23 = vpop.xlane.xlu1 %4100  ;;  %11940 = vmatprep.subr.mxu1 %v14822_v49  ;;  %v4205_v10 = vmul.f32 %v12767_v34, %v15289_v28  ;;  %v15440_v26 = vpop.eup %12768  ;;  %v18543_v34 = vld [vmem:[#allocation17_spill] sm:$0xff] }
 0x5b9   : > { %12774 = vrcp.f32 %v4101_v23  ;;  %11941 = vmatpush3.msra.mxu1 %v14822_v49  ;;  %v4168_v14 = vsel %vm391_vm0, %v15440_v26, 0.0  ;;  %v15448_v38 = vpop.eup %12770 }
 0x5ba   : > { %11921 = vmatprep.mubr.msk.f32.mxu1 %vm391_vm0, %v4205_v10  ;;  %11942 = vmatprep.subr.mxu1 %v14826_v55  ;;  %v4165_v49 = vsel %vm391_vm0, %v15448_v38, 0.0 }
 0x5bb   : > { %11922 = vmatmul.mubr.msk.f32.gmra.mxu1 %vm391_vm0, %v4206_v41  ;;  %v18544_v41 = vld [vmem:[#allocation13_spill] sm:$0xff] }
 0x5bc   : > { %11943 = vmatpush3.msra.mxu1 %v14826_v55 }
 0x5bd   : > { %11944 = vmatprep.subr.mxu1 %v14841_v48 }
 0x5be   : > { %11945 = vmatpush3.msra.mxu1 %v14841_v48 }
 0x5bf   : > { %11966 = vmatprep.subr.mxu1 %v14920_v36  ;;  %4169 = vadd.xlane.f32.xlu1 %v4168_v14 }
 0x5c2   : > { %v12773_v46 = vpop.eup %12772 }
 0x5c3   : > { %4166 = vadd.xlane.f32.xlu0 %v4165_v49  ;;  %v4212_v53 = vmul.f32 %v12773_v46, %v15295_v35  ;;  %v18546_v49 = vld [vmem:[#allocation24_spill] sm:$0xff]  ;;  %v18547_v46 = vld [vmem:[#allocation22_spill] sm:$0xff] }
 0x5c6   : > { %v12775_v28 = vpop.eup %12774 }
 0x5c7   : > { %v4211_v55 = vmul.f32 %v12775_v28, %v15299_v21  ;;  %v18548_v28 = vld [vmem:[#allocation52_spill] sm:$0xff] }
 0x5c9   : > { %11946 = vmatprep.mubr.msk.f32.mxu1 %vm391_vm0, %v4211_v55 }
 0x5ca   : > { %11947 = vmatmul.mubr.msk.f32.vlgmr.msra.gmra.mxu1 %vm391_vm0, %v4212_v53 }
 0x5cb   : > { %11967 = vmatpush3.msra.mxu1 %v14920_v36 }
 0x5cc   : > { %11968 = vmatprep.subr.mxu1 %v14853_v31 }
 0x5cd   : > { %11969 = vmatpush3.msra.mxu1 %v14853_v31 }
 0x5ce   : > { %11970 = vmatprep.subr.mxu1 %v14937_v1 }
 0x5cf   : > { %11971 = vmatpush3.msra.mxu1 %v14937_v1  ;;  %v4110_v48 = vpop.xlane.xlu1 %4109 }
 0x5d0   : > { %11972 = vmatprep.subr.mxu1 %v14908_v40  ;;  %5709 = vrot.lane.b32.xlu1 %v13476_v19, %s13209_s22  ;;  %12776 = vrcp.f32 %v4110_v48  ;;  %v18549_v48 = vld [vmem:[#allocation70_spill] sm:$0xff] }
 0x5d1   : > { %11973 = vmatpush3.msra.mxu1 %v14908_v40 }
 0x5d2   : > { %11994 = vmatprep.subr.mxu1 %v14967_v32 }
 0x5d3   : > { %v4107_v36 = vpop.xlane.xlu1 %4106 }
 0x5d4   : > { %5580 = vrot.lane.b32.xlu1 %v13443_v6, %s13210_s12  ;;  %12778 = vrcp.f32 %v4107_v36  ;;  %v18550_v36 = vld [vmem:[#allocation32_spill] sm:$0xff] }
 0x5d7   : > { %v4128_v31 = vpop.xlane.xlu1 %4127 }
 0x5d8   : > { %5828 = vrot.lane.b32.xlu1 %v13490_v24, %s13209_s22  ;;  %12780 = vrcp.f32 %v4128_v31 }
 0x5d9   : > { %5588 = vrot.lane.b32.xlu0 %v13443_v6, %s13209_s22 }
 0x5db   : > { %v4125_v1 = vpop.xlane.xlu1 %4124 }
 0x5dc   : > { %5467 = vrot.lane.b32.xlu1 %v13433_v2, %s13210_s12  ;;  %12782 = vrcp.f32 %v4125_v1  ;;  %v18552_v1 = vld [vmem:[#allocation55_spill] sm:$0xff] }
 0x5dd   : > { %5352 = vrot.lane.b32.xlu0 %v13408_v56, %s13210_s12  ;;  %v12777_v35 = vpop.eup %12776 }
 0x5de   : > { %v4092_v40 = vpop.xlane.xlu0 %4091  ;;  %v4214_v39 = vmul.f32 %v12777_v35, %v15308_v44  ;;  %v18553_v35 = vld [vmem:[#allocation40_spill] sm:$0xff] }
 0x5df   : > { %12784 = vrcp.f32 %v4092_v40 }
 0x5e0   : > { %5826 = vrot.lane.b32.xlu1 %v13496_v27, %s13209_s22 }
 0x5e1   : > { %v12779_v21 = vpop.eup %12778  ;;  %5707 = vrot.lane.b32.xlu0 %v13473_v18, %s13209_s22 }
 0x5e2   : > { %v4089_v16 = vpop.xlane.xlu0 %4088  ;;  %v4213_v43 = vmul.f32 %v12779_v21, %v15313_v15  ;;  %v18554_v21 = vld [vmem:[#allocation26_spill] sm:$0xff] }
 0x5e3   : > { %12786 = vrcp.f32 %v4089_v16 }
 0x5e4   : > { %5697 = vrot.lane.b32.xlu1 %v18540_v60, %s13210_s12  ;;  %11949 = vmatprep.mubr.msk.f32.mxu1 %vm391_vm0, %v4213_v43  ;;  %v18555_v43 = vld [vmem:[#allocation16_spill] sm:$0xff] }
 0x5e5   : > { %5582 = vrot.lane.b32.xlu0 %v18541_v59, %s13210_s12  ;;  %11950 = vmatmul.mubr.msk.f32.gmra.mxu1 %vm391_vm0, %v4214_v39  ;;  %v12781_v3 = vpop.eup %12780 }
 0x5e6   : > { %v4098_v47 = vpop.xlane.xlu0 %4097  ;;  %v4220_v33 = vmul.f32 %v12781_v3, %v15318_v22 }
 0x5e7   : > { %12788 = vrcp.f32 %v4098_v47  ;;  %v18556_v47 = vld [vmem:[#allocation49_spill] sm:$0xff] }
 0x5e8   : > { %5945 = vrot.lane.b32.xlu1 %v18542_v57, %s13209_s22 }
 0x5e9   : > { %v12783_v45 = vpop.eup %12782  ;;  %5705 = vrot.lane.b32.xlu0 %v18540_v60, %s13209_s22 }
 0x5ea   : > { %v4095_v44 = vpop.xlane.xlu0 %4094  ;;  %v4219_v15 = vmul.f32 %v12783_v45, %v15324_v52  ;;  %v18545_v52 = vld [vmem:[#allocation65_spill] sm:$0xff] }
 0x5eb   : > { %12790 = vrcp.f32 %v4095_v44  ;;  %v4134_v8 = vpop.xlane.xlu1 %4133 }
 0x5ec   : > { %5584 = vrot.lane.b32.xlu1 %v18543_v34, %s13210_s12  ;;  %11974 = vmatprep.mubr.msk.f32.mxu1 %vm391_vm0, %v4219_v15  ;;  %v12785_v10 = vpop.eup %12784  ;;  %12792 = vrcp.f32 %v4134_v8  ;;  %v18557_v15 = vld [vmem:[#allocation50_spill] sm:$0xff] }
 0x5ed   : > { %5469 = vrot.lane.b32.xlu0 %v18544_v41, %s13210_s12  ;;  %11975 = vmatmul.mubr.msk.f32.vlgmr.msra.gmra.mxu1 %vm391_vm0, %v4220_v33  ;;  %v18558_v33 = vld [vmem:[#allocation19_spill] sm:$0xff] }
 0x5ee   : > { %v4116_v23 = vpop.xlane.xlu0 %4115  ;;  %11995 = vmatpush3.msra.mxu1 %v14967_v32  ;;  %v4208_v32 = vmul.f32 %v12785_v10, %v15329_v9  ;;  %v18551_v9 = vld [vmem:[#allocation36_spill] sm:$0xff] }
 0x5ef   : > { %11996 = vmatprep.subr.mxu1 %v18545_v52  ;;  %v4131_v22 = vpop.xlane.xlu1 %4130 }
 0x5f0   : > { %v12787_v14 = vpop.eup %12786  ;;  %5822 = vrot.lane.b32.xlu1 %v18546_v49, %s13209_s22  ;;  %12794 = vrcp.f32 %v4131_v22  ;;  %11997 = vmatpush3.msra.mxu1 %v18545_v52 }
 0x5f1   : > { %5824 = vrot.lane.b32.xlu0 %v18547_v46, %s13209_s22  ;;  %11998 = vmatprep.subr.mxu1 %v18548_v28  ;;  %v4207_v55 = vmul.f32 %v12787_v14, %v15335_v54  ;;  %12796 = vrcp.f32 %v4116_v23  ;;  %v18559_v23 = vld [vmem:[#allocation27_spill] sm:$0xff]  ;;  %v18560_v14 = vld [vmem:[#allocation28_spill] sm:$0xff] }
 0x5f2   : > { %v4113_v53 = vpop.xlane.xlu0 %4112  ;;  %11999 = vmatpush3.msra.mxu1 %v18548_v28 }
 0x5f3   : > { %12798 = vrcp.f32 %v4113_v53  ;;  %11932 = vmatprep.mubr.msk.f32.mxu0 %vm391_vm0, %v4207_v55  ;;  %12000 = vmatprep.subr.mxu1 %v18549_v48 }
 0x5f4   : > { %5814 = vrot.lane.b32.xlu1 %v18546_v49, %s13210_s12  ;;  %11933 = vmatmul.mubr.msk.f32.vlgmr.msra.gmra.mxu0 %vm391_vm0, %v4208_v32  ;;  %v12789_v54 = vpop.eup %12788  ;;  %v18561_v32 = vld [vmem:[#allocation56_spill] sm:$0xff] }
 0x5f5   : > { %11953 = vmatpush3.msra.mxu0 %v18550_v36  ;;  %v4152_v31 = vpop.xlane.xlu1 %4151  ;;  %5699 = vrot.lane.b32.xlu0 %v13473_v18, %s13210_s12  ;;  %v4210_v45 = vmul.f32 %v12789_v54, %v15340_v11  ;;  %v18563_v54 = vld [vmem:[#allocation54_spill] sm:$0xff] }
 0x5f6   : > { %11954 = vmatprep.subr.mxu0 %v18551_v9  ;;  %12001 = vmatpush3.msra.mxu1 %v18549_v48  ;;  %12800 = vrcp.f32 %v4152_v31  ;;  %v18562_v48 = vld [vmem:[#allocation58_spill] sm:$0xff] }
 0x5f7   : > { %11955 = vmatpush3.msra.mxu0 %v18551_v9  ;;  %12022 = vmatprep.subr.msk.mxu1 %vm761_vm1, %v18552_v1 }
 0x5f8   : > { %v12791_v40 = vpop.eup %12790  ;;  %11956 = vmatprep.subr.mxu0 %v18553_v35  ;;  %5941 = vrot.lane.b32.xlu1 %v18554_v21, %s13209_s22 }
 0x5f9   : > { %11957 = vmatpush3.msra.mxu0 %v18553_v35  ;;  %v4149_v16 = vpop.xlane.xlu1 %4148  ;;  %5586 = vrot.lane.b32.xlu0 %v18555_v43, %s13210_s12  ;;  %v4209_v39 = vmul.f32 %v12791_v40, %v15347_v61  ;;  %v12793_v44 = vpop.eup %12792 }
 0x5fa   : > { %12802 = vrcp.f32 %v4149_v16  ;;  %11958 = vmatprep.subr.mxu0 %v18556_v47  ;;  %v4119_v3 = vpop.xlane.xlu0 %4118  ;;  %v4222_v22 = vmul.f32 %v12793_v44, %v15349_v0  ;;  %v18569_v44 = vld [vmem:[#allocation6_spill] sm:$0xff] }
 0x5fb   : > { %11959 = vmatpush3.msra.mxu0 %v18556_v47  ;;  %12804 = vrcp.f32 %v4119_v3  ;;  %11935 = vmatprep.mubr.msk.f32.mxu0 %vm391_vm0, %v4209_v39 }
 0x5fc   : > { %11980 = vmatprep.subr.mxu0 %v18557_v15  ;;  %5703 = vrot.lane.b32.xlu1 %v18558_v33, %s13210_s12 }
 0x5fd   : > { %v12795_v8 = vpop.eup %12794  ;;  %11936 = vmatmul.mubr.msk.f32.gmra.mxu0 %vm391_vm0, %v4210_v45  ;;  %v4122_v61 = vpop.xlane.xlu1 %4121  ;;  %5943 = vrot.lane.b32.xlu0 %v18559_v23, %s13209_s22 }
 0x5fe   : > { %12806 = vrcp.f32 %v4122_v61  ;;  %v4221_v10 = vmul.f32 %v12795_v8, %v15357_v5  ;;  %v12797_v52 = vpop.eup %12796  ;;  %v18570_v8 = vld [vmem:[#allocation80_spill] sm:$0xff] }
 0x5ff   : > { %v4216_v55 = vmul.f32 %v12797_v52, %v15355_v25 }
 0x600   : > { %v12799_v11 = vpop.eup %12798  ;;  %5931 = vrot.lane.b32.xlu1 %v18560_v14, %s13210_s12  ;;  %11977 = vmatprep.mubr.msk.f32.mxu1 %vm391_vm0, %v4221_v10 }
 0x601   : > { %5816 = vrot.lane.b32.xlu0 %v18547_v46, %s13210_s12  ;;  %v4215_v28 = vmul.f32 %v12799_v11, %v15363_v37  ;;  %11978 = vmatmul.mubr.msk.f32.gmra.mxu1 %vm391_vm0, %v4222_v22  ;;  %v18571_v11 = vld [vmem:[#allocation84_spill] sm:$0xff] }
 0x603   : > { %11960 = vmatprep.mubr.msk.f32.mxu0 %vm391_vm0, %v4215_v28  ;;  %v12801_v0 = vpop.eup %12800  ;;  %v18572_v28 = vld [vmem:[#allocation4_spill] sm:$0xff] }
 0x604   : > { %5818 = vrot.lane.b32.xlu1 %v13496_v27, %s13210_s12  ;;  %11961 = vmatmul.mubr.msk.f32.vlgmr.msra.gmra.mxu0 %vm391_vm0, %v4216_v55  ;;  %v4228_v9 = vmul.f32 %v12801_v0, %v15368_v20  ;;  %v18565_v20 = vld [vmem:[#allocation5_spill] sm:$0xff]  ;;  %v18574_v0 = vld [vmem:[#allocation8_spill] sm:$0xff] }
 0x605   : > { %11981 = vmatpush3.msra.mxu0 %v18557_v15  ;;  %5701 = vrot.lane.b32.xlu0 %v13476_v19, %s13210_s12  ;;  %v4158_v5 = vpop.xlane.xlu1 %4157 }
 0x606   : > { %11982 = vmatprep.subr.mxu0 %v18561_v32 }
 0x607   : > { %v12803_v37 = vpop.eup %12802  ;;  %11983 = vmatpush3.msra.mxu0 %v18561_v32  ;;  %v4155_v25 = vpop.xlane.xlu0 %4154  ;;  %v18575_v32 = vld [vmem:[#allocation2_spill] sm:$0xff] }
 0x608   : > { %v12805_v53 = vpop.eup %12804  ;;  %11984 = vmatprep.subr.mxu0 %v18562_v48  ;;  %12808 = vrcp.f32 %v4155_v25  ;;  %5935 = vrot.lane.b32.xlu1 %v18559_v23, %s13210_s12  ;;  %v4227_v36 = vmul.f32 %v12803_v37, %v15374_v63  ;;  %v18564_v63 = vld [vmem:[#allocation69_spill] sm:$0xff]  ;;  %v18577_v25 = vld [vmem:[#allocation92_spill] sm:$0xff] }
 0x609   : > { %12810 = vrcp.f32 %v4158_v5  ;;  %11985 = vmatpush3.msra.mxu0 %v18562_v48  ;;  %5939 = vrot.lane.b32.xlu0 %v18560_v14, %s13209_s22  ;;  %v4217_v31 = vmul.f32 %v12805_v53, %v15376_v12  ;;  %s13211_s22 = smov 48   ;;  %v18566_v12 = vld [vmem:[#allocation71_spill] sm:$0xff] }
 0x60a   : > { %11986 = vmatprep.subr.mxu0 %v18563_v54  ;;  %12002 = vmatprep.mubr.msk.f32.mxu1 %vm391_vm0, %v4227_v36  ;;  %v18578_v48 = vld [vmem:[#allocation87_spill] sm:$0xff] }
 0x60b   : > { %v12807_v40 = vpop.eup %12806  ;;  %11987 = vmatpush3.msra.mxu0 %v18563_v54  ;;  %11963 = vmatprep.mubr.msk.f32.mxu0 %vm391_vm0, %v4217_v31  ;;  %v4140_v16 = vpop.xlane.xlu1 %4139  ;;  %v18579_v36 = vld [vmem:[#allocation11_spill] sm:$0xff] }
 0x60c   : > { %12003 = vmatmul.mubr.msk.f32.vlgmr.msra.gmra.mxu1 %vm391_vm0, %v4228_v9  ;;  %12008 = vmatprep.subr.mxu0 %v18564_v63  ;;  %v4218_v35 = vmul.f32 %v12807_v40, %v15381_v62  ;;  %12812 = vrcp.f32 %v4140_v16  ;;  %v18567_v62 = vld [vmem:[#allocation3_spill] sm:$0xff]  ;;  %v18583_v16 = vld [vmem:[#allocation89_spill] sm:$0xff] }
 0x60d   : > { %12023 = vmatpush3.xpose.msk.msra.mxu1 %vm761_vm1, %v18552_v1  ;;  %6436 = vrot.lane.b32.xlu1 %v18565_v20, %s13211_s22  ;;  %v18568_v1 = vld [vmem:[#allocation77_spill] sm:$0xff]  ;;  %v18580_v9 = vld [vmem:[#allocation7_spill] sm:$0xff] }
 0x60e   : > { %12024 = vmatprep.subr.msk.mxu1 %vm761_vm1, %v18566_v12  ;;  %5933 = vrot.lane.b32.xlu0 %v18554_v21, %s13210_s12 }
 0x60f   : > { %11964 = vmatmul.mubr.msk.f32.gmra.mxu0 %vm391_vm0, %v4218_v35  ;;  %v4137_v39 = vpop.xlane.xlu0 %4136  ;;  %v4146_v47 = vpop.xlane.xlu1 %4145  ;;  %v18582_v35 = vld [vmem:[#allocation62_spill] sm:$0xff] }
 0x610   : > { %12814 = vrcp.f32 %v4137_v39 }
 0x611   : > { %12025 = vmatpush3.xpose.msk.msra.mxu1 %vm761_vm1, %v18566_v12  ;;  %6432 = vrot.lane.b32.xlu1 %v18567_v62, %s13211_s22  ;;  %v18584_v12 = vld [vmem:[#allocation96_spill] sm:$0xff] }
 0x612   : > { %12026 = vmatprep.subr.msk.mxu1 %vm761_vm1, %v18568_v1  ;;  %5820 = vrot.lane.b32.xlu0 %v13490_v24, %s13210_s12 }
 0x613   : > { %v4143_v3 = vpop.xlane.xlu0 %4142  ;;  %v4164_v52 = vpop.xlane.xlu1 %4163 }
 0x614   : > { %12816 = vrcp.f32 %v4143_v3  ;;  %v18587_v3 = vld [vmem:[#allocation72_spill] sm:$0xff] }
 0x615   : > { %v12809_v45 = vpop.eup %12808  ;;  %12027 = vmatpush3.xpose.msk.msra.mxu1 %vm761_vm1, %v18568_v1  ;;  %6547 = vrot.lane.b32.xlu1 %v18569_v44, %s13211_s22  ;;  %12818 = vrcp.f32 %v4146_v47  ;;  %v18586_v47 = vld [vmem:[#allocation93_spill] sm:$0xff] }
 0x616   : > { %v12811_v15 = vpop.eup %12810  ;;  %12028 = vmatprep.subr.msk.mxu1 %vm761_vm1, %v18570_v8  ;;  %5937 = vrot.lane.b32.xlu0 %v18542_v57, %s13210_s12  ;;  %v4229_v61 = vmul.f32 %v12809_v45, %v15395_v50  ;;  %v18573_v50 = vld [vmem:[#allocation82_spill] sm:$0xff]  ;;  %v18589_v45 = vld [vmem:[#allocation9_spill] sm:$0xff]  ;;  %s13212_s12 = smov 72  }
 0x617   : > { %v4161_v10 = vpop.xlane.xlu0 %4160  ;;  %v4230_v22 = vmul.f32 %v12811_v15, %v15390_v51  ;;  %v18576_v51 = vld [vmem:[#allocation85_spill] sm:$0xff]  ;;  %v18590_v15 = vld [vmem:[#allocation98_spill] sm:$0xff] }
 0x618   : > { %12820 = vrcp.f32 %v4161_v10  ;;  %12005 = vmatprep.mubr.msk.f32.mxu1 %vm391_vm0, %v4229_v61  ;;  %v18592_v61 = vld [vmem:[#allocation99_spill] sm:$0xff]  ;;  %v18593_v10 = vld [vmem:[#allocation12_spill] sm:$0xff] }
 0x619   : > { %12029 = vmatpush3.xpose.msk.msra.mxu1 %vm761_vm1, %v18570_v8  ;;  %6656 = vrot.lane.b32.xlu1 %v13408_v56, %s13211_s22  ;;  %12822 = vrcp.f32 %v4164_v52  ;;  %v12813_v55 = vpop.eup %12812  ;;  %v5351_v8 = vpop.permute.xlu1 %5350  ;;  %v18594_v52 = vld [vmem:[#allocation102_spill] sm:$0xff] }
 0x61a   : > { %12050 = vmatprep.subr.msk.mxu1 %vm761_vm1, %v18571_v11  ;;  %6438 = vrot.lane.b32.xlu0 %v18572_v28, %s13211_s22  ;;  %v4224_v53 = vmul.f32 %v12813_v55, %v15399_v29  ;;  %v18598_v55 = vld [vmem:[#allocation90_spill] sm:$0xff] }
 0x61b   : > { %12006 = vmatmul.mubr.msk.f32.gmra.mxu1 %vm391_vm0, %v4230_v22  ;;  %v18595_v22 = vld [vmem:[#allocation83_spill] sm:$0xff] }
 0x61c   : > { %12030 = vmatprep.mubr.msk.f32.mxu1 %vm761_vm1, %v18573_v50  ;;  %v18597_v50 = vld [vmem:[#allocation86_spill] sm:$0xff] }
 0x61d   : > { %6543 = vrot.lane.b32.xlu1 %v18574_v0, %s13211_s22  ;;  %v12815_v5 = vpop.eup %12814 }
 0x61e   : > { %6434 = vrot.lane.b32.xlu0 %v18575_v32, %s13211_s22  ;;  %v4223_v37 = vmul.f32 %v12815_v5, %v15405_v42  ;;  %v18581_v42 = vld [vmem:[#allocation95_spill] sm:$0xff] }
 0x61f   : > { %12031 = vmatmul.mubr.msk.f32.vlgmr.msra.gmra.mxu1 %vm761_vm1, %v18576_v51  ;;  %v18599_v5 = vld [vmem:[#allocation15_spill] sm:$0xff]  ;;  %v15730_v51 = vpop.permute.xlu0 %5465 }
 0x620   : > { %12051 = vmatpush3.xpose.msk.msra.mxu1 %vm761_vm1, %v18571_v11  ;;  %12033 = vmatprep.mubr.msk.f32.mxu1 %vm761_vm1, %v18577_v25  ;;  %v18596_v11 = vld [vmem:[#allocation105_spill] sm:$0xff] }
 0x621   : > { %12052 = vmatprep.subr.msk.mxu1 %vm761_vm1, %v18578_v48  ;;  %6652 = vrot.lane.b32.xlu1 %v18579_v36, %s13211_s22  ;;  %v12817_v31 = vpop.eup %12816 }
 0x622   : > { %11988 = vmatprep.mubr.msk.f32.mxu0 %vm391_vm0, %v4223_v37  ;;  %6545 = vrot.lane.b32.xlu0 %v18580_v9, %s13211_s22  ;;  %v4225_v54 = vmul.f32 %v12817_v31, %v15413_v13  ;;  %v12819_v29 = vpop.eup %12818 }
 0x623   : > { %11989 = vmatmul.mubr.msk.f32.vlgmr.msra.gmra.mxu0 %vm391_vm0, %v4224_v53  ;;  %12034 = vmatmul.mubr.msk.f32.gmra.mxu1 %vm761_vm1, %v18581_v42  ;;  %v4226_v13 = vmul.f32 %v12819_v29, %v15403_v17 }
 0x624   : > { %12009 = vmatpush3.msra.mxu0 %v18564_v63  ;;  %12053 = vmatpush3.xpose.msk.msra.mxu1 %vm761_vm1, %v18578_v48  ;;  %v18585_v63 = vld [vmem:[#allocation61_spill] sm:$0xff] }
 0x625   : > { %v12821_v40 = vpop.eup %12820  ;;  %12010 = vmatprep.subr.mxu0 %v18582_v35  ;;  %12054 = vmatprep.subr.msk.mxu1 %vm761_vm1, %v18583_v16 }
 0x626   : > { %12058 = vmatprep.mubr.msk.f32.mxu1 %vm761_vm1, %v18584_v12  ;;  %12011 = vmatpush3.msra.mxu0 %v18582_v35  ;;  %v4231_v39 = vmul.f32 %v12821_v40, %v15419_v30  ;;  %v12823_v1 = vpop.eup %12822  ;;  %v18588_v30 = vld [vmem:[#allocation79_spill] sm:$0xff] }
 0x627   : > { %6765 = vrot.lane.b32.xlu1 %v18544_v41, %s13211_s22  ;;  %11991 = vmatprep.mubr.msk.f32.mxu0 %vm391_vm0, %v4225_v54  ;;  %v4232_v17 = vmul.f32 %v12823_v1, %v15411_v7  ;;  %v18591_v7 = vld [vmem:[#allocation81_spill] sm:$0xff]  ;;  %v18600_v1 = vld [vmem:[#allocation88_spill] sm:$0xff] }
 0x628   : > { %12012 = vmatprep.subr.mxu0 %v18585_v63  ;;  %6654 = vrot.lane.b32.xlu0 %v13413_v58, %s13211_s22 }
 0x629   : > { %11992 = vmatmul.mubr.msk.f32.gmra.mxu0 %vm391_vm0, %v4226_v13  ;;  %12055 = vmatpush3.xpose.msk.msra.mxu1 %vm761_vm1, %v18583_v16 }
 0x62a   : > { %12013 = vmatpush3.msra.mxu0 %v18585_v63  ;;  %12056 = vmatprep.subr.msk.mxu1 %vm761_vm1, %v18586_v47 }
 0x62b   : > { %12014 = vmatprep.subr.mxu0 %v18587_v3  ;;  %6874 = vrot.lane.b32.xlu1 %v18555_v43, %s13211_s22 }
 0x62c   : > { %12015 = vmatpush3.msra.mxu0 %v18587_v3  ;;  %12016 = vmatprep.mubr.msk.f32.mxu0 %vm391_vm0, %v4231_v39  ;;  %v18602_v3 = vld [vmem:[#allocation100_spill] sm:$0xff] }
 0x62d   : > { %12036 = vmatprep.subr.msk.mxu0 %vm761_vm1, %v18588_v30  ;;  %6541 = vrot.lane.b32.xlu0 %v18589_v45, %s13211_s22 }
 0x62e   : > { %12017 = vmatmul.mubr.msk.f32.vlgmr.msra.gmra.mxu0 %vm391_vm0, %v4232_v17  ;;  %12057 = vmatpush3.xpose.msk.msra.mxu1 %vm761_vm1, %v18586_v47  ;;  %v18601_v47 = vld [vmem:[#allocation91_spill] sm:$0xff] }
 0x62f   : > { %12037 = vmatpush3.xpose.msk.msra.mxu0 %vm761_vm1, %v18588_v30  ;;  %12078 = vmatprep.subr.msk.mxu1 %vm761_vm1, %v18590_v15 }
 0x630   : > { %12038 = vmatprep.subr.msk.mxu0 %vm761_vm1, %v18591_v7  ;;  %6870 = vrot.lane.b32.xlu1 %v18541_v59, %s13211_s22 }
 0x631   : > { %12059 = vmatmul.mubr.msk.f32.vlgmr.msra.gmra.mxu1 %vm761_vm1, %v18592_v61  ;;  %6650 = vrot.lane.b32.xlu0 %v18593_v10, %s13211_s22  ;;  %v18606_v61 = vld [vmem:[#allocation97_spill] sm:$0xff] }
 0x632   : > { %12061 = vmatprep.mubr.msk.f32.mxu1 %vm761_vm1, %v5351_v8  ;;  %12079 = vmatpush3.xpose.msk.msra.mxu1 %vm761_vm1, %v18590_v15  ;;  %v18603_v15 = vld [vmem:[#allocation94_spill] sm:$0xff]  ;;  %v18605_v8 = vld [vmem:[#allocation104_spill] sm:$0xff] }
 0x633   : > { %12039 = vmatpush3.xpose.msk.msra.mxu0 %vm761_vm1, %v18591_v7  ;;  %12080 = vmatprep.subr.msk.mxu1 %vm761_vm1, %v18594_v52  ;;  %v18604_v7 = vld [vmem:[#allocation103_spill] sm:$0xff] }
 0x634   : > { %12040 = vmatprep.subr.msk.mxu0 %vm761_vm1, %v18595_v22  ;;  %6983 = vrot.lane.b32.xlu1 %v18558_v33, %s13211_s22 }
 0x635   : > { %6763 = vrot.lane.b32.xlu0 %v13433_v2, %s13211_s22 }
 0x636   : > { %12081 = vmatpush3.xpose.msk.msra.mxu1 %vm761_vm1, %v18594_v52 }
 0x637   : > { %12041 = vmatpush3.xpose.msk.msra.mxu0 %vm761_vm1, %v18595_v22  ;;  %12082 = vmatprep.subr.msk.mxu1 %vm761_vm1, %v18596_v11 }
 0x638   : > { %12042 = vmatprep.subr.msk.mxu0 %vm761_vm1, %v18597_v50  ;;  %7092 = vrot.lane.b32.xlu1 %v13490_v24, %s13211_s22 }
 0x639   : > { %6872 = vrot.lane.b32.xlu0 %v18543_v34, %s13211_s22 }
 0x63a   : > { %12083 = vmatpush3.xpose.msk.msra.mxu1 %vm761_vm1, %v18596_v11  ;;  %v18607_v11 = vld [vmem:[#allocation101_spill] sm:$0xff] }
 0x63b   : > { %12043 = vmatpush3.xpose.msk.msra.mxu0 %vm761_vm1, %v18597_v50 }
 0x63c   : > { %12064 = vmatprep.subr.msk.mxu0 %vm761_vm1, %v18598_v55  ;;  %7090 = vrot.lane.b32.xlu1 %v13496_v27, %s13211_s22 }
 0x63d   : > { %6761 = vrot.lane.b32.xlu0 %v13438_v4, %s13211_s22 }
 0x640   : > { %7201 = vrot.lane.b32.xlu1 %v18542_v57, %s13211_s22 }
 0x641   : > { %6759 = vrot.lane.b32.xlu0 %v18599_v5, %s13211_s22 }
 0x644   : > { %7199 = vrot.lane.b32.xlu1 %v18559_v23, %s13211_s22 }
 0x645   : > { %6868 = vrot.lane.b32.xlu0 %v13443_v6, %s13211_s22 }
 0x648   : > { %7321 = vrot.lane.b32.xlu1 %v18565_v20, %s13212_s12  ;;  %v4170_v37 = vpop.xlane.xlu1 %4169 }
 0x649   : > { %6981 = vrot.lane.b32.xlu0 %v13476_v19, %s13211_s22  ;;  %12824 = vrcp.f32 %v4170_v37  ;;  %v18608_v37 = vld [vmem:[#allocation106_spill] sm:$0xff] }
 0x64c   : > { %7319 = vrot.lane.b32.xlu1 %v18575_v32, %s13212_s12  ;;  %v15738_v25 = vpop.permute.xlu1 %5709  ;;  %v4167_v53 = vpop.xlane.xlu0 %4166 }
 0x64d   : > { %6979 = vrot.lane.b32.xlu0 %v13473_v18, %s13211_s22  ;;  %12826 = vrcp.f32 %v4167_v53 }
 0x650   : > { %7317 = vrot.lane.b32.xlu1 %v18567_v62, %s13212_s12  ;;  %v5581_v48 = vpop.permute.xlu1 %5580  ;;  %v5589_v31 = vpop.permute.xlu0 %5588 }
 0x651   : > { %7088 = vrot.lane.b32.xlu0 %v18547_v46, %s13211_s22  ;;  %12084 = vmatprep.subr.msk.mxu1 %vm761_vm1, %v5589_v31 }
 0x652   : > { %12085 = vmatpush3.xpose.msk.msra.mxu1 %vm761_vm1, %v5589_v31 }
 0x654   : > { %7309 = vrot.lane.b32.xlu1 %v18567_v62, %s13213_s28  ;;  %v5829_v42 = vpop.permute.xlu1 %5828  ;;  %v5353_v54 = vpop.permute.xlu0 %5352 }
 0x655   : > { %6977 = vrot.lane.b32.xlu0 %v18540_v60, %s13211_s22  ;;  %12062 = vmatmul.mubr.msk.f32.gmra.mxu1 %vm761_vm1, %v5353_v54 }
 0x656   : > { %12106 = vmatprep.subr.msk.mxu1 %vm761_vm1, %v5829_v42  ;;  %12086 = vmatprep.mubr.msk.f32.mxu1 %vm761_vm1, %v5581_v48  ;;  %v12825_v35 = vpop.eup %12824 }
 0x657   : > { %v4234_v39 = vmul.f32 %v12825_v35, %v15440_v26 }
 0x658   : > { %7557 = vrot.lane.b32.xlu1 %v13408_v56, %s13212_s12  ;;  %v5468_v29 = vpop.permute.xlu1 %5467  ;;  %v15757_v40 = vpop.permute.xlu0 %5707 }
 0x659   : > { %7086 = vrot.lane.b32.xlu0 %v18546_v49, %s13211_s22 }
 0x65a   : > { %v12827_v16 = vpop.eup %12826 }
 0x65b   : > { %v4233_v12 = vmul.f32 %v12827_v16, %v15448_v38 }
 0x65c   : > { %7434 = vrot.lane.b32.xlu1 %v18589_v45, %s13212_s12  ;;  %v5827_v13 = vpop.permute.xlu1 %5826  ;;  %v5583_v63 = vpop.permute.xlu0 %5582 }
 0x65d   : > { %7323 = vrot.lane.b32.xlu0 %v18572_v28, %s13212_s12  ;;  %12019 = vmatprep.mubr.msk.f32.mxu0 %vm391_vm0, %v4233_v12 }
 0x65e   : > { %12087 = vmatmul.mubr.msk.f32.vlgmr.msra.gmra.mxu1 %vm761_vm1, %v5583_v63  ;;  %12020 = vmatmul.mubr.msk.f32.gmra.mxu0 %vm391_vm0, %v4234_v39 }
 0x65f   : > { %12107 = vmatpush3.xpose.msk.msra.mxu1 %vm761_vm1, %v5829_v42  ;;  %12044 = vmatprep.mubr.msk.f32.mxu0 %vm761_vm1, %v18600_v1 }
 0x660   : > { %7426 = vrot.lane.b32.xlu1 %v18589_v45, %s13213_s28  ;;  %12108 = vmatprep.subr.msk.mxu1 %vm761_vm1, %v5827_v13  ;;  %v5698_v26 = vpop.permute.xlu1 %5697  ;;  %v5706_v38 = vpop.permute.xlu0 %5705 }
 0x661   : > { %7197 = vrot.lane.b32.xlu0 %v18554_v21, %s13211_s22  ;;  %v13134_v21 = vld [vmem:[%s18098_s2 + $0x78] sm:$0xff] }
 0x662   : > { %12045 = vmatmul.mubr.msk.f32.vlgmr.msra.gmra.mxu0 %vm761_vm1, %v18601_v47 }
 0x663   : > { %12109 = vmatpush3.xpose.msk.msra.mxu1 %vm761_vm1, %v5827_v13  ;;  %12065 = vmatpush3.xpose.msk.msra.mxu0 %vm761_vm1, %v18598_v55 }
 0x664   : > { %7674 = vrot.lane.b32.xlu1 %v18544_v41, %s13212_s12  ;;  %12047 = vmatprep.mubr.msk.f32.mxu0 %vm761_vm1, %v18602_v3  ;;  %v15787_v17 = vpop.permute.xlu1 %5945  ;;  %v5470_v30 = vpop.permute.xlu0 %5469 }
 0x665   : > { %7195 = vrot.lane.b32.xlu0 %v18560_v14, %s13211_s22  ;;  %12066 = vmatprep.subr.msk.mxu0 %vm761_vm1, %v18603_v15 }
 0x666   : > { %12048 = vmatmul.mubr.msk.f32.gmra.mxu0 %vm761_vm1, %v18604_v7 }
 0x667   : > { %12067 = vmatpush3.xpose.msk.msra.mxu0 %vm761_vm1, %v18603_v15  ;;  %12072 = vmatprep.mubr.msk.f32.mxu0 %vm761_vm1, %v18605_v8 }
 0x668   : > { %7313 = vrot.lane.b32.xlu1 %v18565_v20, %s13213_s28  ;;  %12068 = vmatprep.subr.msk.mxu0 %vm761_vm1, %v18606_v61  ;;  %v5585_v52 = vpop.permute.xlu1 %5584  ;;  %v5825_v22 = vpop.permute.xlu0 %5824 }
 0x669   : > { %7440 = vrot.lane.b32.xlu0 %v18569_v44, %s13212_s12  ;;  %12089 = vmatprep.mubr.msk.f32.mxu1 %vm761_vm1, %v5585_v52 }
 0x66a   : > { %12110 = vmatprep.subr.msk.mxu1 %vm761_vm1, %v5825_v22 }
 0x66b   : > { %12069 = vmatpush3.xpose.msk.msra.mxu0 %vm761_vm1, %v18606_v61  ;;  %12111 = vmatpush3.xpose.msk.msra.mxu1 %vm761_vm1, %v5825_v22 }
 0x66c   : > { %7672 = vrot.lane.b32.xlu1 %v13433_v2, %s13212_s12  ;;  %12070 = vmatprep.subr.msk.mxu0 %vm761_vm1, %v18607_v11  ;;  %v5823_v50 = vpop.permute.xlu1 %5822  ;;  %v5700_v55 = vpop.permute.xlu0 %5699 }
 0x66d   : > { %7438 = vrot.lane.b32.xlu0 %v18580_v9, %s13212_s12  ;;  %12112 = vmatprep.subr.msk.mxu1 %vm761_vm1, %v5823_v50 }
 0x66f   : > { %12071 = vmatpush3.xpose.msk.msra.mxu0 %vm761_vm1, %v18607_v11  ;;  %12113 = vmatpush3.xpose.msk.msra.mxu1 %vm761_vm1, %v5823_v50 }
 0x670   : > { %7543 = vrot.lane.b32.xlu1 %v18593_v10, %s13213_s28  ;;  %12092 = vmatprep.subr.msk.mxu0 %vm761_vm1, %v18608_v37  ;;  %v5815_v53 = vpop.permute.xlu1 %5814  ;;  %v5587_v48 = vpop.permute.xlu0 %5586 }
 0x671   : > { %7436 = vrot.lane.b32.xlu0 %v18574_v0, %s13212_s12  ;;  %12090 = vmatmul.mubr.msk.f32.gmra.mxu1 %vm761_vm1, %v5587_v48 }
 0x672   : > { %12073 = vmatmul.mubr.msk.f32.vlgmr.msra.gmra.mxu0 %vm761_vm1, %v15730_v51  ;;  %12114 = vmatprep.mubr.msk.f32.mxu1 %vm761_vm1, %v5815_v53 }
 0x673   : > { %12075 = vmatprep.mubr.msk.f32.mxu0 %vm761_vm1, %v5468_v29  ;;  %12093 = vmatpush3.xpose.msk.msra.mxu0 %vm761_vm1, %v18608_v37 }
 0x674   : > { %7791 = vrot.lane.b32.xlu1 %v18555_v43, %s13212_s12  ;;  %12094 = vmatprep.subr.msk.mxu0 %vm761_vm1, %v15738_v25  ;;  %v5942_v31 = vpop.permute.xlu1 %5941  ;;  %v5944_v42 = vpop.permute.xlu0 %5943 }
 0x675   : > { %7311 = vrot.lane.b32.xlu0 %v18575_v32, %s13213_s28 }
 0x676   : > { %12076 = vmatmul.mubr.msk.f32.gmra.mxu0 %vm761_vm1, %v5470_v30  ;;  %v15911_v52 = vpop.f32.mrf.mxu1 }
 0x677   : > { %12095 = vmatpush3.xpose.msk.msra.mxu0 %vm761_vm1, %v15738_v25  ;;  %12100 = vmatprep.mubr.msk.f32.mxu0 %vm761_vm1, %v5698_v26  ;;  %18610 = vst [vmem:[#allocation18_spill] sm:$0xff] %v15911_v52 }
 0x678   : > { %7430 = vrot.lane.b32.xlu1 %v18580_v9, %s13213_s28  ;;  %12096 = vmatprep.subr.msk.mxu0 %vm761_vm1, %v15757_v40  ;;  %v5704_v51 = vpop.permute.xlu1 %5703  ;;  %v5817_v54 = vpop.permute.xlu0 %5816 }
 0x679   : > { %7555 = vrot.lane.b32.xlu0 %v13413_v58, %s13212_s12  ;;  %12115 = vmatmul.mubr.msk.f32.vlgmr.msra.gmra.mxu1 %vm761_vm1, %v5817_v54  ;;  %v15913_v22 = vpop.f32.mrf.mxu1 }
 0x67a   : > { %18611 = vst [vmem:[#allocation17_spill] sm:$0xff] %v15913_v22 }
 0x67b   : > { %12097 = vmatpush3.xpose.msk.msra.mxu0 %vm761_vm1, %v15757_v40  ;;  %v15915_v11 = vpop.f32.mrf.mxu1 }
 0x67c   : > { %7668 = vrot.lane.b32.xlu1 %v18599_v5, %s13212_s12  ;;  %12098 = vmatprep.subr.msk.mxu0 %vm761_vm1, %v5706_v38  ;;  %v5932_v25 = vpop.permute.xlu1 %5931  ;;  %v5702_v29 = vpop.permute.xlu0 %5701  ;;  %18612 = vst [vmem:[#allocation13_spill] sm:$0xff] %v15915_v11  ;;  %v13118_v11 = vld [vmem:[%s18098_s2 + $0x18] sm:$0xff] }
 0x67d   : > { %7553 = vrot.lane.b32.xlu0 %v18579_v36, %s13212_s12  ;;  %v15917_v50 = vpop.f32.mrf.mxu1 }
 0x67e   : > { %18613 = vst [vmem:[#allocation65_spill] sm:$0xff] %v15917_v50 }
 0x67f   : > { %12099 = vmatpush3.xpose.msk.msra.mxu0 %vm761_vm1, %v5706_v38 }
 0x680   : > { %7660 = vrot.lane.b32.xlu1 %v18599_v5, %s13213_s28  ;;  %12120 = vmatprep.subr.msk.mxu0 %vm761_vm1, %v15787_v17  ;;  %v5819_v35 = vpop.permute.xlu1 %5818  ;;  %v5940_v40 = vpop.permute.xlu0 %5939 }
 0x681   : > { %7428 = vrot.lane.b32.xlu0 %v18574_v0, %s13213_s28  ;;  %12117 = vmatprep.mubr.msk.f32.mxu1 %vm761_vm1, %v5819_v35 }
 0x682   : > { %12101 = vmatmul.mubr.msk.f32.vlgmr.msra.gmra.mxu0 %vm761_vm1, %v5700_v55 }
 0x683   : > { %12103 = vmatprep.mubr.msk.f32.mxu0 %vm761_vm1, %v5702_v29  ;;  %12121 = vmatpush3.xpose.msk.msra.mxu0 %vm761_vm1, %v15787_v17 }
 0x684   : > { %7787 = vrot.lane.b32.xlu1 %v18541_v59, %s13212_s12  ;;  %12122 = vmatprep.subr.msk.mxu0 %vm761_vm1, %v5944_v42  ;;  %v5936_v16 = vpop.permute.xlu1 %5935  ;;  %v5934_v12 = vpop.permute.xlu0 %5933 }
 0x685   : > { %7551 = vrot.lane.b32.xlu0 %v18593_v10, %s13212_s12 }
 0x686   : > { %12104 = vmatmul.mubr.msk.f32.gmra.mxu0 %vm761_vm1, %v5704_v51 }
 0x687   : > { %12123 = vmatpush3.xpose.msk.msra.mxu0 %vm761_vm1, %v5944_v42  ;;  %12128 = vmatprep.mubr.msk.f32.mxu0 %vm761_vm1, %v5932_v25 }
 0x688   : > { %7547 = vrot.lane.b32.xlu1 %v13413_v58, %s13213_s28  ;;  %12124 = vmatprep.subr.msk.mxu0 %vm761_vm1, %v5942_v31  ;;  %v6437_v13 = vpop.permute.xlu1 %6436  ;;  %v5821_v63 = vpop.permute.xlu0 %5820 }
 0x689   : > { %7315 = vrot.lane.b32.xlu0 %v18572_v28, %s13213_s28  ;;  %12118 = vmatmul.mubr.msk.f32.gmra.mxu1 %vm761_vm1, %v5821_v63 }
 0x68a   : > { %v15919_v55 = vpop.f32.mrf.mxu1 }
 0x68b   : > { %12125 = vmatpush3.xpose.msk.msra.mxu0 %vm761_vm1, %v5942_v31  ;;  %18614 = vst [vmem:[#allocation52_spill] sm:$0xff] %v15919_v55 }
 0x68c   : > { %12126 = vmatprep.subr.msk.mxu0 %vm761_vm1, %v5940_v40  ;;  %v6433_v39 = vpop.permute.xlu1 %6432  ;;  %v5938_v1 = vpop.permute.xlu0 %5937 }
 0x68d   : > { %7670 = vrot.lane.b32.xlu0 %v13438_v4, %s13212_s12  ;;  %v15921_v37 = vpop.f32.mrf.mxu1 }
 0x68e   : > { %18615 = vst [vmem:[#allocation70_spill] sm:$0xff] %v15921_v37  ;;  %v13117_v37 = vld [vmem:[%s18098_s2] sm:$0xff] }
 0x68f   : > { %12127 = vmatpush3.xpose.msk.msra.mxu0 %vm761_vm1, %v5940_v40 }
 0x690   : > { %v6548_v26 = vpop.permute.xlu1 %6547  ;;  %v6439_v38 = vpop.permute.xlu0 %6438 }
 0x691   : > { %7545 = vrot.lane.b32.xlu0 %v18579_v36, %s13213_s28  ;;  %12148 = vmatprep.subr.mxu0 %v6548_v26 }
 0x692   : > { %12129 = vmatmul.mubr.msk.f32.vlgmr.msra.gmra.mxu0 %vm761_vm1, %v5934_v12  ;;  %12134 = vmatprep.subr.mxu1 %v6439_v38 }
 0x693   : > { %12131 = vmatprep.mubr.msk.f32.mxu0 %vm761_vm1, %v5936_v16  ;;  %12135 = vmatpush3.msra.mxu1 %v6439_v38  ;;  %v15961_v38 = vld [vmem:[%s18097_s1 + $0x40] sm:$0xff] }
 0x694   : > { %12149 = vmatpush3.msra.mxu0 %v6548_v26  ;;  %12136 = vmatprep.subr.mxu1 %v6437_v13  ;;  %v15892_v47 = vpop.permute.xlu1 %6656  ;;  %v6435_v3 = vpop.permute.xlu0 %6434 }
 0x695   : > { %7432 = vrot.lane.b32.xlu0 %v18569_v44, %s13213_s28  ;;  %12137 = vmatpush3.msra.mxu1 %v6437_v13 }
 0x696   : > { %12132 = vmatmul.mubr.msk.f32.gmra.mxu0 %vm761_vm1, %v5938_v1  ;;  %12138 = vmatprep.subr.mxu1 %v6435_v3  ;;  %v15956_v1 = vld [vmem:[%s18097_s1 + $0x48] sm:$0xff] }
 0x697   : > { %12139 = vmatpush3.msra.mxu1 %v6435_v3 }
 0x698   : > { %12140 = vmatprep.subr.mxu1 %v6433_v39  ;;  %v6544_v17 = vpop.permute.xlu1 %6543  ;;  %v6546_v30 = vpop.permute.xlu0 %6545 }
 0x699   : > { %7789 = vrot.lane.b32.xlu0 %v18543_v34, %s13212_s12  ;;  %12141 = vmatpush3.msra.mxu1 %v6433_v39 }
 0x69a   : > { %12150 = vmatprep.subr.mxu0 %v6546_v30  ;;  %12162 = vmatprep.subr.mxu1 %v15892_v47 }
 0x69b   : > { %12151 = vmatpush3.msra.mxu0 %v6546_v30 }
 0x69c   : > { %12152 = vmatprep.subr.mxu0 %v6544_v17  ;;  %v15902_v15 = vpop.permute.xlu1 %6652  ;;  %v15904_v7 = vpop.permute.xlu0 %6654 }
 0x69d   : > { %7662 = vrot.lane.b32.xlu0 %v13438_v4, %s13213_s28  ;;  %12153 = vmatpush3.msra.mxu0 %v6544_v17 }
 0x6a0   : > { %v6542_v8 = vpop.permute.xlu0 %6541  ;;  %v15908_v61 = vpop.permute.xlu1 %6765 }
 0x6a1   : > { %7908 = vrot.lane.b32.xlu0 %v18558_v33, %s13212_s12  ;;  %12154 = vmatprep.subr.mxu0 %v6542_v8  ;;  %18609 = vst [vmem:[#allocation20_spill] sm:$0xff] %v15908_v61 }
 0x6a2   : > { %12155 = vmatpush3.msra.mxu0 %v6542_v8 }
 0x6a3   : > { %12176 = vmatprep.subr.mxu0 %v15908_v61 }
 0x6a4   : > { %v15923_v53 = vpop.permute.xlu0 %6650  ;;  %v15966_v30 = vpop.permute.xlu1 %6874 }
 0x6a5   : > { %v15925_v48 = vpop.f32.mrf.mxu1 }
 0x6a6   : > { %18616 = vst [vmem:[#allocation32_spill] sm:$0xff] %v15925_v48  ;;  %v15971_v48 = vld [vmem:[%s18097_s1 + $0x58] sm:$0xff] }
 0x6a7   : > { %v15927_v31 = vpop.f32.mrf.mxu1 }
 0x6a8   : > { %18617 = vst [vmem:[#allocation36_spill] sm:$0xff] %v15927_v31  ;;  %v15929_v42 = vpop.permute.xlu0 %6763  ;;  %v13116_v31 = vld [vmem:[%s18098_s2 + $0x8] sm:$0xff] }
 0x6a9   : > { %18618 = vst [vmem:[#allocation55_spill] sm:$0xff] %v15929_v42 }
 0x6ac   : > { %v15935_v25 = vpop.permute.xlu0 %6872 }
 0x6ad   : > { %v15931_v51 = vpop.f32.mrf.mxu1 }
 0x6ae   : > { %18619 = vst [vmem:[#allocation40_spill] sm:$0xff] %v15931_v51 }
 0x6af   : > { %v15933_v54 = vpop.f32.mrf.mxu1 }
 0x6b0   : > { %18620 = vst [vmem:[#allocation49_spill] sm:$0xff] %v15933_v54  ;;  %v15941_v40 = vpop.permute.xlu0 %6761 }
 0x6b1   : > { %18623 = vst [vmem:[#allocation58_spill] sm:$0xff] %v15941_v40  ;;  %v13135_v40 = vld [vmem:[%s18098_s2 + $0xc8] sm:$0xff] }
 0x6b4   : > { %v15947_v13 = vpop.permute.xlu0 %6759 }
 0x6b5   : > { %18626 = vst [vmem:[#allocation71_spill] sm:$0xff] %v15947_v13 }
 0x6b8   : > { %v15963_v3 = vpop.permute.xlu0 %6868 }
 0x6c1   : > { %v15937_v29 = vpop.f32.mrf.mxu1 }
 0x6c2   : > { %18621 = vst [vmem:[#allocation50_spill] sm:$0xff] %v15937_v29 }
 0x6c3   : > { %v15939_v35 = vpop.f32.mrf.mxu1 }
 0x6c4   : > { %18622 = vst [vmem:[#allocation56_spill] sm:$0xff] %v15939_v35  ;;  %v16017_v35 = vpop.f32.mrf.mxu0 }
 0x6c5   : > { %18632 = vst [vmem:[#allocation92_spill] sm:$0xff] %v16017_v35  ;;  %v13121_v35 = vld [vmem:[%s18098_s2 + $0x40] sm:$0xff] }
 0x6c6   : > { %v16024_v54 = vpop.f32.mrf.mxu0 }
 0x6c7   : > { %18634 = vst [vmem:[#allocation95_spill] sm:$0xff] %v16024_v54 }
 0x6c8   : > { %v16032_v36 = vpop.f32.mrf.mxu0 }
 0x6c9   : > { %18635 = vst [vmem:[#allocation62_spill] sm:$0xff] %v16032_v36 }
 0x6cc   : > { %v15943_v16 = vpop.f32.mrf.mxu1 }
 0x6cd   : > { %18624 = vst [vmem:[#allocation54_spill] sm:$0xff] %v15943_v16 }
 0x6ce   : > { %v15945_v12 = vpop.f32.mrf.mxu1 }
 0x6cf   : > { %18625 = vst [vmem:[#allocation69_spill] sm:$0xff] %v15945_v12 }
 0x6db   : > { %v15949_v63 = vpop.f32.mrf.mxu1 }
 0x6dc   : > { %18627 = vst [vmem:[#allocation77_spill] sm:$0xff] %v15949_v63 }
 0x6dd   : > { %v15951_v39 = vpop.f32.mrf.mxu1 }
 0x6de   : > { %18628 = vst [vmem:[#allocation80_spill] sm:$0xff] %v15951_v39 }
 0x6df   : > { %v12032_v26 = vpop.f32.mrf.mxu1 }
 0x6e0   : > { %v5216_v17 = vadd.f32 %v12032_v26, %v15956_v1  ;;  %v15982_v26 = vld [vmem:[%s18097_s1 + $0x50] sm:$0xff] }
 0x6e1   : > { %v5210_v8 = vpop.f32.mrf.mxu1 }
 0x6e2   : > { %v15976_v63 = vadd.f32 %v13116_v31, %v5216_v17  ;;  %v5211_v55 = vadd.f32 %v15961_v38, %v5210_v8  ;;  %v15992_v8 = vpop.permute.xlu0 %6981 }
 0x6e3   : > { %v12035_v39 = vpop.f32.mrf.mxu1  ;;  %18629 = vst [vmem:[#allocation84_spill] sm:$0xff] %v15992_v8 }
 0x6e4   : > { %v15987_v16 = vadd.f32 %v13117_v37, %v5211_v55  ;;  %v5226_v12 = vadd.f32 %v12035_v39, %v15971_v48  ;;  %v6083_v31 = vsel %vm391_vm0, %v15976_v63, -inf  ;;  %v16002_v37 = vpop.permute.xlu1 %6870  ;;  %v13119_v39 = vld [vmem:[%s18098_s2 + $0x10] sm:$0xff] }
 0x6e5   : > { %v5220_v17 = vpop.f32.mrf.mxu1  ;;  %6084 = vmax.xlane.f32.xlu0 %v6083_v31 }
 0x6e6   : > { %v15997_v50 = vadd.f32 %v13118_v11, %v5226_v12  ;;  %v5221_v29 = vadd.f32 %v15982_v26, %v5220_v17  ;;  %v6080_v55 = vsel %vm391_vm0, %v15987_v16, -inf  ;;  %v16013_v12 = vpop.permute.xlu0 %6979 }
 0x6e7   : > { %6081 = vmax.xlane.f32.xlu1 %v6080_v55  ;;  %18630 = vst [vmem:[#allocation82_spill] sm:$0xff] %v16013_v12 }
 0x6e8   : > { %v16007_v31 = vadd.f32 %v13119_v39, %v5221_v29  ;;  %v6089_v52 = vsel %vm391_vm0, %v15997_v50, -inf  ;;  %v16015_v17 = vpop.permute.xlu1 %6983 }
 0x6e9   : > { %18631 = vst [vmem:[#allocation85_spill] sm:$0xff] %v16015_v17 }
 0x6ea   : > { %v6086_v11 = vsel %vm391_vm0, %v16007_v31, -inf  ;;  %v16019_v22 = vpop.permute.xlu0 %7088 }
 0x6eb   : > { %6090 = vmax.xlane.f32.xlu1 %v6089_v52  ;;  %6087 = vmax.xlane.f32.xlu0 %v6086_v11  ;;  %18633 = vst [vmem:[#allocation87_spill] sm:$0xff] %v16019_v22  ;;  %v13120_v52 = vld [vmem:[%s18098_s2 + $0x48] sm:$0xff] }
 0x6ec   : > { %v16022_v39 = vpop.permute.xlu1 %7092 }
 0x6ee   : > { %v16041_v54 = vpop.permute.xlu0 %6977 }
 0x6ef   : > { %18636 = vst [vmem:[#allocation89_spill] sm:$0xff] %v16041_v54 }
 0x6f0   : > { %v16043_v45 = vpop.permute.xlu1 %7090 }
 0x6f1   : > { %v12060_v55 = vpop.f32.mrf.mxu1  ;;  %18637 = vst [vmem:[#allocation96_spill] sm:$0xff] %v16043_v45 }
 0x6f2   : > { %v5450_v29 = vadd.f32 %v12060_v55, %v15956_v1  ;;  %v16051_v36 = vpop.permute.xlu0 %7086 }
 0x6f3   : > { %v5444_v51 = vpop.f32.mrf.mxu1  ;;  %18640 = vst [vmem:[#allocation72_spill] sm:$0xff] %v16051_v36 }
 0x6f4   : > { %v16029_v11 = vadd.f32 %v13120_v52, %v5450_v29  ;;  %v5445_v5 = vadd.f32 %v15961_v38, %v5444_v51  ;;  %v16045_v29 = vpop.f32.mrf.mxu0 }
 0x6f5   : > { %18638 = vst [vmem:[#allocation61_spill] sm:$0xff] %v16045_v29 }
 0x6f6   : > { %v16037_v55 = vadd.f32 %v13121_v35, %v5445_v5  ;;  %v6107_v10 = vsel %vm391_vm0, %v16029_v11, -inf  ;;  %v16049_v52 = vpop.f32.mrf.mxu0  ;;  %v16053_v5 = vpop.permute.xlu1 %7201 }
 0x6f7   : > { %6108 = vmax.xlane.f32.xlu1 %v6107_v10  ;;  %18639 = vst [vmem:[#allocation93_spill] sm:$0xff] %v16049_v52  ;;  %18641 = vst [vmem:[#allocation79_spill] sm:$0xff] %v16053_v5  ;;  %v16059_v10 = vpop.permute.xlu0 %7323  ;;  %v13125_v5 = vld [vmem:[%s18098_s2 + $0x80] sm:$0xff] }
 0x6f8   : > { %v6104_v51 = vsel %vm391_vm0, %v16037_v55, -inf  ;;  %v16055_v35 = vpop.f32.mrf.mxu0  ;;  %18644 = vst [vmem:[#allocation99_spill] sm:$0xff] %v16059_v10 }
 0x6f9   : > { %18642 = vst [vmem:[#allocation98_spill] sm:$0xff] %v16055_v35 }
 0x6fa   : > { %v16057_v4 = vpop.f32.mrf.mxu0  ;;  %v16061_v32 = vpop.permute.xlu1 %7199 }
 0x6fb   : > { %6105 = vmax.xlane.f32.xlu1 %v6104_v51  ;;  %18643 = vst [vmem:[#allocation81_spill] sm:$0xff] %v16057_v4  ;;  %18645 = vst [vmem:[#allocation102_spill] sm:$0xff] %v16061_v32  ;;  %v16067_v9 = vpop.permute.xlu0 %7197 }
 0x6fc   : > { %v16063_v58 = vpop.f32.mrf.mxu0  ;;  %18648 = vst [vmem:[#allocation86_spill] sm:$0xff] %v16067_v9 }
 0x6fd   : > { %18646 = vst [vmem:[#allocation83_spill] sm:$0xff] %v16063_v58 }
 0x6fe   : > { %v16065_v29 = vpop.f32.mrf.mxu0  ;;  %v16069_v51 = vpop.permute.xlu1 %7321 }
 0x6ff   : > { %18647 = vst [vmem:[#allocation105_spill] sm:$0xff] %v16065_v29  ;;  %18649 = vst [vmem:[#allocation90_spill] sm:$0xff] %v16069_v51  ;;  %v16073_v28 = vpop.permute.xlu0 %7195 }
 0x700   : > { %v16071_v52 = vpop.f32.mrf.mxu0  ;;  %18651 = vst [vmem:[#allocation91_spill] sm:$0xff] %v16073_v28 }
 0x701   : > { %18650 = vst [vmem:[#allocation88_spill] sm:$0xff] %v16071_v52  ;;  %v13122_v52 = vld [vmem:[%s18098_s2 + $0x58] sm:$0xff] }
 0x702   : > { %v16075_v62 = vpop.f32.mrf.mxu0  ;;  %v16077_v35 = vpop.permute.xlu1 %7319 }
 0x703   : > { %18652 = vst [vmem:[#allocation100_spill] sm:$0xff] %v16075_v62  ;;  %18653 = vst [vmem:[#allocation94_spill] sm:$0xff] %v16077_v35  ;;  %v16081_v32 = vpop.permute.xlu0 %7440 }
 0x704   : > { %v16079_v4 = vpop.f32.mrf.mxu0  ;;  %18655 = vst [vmem:[#allocation104_spill] sm:$0xff] %v16081_v32 }
 0x705   : > { %18654 = vst [vmem:[#allocation103_spill] sm:$0xff] %v16079_v4  ;;  %v13123_v4 = vld [vmem:[%s18098_s2 + $0x50] sm:$0xff] }
 0x706   : > { %v16084_v29 = vpop.permute.xlu1 %7317  ;;  %v16086_v20 = vpop.f32.mrf.mxu0 }
 0x707   : > { %18656 = vst [vmem:[#allocation97_spill] sm:$0xff] %v16084_v29  ;;  %18657 = vst [vmem:[#allocation101_spill] sm:$0xff] %v16086_v20  ;;  %v16101_v29 = vpop.permute.xlu0 %7438 }
 0x708   : > { %18658 = vst [vmem:[#allocation106_spill] sm:$0xff] %v16101_v29  ;;  %v16103_v20 = vpop.f32.mrf.mxu0 }
 0x709   : > { %18659 = vst [vmem:[#allocation107_spill] sm:$0xff] %v16103_v20 }
 0x70a   : > { %v16105_v35 = vpop.permute.xlu1 %7309 }
 0x70b   : > { %18660 = vst [vmem:[#allocation108_spill] sm:$0xff] %v16105_v35  ;;  %v16120_v35 = vpop.permute.xlu0 %7436 }
 0x70c   : > { %18663 = vst [vmem:[#allocation111_spill] sm:$0xff] %v16120_v35 }
 0x70e   : > { %v16130_v54 = vpop.permute.xlu1 %7557 }
 0x70f   : > { %18664 = vst [vmem:[#allocation112_spill] sm:$0xff] %v16130_v54  ;;  %v16148_v12 = vpop.permute.xlu0 %7311 }
 0x710   : > { %18665 = vst [vmem:[#allocation113_spill] sm:$0xff] %v16148_v12 }
 0x713   : > { %v16160_v8 = vpop.permute.xlu0 %7555 }
 0x714   : > { %18667 = vst [vmem:[#allocation115_spill] sm:$0xff] %v16160_v8 }
 0x715   : > { %v12063_v0 = vpop.f32.mrf.mxu1 }
 0x716   : > { %v5460_v58 = vadd.f32 %v12063_v0, %v15971_v48 }
 0x717   : > { %v5454_v9 = vpop.f32.mrf.mxu1  ;;  %v16175_v23 = vpop.permute.xlu0 %7553 }
 0x718   : > { %v16091_v28 = vadd.f32 %v13122_v52, %v5460_v58  ;;  %v5455_v62 = vadd.f32 %v15982_v26, %v5454_v9  ;;  %18669 = vst [vmem:[#allocation117_spill] sm:$0xff] %v16175_v23  ;;  %v13132_v23 = vld [vmem:[%s18098_s2 + $0x90] sm:$0xff] }
 0x71a   : > { %v16097_v32 = vadd.f32 %v13123_v4, %v5455_v62  ;;  %v6113_v0 = vsel %vm391_vm0, %v16091_v28, -inf }
 0x71b   : > { %6114 = vmax.xlane.f32.xlu1 %v6113_v0  ;;  %v13124_v0 = vld [vmem:[%s18098_s2 + $0x88] sm:$0xff] }
 0x71c   : > { %v6110_v9 = vsel %vm391_vm0, %v16097_v32, -inf }
 0x71e   : > { %v12088_v58 = vpop.f32.mrf.mxu1  ;;  %v16107_v52 = vpop.f32.mrf.mxu0 }
 0x71f   : > { %18661 = vst [vmem:[#allocation109_spill] sm:$0xff] %v16107_v52  ;;  %v5684_v51 = vadd.f32 %v12088_v58, %v15956_v1  ;;  %6111 = vmax.xlane.f32.xlu1 %v6110_v9 }
 0x720   : > { %v5678_v4 = vpop.f32.mrf.mxu1  ;;  %v16112_v62 = vpop.f32.mrf.mxu0 }
 0x721   : > { %18662 = vst [vmem:[#allocation110_spill] sm:$0xff] %v16112_v62  ;;  %v16117_v29 = vadd.f32 %v13124_v0, %v5684_v51  ;;  %v5679_v20 = vadd.f32 %v15961_v38, %v5678_v4  ;;  %v13126_v4 = vld [vmem:[%s18098_s2 + $0x28] sm:$0xff] }
 0x722   : > { %v12046_v52 = vpop.f32.mrf.mxu0 }
 0x723   : > { %v16125_v58 = vadd.f32 %v13125_v5, %v5679_v20  ;;  %v5333_v9 = vadd.f32 %v12046_v52, %v15956_v1  ;;  %v6131_v62 = vsel %vm391_vm0, %v16117_v29, -inf  ;;  %v13127_v20 = vld [vmem:[%s18098_s2 + $0x20] sm:$0xff] }
 0x724   : > { %6132 = vmax.xlane.f32.xlu1 %v6131_v62  ;;  %v5327_v51 = vpop.f32.mrf.mxu0 }
 0x725   : > { %v16135_v0 = vadd.f32 %v13126_v4, %v5333_v9  ;;  %v5328_v35 = vadd.f32 %v15961_v38, %v5327_v51  ;;  %v6128_v62 = vsel %vm391_vm0, %v16125_v58, -inf  ;;  %v16150_v51 = vpop.permute.xlu1 %7434 }
 0x726   : > { %v12049_v44 = vpop.f32.mrf.mxu0  ;;  %18666 = vst [vmem:[#allocation114_spill] sm:$0xff] %v16150_v51 }
 0x727   : > { %v16141_v5 = vadd.f32 %v13127_v20, %v5328_v35  ;;  %v5343_v52 = vadd.f32 %v12049_v44, %v15971_v48  ;;  %v6095_v54 = vsel %vm391_vm0, %v16135_v0, -inf  ;;  %v13128_v35 = vld [vmem:[%s18098_s2 + $0x38] sm:$0xff] }
 0x728   : > { %6129 = vmax.xlane.f32.xlu1 %v6128_v62  ;;  %v5337_v9 = vpop.f32.mrf.mxu0  ;;  %6096 = vmax.xlane.f32.xlu0 %v6095_v54  ;;  %v13129_v54 = vld [vmem:[%s18098_s2 + $0x30] sm:$0xff] }
 0x729   : > { %v16155_v4 = vadd.f32 %v13128_v35, %v5343_v52  ;;  %v5338_v44 = vadd.f32 %v15982_v26, %v5337_v9  ;;  %v6092_v20 = vsel %vm391_vm0, %v16141_v5, -inf  ;;  %v16169_v12 = vpop.permute.xlu1 %7426 }
 0x72a   : > { %18668 = vst [vmem:[#allocation116_spill] sm:$0xff] %v16169_v12 }
 0x72b   : > { %v16165_v62 = vadd.f32 %v13129_v54, %v5338_v44  ;;  %v6101_v51 = vsel %vm391_vm0, %v16155_v4, -inf  ;;  %v13130_v44 = vld [vmem:[%s18098_s2 + $0x98] sm:$0xff] }
 0x72c   : > { %6093 = vmax.xlane.f32.xlu0 %v6092_v20 }
 0x72d   : > { %v6098_v8 = vsel %vm391_vm0, %v16165_v62, -inf  ;;  %v16189_v13 = vpop.permute.xlu1 %7674 }
 0x72e   : > { %18670 = vst [vmem:[#allocation118_spill] sm:$0xff] %v16189_v13 }
 0x730   : > { %6102 = vmax.xlane.f32.xlu0 %v6101_v51 }
 0x731   : > { %v12091_v52 = vpop.f32.mrf.mxu1 }
 0x732   : > { %v12074_v9 = vpop.f32.mrf.mxu0  ;;  %v5694_v35 = vadd.f32 %v12091_v52, %v15971_v48  ;;  %v13131_v52 = vld [vmem:[%s18098_s2 + $0x68] sm:$0xff] }
 0x733   : > { %v5567_v20 = vadd.f32 %v12074_v9, %v15956_v1  ;;  %v5688_v14 = vpop.f32.mrf.mxu1 }
 0x734   : > { %v16180_v54 = vadd.f32 %v13130_v44, %v5694_v35  ;;  %v5561_v12 = vpop.f32.mrf.mxu0  ;;  %v5689_v51 = vadd.f32 %v15982_v26, %v5688_v14  ;;  %6099 = vmax.xlane.f32.xlu0 %v6098_v8  ;;  %v13133_v8 = vld [vmem:[%s18098_s2 + $0x60] sm:$0xff] }
 0x735   : > { %v16186_v9 = vadd.f32 %v13131_v52, %v5567_v20  ;;  %v5562_v17 = vadd.f32 %v15961_v38, %v5561_v12 }
 0x736   : > { %v16194_v35 = vadd.f32 %v13132_v23, %v5689_v51  ;;  %v12077_v44 = vpop.f32.mrf.mxu0  ;;  %v6137_v14 = vsel %vm391_vm0, %v16180_v54, -inf  ;;  %v16206_v23 = vpop.permute.xlu0 %7428 }
 0x737   : > { %v16201_v20 = vadd.f32 %v13133_v8, %v5562_v17  ;;  %v5577_v12 = vadd.f32 %v12077_v44, %v15971_v48  ;;  %6138 = vmax.xlane.f32.xlu1 %v6137_v14  ;;  %v6119_v52 = vsel %vm391_vm0, %v16186_v9, -inf  ;;  %18671 = vst [vmem:[#allocation119_spill] sm:$0xff] %v16206_v23 }
 0x738   : > { %v5571_v13 = vpop.f32.mrf.mxu0  ;;  %6120 = vmax.xlane.f32.xlu0 %v6119_v52  ;;  %v6134_v33 = vsel %vm391_vm0, %v16194_v35, -inf  ;;  %v16219_v52 = vpop.permute.xlu1 %7313 }
 0x739   : > { %v12116_v51 = vpop.f32.mrf.mxu1  ;;  %v16213_v17 = vadd.f32 %v13134_v21, %v5577_v12  ;;  %v5572_v44 = vadd.f32 %v15982_v26, %v5571_v13  ;;  %v6116_v8 = vsel %vm391_vm0, %v16201_v20, -inf  ;;  %18672 = vst [vmem:[#allocation120_spill] sm:$0xff] %v16219_v52  ;;  %v13136_v13 = vld [vmem:[%s18098_s2 + $0x70] sm:$0xff]  ;;  %v13137_v12 = vld [vmem:[%s18098_s2 + $0xc0] sm:$0xff] }
 0x73a   : > { %v5918_v14 = vadd.f32 %v12116_v51, %v15956_v1 }
 0x73b   : > { %6135 = vmax.xlane.f32.xlu1 %v6134_v33  ;;  %v5912_v23 = vpop.f32.mrf.mxu1  ;;  %v16230_v33 = vadd.f32 %v13136_v13, %v5572_v44 }
 0x73c   : > { %6117 = vmax.xlane.f32.xlu0 %v6116_v8  ;;  %v16224_v10 = vadd.f32 %v13135_v40, %v5918_v14  ;;  %v5913_v21 = vadd.f32 %v15961_v38, %v5912_v23  ;;  %v6125_v40 = vsel %vm391_vm0, %v16213_v17, -inf  ;;  %v16241_v14 = vpop.permute.xlu0 %7551  ;;  %v16243_v23 = vpop.permute.xlu1 %7672 }
 0x73d   : > { %18673 = vst [vmem:[#allocation121_spill] sm:$0xff] %v16241_v14  ;;  %18674 = vst [vmem:[#allocation122_spill] sm:$0xff] %v16243_v23 }
 0x73e   : > { %v16235_v51 = vadd.f32 %v13137_v12, %v5913_v21  ;;  %v6155_v8 = vsel %vm391_vm0, %v16224_v10, -inf  ;;  %v6122_v21 = vsel %vm391_vm0, %v16230_v33, -inf }
 0x73f   : > { %6156 = vmax.xlane.f32.xlu1 %v6155_v8 }
 0x740   : > { %6126 = vmax.xlane.f32.xlu0 %v6125_v40  ;;  %v6152_v13 = vsel %vm391_vm0, %v16235_v51, -inf  ;;  %v16249_v52 = vpop.permute.xlu0 %7315  ;;  %v16251_v42 = vpop.permute.xlu1 %7543 }
 0x741   : > { %18675 = vst [vmem:[#allocation123_spill] sm:$0xff] %v16249_v52  ;;  %18676 = vst [vmem:[#allocation124_spill] sm:$0xff] %v16251_v42 }
 0x742   : > { %v12102_v44 = vpop.f32.mrf.mxu0 }
 0x743   : > { %6153 = vmax.xlane.f32.xlu1 %v6152_v13  ;;  %v5801_v36 = vadd.f32 %v12102_v44, %v15956_v1  ;;  %v13138_v13 = vld [vmem:[%s18098_s2 + $0xd8] sm:$0xff]  ;;  %v13140_v44 = vld [vmem:[%s18098_s2 + $0xd0] sm:$0xff] }
 0x744   : > { %v5795_v12 = vpop.f32.mrf.mxu0  ;;  %6123 = vmax.xlane.f32.xlu0 %v6122_v21  ;;  %v16255_v23 = vpop.permute.xlu0 %7670 }
 0x745   : > { %18677 = vst [vmem:[#allocation125_spill] sm:$0xff] %v16255_v23  ;;  %v16264_v42 = vpop.permute.xlu1 %7791 }
 0x746   : > { %v12105_v57 = vpop.f32.mrf.mxu0  ;;  %18678 = vst [vmem:[#allocation126_spill] sm:$0xff] %v16264_v42 }
 0x747   : > { %v5811_v8 = vadd.f32 %v12105_v57, %v15971_v48  ;;  %v13139_v57 = vld [vmem:[%s18098_s2 + $0xb8] sm:$0xff] }
 0x748   : > { %v16286_v22 = vpop.permute.xlu0 %7545 }
 0x749   : > { %v12119_v14 = vpop.f32.mrf.mxu1  ;;  %18679 = vst [vmem:[#allocation127_spill] sm:$0xff] %v16286_v22  ;;  %v16291_v45 = vpop.permute.xlu1 %7430 }
 0x74a   : > { %v5928_v40 = vadd.f32 %v12119_v14, %v15971_v48  ;;  %v16269_v14 = vadd.f32 %v13139_v57, %v5811_v8  ;;  %v5796_v8 = vadd.f32 %v15961_v38, %v5795_v12  ;;  %18680 = vst [vmem:[#allocation128_spill] sm:$0xff] %v16291_v45 }
 0x74b   : > { %v5922_v61 = vpop.f32.mrf.mxu1 }
 0x74c   : > { %v16261_v21 = vadd.f32 %v13138_v13, %v5928_v40  ;;  %v5923_v52 = vadd.f32 %v15982_v26, %v5922_v61  ;;  %v5805_v13 = vpop.f32.mrf.mxu0  ;;  %v13141_v61 = vld [vmem:[%s18098_s2 + $0xa8] sm:$0xff] }
 0x74d   : > { %v16281_v42 = vadd.f32 %v13141_v61, %v5801_v36  ;;  %v13142_v36 = vld [vmem:[%s18098_s2 + $0xa0] sm:$0xff]  ;;  %v5806_v61 = vadd.f32 %v15982_v26, %v5805_v13  ;;  %v13144_v13 = vld [vmem:[%s18098_s2 + $0xb0] sm:$0xff] }
 0x74e   : > { %v16274_v23 = vadd.f32 %v13140_v44, %v5923_v52  ;;  %v6161_v40 = vsel %vm391_vm0, %v16261_v21, -inf  ;;  %v16296_v12 = vadd.f32 %v13142_v36, %v5796_v8  ;;  %v16309_v8 = vpop.permute.xlu0 %7432 }
 0x74f   : > { %6162 = vmax.xlane.f32.xlu1 %v6161_v40  ;;  %v6149_v40 = vsel %vm391_vm0, %v16269_v14, -inf  ;;  %18681 = vst [vmem:[#allocation129_spill] sm:$0xff] %v16309_v8  ;;  %v16314_v36 = vadd.f32 %v13144_v13, %v5806_v61 }
 0x750   : > { %v6158_v57 = vsel %vm391_vm0, %v16274_v23, -inf }
 0x751   : > { %6159 = vmax.xlane.f32.xlu0 %v6158_v57  ;;  %v13143_v57 = vld [vmem:[%s18098_s2 + $0xe8] sm:$0xff] }
 0x752   : > { %v12130_v52 = vpop.f32.mrf.mxu0  ;;  %v16336_v13 = vpop.permute.xlu0 %7789 }
 0x753   : > { %v6035_v44 = vadd.f32 %v12130_v52, %v15956_v1  ;;  %6150 = vmax.xlane.f32.xlu1 %v6149_v40  ;;  %v6143_v52 = vsel %vm391_vm0, %v16281_v42, -inf  ;;  %18683 = vst [vmem:[#allocation131_spill] sm:$0xff] %v16336_v13 }
 0x754   : > { %v6029_v49 = vpop.f32.mrf.mxu0 }
 0x755   : > { %v16302_v1 = vadd.f32 %v13143_v57, %v6035_v44  ;;  %6144 = vmax.xlane.f32.xlu0 %v6143_v52  ;;  %v6030_v44 = vadd.f32 %v15961_v38, %v6029_v49  ;;  %v13145_v57 = vld [vmem:[%s18098_s2 + $0xf8] sm:$0xff]  ;;  %v13146_v49 = vld [vmem:[%s18098_s2 + $0xe0] sm:$0xff] }
 0x756   : > { %v12133_v45 = vpop.f32.mrf.mxu0 }
 0x757   : > { %v6045_v40 = vadd.f32 %v12133_v45, %v15971_v48  ;;  %v6167_v22 = vsel %vm391_vm0, %v16302_v1, -inf  ;;  %v6140_v45 = vsel %vm391_vm0, %v16296_v12, -inf  ;;  %v16324_v48 = vpop.permute.xlu1 %7668  ;;  %v16331_v38 = vadd.f32 %v13146_v49, %v6030_v44  ;;  %v16347_v49 = vpop.permute.xlu0 %7662 }
 0x758   : > { %6168 = vmax.xlane.f32.xlu1 %v6167_v22  ;;  %18682 = vst [vmem:[#allocation130_spill] sm:$0xff] %v16324_v48  ;;  %v6039_v22 = vpop.f32.mrf.mxu0  ;;  %18685 = vst [vmem:[#allocation133_spill] sm:$0xff] %v16347_v49 }
 0x759   : > { %v16320_v52 = vadd.f32 %v13145_v57, %v6045_v40  ;;  %6141 = vmax.xlane.f32.xlu0 %v6140_v45  ;;  %v6040_v61 = vadd.f32 %v15982_v26, %v6039_v22  ;;  %v6146_v40 = vsel %vm391_vm0, %v16314_v36, -inf  ;;  %v6164_v44 = vsel %vm391_vm0, %v16331_v38, -inf }
 0x75b   : > { %v6173_v8 = vsel %vm391_vm0, %v16320_v52, -inf  ;;  %v16338_v57 = vpop.permute.xlu1 %7660 }
 0x75c   : > { %6174 = vmax.xlane.f32.xlu1 %v6173_v8  ;;  %18684 = vst [vmem:[#allocation132_spill] sm:$0xff] %v16338_v57  ;;  %v13147_v8 = vld [vmem:[%s18098_s2 + $0xf0] sm:$0xff] }
 0x75d   : > { %6147 = vmax.xlane.f32.xlu0 %v6146_v40  ;;  %v16343_v45 = vadd.f32 %v13147_v8, %v6040_v61  ;;  %v16353_v40 = vpop.permute.xlu0 %7908 }
 0x75e   : > { %18687 = vst [vmem:[#allocation135_spill] sm:$0xff] %v16353_v40 }
 0x75f   : > { %v6170_v26 = vsel %vm391_vm0, %v16343_v45, -inf  ;;  %v16351_v22 = vpop.permute.xlu1 %7787 }
 0x760   : > { %18686 = vst [vmem:[#allocation134_spill] sm:$0xff] %v16351_v22 }
 0x761   : > { %6165 = vmax.xlane.f32.xlu0 %v6164_v44 }
 0x763   : > { %v16355_v48 = vpop.permute.xlu1 %7547 }
 0x764   : > { %18688 = vst [vmem:[#allocation136_spill] sm:$0xff] %v16355_v48 }
 0x765   : > { %6171 = vmax.xlane.f32.xlu0 %v6170_v26 }
 0x76e   : > { %v6085_v57 = vpop.xlane.xlu0 %6084 }
 0x76f   : > { %v6177_v61 = vsub.f32 %v15976_v63, %v6085_v57 }
 0x770   : > { %v6082_v8 = vpop.xlane.xlu1 %6081 }
 0x771   : > { %v6210_v13 = vmul.f32 1.442695, %v6177_v61  ;;  %v6176_v27 = vsub.f32 %v15987_v16, %v6082_v8 }
 0x773   : > { %12828 = vpow2.f32 %v6210_v13  ;;  %v6208_v44 = vmul.f32 1.442695, %v6176_v27 }
 0x774   : > { %v6091_v49 = vpop.xlane.xlu1 %6090  ;;  %v6088_v43 = vpop.xlane.xlu0 %6087 }
 0x775   : > { %12830 = vpow2.f32 %v6208_v44  ;;  %v6179_v46 = vsub.f32 %v15997_v50, %v6091_v49  ;;  %v6178_v26 = vsub.f32 %v16007_v31, %v6088_v43 }
 0x777   : > { %v6214_v22 = vmul.f32 1.442695, %v6179_v46  ;;  %v6212_v40 = vmul.f32 1.442695, %v6178_v26 }
 0x779   : > { %12832 = vpow2.f32 %v6214_v22 }
 0x77a   : > { %12834 = vpow2.f32 %v6212_v40 }
 0x780   : > { %v16361_v48 = vpop.eup %12828  ;;  %v6109_v63 = vpop.xlane.xlu1 %6108 }
 0x781   : > { %v6185_v57 = vsub.f32 %v16029_v11, %v6109_v63  ;;  %v6275_v16 = vsel %vm391_vm0, %v16361_v48, 0.0 }
 0x782   : > { %v16366_v27 = vpop.eup %12830  ;;  %6276 = vadd.xlane.f32.xlu1 %v6275_v16 }
 0x783   : > { %v6226_v13 = vmul.f32 1.442695, %v6185_v57  ;;  %v6272_v50 = vsel %vm391_vm0, %v16366_v27, 0.0 }
 0x784   : > { %v6106_v43 = vpop.xlane.xlu1 %6105  ;;  %6273 = vadd.xlane.f32.xlu0 %v6272_v50 }
 0x785   : > { %12836 = vpow2.f32 %v6226_v13  ;;  %v6184_v46 = vsub.f32 %v16037_v55, %v6106_v43 }
 0x786   : > { %v16371_v31 = vpop.eup %12832 }
 0x787   : > { %v16373_v49 = vpop.eup %12834  ;;  %v6224_v11 = vmul.f32 1.442695, %v6184_v46  ;;  %v6281_v22 = vsel %vm391_vm0, %v16371_v31, 0.0 }
 0x788   : > { %6282 = vadd.xlane.f32.xlu1 %v6281_v22  ;;  %v6278_v40 = vsel %vm391_vm0, %v16373_v49, 0.0 }
 0x789   : > { %12838 = vpow2.f32 %v6224_v11  ;;  %6279 = vadd.xlane.f32.xlu0 %v6278_v40 }
 0x792   : > { %v16379_v61 = vpop.eup %12836 }
 0x793   : > { %v6299_v8 = vsel %vm391_vm0, %v16379_v61, 0.0 }
 0x794   : > { %6300 = vadd.xlane.f32.xlu1 %v6299_v8 }
 0x796   : > { %v16383_v55 = vpop.eup %12838 }
 0x797   : > { %v6296_v44 = vsel %vm391_vm0, %v16383_v55, 0.0 }
 0x798   : > { %6297 = vadd.xlane.f32.xlu1 %v6296_v44 }
 0x7a4   : > { %v6115_v26 = vpop.xlane.xlu1 %6114 }
 0x7a5   : > { %v6187_v63 = vsub.f32 %v16091_v28, %v6115_v26 }
 0x7a7   : > { %v6230_v57 = vmul.f32 1.442695, %v6187_v63 }
 0x7a8   : > { %v6112_v16 = vpop.xlane.xlu1 %6111 }
 0x7a9   : > { %12840 = vpow2.f32 %v6230_v57  ;;  %v6186_v13 = vsub.f32 %v16097_v32, %v6112_v16 }
 0x7ab   : > { %v6228_v50 = vmul.f32 1.442695, %v6186_v13 }
 0x7ad   : > { %12842 = vpow2.f32 %v6228_v50  ;;  %v6133_v43 = vpop.xlane.xlu1 %6132 }
 0x7ae   : > { %v6193_v46 = vsub.f32 %v16117_v29, %v6133_v43 }
 0x7b0   : > { %v6242_v11 = vmul.f32 1.442695, %v6193_v46 }
 0x7b1   : > { %v6130_v22 = vpop.xlane.xlu1 %6129  ;;  %v6097_v40 = vpop.xlane.xlu0 %6096 }
 0x7b2   : > { %12844 = vpow2.f32 %v6242_v11  ;;  %v6192_v8 = vsub.f32 %v16125_v58, %v6130_v22  ;;  %v6181_v44 = vsub.f32 %v16135_v0, %v6097_v40 }
 0x7b4   : > { %v6240_v24 = vmul.f32 1.442695, %v6192_v8  ;;  %v6218_v28 = vmul.f32 1.442695, %v6181_v44 }
 0x7b5   : > { %v6094_v26 = vpop.xlane.xlu0 %6093 }
 0x7b6   : > { %v16392_v63 = vpop.eup %12840  ;;  %12846 = vpow2.f32 %v6240_v24  ;;  %v6180_v32 = vsub.f32 %v16141_v5, %v6094_v26 }
 0x7b7   : > { %12848 = vpow2.f32 %v6218_v28  ;;  %v6305_v29 = vsel %vm391_vm0, %v16392_v63, 0.0 }
 0x7b8   : > { %v6216_v57 = vmul.f32 1.442695, %v6180_v32  ;;  %6306 = vadd.xlane.f32.xlu1 %v6305_v29 }
 0x7b9   : > { %v6103_v16 = vpop.xlane.xlu0 %6102 }
 0x7ba   : > { %v16397_v13 = vpop.eup %12842  ;;  %12850 = vpow2.f32 %v6216_v57  ;;  %v6183_v58 = vsub.f32 %v16155_v4, %v6103_v16 }
 0x7bb   : > { %v6302_v0 = vsel %vm391_vm0, %v16397_v13, 0.0 }
 0x7bc   : > { %v6222_v50 = vmul.f32 1.442695, %v6183_v58  ;;  %6303 = vadd.xlane.f32.xlu1 %v6302_v0 }
 0x7bd   : > { %v6100_v24 = vpop.xlane.xlu0 %6099 }
 0x7be   : > { %12852 = vpow2.f32 %v6222_v50  ;;  %v6182_v5 = vsub.f32 %v16165_v62, %v6100_v24 }
 0x7bf   : > { %v16403_v43 = vpop.eup %12844 }
 0x7c0   : > { %v6220_v46 = vmul.f32 1.442695, %v6182_v5  ;;  %v6139_v11 = vpop.xlane.xlu1 %6138  ;;  %v6323_v22 = vsel %vm391_vm0, %v16403_v43, 0.0 }
 0x7c1   : > { %v6195_v40 = vsub.f32 %v16180_v54, %v6139_v11  ;;  %6324 = vadd.xlane.f32.xlu1 %v6323_v22  ;;  %v6121_v4 = vpop.xlane.xlu0 %6120 }
 0x7c2   : > { %12854 = vpow2.f32 %v6220_v46  ;;  %v6189_v8 = vsub.f32 %v16186_v9, %v6121_v4 }
 0x7c3   : > { %v16409_v44 = vpop.eup %12846  ;;  %v6246_v28 = vmul.f32 1.442695, %v6195_v40 }
 0x7c4   : > { %v16411_v26 = vpop.eup %12848  ;;  %v6234_v62 = vmul.f32 1.442695, %v6189_v8  ;;  %v6136_v32 = vpop.xlane.xlu1 %6135  ;;  %v6320_v29 = vsel %vm391_vm0, %v16409_v44, 0.0 }
 0x7c5   : > { %12856 = vpow2.f32 %v6246_v28  ;;  %v6194_v57 = vsub.f32 %v16194_v35, %v6136_v32  ;;  %6321 = vadd.xlane.f32.xlu1 %v6320_v29  ;;  %v6287_v54 = vsel %vm391_vm0, %v16411_v26, 0.0  ;;  %v6118_v16 = vpop.xlane.xlu0 %6117 }
 0x7c6   : > { %12858 = vpow2.f32 %v6234_v62  ;;  %6288 = vadd.xlane.f32.xlu0 %v6287_v54  ;;  %v6188_v9 = vsub.f32 %v16201_v20, %v6118_v16 }
 0x7c7   : > { %v16419_v58 = vpop.eup %12850  ;;  %v6244_v0 = vmul.f32 1.442695, %v6194_v57 }
 0x7c8   : > { %v6232_v50 = vmul.f32 1.442695, %v6188_v9  ;;  %v6284_v24 = vsel %vm391_vm0, %v16419_v58, 0.0  ;;  %v6157_v5 = vpop.xlane.xlu1 %6156 }
 0x7c9   : > { %12860 = vpow2.f32 %v6244_v0  ;;  %v6127_v46 = vpop.xlane.xlu0 %6126  ;;  %v6201_v35 = vsub.f32 %v16224_v10, %v6157_v5 }
 0x7ca   : > { %12862 = vpow2.f32 %v6232_v50  ;;  %6285 = vadd.xlane.f32.xlu0 %v6284_v24  ;;  %v6191_v22 = vsub.f32 %v16213_v17, %v6127_v46 }
 0x7cb   : > { %v16424_v11 = vpop.eup %12852  ;;  %v6258_v40 = vmul.f32 1.442695, %v6201_v35 }
 0x7cc   : > { %v6293_v20 = vsel %vm391_vm0, %v16424_v11, 0.0  ;;  %v6154_v4 = vpop.xlane.xlu1 %6153  ;;  %v6238_v10 = vmul.f32 1.442695, %v6191_v22 }
 0x7cd   : > { %v6124_v8 = vpop.xlane.xlu0 %6123  ;;  %12864 = vpow2.f32 %v6258_v40  ;;  %v6200_v28 = vsub.f32 %v16235_v51, %v6154_v4 }
 0x7ce   : > { %6294 = vadd.xlane.f32.xlu0 %v6293_v20  ;;  %v6190_v62 = vsub.f32 %v16230_v33, %v6124_v8 }
 0x7cf   : > { %v16431_v32 = vpop.eup %12854  ;;  %v6256_v29 = vmul.f32 1.442695, %v6200_v28 }
 0x7d0   : > { %v6236_v57 = vmul.f32 1.442695, %v6190_v62  ;;  %v6290_v17 = vsel %vm391_vm0, %v16431_v32, 0.0 }
 0x7d1   : > { %12866 = vpow2.f32 %v6256_v29 }
 0x7d2   : > { %v16435_v54 = vpop.eup %12856  ;;  %6291 = vadd.xlane.f32.xlu0 %v6290_v17  ;;  %12868 = vpow2.f32 %v6236_v57 }
 0x7d3   : > { %v16437_v16 = vpop.eup %12858  ;;  %v6329_v51 = vsel %vm391_vm0, %v16435_v54, 0.0  ;;  %12870 = vpow2.f32 %v6238_v10 }
 0x7d4   : > { %6330 = vadd.xlane.f32.xlu1 %v6329_v51  ;;  %v6311_v33 = vsel %vm391_vm0, %v16437_v16, 0.0 }
 0x7d6   : > { %v16443_v9 = vpop.eup %12860  ;;  %6312 = vadd.xlane.f32.xlu0 %v6311_v33 }
 0x7d7   : > { %v16445_v0 = vpop.eup %12862  ;;  %v6326_v50 = vsel %vm391_vm0, %v16443_v9, 0.0 }
 0x7d8   : > { %6327 = vadd.xlane.f32.xlu1 %v6326_v50  ;;  %v6308_v24 = vsel %vm391_vm0, %v16445_v0, 0.0  ;;  %v6163_v5 = vpop.xlane.xlu1 %6162 }
 0x7d9   : > { %v6203_v46 = vsub.f32 %v16261_v21, %v6163_v5 }
 0x7da   : > { %6309 = vadd.xlane.f32.xlu0 %v6308_v24  ;;  %v16452_v35 = vpop.eup %12864  ;;  %v6160_v22 = vpop.xlane.xlu0 %6159 }
 0x7db   : > { %v6262_v40 = vmul.f32 1.442695, %v6203_v46  ;;  %v6202_v20 = vsub.f32 %v16274_v23, %v6160_v22  ;;  %v6347_v4 = vsel %vm391_vm0, %v16452_v35, 0.0 }
 0x7dc   : > { %v6151_v8 = vpop.xlane.xlu1 %6150  ;;  %6348 = vadd.xlane.f32.xlu1 %v6347_v4 }
 0x7dd   : > { %12872 = vpow2.f32 %v6262_v40  ;;  %v6260_v28 = vmul.f32 1.442695, %v6202_v20  ;;  %v6199_v62 = vsub.f32 %v16269_v14, %v6151_v8 }
 0x7de   : > { %v16458_v10 = vpop.eup %12866  ;;  %v6145_v29 = vpop.xlane.xlu0 %6144 }
 0x7df   : > { %v16460_v21 = vpop.eup %12868  ;;  %12874 = vpow2.f32 %v6260_v28  ;;  %v6197_v57 = vsub.f32 %v16281_v42, %v6145_v29  ;;  %v6344_v23 = vsel %vm391_vm0, %v16458_v10, 0.0  ;;  %v6254_v50 = vmul.f32 1.442695, %v6199_v62 }
 0x7e0   : > { %v16465_v17 = vpop.eup %12870  ;;  %6345 = vadd.xlane.f32.xlu1 %v6344_v23  ;;  %v6314_v33 = vsel %vm391_vm0, %v16460_v21, 0.0 }
 0x7e1   : > { %v6169_v51 = vpop.xlane.xlu1 %6168  ;;  %v6250_v14 = vmul.f32 1.442695, %v6197_v57  ;;  %6315 = vadd.xlane.f32.xlu0 %v6314_v33  ;;  %v6317_v42 = vsel %vm391_vm0, %v16465_v17, 0.0 }
 0x7e2   : > { %v6205_v24 = vsub.f32 %v16302_v1, %v6169_v51  ;;  %v6142_v5 = vpop.xlane.xlu0 %6141 }
 0x7e3   : > { %12876 = vpow2.f32 %v6250_v14  ;;  %v6196_v46 = vsub.f32 %v16296_v12, %v6142_v5 }
 0x7e4   : > { %6318 = vadd.xlane.f32.xlu1 %v6317_v42  ;;  %12878 = vpow2.f32 %v6254_v50  ;;  %v6266_v22 = vmul.f32 1.442695, %v6205_v24 }
 0x7e5   : > { %v6248_v40 = vmul.f32 1.442695, %v6196_v46 }
 0x7e6   : > { %v6148_v20 = vpop.xlane.xlu0 %6147 }
 0x7e7   : > { %12880 = vpow2.f32 %v6248_v40  ;;  %v6198_v4 = vsub.f32 %v16314_v36, %v6148_v20  ;;  %v6175_v20 = vpop.xlane.xlu1 %6174 }
 0x7e8   : > { %12882 = vpow2.f32 %v6266_v22 }
 0x7e9   : > { %v6252_v8 = vmul.f32 1.442695, %v6198_v4 }
 0x7ea   : > { %v16474_v28 = vpop.eup %12872  ;;  %v6166_v1 = vpop.xlane.xlu0 %6165 }
 0x7eb   : > { %12884 = vpow2.f32 %v6252_v8  ;;  %v6204_v62 = vsub.f32 %v16331_v38, %v6166_v1  ;;  %v6353_v12 = vsel %vm391_vm0, %v16474_v28, 0.0 }
 0x7ec   : > { %v16479_v29 = vpop.eup %12874  ;;  %6354 = vadd.xlane.f32.xlu1 %v6353_v12 }
 0x7ed   : > { %v6264_v57 = vmul.f32 1.442695, %v6204_v62  ;;  %v6350_v23 = vsel %vm391_vm0, %v16479_v29, 0.0 }
 0x7ee   : > { %6351 = vadd.xlane.f32.xlu0 %v6350_v23  ;;  %v6172_v4 = vpop.xlane.xlu0 %6171 }
 0x7ef   : > { %12886 = vpow2.f32 %v6264_v57  ;;  %v6207_v57 = vsub.f32 %v16320_v52, %v6175_v20 }
 0x7f0   : > { %v16483_v36 = vpop.eup %12876 }
 0x7f1   : > { %v6335_v51 = vsel %vm391_vm0, %v16483_v36, 0.0  ;;  %v16487_v33 = vpop.eup %12878 }
 0x7f2   : > { %6336 = vadd.xlane.f32.xlu1 %v6335_v51  ;;  %v6341_v50 = vsel %vm391_vm0, %v16487_v33, 0.0 }
 0x7f4   : > { %v16489_v38 = vpop.eup %12880 }
 0x7f5   : > { %v6332_v14 = vsel %vm391_vm0, %v16489_v38, 0.0  ;;  %v16495_v24 = vpop.eup %12882 }
 0x7f6   : > { %6342 = vadd.xlane.f32.xlu1 %v6341_v50  ;;  %6333 = vadd.xlane.f32.xlu0 %v6332_v14  ;;  %v6359_v46 = vsel %vm391_vm0, %v16495_v24, 0.0  ;;  %v6270_v50 = vmul.f32 1.442695, %v6207_v57  ;;  %v6206_v14 = vsub.f32 %v16343_v45, %v6172_v4 }
 0x7f8   : > { %v16497_v5 = vpop.eup %12884 }
 0x7f9   : > { %v6338_v42 = vsel %vm391_vm0, %v16497_v5, 0.0 }
 0x7fa   : > { %6360 = vadd.xlane.f32.xlu1 %v6359_v46  ;;  %6339 = vadd.xlane.f32.xlu0 %v6338_v42 }
 0x7fc   : > { %v16503_v22 = vpop.eup %12886 }
 0x7fd   : > { %v6356_v40 = vsel %vm391_vm0, %v16503_v22, 0.0 }
 0x7fe   : > { %6357 = vadd.xlane.f32.xlu0 %v6356_v40 }
 0x80b   : > { %v6277_v8 = vpop.xlane.xlu1 %6276  ;;  %7549 = vrot.lane.b32.xlu1 %v13408_v56, %s13213_s28 }
 0x80c   : > { %12888 = vrcp.f32 %v6277_v8 }
 0x80d   : > { %v6274_v1 = vpop.xlane.xlu0 %6273 }
 0x80e   : > { %12890 = vrcp.f32 %v6274_v1  ;;  %v6268_v1 = vmul.f32 1.442695, %v6206_v14  ;;  %v18690_v14 = vld [vmem:[#allocation22_spill] sm:$0xff] }
 0x811   : > { %v6283_v62 = vpop.xlane.xlu1 %6282 }
 0x812   : > { %12892 = vrcp.f32 %v6283_v62  ;;  %v6280_v12 = vpop.xlane.xlu0 %6279 }
 0x813   : > { %12894 = vrcp.f32 %v6280_v12 }
 0x814   : > { %7664 = vrot.lane.b32.xlu0 %v13433_v2, %s13213_s28  ;;  %12896 = vpow2.f32 %v6270_v50 }
 0x819   : > { %v12889_v23 = vpop.eup %12888 }
 0x81a   : > { %v6401_v42 = vmul.f32 %v12889_v23, %v16361_v48 }
 0x81b   : > { %v12891_v51 = vpop.eup %12890 }
 0x81c   : > { %v6400_v46 = vmul.f32 %v12891_v51, %v16366_v27  ;;  %v18689_v51 = vld [vmem:[#allocation21_spill] sm:$0xff] }
 0x81d   : > { %v6301_v40 = vpop.xlane.xlu1 %6300 }
 0x81e   : > { %12142 = vmatprep.mubr.msk.f32.mxu1 %vm391_vm0, %v6400_v46  ;;  %12898 = vrcp.f32 %v6301_v40  ;;  %v18691_v46 = vld [vmem:[#allocation16_spill] sm:$0xff] }
 0x81f   : > { %v12893_v8 = vpop.eup %12892  ;;  %12143 = vmatmul.mubr.msk.f32.vlgmr.msra.gmra.mxu1 %vm391_vm0, %v6401_v42 }
 0x820   : > { %v12895_v62 = vpop.eup %12894  ;;  %12163 = vmatpush3.msra.mxu1 %v15892_v47  ;;  %v6403_v52 = vmul.f32 %v12893_v8, %v16371_v31 }
 0x821   : > { %v6298_v20 = vpop.xlane.xlu1 %6297  ;;  %12164 = vmatprep.subr.mxu1 %v15904_v7  ;;  %v6402_v45 = vmul.f32 %v12895_v62, %v16373_v49  ;;  %v16529_v47 = vpop.eup %12896  ;;  %v18692_v62 = vld [vmem:[#allocation23_spill] sm:$0xff] }
 0x822   : > { %12900 = vrcp.f32 %v6298_v20  ;;  %12165 = vmatpush3.msra.mxu1 %v15904_v7  ;;  %v6365_v7 = vsel %vm391_vm0, %v16529_v47, 0.0 }
 0x823   : > { %12902 = vpow2.f32 %v6268_v1  ;;  %12145 = vmatprep.mubr.msk.f32.mxu1 %vm391_vm0, %v6402_v45  ;;  %12166 = vmatprep.subr.mxu1 %v15902_v15 }
 0x824   : > { %12146 = vmatmul.mubr.msk.f32.gmra.mxu1 %vm391_vm0, %v6403_v52 }
 0x825   : > { %12167 = vmatpush3.msra.mxu1 %v15902_v15 }
 0x826   : > { %12168 = vmatprep.subr.mxu1 %v15923_v53 }
 0x827   : > { %12169 = vmatpush3.msra.mxu1 %v15923_v53 }
 0x828   : > { %12190 = vmatprep.subr.mxu1 %v15966_v30 }
 0x82b   : > { %v12899_v48 = vpop.eup %12898 }
 0x82c   : > { %v6409_v15 = vmul.f32 %v12899_v48, %v16379_v61  ;;  %v18693_v48 = vld [vmem:[#allocation24_spill] sm:$0xff] }
 0x82f   : > { %v12901_v27 = vpop.eup %12900  ;;  %6366 = vadd.xlane.f32.xlu1 %v6365_v7 }
 0x830   : > { %v16533_v31 = vpop.eup %12902  ;;  %v6408_v49 = vmul.f32 %v12901_v27, %v16383_v55 }
 0x831   : > { %v6362_v53 = vsel %vm391_vm0, %v16533_v31, 0.0 }
 0x832   : > { %12170 = vmatprep.mubr.msk.f32.mxu1 %vm391_vm0, %v6408_v49 }
 0x833   : > { %12171 = vmatmul.mubr.msk.f32.vlgmr.msra.gmra.mxu1 %vm391_vm0, %v6409_v15  ;;  %6363 = vadd.xlane.f32.xlu0 %v6362_v53  ;;  %v18695_v15 = vld [vmem:[#allocation87_spill] sm:$0xff]  ;;  %v18697_v53 = vld [vmem:[#allocation20_spill] sm:$0xff] }
 0x834   : > { %12191 = vmatpush3.msra.mxu1 %v15966_v30 }
 0x835   : > { %12192 = vmatprep.subr.mxu1 %v15935_v25 }
 0x836   : > { %12193 = vmatpush3.msra.mxu1 %v15935_v25 }
 0x837   : > { %12194 = vmatprep.subr.mxu1 %v16002_v37 }
 0x838   : > { %12195 = vmatpush3.msra.mxu1 %v16002_v37 }
 0x839   : > { %12196 = vmatprep.subr.mxu1 %v15963_v3 }
 0x83a   : > { %12197 = vmatpush3.msra.mxu1 %v15963_v3 }
 0x83b   : > { %12218 = vmatprep.subr.mxu1 %v16022_v39 }
 0x840   : > { %7785 = vrot.lane.b32.xlu1 %v13443_v6, %s13212_s12 }
 0x841   : > { %v6307_v61 = vpop.xlane.xlu1 %6306 }
 0x842   : > { %12904 = vrcp.f32 %v6307_v61  ;;  %v18698_v61 = vld [vmem:[#allocation25_spill] sm:$0xff] }
 0x844   : > { %7777 = vrot.lane.b32.xlu1 %v13443_v6, %s13213_s28 }
 0x845   : > { %v6304_v30 = vpop.xlane.xlu1 %6303 }
 0x846   : > { %12906 = vrcp.f32 %v6304_v30 }
 0x848   : > { %7904 = vrot.lane.b32.xlu1 %v13473_v18, %s13212_s12 }
 0x849   : > { %7666 = vrot.lane.b32.xlu0 %v18544_v41, %s13213_s28 }
 0x84a   : > { %v6325_v25 = vpop.xlane.xlu1 %6324 }
 0x84b   : > { %12908 = vrcp.f32 %v6325_v25  ;;  %v18700_v25 = vld [vmem:[#allocation99_spill] sm:$0xff] }
 0x84c   : > { %7781 = vrot.lane.b32.xlu1 %v18543_v34, %s13213_s28 }
 0x84d   : > { %7906 = vrot.lane.b32.xlu0 %v13476_v19, %s13212_s12 }
 0x84e   : > { %v6322_v3 = vpop.xlane.xlu1 %6321 }
 0x84f   : > { %12910 = vrcp.f32 %v6322_v3  ;;  %v6289_v37 = vpop.xlane.xlu0 %6288  ;;  %v12905_v55 = vpop.eup %12904 }
 0x850   : > { %7902 = vrot.lane.b32.xlu1 %v18540_v60, %s13212_s12  ;;  %12912 = vrcp.f32 %v6289_v37  ;;  %v6411_v23 = vmul.f32 %v12905_v55, %v16392_v63  ;;  %v18701_v37 = vld [vmem:[#allocation58_spill] sm:$0xff] }
 0x851   : > { %7779 = vrot.lane.b32.xlu0 %v18541_v59, %s13213_s28  ;;  %v18702_v55 = vld [vmem:[#allocation26_spill] sm:$0xff] }
 0x853   : > { %v12907_v4 = vpop.eup %12906  ;;  %v6286_v12 = vpop.xlane.xlu0 %6285 }
 0x854   : > { %12914 = vrcp.f32 %v6286_v12  ;;  %v6410_v57 = vmul.f32 %v12907_v4, %v16397_v13  ;;  %7894 = vrot.lane.b32.xlu1 %v18540_v60, %s13213_s28 }
 0x855   : > { %8025 = vrot.lane.b32.xlu0 %v18689_v51, %s13212_s12 }
 0x856   : > { %12173 = vmatprep.mubr.msk.f32.mxu1 %vm391_vm0, %v6410_v57  ;;  %v18703_v57 = vld [vmem:[#allocation19_spill] sm:$0xff] }
 0x857   : > { %v6295_v50 = vpop.xlane.xlu0 %6294  ;;  %12174 = vmatmul.mubr.msk.f32.gmra.mxu1 %vm391_vm0, %v6411_v23 }
 0x858   : > { %8021 = vrot.lane.b32.xlu1 %v18690_v14, %s13212_s12  ;;  %v12909_v13 = vpop.eup %12908 }
 0x859   : > { %7783 = vrot.lane.b32.xlu0 %v18691_v46, %s13213_s28  ;;  %v6417_v1 = vmul.f32 %v12909_v13, %v16403_v43 }
 0x85b   : > { %v6292_v42 = vpop.xlane.xlu0 %6291 }
 0x85c   : > { %v12911_v40 = vpop.eup %12910  ;;  %12916 = vrcp.f32 %v6292_v42  ;;  %7898 = vrot.lane.b32.xlu1 %v13476_v19, %s13213_s28 }
 0x85d   : > { %12918 = vrcp.f32 %v6295_v50  ;;  %v6331_v63 = vpop.xlane.xlu1 %6330  ;;  %v6416_v8 = vmul.f32 %v12911_v40, %v16409_v44  ;;  %8023 = vrot.lane.b32.xlu0 %v18692_v62, %s13212_s12  ;;  %v12913_v20 = vpop.eup %12912  ;;  %v18694_v44 = vld [vmem:[#allocation96_spill] sm:$0xff]  ;;  %v18704_v50 = vld [vmem:[#allocation71_spill] sm:$0xff]  ;;  %v18705_v40 = vld [vmem:[#allocation85_spill] sm:$0xff] }
 0x85e   : > { %12920 = vrcp.f32 %v6331_v63  ;;  %v6405_v49 = vmul.f32 %v12913_v20, %v16411_v26  ;;  %v18699_v26 = vld [vmem:[#allocation55_spill] sm:$0xff] }
 0x85f   : > { %12198 = vmatprep.mubr.msk.f32.mxu1 %vm391_vm0, %v6416_v8  ;;  %v6313_v52 = vpop.xlane.xlu0 %6312  ;;  %v18706_v8 = vld [vmem:[#allocation27_spill] sm:$0xff] }
 0x860   : > { %12199 = vmatmul.mubr.msk.f32.vlgmr.msra.gmra.mxu1 %vm391_vm0, %v6417_v1  ;;  %8019 = vrot.lane.b32.xlu1 %v18693_v48, %s13212_s12 }
 0x861   : > { %v12915_v45 = vpop.eup %12914  ;;  %12219 = vmatpush3.msra.mxu1 %v16022_v39  ;;  %v6328_v27 = vpop.xlane.xlu1 %6327  ;;  %7896 = vrot.lane.b32.xlu0 %v13473_v18, %s13213_s28  ;;  %v18696_v39 = vld [vmem:[#allocation72_spill] sm:$0xff] }
 0x862   : > { %12220 = vmatprep.subr.mxu1 %v18694_v44  ;;  %12922 = vrcp.f32 %v6328_v27  ;;  %v6404_v43 = vmul.f32 %v12915_v45, %v16419_v58  ;;  %v18707_v45 = vld [vmem:[#allocation28_spill] sm:$0xff] }
 0x863   : > { %12924 = vrcp.f32 %v6313_v52  ;;  %12221 = vmatpush3.msra.mxu1 %v18694_v44  ;;  %v6310_v7 = vpop.xlane.xlu0 %6309 }
 0x864   : > { %12222 = vmatprep.subr.mxu1 %v18695_v15  ;;  %12926 = vrcp.f32 %v6310_v7  ;;  %12156 = vmatprep.mubr.msk.f32.mxu0 %vm391_vm0, %v6404_v43 }
 0x865   : > { %12223 = vmatpush3.msra.mxu1 %v18695_v15  ;;  %8011 = vrot.lane.b32.xlu1 %v18693_v48, %s13213_s28  ;;  %v6349_v58 = vpop.xlane.xlu1 %6348 }
 0x866   : > { %12157 = vmatmul.mubr.msk.f32.vlgmr.msra.gmra.mxu0 %vm391_vm0, %v6405_v49  ;;  %12224 = vmatprep.subr.mxu1 %v18696_v39  ;;  %12928 = vrcp.f32 %v6349_v58  ;;  %v18709_v49 = vld [vmem:[#allocation82_spill] sm:$0xff] }
 0x867   : > { %12177 = vmatpush3.msra.mxu0 %v18697_v53  ;;  %8142 = vrot.lane.b32.xlu0 %v18698_v61, %s13212_s12 }
 0x868   : > { %12178 = vmatprep.subr.mxu0 %v18699_v26  ;;  %12225 = vmatpush3.msra.mxu1 %v18696_v39  ;;  %v18710_v39 = vld [vmem:[#allocation6_spill] sm:$0xff] }
 0x869   : > { %v12917_v30 = vpop.eup %12916  ;;  %12179 = vmatpush3.msra.mxu0 %v18699_v26  ;;  %12246 = vmatprep.subr.msk.mxu1 %vm761_vm1, %v18700_v25  ;;  %v6346_v4 = vpop.xlane.xlu1 %6345  ;;  %v18711_v26 = vld [vmem:[#allocation89_spill] sm:$0xff] }
 0x86a   : > { %v12919_v3 = vpop.eup %12918  ;;  %12180 = vmatprep.subr.mxu0 %v18701_v37  ;;  %8138 = vrot.lane.b32.xlu1 %v18702_v55, %s13212_s12  ;;  %v6406_v12 = vmul.f32 %v12917_v30, %v16431_v32  ;;  %12930 = vrcp.f32 %v6346_v4  ;;  %v6316_v23 = vpop.xlane.xlu0 %6315 }
 0x86b   : > { %12181 = vmatpush3.msra.mxu0 %v18701_v37  ;;  %7900 = vrot.lane.b32.xlu0 %v18703_v57, %s13213_s28  ;;  %12932 = vrcp.f32 %v6316_v23  ;;  %v6407_v13 = vmul.f32 %v12919_v3, %v16424_v11  ;;  %v12921_v42 = vpop.eup %12920  ;;  %v18714_v37 = vld [vmem:[#allocation90_spill] sm:$0xff] }
 0x86c   : > { %12182 = vmatprep.subr.mxu0 %v18704_v50  ;;  %12159 = vmatprep.mubr.msk.f32.mxu0 %vm391_vm0, %v6406_v12  ;;  %v6419_v11 = vmul.f32 %v12921_v42, %v16435_v54  ;;  %v18717_v42 = vld [vmem:[#allocation3_spill] sm:$0xff] }
 0x86d   : > { %12183 = vmatpush3.msra.mxu0 %v18704_v50  ;;  %v6319_v32 = vpop.xlane.xlu1 %6318 }
 0x86e   : > { %12204 = vmatprep.subr.mxu0 %v18705_v40  ;;  %8017 = vrot.lane.b32.xlu1 %v18689_v51, %s13213_s28  ;;  %12934 = vrcp.f32 %v6319_v32 }
 0x86f   : > { %v12923_v63 = vpop.eup %12922  ;;  %12160 = vmatmul.mubr.msk.f32.gmra.mxu0 %vm391_vm0, %v6407_v13  ;;  %8140 = vrot.lane.b32.xlu0 %v18706_v8, %s13212_s12 }
 0x870   : > { %v12925_v1 = vpop.eup %12924  ;;  %v6418_v52 = vmul.f32 %v12923_v63, %v16443_v9  ;;  %v18719_v63 = vld [vmem:[#allocation4_spill] sm:$0xff] }
 0x871   : > { %v12927_v20 = vpop.eup %12926  ;;  %v6413_v44 = vmul.f32 %v12925_v1, %v16437_v16  ;;  %v18708_v16 = vld [vmem:[#allocation84_spill] sm:$0xff] }
 0x872   : > { %8128 = vrot.lane.b32.xlu1 %v18707_v45, %s13213_s28  ;;  %12201 = vmatprep.mubr.msk.f32.mxu1 %vm391_vm0, %v6418_v52  ;;  %v6412_v27 = vmul.f32 %v12927_v20, %v16445_v0 }
 0x873   : > { %8013 = vrot.lane.b32.xlu0 %v18690_v14, %s13213_s28  ;;  %12202 = vmatmul.mubr.msk.f32.gmra.mxu1 %vm391_vm0, %v6419_v11  ;;  %v12929_v54 = vpop.eup %12928  ;;  %v18720_v11 = vld [vmem:[#allocation112_spill] sm:$0xff] }
 0x874   : > { %12184 = vmatprep.mubr.msk.f32.mxu0 %vm391_vm0, %v6412_v27  ;;  %v6425_v53 = vmul.f32 %v12929_v54, %v16452_v35  ;;  %v18713_v35 = vld [vmem:[#allocation5_spill] sm:$0xff]  ;;  %v18722_v27 = vld [vmem:[#allocation108_spill] sm:$0xff] }
 0x875   : > { %12185 = vmatmul.mubr.msk.f32.vlgmr.msra.gmra.mxu0 %vm391_vm0, %v6413_v44  ;;  %v6355_v9 = vpop.xlane.xlu1 %6354 }
 0x876   : > { %8132 = vrot.lane.b32.xlu1 %v18706_v8, %s13213_s28  ;;  %12205 = vmatpush3.msra.mxu0 %v18705_v40  ;;  %v18718_v40 = vld [vmem:[#allocation97_spill] sm:$0xff] }
 0x877   : > { %8015 = vrot.lane.b32.xlu0 %v18692_v62, %s13213_s28  ;;  %12206 = vmatprep.subr.mxu0 %v18708_v16  ;;  %v12931_v0 = vpop.eup %12930  ;;  %v6352_v43 = vpop.xlane.xlu0 %6351 }
 0x878   : > { %12207 = vmatpush3.msra.mxu0 %v18708_v16  ;;  %v12933_v7 = vpop.eup %12932  ;;  %12936 = vrcp.f32 %v6352_v43  ;;  %v6424_v15 = vmul.f32 %v12931_v0, %v16458_v10  ;;  %v18726_v43 = vld [vmem:[#allocation120_spill] sm:$0xff] }
 0x879   : > { %12208 = vmatprep.subr.mxu0 %v18709_v49  ;;  %12938 = vrcp.f32 %v6355_v9  ;;  %v6414_v58 = vmul.f32 %v12933_v7, %v16460_v21  ;;  %v18712_v21 = vld [vmem:[#allocation79_spill] sm:$0xff]  ;;  %v18723_v9 = vld [vmem:[#allocation10_spill] sm:$0xff] }
 0x87a   : > { %8744 = vrot.lane.b32.xlu1 %v18710_v39, %s13214_s15  ;;  %12209 = vmatpush3.msra.mxu0 %v18709_v49  ;;  %v18727_v7 = vld [vmem:[#allocation115_spill] sm:$0xff] }
 0x87b   : > { %8136 = vrot.lane.b32.xlu0 %v18707_v45, %s13212_s12  ;;  %12210 = vmatprep.subr.mxu0 %v18711_v26  ;;  %v12935_v30 = vpop.eup %12934  ;;  %v6337_v3 = vpop.xlane.xlu1 %6336 }
 0x87c   : > { %12211 = vmatpush3.msra.mxu0 %v18711_v26  ;;  %12226 = vmatprep.mubr.msk.f32.mxu1 %vm391_vm0, %v6424_v15  ;;  %v6415_v10 = vmul.f32 %v12935_v30, %v16465_v17  ;;  %12940 = vrcp.f32 %v6337_v3  ;;  %v18715_v17 = vld [vmem:[#allocation8_spill] sm:$0xff]  ;;  %v18728_v15 = vld [vmem:[#allocation14_spill] sm:$0xff] }
 0x87d   : > { %12187 = vmatprep.mubr.msk.f32.mxu0 %vm391_vm0, %v6414_v58  ;;  %12227 = vmatmul.mubr.msk.f32.vlgmr.msra.gmra.mxu1 %vm391_vm0, %v6425_v53  ;;  %v18730_v58 = vld [vmem:[#allocation123_spill] sm:$0xff]  ;;  %v18731_v53 = vld [vmem:[#allocation102_spill] sm:$0xff]  ;;  %v18732_v30 = vld [vmem:[#allocation124_spill] sm:$0xff] }
 0x87e   : > { %12232 = vmatprep.subr.mxu0 %v18712_v21  ;;  %12247 = vmatpush3.xpose.msk.msra.mxu1 %vm761_vm1, %v18700_v25  ;;  %v18716_v25 = vld [vmem:[#allocation94_spill] sm:$0xff] }
 0x87f   : > { %8633 = vrot.lane.b32.xlu1 %v18713_v35, %s13214_s15  ;;  %12248 = vmatprep.subr.msk.mxu1 %vm761_vm1, %v18714_v37  ;;  %v6334_v4 = vpop.xlane.xlu0 %6333  ;;  %v6343_v12 = vpop.xlane.xlu1 %6342 }
 0x880   : > { %8130 = vrot.lane.b32.xlu0 %v18702_v55, %s13213_s28  ;;  %12188 = vmatmul.mubr.msk.f32.gmra.mxu0 %vm391_vm0, %v6415_v10  ;;  %12942 = vrcp.f32 %v6334_v4  ;;  %v18733_v10 = vld [vmem:[#allocation117_spill] sm:$0xff] }
 0x881   : > { %v18736_v4 = vld [vmem:[#allocation121_spill] sm:$0xff] }
 0x882   : > { %12249 = vmatpush3.xpose.msk.msra.mxu1 %vm761_vm1, %v18714_v37 }
 0x883   : > { %8740 = vrot.lane.b32.xlu1 %v18715_v17, %s13214_s15  ;;  %12250 = vmatprep.subr.msk.mxu1 %vm761_vm1, %v18716_v25  ;;  %v6340_v23 = vpop.xlane.xlu0 %6339  ;;  %v6361_v52 = vpop.xlane.xlu1 %6360  ;;  %v18737_v17 = vld [vmem:[#allocation91_spill] sm:$0xff] }
 0x884   : > { %8134 = vrot.lane.b32.xlu0 %v18698_v61, %s13213_s28  ;;  %12944 = vrcp.f32 %v6340_v23  ;;  %s17989_s28 = scalar_lea.vmem %s18103_s7, %s10932_s13 }
 0x885   : > { %v12937_v50 = vpop.eup %12936  ;;  %12946 = vrcp.f32 %v6343_v12  ;;  %v18744_v12 = vld [vmem:[#allocation131_spill] sm:$0xff] }
 0x886   : > { %12251 = vmatpush3.xpose.msk.msra.mxu1 %vm761_vm1, %v18716_v25  ;;  %v12939_v13 = vpop.eup %12938  ;;  %v6426_v32 = vmul.f32 %v12937_v50, %v16479_v29  ;;  %v18721_v29 = vld [vmem:[#allocation7_spill] sm:$0xff]  ;;  %v18743_v25 = vld [vmem:[#allocation136_spill] sm:$0xff] }
 0x887   : > { %8629 = vrot.lane.b32.xlu1 %v18717_v42, %s13214_s15  ;;  %12252 = vmatprep.subr.msk.mxu1 %vm761_vm1, %v18718_v40  ;;  %v6358_v1 = vpop.xlane.xlu0 %6357  ;;  %v6427_v20 = vmul.f32 %v12939_v13, %v16474_v28  ;;  %v18724_v28 = vld [vmem:[#allocation2_spill] sm:$0xff]  ;;  %v7550_v23 = vpop.permute.xlu1 %7549  ;;  %v18746_v50 = vld [vmem:[#allocation15_spill] sm:$0xff] }
 0x888   : > { %8635 = vrot.lane.b32.xlu0 %v18719_v63, %s13214_s15  ;;  %12948 = vrcp.f32 %v6358_v1  ;;  %12229 = vmatprep.mubr.msk.f32.mxu1 %vm391_vm0, %v6426_v32  ;;  %v18747_v13 = vld [vmem:[#allocation134_spill] sm:$0xff] }
 0x889   : > { %12230 = vmatmul.mubr.msk.f32.gmra.mxu1 %vm391_vm0, %v6427_v20  ;;  %12950 = vrcp.f32 %v6361_v52  ;;  %v12941_v44 = vpop.eup %12940  ;;  %v18748_v42 = vld [vmem:[#allocation114_spill] sm:$0xff] }
 0x88a   : > { %12253 = vmatpush3.xpose.msk.msra.mxu1 %vm761_vm1, %v18718_v40  ;;  %12254 = vmatprep.mubr.msk.f32.mxu1 %vm761_vm1, %v18722_v27  ;;  %v6421_v0 = vmul.f32 %v12941_v44, %v16483_v36 }
 0x88b   : > { %8962 = vrot.lane.b32.xlu1 %v18544_v41, %s13214_s15  ;;  %12274 = vmatprep.subr.msk.mxu1 %vm761_vm1, %v18720_v11  ;;  %v18725_v41 = vld [vmem:[#allocation113_spill] sm:$0xff] }
 0x88c   : > { %8742 = vrot.lane.b32.xlu0 %v18721_v29, %s13214_s15  ;;  %v18750_v29 = vld [vmem:[#allocation116_spill] sm:$0xff] }
 0x88d   : > { %v12943_v54 = vpop.eup %12942  ;;  %12255 = vmatmul.mubr.msk.f32.vlgmr.msra.gmra.mxu1 %vm761_vm1, %v18725_v41  ;;  %v18754_v41 = vld [vmem:[#allocation129_spill] sm:$0xff] }
 0x88e   : > { %v6420_v16 = vmul.f32 %v12943_v54, %v16489_v38  ;;  %12275 = vmatpush3.xpose.msk.msra.mxu1 %vm761_vm1, %v18720_v11  ;;  %12257 = vmatprep.mubr.msk.f32.mxu1 %vm761_vm1, %v18726_v43  ;;  %v18729_v38 = vld [vmem:[#allocation9_spill] sm:$0xff]  ;;  %v18753_v54 = vld [vmem:[#allocation122_spill] sm:$0xff] }
 0x88f   : > { %8851 = vrot.lane.b32.xlu1 %v18723_v9, %s13214_s15  ;;  %12276 = vmatprep.subr.msk.mxu1 %vm761_vm1, %v18727_v7 }
 0x890   : > { %8631 = vrot.lane.b32.xlu0 %v18724_v28, %s13214_s15  ;;  %12212 = vmatprep.mubr.msk.f32.mxu0 %vm391_vm0, %v6420_v16  ;;  %v18755_v16 = vld [vmem:[#allocation132_spill] sm:$0xff] }
 0x891   : > { %v12945_v49 = vpop.eup %12944  ;;  %12213 = vmatmul.mubr.msk.f32.vlgmr.msra.gmra.mxu0 %vm391_vm0, %v6421_v0  ;;  %12258 = vmatmul.mubr.msk.f32.gmra.mxu1 %vm761_vm1, %v18730_v58  ;;  %v18756_v0 = vld [vmem:[#allocation125_spill] sm:$0xff] }
 0x892   : > { %12233 = vmatpush3.msra.mxu0 %v18712_v21  ;;  %v6422_v36 = vmul.f32 %v12945_v49, %v16497_v5  ;;  %v12947_v39 = vpop.eup %12946  ;;  %12277 = vmatpush3.xpose.msk.msra.mxu1 %vm761_vm1, %v18727_v7  ;;  %v18734_v5 = vld [vmem:[#allocation12_spill] sm:$0xff]  ;;  %v18735_v21 = vld [vmem:[#allocation86_spill] sm:$0xff] }
 0x893   : > { %8958 = vrot.lane.b32.xlu1 %v18728_v15, %s13214_s15  ;;  %12234 = vmatprep.subr.mxu0 %v18731_v53  ;;  %v6423_v3 = vmul.f32 %v12947_v39, %v16487_v33  ;;  %v18738_v33 = vld [vmem:[#allocation104_spill] sm:$0xff]  ;;  %v18757_v49 = vld [vmem:[#allocation130_spill] sm:$0xff] }
 0x894   : > { %8738 = vrot.lane.b32.xlu0 %v18729_v38, %s13214_s15  ;;  %12282 = vmatprep.mubr.msk.f32.mxu1 %vm761_vm1, %v18732_v30 }
 0x895   : > { %v12949_v26 = vpop.eup %12948  ;;  %12278 = vmatprep.subr.msk.mxu1 %vm761_vm1, %v18733_v10  ;;  %12235 = vmatpush3.msra.mxu0 %v18731_v53  ;;  %v18759_v53 = vld [vmem:[#allocation133_spill] sm:$0xff] }
 0x896   : > { %12215 = vmatprep.mubr.msk.f32.mxu0 %vm391_vm0, %v6422_v36  ;;  %12236 = vmatprep.subr.mxu0 %v18735_v21  ;;  %v6428_v35 = vmul.f32 %v12949_v26, %v16503_v22  ;;  %v12951_v37 = vpop.eup %12950  ;;  %v18741_v22 = vld [vmem:[#allocation127_spill] sm:$0xff] }
 0x897   : > { %8847 = vrot.lane.b32.xlu1 %v18734_v5, %s13214_s15  ;;  %12216 = vmatmul.mubr.msk.f32.gmra.mxu0 %vm391_vm0, %v6423_v3  ;;  %v18758_v36 = vld [vmem:[#allocation135_spill] sm:$0xff] }
 0x898   : > { %8853 = vrot.lane.b32.xlu0 %v13408_v56, %s13214_s15  ;;  %12279 = vmatpush3.xpose.msk.msra.mxu1 %vm761_vm1, %v18733_v10  ;;  %v6429_v56 = vmul.f32 %v12951_v37, %v16495_v24  ;;  %v18740_v24 = vld [vmem:[#allocation106_spill] sm:$0xff] }
 0x899   : > { %12237 = vmatpush3.msra.mxu0 %v18735_v21  ;;  %12280 = vmatprep.subr.msk.mxu1 %vm761_vm1, %v18736_v4 }
 0x89a   : > { %12238 = vmatprep.subr.mxu0 %v18737_v17  ;;  %12240 = vmatprep.mubr.msk.f32.mxu0 %vm391_vm0, %v6428_v35 }
 0x89b   : > { %9069 = vrot.lane.b32.xlu1 %v18543_v34, %s13214_s15  ;;  %12239 = vmatpush3.msra.mxu0 %v18737_v17  ;;  %v18739_v34 = vld [vmem:[#allocation126_spill] sm:$0xff] }
 0x89c   : > { %12260 = vmatprep.subr.msk.mxu0 %vm761_vm1, %v18738_v33  ;;  %8960 = vrot.lane.b32.xlu0 %v13433_v2, %s13214_s15  ;;  %v18742_v2 = vld [vmem:[#allocation11_spill] sm:$0xff] }
 0x89d   : > { %12241 = vmatmul.mubr.msk.f32.vlgmr.msra.gmra.mxu0 %vm391_vm0, %v6429_v56  ;;  %12281 = vmatpush3.xpose.msk.msra.mxu1 %vm761_vm1, %v18736_v4 }
 0x89e   : > { %12261 = vmatpush3.xpose.msk.msra.mxu0 %vm761_vm1, %v18738_v33  ;;  %12302 = vmatprep.subr.msk.mxu1 %vm761_vm1, %v18739_v34 }
 0x89f   : > { %12262 = vmatprep.subr.msk.mxu0 %vm761_vm1, %v18740_v24  ;;  %9065 = vrot.lane.b32.xlu1 %v13443_v6, %s13214_s15  ;;  %v18745_v6 = vld [vmem:[#allocation111_spill] sm:$0xff] }
 0x8a0   : > { %12283 = vmatmul.mubr.msk.f32.vlgmr.msra.gmra.mxu1 %vm761_vm1, %v18741_v22  ;;  %8849 = vrot.lane.b32.xlu0 %v18742_v2, %s13214_s15 }
 0x8a1   : > { %12285 = vmatprep.mubr.msk.f32.mxu1 %vm761_vm1, %v18743_v25  ;;  %12303 = vmatpush3.xpose.msk.msra.mxu1 %vm761_vm1, %v18739_v34 }
 0x8a2   : > { %12263 = vmatpush3.xpose.msk.msra.mxu0 %vm761_vm1, %v18740_v24  ;;  %12304 = vmatprep.subr.msk.mxu1 %vm761_vm1, %v18744_v12 }
 0x8a3   : > { %12264 = vmatprep.subr.msk.mxu0 %vm761_vm1, %v18745_v6  ;;  %9178 = vrot.lane.b32.xlu1 %v13476_v19, %s13214_s15  ;;  %v18749_v19 = vld [vmem:[#allocation118_spill] sm:$0xff] }
 0x8a4   : > { %12286 = vmatmul.mubr.msk.f32.gmra.mxu1 %vm761_vm1, %v7550_v23  ;;  %8956 = vrot.lane.b32.xlu0 %v18746_v50, %s13214_s15 }
 0x8a5   : > { %12305 = vmatpush3.xpose.msk.msra.mxu1 %vm761_vm1, %v18744_v12 }
 0x8a6   : > { %12265 = vmatpush3.xpose.msk.msra.mxu0 %vm761_vm1, %v18745_v6  ;;  %12306 = vmatprep.subr.msk.mxu1 %vm761_vm1, %v18747_v13 }
 0x8a7   : > { %12266 = vmatprep.subr.msk.mxu0 %vm761_vm1, %v18748_v42  ;;  %9176 = vrot.lane.b32.xlu1 %v13473_v18, %s13214_s15  ;;  %v7665_v18 = vpop.permute.xlu0 %7664 }
 0x8a8   : > { %9071 = vrot.lane.b32.xlu0 %v18691_v46, %s13214_s15 }
 0x8a9   : > { %12307 = vmatpush3.xpose.msk.msra.mxu1 %vm761_vm1, %v18747_v13 }
 0x8aa   : > { %12267 = vmatpush3.xpose.msk.msra.mxu0 %vm761_vm1, %v18748_v42 }
 0x8ab   : > { %12288 = vmatprep.subr.msk.mxu0 %vm761_vm1, %v18749_v19  ;;  %9289 = vrot.lane.b32.xlu1 %v18689_v51, %s13214_s15 }
 0x8ac   : > { %9067 = vrot.lane.b32.xlu0 %v18541_v59, %s13214_s15 }
 0x8af   : > { %9285 = vrot.lane.b32.xlu1 %v18690_v14, %s13214_s15 }
 0x8b0   : > { %9180 = vrot.lane.b32.xlu0 %v18703_v57, %s13214_s15 }
 0x8b4   : > { %9174 = vrot.lane.b32.xlu0 %v18540_v60, %s13214_s15 }
 0x8b8   : > { %v6367_v46 = vpop.xlane.xlu1 %6366  ;;  %9287 = vrot.lane.b32.xlu0 %v18692_v62, %s13214_s15 }
 0x8b9   : > { %12952 = vrcp.f32 %v6367_v46 }
 0x8bc   : > { %v7786_v40 = vpop.permute.xlu1 %7785  ;;  %v6364_v51 = vpop.xlane.xlu0 %6363  ;;  %9283 = vrot.lane.b32.xlu0 %v18693_v48, %s13214_s15 }
 0x8bd   : > { %12954 = vrcp.f32 %v6364_v51  ;;  %12308 = vmatprep.subr.msk.mxu1 %vm761_vm1, %v7786_v40 }
 0x8be   : > { %12309 = vmatpush3.xpose.msk.msra.mxu1 %vm761_vm1, %v7786_v40 }
 0x8c0   : > { %v7778_v59 = vpop.permute.xlu1 %7777  ;;  %v7667_v14 = vpop.permute.xlu0 %7666 }
 0x8c1   : > { %12310 = vmatprep.mubr.msk.f32.mxu1 %vm761_vm1, %v7778_v59 }
 0x8c4   : > { %v7905_v60 = vpop.permute.xlu1 %7904  ;;  %v7907_v57 = vpop.permute.xlu0 %7906 }
 0x8c6   : > { %v12953_v62 = vpop.eup %12952 }
 0x8c7   : > { %v6431_v11 = vmul.f32 %v12953_v62, %v16529_v47  ;;  %v18752_v47 = vld [vmem:[#allocation128_spill] sm:$0xff] }
 0x8c8   : > { %v7782_v32 = vpop.permute.xlu1 %7781  ;;  %v7780_v63 = vpop.permute.xlu0 %7779 }
 0x8c9   : > { %12311 = vmatmul.mubr.msk.f32.vlgmr.msra.gmra.mxu1 %vm761_vm1, %v7780_v63 }
 0x8ca   : > { %v12955_v1 = vpop.eup %12954  ;;  %12313 = vmatprep.mubr.msk.f32.mxu1 %vm761_vm1, %v7782_v32 }
 0x8cb   : > { %v6430_v48 = vmul.f32 %v12955_v1, %v16533_v31  ;;  %v18751_v31 = vld [vmem:[#allocation119_spill] sm:$0xff] }
 0x8cc   : > { %v7903_v52 = vpop.permute.xlu1 %7902  ;;  %v8026_v20 = vpop.permute.xlu0 %8025 }
 0x8cd   : > { %12243 = vmatprep.mubr.msk.f32.mxu0 %vm391_vm0, %v6430_v48  ;;  %12330 = vmatprep.subr.msk.mxu1 %vm761_vm1, %v8026_v20  ;;  %v16935_v48 = vld [vmem:[%s18097_s1 + $0x68] sm:$0xff] }
 0x8ce   : > { %12244 = vmatmul.mubr.msk.f32.gmra.mxu0 %vm391_vm0, %v6431_v11  ;;  %12331 = vmatpush3.xpose.msk.msra.mxu1 %vm761_vm1, %v8026_v20  ;;  %v16940_v20 = vld [vmem:[%s18097_s1 + $0x60] sm:$0xff] }
 0x8cf   : > { %12268 = vmatprep.mubr.msk.f32.mxu0 %vm761_vm1, %v18750_v29 }
 0x8d0   : > { %v7895_v27 = vpop.permute.xlu1 %7894  ;;  %v7784_v44 = vpop.permute.xlu0 %7783 }
 0x8d1   : > { %12314 = vmatmul.mubr.msk.f32.gmra.mxu1 %vm761_vm1, %v7784_v44 }
 0x8d2   : > { %12269 = vmatmul.mubr.msk.f32.vlgmr.msra.gmra.mxu0 %vm761_vm1, %v18751_v31 }
 0x8d3   : > { %12289 = vmatpush3.xpose.msk.msra.mxu0 %vm761_vm1, %v18749_v19  ;;  %12271 = vmatprep.mubr.msk.f32.mxu0 %vm761_vm1, %v18752_v47  ;;  %v16952_v47 = vld [vmem:[%s18097_s1 + $0x78] sm:$0xff] }
 0x8d4   : > { %12290 = vmatprep.subr.msk.mxu0 %vm761_vm1, %v18753_v54  ;;  %v8022_v9 = vpop.permute.xlu1 %8021  ;;  %v8024_v28 = vpop.permute.xlu0 %8023 }
 0x8d5   : > { %12332 = vmatprep.subr.msk.mxu1 %vm761_vm1, %v8024_v28 }
 0x8d6   : > { %12272 = vmatmul.mubr.msk.f32.gmra.mxu0 %vm761_vm1, %v18754_v41  ;;  %12333 = vmatpush3.xpose.msk.msra.mxu1 %vm761_vm1, %v8024_v28 }
 0x8d7   : > { %12291 = vmatpush3.xpose.msk.msra.mxu0 %vm761_vm1, %v18753_v54  ;;  %12296 = vmatprep.mubr.msk.f32.mxu0 %vm761_vm1, %v18755_v16  ;;  %v13149_v54 = vld [vmem:[%s18098_s2] sm:$0xff]  ;;  %v16964_v16 = vld [vmem:[%s18097_s1 + $0x70] sm:$0xff] }
 0x8d8   : > { %12292 = vmatprep.subr.msk.mxu0 %vm761_vm1, %v18756_v0  ;;  %12334 = vmatprep.subr.msk.mxu1 %vm761_vm1, %v8022_v9  ;;  %v7899_v43 = vpop.permute.xlu1 %7898  ;;  %v7897_v7 = vpop.permute.xlu0 %7896 }
 0x8da   : > { %12335 = vmatpush3.xpose.msk.msra.mxu1 %vm761_vm1, %v8022_v9 }
 0x8db   : > { %12293 = vmatpush3.xpose.msk.msra.mxu0 %vm761_vm1, %v18756_v0 }
 0x8dc   : > { %12294 = vmatprep.subr.msk.mxu0 %vm761_vm1, %v18757_v49  ;;  %v8020_v15 = vpop.permute.xlu1 %8019  ;;  %v8143_v38 = vpop.permute.xlu0 %8142 }
 0x8dd   : > { %12336 = vmatprep.subr.msk.mxu1 %vm761_vm1, %v8020_v15 }
 0x8de   : > { %12337 = vmatpush3.xpose.msk.msra.mxu1 %vm761_vm1, %v8020_v15 }
 0x8df   : > { %12295 = vmatpush3.xpose.msk.msra.mxu0 %vm761_vm1, %v18757_v49  ;;  %v16900_v50 = vpop.f32.mrf.mxu1  ;;  %v13150_v49 = vld [vmem:[%s18098_s2 + $0x18] sm:$0xff] }
 0x8e0   : > { %12316 = vmatprep.subr.msk.mxu0 %vm761_vm1, %v18758_v36  ;;  %v8012_v39 = vpop.permute.xlu1 %8011  ;;  %v7901_v58 = vpop.permute.xlu0 %7900 }
 0x8e1   : > { %12338 = vmatprep.mubr.msk.f32.mxu1 %vm761_vm1, %v8012_v39  ;;  %v16902_v13 = vpop.f32.mrf.mxu1 }
 0x8e2   : > { %12297 = vmatmul.mubr.msk.f32.vlgmr.msra.gmra.mxu0 %vm761_vm1, %v18759_v53 }
 0x8e3   : > { %12299 = vmatprep.mubr.msk.f32.mxu0 %vm761_vm1, %v7665_v18  ;;  %12317 = vmatpush3.xpose.msk.msra.mxu0 %vm761_vm1, %v18758_v36  ;;  %v13151_v36 = vld [vmem:[%s18098_s2 + $0x10] sm:$0xff] }
 0x8e4   : > { %12318 = vmatprep.subr.msk.mxu0 %vm761_vm1, %v7907_v57  ;;  %v8139_v26 = vpop.permute.xlu1 %8138  ;;  %v8141_v30 = vpop.permute.xlu0 %8140 }
 0x8e5   : > { %v16904_v42 = vpop.f32.mrf.mxu1 }
 0x8e6   : > { %12300 = vmatmul.mubr.msk.f32.gmra.mxu0 %vm761_vm1, %v7667_v14  ;;  %18761 = vst [vmem:[#allocation22_spill] sm:$0xff] %v16904_v42 }
 0x8e7   : > { %12319 = vmatpush3.xpose.msk.msra.mxu0 %vm761_vm1, %v7907_v57  ;;  %12324 = vmatprep.mubr.msk.f32.mxu0 %vm761_vm1, %v7895_v27  ;;  %v16906_v19 = vpop.f32.mrf.mxu1  ;;  %v13148_v27 = vld [vmem:[%s18098_s2 + $0x8] sm:$0xff] }
 0x8e8   : > { %12320 = vmatprep.subr.msk.mxu0 %vm761_vm1, %v7905_v60  ;;  %v8018_v10 = vpop.permute.xlu1 %8017  ;;  %v8014_v5 = vpop.permute.xlu0 %8013 }
 0x8e9   : > { %12339 = vmatmul.mubr.msk.f32.vlgmr.msra.gmra.mxu1 %vm761_vm1, %v8014_v5 }
 0x8eb   : > { %12321 = vmatpush3.xpose.msk.msra.mxu0 %vm761_vm1, %v7905_v60 }
 0x8ec   : > { %12322 = vmatprep.subr.msk.mxu0 %vm761_vm1, %v7903_v52  ;;  %v8129_v3 = vpop.permute.xlu1 %8128  ;;  %v8016_v21 = vpop.permute.xlu0 %8015 }
 0x8ed   : > { %12341 = vmatprep.mubr.msk.f32.mxu1 %vm761_vm1, %v8016_v21  ;;  %v13152_v21 = vld [vmem:[%s18098_s2 + $0x48] sm:$0xff] }
 0x8ee   : > { %12342 = vmatmul.mubr.msk.f32.gmra.mxu1 %vm761_vm1, %v8018_v10 }
 0x8ef   : > { %12323 = vmatpush3.xpose.msk.msra.mxu0 %vm761_vm1, %v7903_v52 }
 0x8f0   : > { %12344 = vmatprep.subr.msk.mxu0 %vm761_vm1, %v8143_v38  ;;  %v8133_v35 = vpop.permute.xlu1 %8132  ;;  %v8137_v37 = vpop.permute.xlu0 %8136 }
 0x8f2   : > { %12325 = vmatmul.mubr.msk.f32.vlgmr.msra.gmra.mxu0 %vm761_vm1, %v7897_v7 }
 0x8f3   : > { %12327 = vmatprep.mubr.msk.f32.mxu0 %vm761_vm1, %v7899_v43  ;;  %12345 = vmatpush3.xpose.msk.msra.mxu0 %vm761_vm1, %v8143_v38  ;;  %v16908_v18 = vpop.f32.mrf.mxu1 }
 0x8f4   : > { %12346 = vmatprep.subr.msk.mxu0 %vm761_vm1, %v8141_v30  ;;  %v8745_v4 = vpop.permute.xlu1 %8744  ;;  %v8131_v17 = vpop.permute.xlu0 %8130  ;;  %18762 = vst [vmem:[#allocation16_spill] sm:$0xff] %v16908_v18 }
 0x8f5   : > { %v16910_v46 = vpop.f32.mrf.mxu1 }
 0x8f6   : > { %12328 = vmatmul.mubr.msk.f32.gmra.mxu0 %vm761_vm1, %v7901_v58  ;;  %18763 = vst [vmem:[#allocation23_spill] sm:$0xff] %v16910_v46  ;;  %v13169_v46 = vld [vmem:[%s18098_s2 + $0xd0] sm:$0xff] }
 0x8f7   : > { %12347 = vmatpush3.xpose.msk.msra.mxu0 %vm761_vm1, %v8141_v30  ;;  %12352 = vmatprep.mubr.msk.f32.mxu0 %vm761_vm1, %v8129_v3 }
 0x8f8   : > { %12348 = vmatprep.subr.msk.mxu0 %vm761_vm1, %v8139_v26  ;;  %v8634_v56 = vpop.permute.xlu1 %8633  ;;  %v8135_v33 = vpop.permute.xlu0 %8134 }
 0x8fb   : > { %12349 = vmatpush3.xpose.msk.msra.mxu0 %vm761_vm1, %v8139_v26 }
 0x8fc   : > { %12350 = vmatprep.subr.msk.mxu0 %vm761_vm1, %v8137_v37  ;;  %v8636_v34 = vpop.permute.xlu0 %8635  ;;  %v8741_v24 = vpop.permute.xlu1 %8740 }
 0x8fd   : > { %12358 = vmatprep.subr.mxu1 %v8636_v34 }
 0x8fe   : > { %12359 = vmatpush3.msra.mxu1 %v8636_v34 }
 0x8ff   : > { %12351 = vmatpush3.xpose.msk.msra.mxu0 %vm761_vm1, %v8137_v37  ;;  %12360 = vmatprep.subr.mxu1 %v8634_v56 }
 0x900   : > { %12372 = vmatprep.subr.mxu0 %v8745_v4  ;;  %12361 = vmatpush3.msra.mxu1 %v8634_v56  ;;  %v8743_v22 = vpop.permute.xlu0 %8742  ;;  %v8630_v2 = vpop.permute.xlu1 %8629  ;;  %v13153_v56 = vld [vmem:[%s18098_s2 + $0x40] sm:$0xff] }
 0x902   : > { %12353 = vmatmul.mubr.msk.f32.vlgmr.msra.gmra.mxu0 %vm761_vm1, %v8131_v17 }
 0x903   : > { %12355 = vmatprep.mubr.msk.f32.mxu0 %vm761_vm1, %v8133_v35  ;;  %12373 = vmatpush3.msra.mxu0 %v8745_v4 }
 0x904   : > { %12374 = vmatprep.subr.mxu0 %v8743_v22  ;;  %v8632_v25 = vpop.permute.xlu0 %8631  ;;  %v16894_v23 = vpop.permute.xlu1 %8962 }
 0x905   : > { %12375 = vmatpush3.msra.mxu0 %v8743_v22  ;;  %12362 = vmatprep.subr.mxu1 %v8632_v25  ;;  %18760 = vst [vmem:[#allocation21_spill] sm:$0xff] %v16894_v23 }
 0x906   : > { %12356 = vmatmul.mubr.msk.f32.gmra.mxu0 %vm761_vm1, %v8135_v33  ;;  %12376 = vmatprep.subr.mxu0 %v8741_v24 }
 0x907   : > { %12363 = vmatpush3.msra.mxu1 %v8632_v25  ;;  %12377 = vmatpush3.msra.mxu0 %v8741_v24  ;;  %v13154_v25 = vld [vmem:[%s18098_s2 + $0x58] sm:$0xff] }
 0x908   : > { %12364 = vmatprep.subr.mxu1 %v8630_v2  ;;  %v8739_v12 = vpop.permute.xlu0 %8738 }
 0x909   : > { %12365 = vmatpush3.msra.mxu1 %v8630_v2  ;;  %12378 = vmatprep.subr.mxu0 %v8739_v12 }
 0x90a   : > { %12379 = vmatpush3.msra.mxu0 %v8739_v12 }
 0x90b   : > { %12400 = vmatprep.subr.mxu0 %v16894_v23 }
 0x90c   : > { %v16897_v6 = vpop.permute.xlu0 %8853 }
 0x90d   : > { %12386 = vmatprep.subr.mxu1 %v16897_v6 }
 0x917   : > { %v16912_v40 = vpop.f32.mrf.mxu1 }
 0x918   : > { %18764 = vst [vmem:[#allocation24_spill] sm:$0xff] %v16912_v40  ;;  %v17122_v40 = vpop.permute.xlu0 %8960 }
 0x919   : > { %v16914_v51 = vpop.f32.mrf.mxu1  ;;  %18783 = vst [vmem:[#allocation79_spill] sm:$0xff] %v17122_v40 }
 0x91a   : > { %18765 = vst [vmem:[#allocation96_spill] sm:$0xff] %v16914_v51 }
 0x920   : > { %v16916_v59 = vpop.f32.mrf.mxu1 }
 0x922   : > { %v16918_v14 = vpop.f32.mrf.mxu1 }
 0x926   : > { %v16984_v26 = vpop.f32.mrf.mxu0 }
 0x927   : > { %18770 = vst [vmem:[#allocation55_spill] sm:$0xff] %v16984_v26 }
 0x928   : > { %v16987_v3 = vpop.f32.mrf.mxu0 }
 0x929   : > { %18771 = vst [vmem:[#allocation99_spill] sm:$0xff] %v16987_v3 }
 0x92f   : > { %v16995_v17 = vpop.f32.mrf.mxu0 }
 0x930   : > { %18772 = vst [vmem:[#allocation58_spill] sm:$0xff] %v16995_v17 }
 0x931   : > { %v17005_v2 = vpop.f32.mrf.mxu0 }
 0x932   : > { %18773 = vst [vmem:[#allocation26_spill] sm:$0xff] %v17005_v2 }
 0x933   : > { %v16920_v60 = vpop.f32.mrf.mxu1 }
 0x935   : > { %v16922_v57 = vpop.f32.mrf.mxu1 }
 0x93d   : > { %v16924_v32 = vpop.f32.mrf.mxu1 }
 0x93e   : > { %18766 = vst [vmem:[#allocation87_spill] sm:$0xff] %v16924_v32  ;;  %v13170_v32 = vld [vmem:[%s18098_s2 + $0xd8] sm:$0xff] }
 0x93f   : > { %v16926_v63 = vpop.f32.mrf.mxu1 }
 0x940   : > { %18767 = vst [vmem:[#allocation72_spill] sm:$0xff] %v16926_v63 }
 0x949   : > { %v16928_v62 = vpop.f32.mrf.mxu1 }
 0x94a   : > { %18768 = vst [vmem:[#allocation20_spill] sm:$0xff] %v16928_v62 }
 0x94b   : > { %v16930_v1 = vpop.f32.mrf.mxu1 }
 0x94c   : > { %18769 = vst [vmem:[#allocation25_spill] sm:$0xff] %v16930_v1 }
 0x94d   : > { %v12256_v52 = vpop.f32.mrf.mxu1 }
 0x94e   : > { %v7413_v11 = vadd.f32 %v12256_v52, %v16935_v48 }
 0x94f   : > { %v7407_v29 = vpop.f32.mrf.mxu1 }
 0x950   : > { %v16946_v44 = vadd.f32 %v13148_v27, %v7413_v11  ;;  %v7408_v31 = vadd.f32 %v16940_v20, %v7407_v29  ;;  %v17015_v29 = vpop.f32.mrf.mxu0  ;;  %v13155_v27 = vld [vmem:[%s18098_s2 + $0x50] sm:$0xff] }
 0x951   : > { %v12259_v28 = vpop.f32.mrf.mxu1  ;;  %18774 = vst [vmem:[#allocation19_spill] sm:$0xff] %v17015_v29 }
 0x952   : > { %v16957_v9 = vadd.f32 %v13149_v54, %v7408_v31  ;;  %v8280_v41 = vsel %vm391_vm0, %v16946_v44, -inf  ;;  %v7423_v0 = vadd.f32 %v12259_v28, %v16952_v47  ;;  %v17024_v28 = vpop.f32.mrf.mxu0 }
 0x953   : > { %8281 = vmax.xlane.f32.xlu0 %v8280_v41  ;;  %v7417_v43 = vpop.f32.mrf.mxu1  ;;  %18775 = vst [vmem:[#allocation71_spill] sm:$0xff] %v17024_v28 }
 0x954   : > { %v8277_v7 = vsel %vm391_vm0, %v16957_v9, -inf  ;;  %v16972_v15 = vadd.f32 %v13150_v49, %v7423_v0  ;;  %v7418_v38 = vadd.f32 %v16964_v16, %v7417_v43  ;;  %v17026_v41 = vpop.f32.mrf.mxu0 }
 0x955   : > { %8278 = vmax.xlane.f32.xlu1 %v8277_v7 }
 0x956   : > { %v16978_v39 = vadd.f32 %v13151_v36, %v7418_v38  ;;  %v8286_v58 = vsel %vm391_vm0, %v16972_v15, -inf  ;;  %v17030_v43 = vpop.f32.mrf.mxu0 }
 0x957   : > { %8287 = vmax.xlane.f32.xlu0 %v8286_v58 }
 0x958   : > { %v8283_v53 = vsel %vm391_vm0, %v16978_v39, -inf  ;;  %v17032_v7 = vpop.f32.mrf.mxu0 }
 0x959   : > { %18776 = vst [vmem:[#allocation85_spill] sm:$0xff] %v17032_v7 }
 0x95a   : > { %v17034_v49 = vpop.f32.mrf.mxu0 }
 0x95b   : > { %8284 = vmax.xlane.f32.xlu0 %v8283_v53 }
 0x95c   : > { %v17036_v38 = vpop.f32.mrf.mxu0 }
 0x95d   : > { %18777 = vst [vmem:[#allocation27_spill] sm:$0xff] %v17036_v38 }
 0x95e   : > { %v17038_v36 = vpop.f32.mrf.mxu0 }
 0x95f   : > { %18778 = vst [vmem:[#allocation28_spill] sm:$0xff] %v17038_v36  ;;  %v13176_v36 = vld [vmem:[%s18098_s2 + $0xe8] sm:$0xff] }
 0x960   : > { %v12284_v30 = vpop.f32.mrf.mxu1  ;;  %v17040_v58 = vpop.f32.mrf.mxu0 }
 0x961   : > { %v7647_v10 = vadd.f32 %v12284_v30, %v16935_v48  ;;  %18779 = vst [vmem:[#allocation84_spill] sm:$0xff] %v17040_v58 }
 0x962   : > { %v7641_v5 = vpop.f32.mrf.mxu1  ;;  %v17042_v53 = vpop.f32.mrf.mxu0 }
 0x963   : > { %v16992_v35 = vadd.f32 %v13152_v21, %v7647_v10  ;;  %v7642_v37 = vadd.f32 %v16940_v20, %v7641_v5  ;;  %18780 = vst [vmem:[#allocation82_spill] sm:$0xff] %v17042_v53 }
 0x964   : > { %v12287_v4 = vpop.f32.mrf.mxu1 }
 0x965   : > { %v17000_v33 = vadd.f32 %v13153_v56, %v7642_v37  ;;  %v7657_v34 = vadd.f32 %v12287_v4, %v16952_v47  ;;  %v8304_v24 = vsel %vm391_vm0, %v16992_v35, -inf }
 0x966   : > { %v7651_v22 = vpop.f32.mrf.mxu1  ;;  %8305 = vmax.xlane.f32.xlu0 %v8304_v24 }
 0x967   : > { %v17010_v12 = vadd.f32 %v13154_v25, %v7657_v34  ;;  %v7652_v52 = vadd.f32 %v16964_v16, %v7651_v22  ;;  %v8301_v11 = vsel %vm391_vm0, %v17000_v33, -inf  ;;  %v13156_v25 = vld [vmem:[%s18098_s2 + $0x28] sm:$0xff] }
 0x969   : > { %v17020_v31 = vadd.f32 %v13155_v27, %v7652_v52  ;;  %v8310_v54 = vsel %vm391_vm0, %v17010_v12, -inf }
 0x96a   : > { %8302 = vmax.xlane.f32.xlu0 %v8301_v11 }
 0x96b   : > { %v8307_v0 = vsel %vm391_vm0, %v17020_v31, -inf }
 0x96e   : > { %8311 = vmax.xlane.f32.xlu0 %v8310_v54 }
 0x972   : > { %8308 = vmax.xlane.f32.xlu0 %v8307_v0  ;;  %v13157_v0 = vld [vmem:[%s18098_s2 + $0x88] sm:$0xff] }
 0x989   : > { %v12312_v30 = vpop.f32.mrf.mxu1 }
 0x98a   : > { %v7881_v56 = vadd.f32 %v12312_v30, %v16935_v48 }
 0x98b   : > { %v7875_v5 = vpop.f32.mrf.mxu1 }
 0x98c   : > { %v7876_v22 = vadd.f32 %v16940_v20, %v7875_v5  ;;  %v17060_v30 = vadd.f32 %v13157_v0, %v7881_v56  ;;  %v13158_v5 = vld [vmem:[%s18098_s2 + $0x20] sm:$0xff] }
 0x98e   : > { %v17044_v10 = vpop.f32.mrf.mxu0 }
 0x98f   : > { %18781 = vst [vmem:[#allocation6_spill] sm:$0xff] %v17044_v10 }
 0x990   : > { %v17046_v21 = vpop.f32.mrf.mxu0 }
 0x991   : > { %18782 = vst [vmem:[#allocation89_spill] sm:$0xff] %v17046_v21  ;;  %v12315_v37 = vpop.f32.mrf.mxu1 }
 0x992   : > { %v12270_v4 = vpop.f32.mrf.mxu0 }
 0x993   : > { %v7530_v34 = vadd.f32 %v12270_v4, %v16935_v48  ;;  %v7885_v27 = vpop.f32.mrf.mxu1 }
 0x994   : > { %v7524_v24 = vpop.f32.mrf.mxu0  ;;  %v7886_v56 = vadd.f32 %v16964_v16, %v7885_v27 }
 0x995   : > { %v17054_v52 = vadd.f32 %v13156_v25, %v7530_v34  ;;  %v7525_v11 = vadd.f32 %v16940_v20, %v7524_v24  ;;  %v13159_v24 = vld [vmem:[%s18098_s2 + $0x80] sm:$0xff] }
 0x996   : > { %v12273_v54 = vpop.f32.mrf.mxu0  ;;  %v17073_v25 = vadd.f32 %v13159_v24, %v7876_v22  ;;  %v13161_v22 = vld [vmem:[%s18098_s2 + $0x90] sm:$0xff] }
 0x997   : > { %v17065_v4 = vadd.f32 %v13158_v5, %v7525_v11  ;;  %v7540_v10 = vadd.f32 %v12273_v54, %v16952_v47  ;;  %v8292_v34 = vsel %vm391_vm0, %v17054_v52, -inf  ;;  %v7891_v11 = vadd.f32 %v12315_v37, %v16952_v47  ;;  %v13160_v54 = vld [vmem:[%s18098_s2 + $0x38] sm:$0xff] }
 0x998   : > { %8293 = vmax.xlane.f32.xlu1 %v8292_v34  ;;  %v8328_v34 = vsel %vm391_vm0, %v17060_v30, -inf  ;;  %v7534_v29 = vpop.f32.mrf.mxu0  ;;  %v17089_v27 = vadd.f32 %v13161_v22, %v7886_v56  ;;  %v8325_v37 = vsel %vm391_vm0, %v17073_v25, -inf  ;;  %v13163_v22 = vld [vmem:[%s18098_s2 + $0x30] sm:$0xff] }
 0x999   : > { %v8289_v0 = vsel %vm391_vm0, %v17065_v4, -inf  ;;  %v17082_v5 = vadd.f32 %v13160_v54, %v7540_v10  ;;  %v13162_v10 = vld [vmem:[%s18098_s2 + $0x98] sm:$0xff] }
 0x99a   : > { %8290 = vmax.xlane.f32.xlu0 %v8289_v0  ;;  %v17096_v24 = vadd.f32 %v13162_v10, %v7891_v11  ;;  %v7535_v0 = vadd.f32 %v16964_v16, %v7534_v29  ;;  %v8331_v56 = vsel %vm391_vm0, %v17089_v27, -inf  ;;  %v13164_v10 = vld [vmem:[%s18098_s2 + $0x68] sm:$0xff] }
 0x99b   : > { %v8298_v54 = vsel %vm391_vm0, %v17082_v5, -inf }
 0x99c   : > { %8329 = vmax.xlane.f32.xlu1 %v8328_v34  ;;  %v8334_v29 = vsel %vm391_vm0, %v17096_v24, -inf }
 0x99e   : > { %8326 = vmax.xlane.f32.xlu0 %v8325_v37  ;;  %v17106_v37 = vadd.f32 %v13163_v22, %v7535_v0 }
 0x9a0   : > { %8299 = vmax.xlane.f32.xlu1 %v8298_v54 }
 0x9a2   : > { %v12298_v34 = vpop.f32.mrf.mxu0  ;;  %8332 = vmax.xlane.f32.xlu0 %v8331_v56  ;;  %v8295_v56 = vsel %vm391_vm0, %v17106_v37, -inf }
 0x9a3   : > { %v7764_v11 = vadd.f32 %v12298_v34, %v16935_v48 }
 0x9a4   : > { %8335 = vmax.xlane.f32.xlu1 %v8334_v29  ;;  %v7758_v28 = vpop.f32.mrf.mxu0 }
 0x9a5   : > { %v17114_v54 = vadd.f32 %v13164_v10, %v7764_v11  ;;  %v7759_v0 = vadd.f32 %v16940_v20, %v7758_v28  ;;  %v13165_v11 = vld [vmem:[%s18098_s2 + $0xc8] sm:$0xff]  ;;  %v13166_v28 = vld [vmem:[%s18098_s2 + $0x60] sm:$0xff] }
 0x9a6   : > { %v12301_v29 = vpop.f32.mrf.mxu0 }
 0x9a7   : > { %v8316_v22 = vsel %vm391_vm0, %v17114_v54, -inf  ;;  %v7774_v53 = vadd.f32 %v12301_v29, %v16952_v47  ;;  %v17146_v29 = vpop.permute.xlu0 %8849 }
 0x9a8   : > { %8296 = vmax.xlane.f32.xlu1 %v8295_v56 }
 0x9a9   : > { %v12340_v21 = vpop.f32.mrf.mxu1 }
 0x9aa   : > { %v8115_v34 = vadd.f32 %v12340_v21, %v16935_v48  ;;  %v17133_v21 = vadd.f32 %v13166_v28, %v7759_v0 }
 0x9ab   : > { %v8109_v58 = vpop.f32.mrf.mxu1  ;;  %v17179_v63 = vpop.permute.xlu0 %8956 }
 0x9ac   : > { %8317 = vmax.xlane.f32.xlu1 %v8316_v22  ;;  %v17127_v10 = vadd.f32 %v13165_v11, %v8115_v34  ;;  %v8110_v56 = vadd.f32 %v16940_v20, %v8109_v58  ;;  %v13167_v22 = vld [vmem:[%s18098_s2 + $0xc0] sm:$0xff]  ;;  %v7768_v11 = vpop.f32.mrf.mxu0  ;;  %18784 = vst [vmem:[#allocation5_spill] sm:$0xff] %v17179_v63 }
 0x9ae   : > { %v17139_v51 = vadd.f32 %v13167_v22, %v8110_v56  ;;  %v12343_v62 = vpop.f32.mrf.mxu1  ;;  %v8352_v34 = vsel %vm391_vm0, %v17127_v10, -inf  ;;  %v13168_v56 = vld [vmem:[%s18098_s2 + $0x78] sm:$0xff] }
 0x9af   : > { %v17151_v22 = vadd.f32 %v13168_v56, %v7774_v53  ;;  %v8125_v1 = vadd.f32 %v12343_v62, %v16952_v47  ;;  %v17164_v56 = vpop.permute.xlu1 %8851  ;;  %v7769_v62 = vadd.f32 %v16964_v16, %v7768_v11 }
 0x9b0   : > { %8353 = vmax.xlane.f32.xlu1 %v8352_v34  ;;  %v8119_v58 = vpop.f32.mrf.mxu1  ;;  %v8349_v18 = vsel %vm391_vm0, %v17139_v51, -inf  ;;  %v8313_v34 = vsel %vm391_vm0, %v17133_v21, -inf }
 0x9b1   : > { %v8120_v0 = vadd.f32 %v16964_v16, %v8119_v58  ;;  %8350 = vmax.xlane.f32.xlu0 %v8349_v18  ;;  %v17170_v17 = vadd.f32 %v13170_v32, %v8125_v1  ;;  %v13172_v1 = vld [vmem:[%s18098_s2 + $0x70] sm:$0xff] }
 0x9b2   : > { %v12326_v28 = vpop.f32.mrf.mxu0  ;;  %v17187_v2 = vadd.f32 %v13172_v1, %v7769_v62  ;;  %v17201_v62 = vpop.permute.xlu0 %9071 }
 0x9b3   : > { %v17159_v58 = vadd.f32 %v13169_v46, %v8120_v0  ;;  %v13171_v46 = vld [vmem:[%s18098_s2 + $0xa0] sm:$0xff] }
 0x9b4   : > { %v7992_v18 = vpop.f32.mrf.mxu0  ;;  %8314 = vmax.xlane.f32.xlu1 %v8313_v34  ;;  %v8322_v34 = vsel %vm391_vm0, %v17151_v22, -inf }
 0x9b5   : > { %v7993_v40 = vadd.f32 %v16940_v20, %v7992_v18  ;;  %v8355_v53 = vsel %vm391_vm0, %v17159_v58, -inf }
 0x9b6   : > { %v12329_v23 = vpop.f32.mrf.mxu0  ;;  %8356 = vmax.xlane.f32.xlu0 %v8355_v53  ;;  %v13173_v53 = vld [vmem:[%s18098_s2 + $0xb0] sm:$0xff] }
 0x9b7   : > { %v17175_v0 = vadd.f32 %v13171_v46, %v7993_v40  ;;  %v7998_v40 = vadd.f32 %v12326_v28, %v16935_v48  ;;  %v13174_v28 = vld [vmem:[%s18098_s2 + $0xa8] sm:$0xff] }
 0x9b8   : > { %v8002_v18 = vpop.f32.mrf.mxu0  ;;  %8323 = vmax.xlane.f32.xlu1 %v8322_v34  ;;  %v8358_v34 = vsel %vm391_vm0, %v17170_v17, -inf }
 0x9b9   : > { %v8003_v11 = vadd.f32 %v16964_v16, %v8002_v18  ;;  %v8337_v32 = vsel %vm391_vm0, %v17175_v0, -inf  ;;  %v17197_v18 = vpop.permute.xlu1 %8958  ;;  %v17206_v1 = vadd.f32 %v13174_v28, %v7998_v40 }
 0x9ba   : > { %8338 = vmax.xlane.f32.xlu0 %v8337_v32  ;;  %18785 = vst [vmem:[#allocation90_spill] sm:$0xff] %v17197_v18  ;;  %v8319_v32 = vsel %vm391_vm0, %v17187_v2, -inf  ;;  %v13175_v18 = vld [vmem:[%s18098_s2 + $0xb8] sm:$0xff] }
 0x9bb   : > { %v17193_v46 = vadd.f32 %v13173_v53, %v8003_v11  ;;  %v8008_v11 = vadd.f32 %v12329_v23, %v16952_v47  ;;  %v8340_v40 = vsel %vm391_vm0, %v17206_v1, -inf }
 0x9bc   : > { %8359 = vmax.xlane.f32.xlu1 %v8358_v34 }
 0x9bd   : > { %v8343_v63 = vsel %vm391_vm0, %v17193_v46, -inf  ;;  %v17211_v34 = vpop.permute.xlu1 %8847  ;;  %v17216_v38 = vadd.f32 %v13175_v18, %v8008_v11 }
 0x9be   : > { %8344 = vmax.xlane.f32.xlu0 %v8343_v63  ;;  %v17221_v63 = vpop.permute.xlu0 %9067 }
 0x9bf   : > { %18786 = vst [vmem:[#allocation8_spill] sm:$0xff] %v17221_v63 }
 0x9c0   : > { %8320 = vmax.xlane.f32.xlu1 %v8319_v32 }
 0x9c2   : > { %v12354_v53 = vpop.f32.mrf.mxu0 }
 0x9c3   : > { %v8232_v26 = vadd.f32 %v12354_v53, %v16935_v48  ;;  %v13177_v48 = vld [vmem:[%s18098_s2 + $0xe0] sm:$0xff]  ;;  %v8346_v53 = vsel %vm391_vm0, %v17216_v38, -inf }
 0x9c4   : > { %v8226_v23 = vpop.f32.mrf.mxu0  ;;  %8341 = vmax.xlane.f32.xlu1 %v8340_v40 }
 0x9c5   : > { %v8227_v28 = vadd.f32 %v16940_v20, %v8226_v23  ;;  %v17227_v3 = vadd.f32 %v13176_v36, %v8232_v26  ;;  %v17237_v20 = vpop.permute.xlu1 %9069  ;;  %v17242_v36 = vpop.permute.xlu0 %9180 }
 0x9c6   : > { %v12357_v32 = vpop.f32.mrf.mxu0  ;;  %18787 = vst [vmem:[#allocation94_spill] sm:$0xff] %v17237_v20  ;;  %18788 = vst [vmem:[#allocation3_spill] sm:$0xff] %v17242_v36 }
 0x9c7   : > { %v17232_v18 = vadd.f32 %v13177_v48, %v8227_v28  ;;  %v8242_v11 = vadd.f32 %v12357_v32, %v16952_v47  ;;  %v13178_v28 = vld [vmem:[%s18098_s2 + $0xf8] sm:$0xff]  ;;  %v13179_v32 = vld [vmem:[%s18098_s2 + $0xf0] sm:$0xff] }
 0x9c8   : > { %v8236_v40 = vpop.f32.mrf.mxu0  ;;  %8347 = vmax.xlane.f32.xlu1 %v8346_v53 }
 0x9c9   : > { %v8237_v23 = vadd.f32 %v16964_v16, %v8236_v40  ;;  %v8361_v26 = vsel %vm391_vm0, %v17232_v18, -inf  ;;  %v17247_v47 = vadd.f32 %v13178_v28, %v8242_v11  ;;  %v8364_v16 = vsel %vm391_vm0, %v17227_v3, -inf  ;;  %v17258_v40 = vpop.permute.xlu1 %9065 }
 0x9ca   : > { %8362 = vmax.xlane.f32.xlu0 %v8361_v26  ;;  %18789 = vst [vmem:[#allocation97_spill] sm:$0xff] %v17258_v40  ;;  %v17262_v26 = vpop.permute.xlu0 %9174 }
 0x9cb   : > { %v17252_v48 = vadd.f32 %v13179_v32, %v8237_v23  ;;  %v8370_v11 = vsel %vm391_vm0, %v17247_v47, -inf  ;;  %18790 = vst [vmem:[#allocation4_spill] sm:$0xff] %v17262_v26 }
 0x9cc   : > { %8365 = vmax.xlane.f32.xlu1 %v8364_v16 }
 0x9cd   : > { %v8367_v53 = vsel %vm391_vm0, %v17252_v48, -inf  ;;  %v17264_v28 = vpop.permute.xlu1 %9178 }
 0x9ce   : > { %8368 = vmax.xlane.f32.xlu0 %v8367_v53  ;;  %18791 = vst [vmem:[#allocation112_spill] sm:$0xff] %v17264_v28  ;;  %v17266_v23 = vpop.permute.xlu0 %9287 }
 0x9cf   : > { %18792 = vst [vmem:[#allocation7_spill] sm:$0xff] %v17266_v23 }
 0x9d0   : > { %8371 = vmax.xlane.f32.xlu1 %v8370_v11 }
 0x9d1   : > { %v17268_v32 = vpop.permute.xlu1 %9176 }
 0x9d2   : > { %18793 = vst [vmem:[#allocation108_spill] sm:$0xff] %v17268_v32  ;;  %v17270_v36 = vpop.permute.xlu0 %9283 }
 0x9d3   : > { %18794 = vst [vmem:[#allocation10_spill] sm:$0xff] %v17270_v36 }
 0x9d5   : > { %v17272_v16 = vpop.permute.xlu1 %9289 }
 0x9d6   : > { %18795 = vst [vmem:[#allocation2_spill] sm:$0xff] %v17272_v16 }
 0x9d9   : > { %v17278_v53 = vpop.permute.xlu1 %9285 }
 0x9da   : > { %18796 = vst [vmem:[#allocation113_spill] sm:$0xff] %v17278_v53 }
 0x9dc   : > { %v8282_v63 = vpop.xlane.xlu0 %8281 }
 0x9dd   : > { %v8374_v26 = vsub.f32 %v16946_v44, %v8282_v63 }
 0x9de   : > { %v8279_v28 = vpop.xlane.xlu1 %8278 }
 0x9df   : > { %v8407_v40 = vmul.f32 1.442695, %v8374_v26  ;;  %v8373_v32 = vsub.f32 %v16957_v9, %v8279_v28 }
 0x9e0   : > { %v8288_v11 = vpop.xlane.xlu0 %8287 }
 0x9e1   : > { %9398 = vrot.lane.b32.xlu1 %v18698_v61, %s13214_s15  ;;  %12956 = vpow2.f32 %v8407_v40  ;;  %v8405_v16 = vmul.f32 1.442695, %v8373_v32  ;;  %v8376_v7 = vsub.f32 %v16972_v15, %v8288_v11 }
 0x9e3   : > { %12958 = vpow2.f32 %v8405_v16  ;;  %v8411_v61 = vmul.f32 1.442695, %v8376_v7 }
 0x9e4   : > { %9396 = vrot.lane.b32.xlu0 %v18706_v8, %s13214_s15  ;;  %v8285_v23 = vpop.xlane.xlu0 %8284 }
 0x9e5   : > { %v8375_v20 = vsub.f32 %v16978_v39, %v8285_v23  ;;  %12960 = vpow2.f32 %v8411_v61 }
 0x9e7   : > { %v8409_v53 = vmul.f32 1.442695, %v8375_v20 }
 0x9e9   : > { %12962 = vpow2.f32 %v8409_v53 }
 0x9ee   : > { %v17286_v9 = vpop.eup %12956 }
 0x9ef   : > { %v8306_v36 = vpop.xlane.xlu0 %8305  ;;  %v8472_v7 = vsel %vm391_vm0, %v17286_v9, 0.0 }
 0x9f0   : > { %v8382_v42 = vsub.f32 %v16992_v35, %v8306_v36  ;;  %v17291_v39 = vpop.eup %12958 }
 0x9f2   : > { %v8423_v63 = vmul.f32 1.442695, %v8382_v42  ;;  %v8469_v42 = vsel %vm391_vm0, %v17291_v39, 0.0 }
 0x9f3   : > { %v8303_v8 = vpop.xlane.xlu0 %8302 }
 0x9f4   : > { %v8381_v26 = vsub.f32 %v17000_v33, %v8303_v8  ;;  %12964 = vpow2.f32 %v8423_v63  ;;  %v17296_v33 = vpop.eup %12960 }
 0x9f6   : > { %v8421_v40 = vmul.f32 1.442695, %v8381_v26  ;;  %v17300_v23 = vpop.eup %12962 }
 0x9f7   : > { %v8312_v44 = vpop.xlane.xlu0 %8311  ;;  %v8475_v32 = vsel %vm391_vm0, %v17300_v23, 0.0 }
 0x9f8   : > { %v8384_v15 = vsub.f32 %v17010_v12, %v8312_v44  ;;  %12966 = vpow2.f32 %v8421_v40  ;;  %v8478_v12 = vsel %vm391_vm0, %v17296_v33, 0.0 }
 0x9fa   : > { %v8427_v35 = vmul.f32 1.442695, %v8384_v15 }
 0x9fb   : > { %v8309_v28 = vpop.xlane.xlu0 %8308 }
 0x9fc   : > { %v8383_v20 = vsub.f32 %v17020_v31, %v8309_v28  ;;  %12968 = vpow2.f32 %v8427_v35 }
 0x9fe   : > { %v8425_v36 = vmul.f32 1.442695, %v8383_v20 }
 0xa00   : > { %12970 = vpow2.f32 %v8425_v36 }
 0xa01   : > { %v17304_v16 = vpop.eup %12964 }
 0xa02   : > { %v8496_v31 = vsel %vm391_vm0, %v17304_v16, 0.0 }
 0xa03   : > { %8473 = vadd.xlane.f32.xlu0 %v8472_v7 }
 0xa05   : > { %v17308_v53 = vpop.eup %12966 }
 0xa06   : > { %v8493_v11 = vsel %vm391_vm0, %v17308_v53, 0.0 }
 0xa07   : > { %8470 = vadd.xlane.f32.xlu0 %v8469_v42 }
 0xa09   : > { %v17312_v61 = vpop.eup %12968 }
 0xa0a   : > { %v8502_v8 = vsel %vm391_vm0, %v17312_v61, 0.0 }
 0xa0b   : > { %8479 = vadd.xlane.f32.xlu0 %v8478_v12 }
 0xa0d   : > { %v17316_v44 = vpop.eup %12970 }
 0xa0e   : > { %v8499_v63 = vsel %vm391_vm0, %v17316_v44, 0.0 }
 0xa0f   : > { %8476 = vadd.xlane.f32.xlu0 %v8475_v32 }
 0xa13   : > { %8497 = vadd.xlane.f32.xlu0 %v8496_v31 }
 0xa17   : > { %8494 = vadd.xlane.f32.xlu0 %v8493_v11 }
 0xa1b   : > { %8503 = vadd.xlane.f32.xlu0 %v8502_v8 }
 0xa1f   : > { %8500 = vadd.xlane.f32.xlu0 %v8499_v63 }
 0xa21   : > { %v8294_v26 = vpop.xlane.xlu1 %8293 }
 0xa22   : > { %v8378_v40 = vsub.f32 %v17054_v52, %v8294_v26 }
 0xa23   : > { %v8291_v15 = vpop.xlane.xlu0 %8290 }
 0xa24   : > { %v8415_v7 = vmul.f32 1.442695, %v8378_v40  ;;  %v8377_v28 = vsub.f32 %v17065_v4, %v8291_v15 }
 0xa25   : > { %v8330_v35 = vpop.xlane.xlu1 %8329 }
 0xa26   : > { %12972 = vpow2.f32 %v8415_v7  ;;  %v8390_v20 = vsub.f32 %v17060_v30, %v8330_v35  ;;  %v8413_v42 = vmul.f32 1.442695, %v8377_v28 }
 0xa27   : > { %v8327_v36 = vpop.xlane.xlu0 %8326 }
 0xa28   : > { %v8439_v12 = vmul.f32 1.442695, %v8390_v20  ;;  %v8389_v32 = vsub.f32 %v17073_v25, %v8327_v36 }
 0xa29   : > { %v8300_v31 = vpop.xlane.xlu1 %8299 }
 0xa2a   : > { %12974 = vpow2.f32 %v8439_v12  ;;  %v8437_v11 = vmul.f32 1.442695, %v8389_v32  ;;  %v8380_v8 = vsub.f32 %v17082_v5, %v8300_v31 }
 0xa2b   : > { %12976 = vpow2.f32 %v8413_v42  ;;  %v8333_v52 = vpop.xlane.xlu0 %8332 }
 0xa2c   : > { %12978 = vpow2.f32 %v8437_v11  ;;  %v8419_v63 = vmul.f32 1.442695, %v8380_v8  ;;  %v8391_v4 = vsub.f32 %v17089_v27, %v8333_v52 }
 0xa2d   : > { %v8336_v26 = vpop.xlane.xlu1 %8335 }
 0xa2e   : > { %v8441_v40 = vmul.f32 1.442695, %v8391_v4  ;;  %v8392_v30 = vsub.f32 %v17096_v24, %v8336_v26  ;;  %12980 = vpow2.f32 %v8419_v63 }
 0xa30   : > { %12982 = vpow2.f32 %v8441_v40  ;;  %v8443_v15 = vmul.f32 1.442695, %v8392_v30 }
 0xa31   : > { %v8297_v7 = vpop.xlane.xlu1 %8296 }
 0xa32   : > { %v8379_v25 = vsub.f32 %v17106_v37, %v8297_v7  ;;  %12984 = vpow2.f32 %v8443_v15 }
 0xa33   : > { %v17328_v28 = vpop.eup %12972 }
 0xa34   : > { %v8417_v5 = vmul.f32 1.442695, %v8379_v25  ;;  %v8484_v35 = vsel %vm391_vm0, %v17328_v28, 0.0 }
 0xa35   : > { %v8318_v20 = vpop.xlane.xlu1 %8317  ;;  %8485 = vadd.xlane.f32.xlu1 %v8484_v35 }
 0xa36   : > { %v8386_v27 = vsub.f32 %v17114_v54, %v8318_v20  ;;  %12986 = vpow2.f32 %v8417_v5 }
 0xa37   : > { %v17333_v42 = vpop.eup %12974 }
 0xa38   : > { %v17335_v24 = vpop.eup %12976  ;;  %v8431_v36 = vmul.f32 1.442695, %v8386_v27  ;;  %v8520_v37 = vsel %vm391_vm0, %v17333_v42, 0.0 }
 0xa39   : > { %v17339_v12 = vpop.eup %12978  ;;  %v8354_v32 = vpop.xlane.xlu1 %8353  ;;  %8521 = vadd.xlane.f32.xlu1 %v8520_v37  ;;  %v8481_v4 = vsel %vm391_vm0, %v17335_v24, 0.0 }
 0xa3a   : > { %v8398_v31 = vsub.f32 %v17127_v10, %v8354_v32  ;;  %v8517_v11 = vsel %vm391_vm0, %v17339_v12, 0.0  ;;  %v8351_v8 = vpop.xlane.xlu0 %8350  ;;  %12988 = vpow2.f32 %v8431_v36 }
 0xa3b   : > { %8518 = vadd.xlane.f32.xlu0 %v8517_v11  ;;  %v17344_v54 = vpop.eup %12980  ;;  %v8397_v63 = vsub.f32 %v17139_v51, %v8351_v8 }
 0xa3c   : > { %v8455_v52 = vmul.f32 1.442695, %v8398_v31  ;;  %v8490_v51 = vsel %vm391_vm0, %v17344_v54, 0.0 }
 0xa3d   : > { %v17349_v26 = vpop.eup %12982  ;;  %v8315_v40 = vpop.xlane.xlu1 %8314  ;;  %8482 = vadd.xlane.f32.xlu1 %v8481_v4  ;;  %v8453_v15 = vmul.f32 1.442695, %v8397_v63 }
 0xa3e   : > { %12990 = vpow2.f32 %v8455_v52  ;;  %v8385_v10 = vsub.f32 %v17133_v21, %v8315_v40  ;;  %v8523_v30 = vsel %vm391_vm0, %v17349_v26, 0.0 }
 0xa3f   : > { %8524 = vadd.xlane.f32.xlu0 %v8523_v30  ;;  %v8357_v25 = vpop.xlane.xlu0 %8356  ;;  %v17356_v5 = vpop.eup %12984 }
 0xa40   : > { %v8429_v7 = vmul.f32 1.442695, %v8385_v10  ;;  %v8526_v21 = vsel %vm391_vm0, %v17356_v5, 0.0  ;;  %v8399_v11 = vsub.f32 %v17159_v58, %v8357_v25 }
 0xa41   : > { %v8324_v35 = vpop.xlane.xlu1 %8323  ;;  %8491 = vadd.xlane.f32.xlu1 %v8490_v51 }
 0xa42   : > { %12992 = vpow2.f32 %v8429_v7  ;;  %v8388_v20 = vsub.f32 %v17151_v22, %v8324_v35  ;;  %v8457_v10 = vmul.f32 1.442695, %v8399_v11 }
 0xa43   : > { %12994 = vpow2.f32 %v8453_v15  ;;  %v17361_v36 = vpop.eup %12986  ;;  %v8339_v32 = vpop.xlane.xlu0 %8338 }
 0xa44   : > { %v8435_v27 = vmul.f32 1.442695, %v8388_v20  ;;  %v8487_v52 = vsel %vm391_vm0, %v17361_v36, 0.0  ;;  %v8393_v30 = vsub.f32 %v17175_v0, %v8339_v32 }
 0xa45   : > { %v8360_v37 = vpop.xlane.xlu1 %8359  ;;  %8527 = vadd.xlane.f32.xlu1 %v8526_v21 }
 0xa46   : > { %v8400_v31 = vsub.f32 %v17170_v17, %v8360_v37  ;;  %12996 = vpow2.f32 %v8435_v27  ;;  %v8445_v0 = vmul.f32 1.442695, %v8393_v30 }
 0xa47   : > { %v17367_v22 = vpop.eup %12988  ;;  %v8345_v17 = vpop.xlane.xlu0 %8344 }
 0xa48   : > { %v8459_v8 = vmul.f32 1.442695, %v8400_v31  ;;  %v8508_v58 = vsel %vm391_vm0, %v17367_v22, 0.0  ;;  %v8395_v35 = vsub.f32 %v17193_v46, %v8345_v17 }
 0xa49   : > { %v8321_v63 = vpop.xlane.xlu1 %8320  ;;  %8488 = vadd.xlane.f32.xlu1 %v8487_v52 }
 0xa4a   : > { %12998 = vpow2.f32 %v8459_v8  ;;  %v8387_v4 = vsub.f32 %v17187_v2, %v8321_v63  ;;  %v8449_v31 = vmul.f32 1.442695, %v8395_v35 }
 0xa4b   : > { %v17370_v40 = vpop.eup %12990 }
 0xa4c   : > { %v8433_v15 = vmul.f32 1.442695, %v8387_v4  ;;  %v8544_v7 = vsel %vm391_vm0, %v17370_v40, 0.0 }
 0xa4d   : > { %v8342_v25 = vpop.xlane.xlu1 %8341  ;;  %8509 = vadd.xlane.f32.xlu1 %v8508_v58  ;;  %8545 = vadd.xlane.f32.xlu0 %v8544_v7 }
 0xa4e   : > { %13000 = vpow2.f32 %v8433_v15  ;;  %v8394_v51 = vsub.f32 %v17206_v1, %v8342_v25 }
 0xa4f   : > { %v17378_v2 = vpop.eup %12992  ;;  %13002 = vpow2.f32 %v8457_v10 }
 0xa50   : > { %v8447_v20 = vmul.f32 1.442695, %v8394_v51  ;;  %v8505_v27 = vsel %vm391_vm0, %v17378_v2, 0.0  ;;  %v17383_v21 = vpop.eup %12994 }
 0xa51   : > { %v8348_v37 = vpop.xlane.xlu1 %8347  ;;  %8506 = vadd.xlane.f32.xlu1 %v8505_v27  ;;  %v8541_v52 = vsel %vm391_vm0, %v17383_v21, 0.0 }
 0xa52   : > { %13004 = vpow2.f32 %v8447_v20  ;;  %v8396_v32 = vsub.f32 %v17216_v38, %v8348_v37 }
 0xa53   : > { %v8363_v11 = vpop.xlane.xlu0 %8362  ;;  %v17386_v1 = vpop.eup %12996  ;;  %13006 = vpow2.f32 %v8445_v0 }
 0xa54   : > { %v8451_v8 = vmul.f32 1.442695, %v8396_v32  ;;  %v8401_v46 = vsub.f32 %v17232_v18, %v8363_v11  ;;  %v8514_v30 = vsel %vm391_vm0, %v17386_v1, 0.0 }
 0xa55   : > { %v8366_v63 = vpop.xlane.xlu1 %8365  ;;  %8542 = vadd.xlane.f32.xlu1 %v8541_v52 }
 0xa56   : > { %13008 = vpow2.f32 %v8451_v8  ;;  %v8402_v4 = vsub.f32 %v17227_v3, %v8366_v63  ;;  %v8461_v17 = vmul.f32 1.442695, %v8401_v46 }
 0xa57   : > { %v17392_v10 = vpop.eup %12998  ;;  %13010 = vpow2.f32 %v8449_v31  ;;  %v8369_v38 = vpop.xlane.xlu0 %8368 }
 0xa58   : > { %v8463_v15 = vmul.f32 1.442695, %v8402_v4  ;;  %v8403_v58 = vsub.f32 %v17252_v48, %v8369_v38  ;;  %v8550_v18 = vsel %vm391_vm0, %v17392_v10, 0.0 }
 0xa59   : > { %v8372_v7 = vpop.xlane.xlu1 %8371  ;;  %8551 = vadd.xlane.f32.xlu0 %v8550_v18  ;;  %8515 = vadd.xlane.f32.xlu1 %v8514_v30  ;;  %v18797_v18 = vld [vmem:[#allocation83_spill] sm:$0xff] }
 0xa5a   : > { %13012 = vpow2.f32 %v8463_v15  ;;  %v8404_v3 = vsub.f32 %v17247_v47, %v8372_v7  ;;  %v8465_v51 = vmul.f32 1.442695, %v8403_v58  ;;  %v18798_v7 = vld [vmem:[#allocation81_spill] sm:$0xff] }
 0xa5b   : > { %v17400_v25 = vpop.eup %13000  ;;  %13014 = vpow2.f32 %v8461_v17 }
 0xa5c   : > { %v8467_v35 = vmul.f32 1.442695, %v8404_v3  ;;  %v8511_v0 = vsel %vm391_vm0, %v17400_v25, 0.0  ;;  %v17404_v20 = vpop.eup %13002  ;;  %v17448_v3 = vpop.permute.xlu0 %9396 }
 0xa5d   : > { %8512 = vadd.xlane.f32.xlu1 %v8511_v0  ;;  %v8547_v47 = vsel %vm391_vm0, %v17404_v20, 0.0  ;;  %v18801_v0 = vld [vmem:[#allocation17_spill] sm:$0xff] }
 0xa5e   : > { %13016 = vpow2.f32 %v8467_v35 }
 0xa5f   : > { %v17406_v48 = vpop.eup %13004  ;;  %13018 = vpow2.f32 %v8465_v51  ;;  %v18799_v51 = vld [vmem:[#allocation49_spill] sm:$0xff] }
 0xa60   : > { %v8532_v27 = vsel %vm391_vm0, %v17406_v48, 0.0  ;;  %v17412_v37 = vpop.eup %13006 }
 0xa61   : > { %8533 = vadd.xlane.f32.xlu0 %v8532_v27  ;;  %8548 = vadd.xlane.f32.xlu1 %v8547_v47  ;;  %v8529_v8 = vsel %vm391_vm0, %v17412_v37, 0.0  ;;  %v18803_v47 = vld [vmem:[#allocation18_spill] sm:$0xff] }
 0xa63   : > { %v17414_v32 = vpop.eup %13008 }
 0xa64   : > { %v17416_v31 = vpop.eup %13010  ;;  %v8538_v11 = vsel %vm391_vm0, %v17414_v32, 0.0 }
 0xa65   : > { %8539 = vadd.xlane.f32.xlu0 %v8538_v11  ;;  %8530 = vadd.xlane.f32.xlu1 %v8529_v8  ;;  %v8535_v63 = vsel %vm391_vm0, %v17416_v31, 0.0  ;;  %v18804_v11 = vld [vmem:[#allocation50_spill] sm:$0xff] }
 0xa67   : > { %v17422_v46 = vpop.eup %13012 }
 0xa68   : > { %v8556_v52 = vsel %vm391_vm0, %v17422_v46, 0.0  ;;  %v17428_v4 = vpop.eup %13014 }
 0xa69   : > { %8557 = vadd.xlane.f32.xlu0 %v8556_v52  ;;  %8536 = vadd.xlane.f32.xlu1 %v8535_v63  ;;  %v8553_v17 = vsel %vm391_vm0, %v17428_v4, 0.0 }
 0xa6b   : > { %v17430_v38 = vpop.eup %13016 }
 0xa6c   : > { %v8562_v30 = vsel %vm391_vm0, %v17430_v38, 0.0  ;;  %v17436_v15 = vpop.eup %13018 }
 0xa6d   : > { %8563 = vadd.xlane.f32.xlu0 %v8562_v30  ;;  %8554 = vadd.xlane.f32.xlu1 %v8553_v17  ;;  %v8559_v58 = vsel %vm391_vm0, %v17436_v15, 0.0 }
 0xa71   : > { %8560 = vadd.xlane.f32.xlu1 %v8559_v58 }
 0xa82   : > { %9394 = vrot.lane.b32.xlu1 %v18702_v55, %s13214_s15 }
 0xa83   : > { %9392 = vrot.lane.b32.xlu0 %v18707_v45, %s13214_s15  ;;  %v18800_v45 = vld [vmem:[#allocation40_spill] sm:$0xff] }
 0xa86   : > { %9561 = vrot.lane.b32.xlu1 %v18797_v18, %s13215_s18  ;;  %v18809_v18 = vld [vmem:[#allocation22_spill] sm:$0xff] }
 0xa87   : > { %9563 = vrot.lane.b32.xlu0 %v18798_v7, %s13215_s18  ;;  %v18810_v7 = vld [vmem:[#allocation94_spill] sm:$0xff] }
 0xa8a   : > { %9689 = vrot.lane.b32.xlu1 %v17030_v43, %s13216_s19 }
 0xa8b   : > { %9691 = vrot.lane.b32.xlu0 %v17026_v41, %s13216_s19  ;;  %v18802_v41 = vld [vmem:[#allocation56_spill] sm:$0xff] }
 0xa8c   : > { %v8474_v55 = vpop.xlane.xlu0 %8473 }
 0xa8d   : > { %13020 = vrcp.f32 %v8474_v55 }
 0xa8e   : > { %9565 = vrot.lane.b32.xlu1 %v18799_v51, %s13215_s18  ;;  %v18814_v51 = vld [vmem:[#allocation97_spill] sm:$0xff] }
 0xa8f   : > { %9567 = vrot.lane.b32.xlu0 %v18800_v45, %s13215_s18  ;;  %v18815_v45 = vld [vmem:[#allocation103_spill] sm:$0xff] }
 0xa90   : > { %v8471_v35 = vpop.xlane.xlu0 %8470 }
 0xa91   : > { %13022 = vrcp.f32 %v8471_v35 }
 0xa92   : > { %9693 = vrot.lane.b32.xlu1 %v16918_v14, %s13216_s19 }
 0xa93   : > { %9695 = vrot.lane.b32.xlu0 %v16916_v59, %s13216_s19 }
 0xa94   : > { %v8480_v43 = vpop.xlane.xlu0 %8479 }
 0xa95   : > { %13024 = vrcp.f32 %v8480_v43  ;;  %v17528_v43 = vpop.permute.xlu1 %9398 }
 0xa96   : > { %9533 = vrot.lane.b32.xlu1 %v18801_v0, %s13215_s18  ;;  %v18816_v0 = vld [vmem:[#allocation2_spill] sm:$0xff] }
 0xa97   : > { %9569 = vrot.lane.b32.xlu0 %v18802_v41, %s13215_s18  ;;  %v18817_v41 = vld [vmem:[#allocation92_spill] sm:$0xff] }
 0xa98   : > { %v8477_v27 = vpop.xlane.xlu0 %8476 }
 0xa99   : > { %13026 = vrcp.f32 %v8477_v27 }
 0xa9a   : > { %9535 = vrot.lane.b32.xlu1 %v18803_v47, %s13215_s18  ;;  %v13021_v8 = vpop.eup %13020  ;;  %v18819_v47 = vld [vmem:[#allocation99_spill] sm:$0xff] }
 0xa9b   : > { %9571 = vrot.lane.b32.xlu0 %v18804_v11, %s13215_s18  ;;  %v8598_v63 = vmul.f32 %v13021_v8, %v17286_v9  ;;  %v18822_v8 = vld [vmem:[#allocation27_spill] sm:$0xff] }
 0xa9c   : > { %v8498_v14 = vpop.xlane.xlu0 %8497 }
 0xa9d   : > { %13028 = vrcp.f32 %v8498_v14  ;;  %v18821_v14 = vld [vmem:[#allocation55_spill] sm:$0xff] }
 0xa9e   : > { %v13023_v52 = vpop.eup %13022  ;;  %9661 = vrot.lane.b32.xlu1 %v16902_v13, %s13216_s19 }
 0xa9f   : > { %9697 = vrot.lane.b32.xlu0 %v16922_v57, %s13216_s19  ;;  %v8597_v59 = vmul.f32 %v13023_v52, %v17291_v39  ;;  %v18805_v39 = vld [vmem:[#allocation65_spill] sm:$0xff] }
 0xaa0   : > { %v8495_v30 = vpop.xlane.xlu0 %8494 }
 0xaa1   : > { %13030 = vrcp.f32 %v8495_v30  ;;  %12366 = vmatprep.mubr.msk.f32.mxu1 %vm391_vm0, %v8597_v59  ;;  %v18824_v30 = vld [vmem:[#allocation69_spill] sm:$0xff] }
 0xaa2   : > { %12367 = vmatmul.mubr.msk.f32.vlgmr.msra.gmra.mxu1 %vm391_vm0, %v8598_v63  ;;  %9663 = vrot.lane.b32.xlu1 %v16900_v50, %s13216_s19  ;;  %v13025_v57 = vpop.eup %13024  ;;  %v18806_v50 = vld [vmem:[#allocation88_spill] sm:$0xff]  ;;  %v18823_v63 = vld [vmem:[#allocation61_spill] sm:$0xff] }
 0xaa3   : > { %12387 = vmatpush3.msra.mxu1 %v16897_v6  ;;  %9699 = vrot.lane.b32.xlu0 %v16920_v60, %s13216_s19  ;;  %v8600_v17 = vmul.f32 %v13025_v57, %v17296_v33 }
 0xaa4   : > { %12388 = vmatprep.subr.mxu1 %v17164_v56  ;;  %v8504_v13 = vpop.xlane.xlu0 %8503 }
 0xaa5   : > { %12389 = vmatpush3.msra.mxu1 %v17164_v56  ;;  %13032 = vrcp.f32 %v8504_v13  ;;  %v18808_v56 = vld [vmem:[#allocation105_spill] sm:$0xff] }
 0xaa6   : > { %v13027_v9 = vpop.eup %13026  ;;  %12390 = vmatprep.subr.mxu1 %v17146_v29  ;;  %9537 = vrot.lane.b32.xlu1 %v18805_v39, %s13215_s18  ;;  %v18826_v39 = vld [vmem:[#allocation54_spill] sm:$0xff] }
 0xaa7   : > { %12391 = vmatpush3.msra.mxu1 %v17146_v29  ;;  %9573 = vrot.lane.b32.xlu0 %v18806_v50, %s13215_s18  ;;  %v8599_v6 = vmul.f32 %v13027_v9, %v17300_v23  ;;  %v18807_v29 = vld [vmem:[#allocation13_spill] sm:$0xff]  ;;  %v18825_v9 = vld [vmem:[#allocation62_spill] sm:$0xff] }
 0xaa8   : > { %12392 = vmatprep.subr.mxu1 %v17211_v34  ;;  %v8501_v60 = vpop.xlane.xlu0 %8500 }
 0xaa9   : > { %12393 = vmatpush3.msra.mxu1 %v17211_v34  ;;  %13034 = vrcp.f32 %v8501_v60  ;;  %12369 = vmatprep.mubr.msk.f32.mxu1 %vm391_vm0, %v8599_v6  ;;  %v18827_v6 = vld [vmem:[#allocation26_spill] sm:$0xff]  ;;  %v18828_v60 = vld [vmem:[#allocation72_spill] sm:$0xff] }
 0xaaa   : > { %12414 = vmatprep.subr.mxu1 %v17201_v62  ;;  %12370 = vmatmul.mubr.msk.f32.gmra.mxu1 %vm391_vm0, %v8600_v17  ;;  %v13029_v23 = vpop.eup %13028 }
 0xaab   : > { %9539 = vrot.lane.b32.xlu1 %v18807_v29, %s13215_s18  ;;  %9575 = vrot.lane.b32.xlu0 %v18808_v56, %s13215_s18  ;;  %v8606_v33 = vmul.f32 %v13029_v23, %v17304_v16  ;;  %v18813_v16 = vld [vmem:[#allocation95_spill] sm:$0xff] }
 0xaae   : > { %v13031_v58 = vpop.eup %13030 }
 0xaaf   : > { %9665 = vrot.lane.b32.xlu1 %v16906_v19, %s13216_s19  ;;  %9701 = vrot.lane.b32.xlu0 %v17034_v49, %s13216_s19  ;;  %v8605_v34 = vmul.f32 %v13031_v58, %v17308_v53  ;;  %v18811_v19 = vld [vmem:[#allocation85_spill] sm:$0xff]  ;;  %v18812_v53 = vld [vmem:[#allocation8_spill] sm:$0xff]  ;;  %v18829_v58 = vld [vmem:[#allocation58_spill] sm:$0xff] }
 0xab1   : > { %12394 = vmatprep.mubr.msk.f32.mxu1 %vm391_vm0, %v8605_v34 }
 0xab2   : > { %12395 = vmatmul.mubr.msk.f32.vlgmr.msra.gmra.mxu1 %vm391_vm0, %v8606_v33  ;;  %v13033_v55 = vpop.eup %13032 }
 0xab3   : > { %12415 = vmatpush3.msra.mxu1 %v17201_v62  ;;  %9667 = vrot.lane.b32.xlu1 %v18809_v18, %s13216_s19  ;;  %v8608_v35 = vmul.f32 %v13033_v55, %v17312_v61  ;;  %v18820_v61 = vld [vmem:[#allocation28_spill] sm:$0xff] }
 0xab4   : > { %12416 = vmatprep.subr.mxu1 %v18810_v7  ;;  %9703 = vrot.lane.b32.xlu0 %v18811_v19, %s13216_s19 }
 0xab5   : > { %12417 = vmatpush3.msra.mxu1 %v18810_v7  ;;  %v18830_v7 = vld [vmem:[#allocation87_spill] sm:$0xff] }
 0xab6   : > { %v13035_v49 = vpop.eup %13034  ;;  %12418 = vmatprep.subr.mxu1 %v18812_v53 }
 0xab7   : > { %12419 = vmatpush3.msra.mxu1 %v18812_v53  ;;  %9541 = vrot.lane.b32.xlu1 %v18813_v16, %s13215_s18  ;;  %v8607_v62 = vmul.f32 %v13035_v49, %v17316_v44  ;;  %v18818_v44 = vld [vmem:[#allocation100_spill] sm:$0xff]  ;;  %v18831_v16 = vld [vmem:[#allocation70_spill] sm:$0xff] }
 0xab8   : > { %12420 = vmatprep.subr.mxu1 %v18814_v51  ;;  %9577 = vrot.lane.b32.xlu0 %v18815_v45, %s13215_s18  ;;  %v18835_v45 = vld [vmem:[#allocation79_spill] sm:$0xff] }
 0xab9   : > { %12421 = vmatpush3.msra.mxu1 %v18814_v51  ;;  %12397 = vmatprep.mubr.msk.f32.mxu1 %vm391_vm0, %v8607_v62  ;;  %v18833_v62 = vld [vmem:[#allocation7_spill] sm:$0xff] }
 0xaba   : > { %12442 = vmatprep.subr.mxu1 %v18816_v0  ;;  %12398 = vmatmul.mubr.msk.f32.gmra.mxu1 %vm391_vm0, %v8608_v35  ;;  %v18836_v35 = vld [vmem:[#allocation113_spill] sm:$0xff] }
 0xabb   : > { %9543 = vrot.lane.b32.xlu1 %v18817_v41, %s13215_s18  ;;  %v18838_v41 = vld [vmem:[#allocation90_spill] sm:$0xff] }
 0xabc   : > { %9579 = vrot.lane.b32.xlu0 %v18818_v44, %s13215_s18  ;;  %v18839_v44 = vld [vmem:[#allocation77_spill] sm:$0xff] }
 0xabe   : > { %v8486_v27 = vpop.xlane.xlu1 %8485 }
 0xabf   : > { %9669 = vrot.lane.b32.xlu1 %v18819_v47, %s13216_s19 }
 0xac0   : > { %9705 = vrot.lane.b32.xlu0 %v18820_v61, %s13216_s19  ;;  %v18840_v61 = vld [vmem:[#allocation10_spill] sm:$0xff] }
 0xac2   : > { %v8522_v11 = vpop.xlane.xlu1 %8521 }
 0xac3   : > { %9671 = vrot.lane.b32.xlu1 %v18821_v14, %s13216_s19  ;;  %13036 = vrcp.f32 %v8522_v11 }
 0xac4   : > { %9707 = vrot.lane.b32.xlu0 %v18822_v8, %s13216_s19  ;;  %v8519_v52 = vpop.xlane.xlu0 %8518  ;;  %v18841_v8 = vld [vmem:[#allocation5_spill] sm:$0xff] }
 0xac5   : > { %13038 = vrcp.f32 %v8519_v52  ;;  %v18842_v52 = vld [vmem:[#allocation23_spill] sm:$0xff] }
 0xac6   : > { %13040 = vrcp.f32 %v8486_v27  ;;  %v8483_v59 = vpop.xlane.xlu1 %8482 }
 0xac7   : > { %13042 = vrcp.f32 %v8483_v59  ;;  %9545 = vrot.lane.b32.xlu1 %v18823_v63, %s13215_s18  ;;  %v18843_v63 = vld [vmem:[#allocation3_spill] sm:$0xff] }
 0xac8   : > { %9581 = vrot.lane.b32.xlu0 %v18824_v30, %s13215_s18  ;;  %v8525_v13 = vpop.xlane.xlu0 %8524  ;;  %v18844_v30 = vld [vmem:[#allocation25_spill] sm:$0xff] }
 0xac9   : > { %13044 = vrcp.f32 %v8525_v13 }
 0xaca   : > { %v8492_v57 = vpop.xlane.xlu1 %8491 }
 0xacb   : > { %9547 = vrot.lane.b32.xlu1 %v18825_v9, %s13215_s18 }
 0xacc   : > { %9583 = vrot.lane.b32.xlu0 %v18826_v39, %s13215_s18 }
 0xace   : > { %v8528_v50 = vpop.xlane.xlu1 %8527 }
 0xacf   : > { %13046 = vrcp.f32 %v8528_v50  ;;  %9673 = vrot.lane.b32.xlu1 %v18827_v6, %s13216_s19 }
 0xad0   : > { %9709 = vrot.lane.b32.xlu0 %v18828_v60, %s13216_s19  ;;  %v13037_v17 = vpop.eup %13036  ;;  %13048 = vrcp.f32 %v8492_v57  ;;  %v18845_v57 = vld [vmem:[#allocation16_spill] sm:$0xff] }
 0xad1   : > { %v8614_v18 = vmul.f32 %v13037_v17, %v17333_v42 }
 0xad2   : > { %v13039_v29 = vpop.eup %13038  ;;  %v8489_v56 = vpop.xlane.xlu1 %8488 }
 0xad3   : > { %v13041_v23 = vpop.eup %13040  ;;  %13050 = vrcp.f32 %v8489_v56  ;;  %9675 = vrot.lane.b32.xlu1 %v18829_v58, %s13216_s19  ;;  %v8613_v34 = vmul.f32 %v13039_v29, %v17339_v12  ;;  %v18832_v12 = vld [vmem:[#allocation80_spill] sm:$0xff]  ;;  %v18848_v29 = vld [vmem:[#allocation107_spill] sm:$0xff] }
 0xad4   : > { %v13043_v33 = vpop.eup %13042  ;;  %9711 = vrot.lane.b32.xlu0 %v18830_v7, %s13216_s19  ;;  %v8602_v53 = vmul.f32 %v13041_v23, %v17328_v28  ;;  %v18851_v7 = vld [vmem:[#allocation112_spill] sm:$0xff] }
 0xad5   : > { %12422 = vmatprep.mubr.msk.f32.mxu1 %vm391_vm0, %v8613_v34  ;;  %v8601_v19 = vmul.f32 %v13043_v33, %v17335_v24  ;;  %v18834_v24 = vld [vmem:[#allocation21_spill] sm:$0xff]  ;;  %v18849_v33 = vld [vmem:[#allocation32_spill] sm:$0xff] }
 0xad6   : > { %v13045_v55 = vpop.eup %13044  ;;  %v8510_v49 = vpop.xlane.xlu1 %8509  ;;  %12423 = vmatmul.mubr.msk.f32.vlgmr.msra.gmra.mxu1 %vm391_vm0, %v8614_v18  ;;  %v18850_v18 = vld [vmem:[#allocation101_spill] sm:$0xff] }
 0xad7   : > { %9549 = vrot.lane.b32.xlu1 %v18831_v16, %s13215_s18  ;;  %12443 = vmatpush3.msra.mxu1 %v18816_v0  ;;  %v8615_v42 = vmul.f32 %v13045_v55, %v17349_v26  ;;  %13052 = vrcp.f32 %v8510_v49  ;;  %v8546_v51 = vpop.xlane.xlu0 %8545  ;;  %v18837_v0 = vld [vmem:[#allocation52_spill] sm:$0xff] }
 0xad8   : > { %12380 = vmatprep.mubr.msk.f32.mxu0 %vm391_vm0, %v8601_v19  ;;  %9585 = vrot.lane.b32.xlu0 %v18832_v12, %s13215_s18  ;;  %v18852_v49 = vld [vmem:[#allocation108_spill] sm:$0xff] }
 0xad9   : > { %12444 = vmatprep.subr.mxu1 %v18833_v62  ;;  %12381 = vmatmul.mubr.msk.f32.vlgmr.msra.gmra.mxu0 %vm391_vm0, %v8602_v53  ;;  %v18855_v53 = vld [vmem:[#allocation4_spill] sm:$0xff] }
 0xada   : > { %12401 = vmatpush3.msra.mxu0 %v18834_v24  ;;  %12445 = vmatpush3.msra.mxu1 %v18833_v62  ;;  %v8507_v28 = vpop.xlane.xlu1 %8506 }
 0xadb   : > { %12402 = vmatprep.subr.mxu0 %v18835_v45  ;;  %12425 = vmatprep.mubr.msk.f32.mxu1 %vm391_vm0, %v8615_v42  ;;  %13054 = vrcp.f32 %v8507_v28 }
 0xadc   : > { %v13047_v26 = vpop.eup %13046  ;;  %12446 = vmatprep.subr.mxu1 %v18836_v35  ;;  %12403 = vmatpush3.msra.mxu0 %v18835_v45  ;;  %13056 = vrcp.f32 %v8546_v51 }
 0xadd   : > { %9551 = vrot.lane.b32.xlu1 %v18837_v0, %s13215_s18  ;;  %12447 = vmatpush3.msra.mxu1 %v18836_v35  ;;  %v13049_v47 = vpop.eup %13048  ;;  %v8616_v11 = vmul.f32 %v13047_v26, %v17356_v5 }
 0xade   : > { %12404 = vmatprep.subr.mxu0 %v18838_v41  ;;  %9587 = vrot.lane.b32.xlu0 %v18839_v44, %s13215_s18  ;;  %v8543_v27 = vpop.xlane.xlu1 %8542  ;;  %v8604_v5 = vmul.f32 %v13049_v47, %v17344_v54  ;;  %v18847_v54 = vld [vmem:[#allocation36_spill] sm:$0xff] }
 0xadf   : > { %12448 = vmatprep.subr.mxu1 %v18840_v61  ;;  %12405 = vmatpush3.msra.mxu0 %v18838_v41  ;;  %13058 = vrcp.f32 %v8543_v27 }
 0xae0   : > { %v13051_v14 = vpop.eup %13050  ;;  %12449 = vmatpush3.msra.mxu1 %v18840_v61  ;;  %12406 = vmatprep.subr.mxu0 %v18841_v8 }
 0xae1   : > { %12407 = vmatpush3.msra.mxu0 %v18841_v8  ;;  %9677 = vrot.lane.b32.xlu1 %v18842_v52, %s13216_s19  ;;  %v8603_v59 = vmul.f32 %v13051_v14, %v17361_v36  ;;  %v18846_v36 = vld [vmem:[#allocation20_spill] sm:$0xff] }
 0xae2   : > { %12428 = vmatprep.subr.mxu0 %v18843_v63  ;;  %9713 = vrot.lane.b32.xlu0 %v18844_v30, %s13216_s19  ;;  %v8516_v13 = vpop.xlane.xlu1 %8515  ;;  %v8552_v9 = vpop.xlane.xlu0 %8551  ;;  %v18856_v52 = vld [vmem:[#allocation60_spill] sm:$0xff] }
 0xae3   : > { %12426 = vmatmul.mubr.msk.f32.gmra.mxu1 %vm391_vm0, %v8616_v11  ;;  %12383 = vmatprep.mubr.msk.f32.mxu0 %vm391_vm0, %v8603_v59  ;;  %13060 = vrcp.f32 %v8516_v13 }
 0xae4   : > { %12384 = vmatmul.mubr.msk.f32.gmra.mxu0 %vm391_vm0, %v8604_v5  ;;  %v13053_v50 = vpop.eup %13052 }
 0xae5   : > { %9679 = vrot.lane.b32.xlu1 %v18845_v57, %s13216_s19  ;;  %v8610_v17 = vmul.f32 %v13053_v50, %v17367_v22  ;;  %v18857_v57 = vld [vmem:[#allocation64_spill] sm:$0xff] }
 0xae6   : > { %9715 = vrot.lane.b32.xlu0 %v18846_v36, %s13216_s19  ;;  %v8513_v39 = vpop.xlane.xlu1 %8512 }
 0xae7   : > { %13062 = vrcp.f32 %v8513_v39 }
 0xae8   : > { %v13055_v6 = vpop.eup %13054  ;;  %13064 = vrcp.f32 %v8552_v9 }
 0xae9   : > { %9553 = vrot.lane.b32.xlu1 %v18847_v54, %s13215_s18  ;;  %v8609_v60 = vmul.f32 %v13055_v6, %v17378_v2  ;;  %v13057_v58 = vpop.eup %13056  ;;  %v18858_v6 = vld [vmem:[#allocation35_spill] sm:$0xff] }
 0xaea   : > { %9589 = vrot.lane.b32.xlu0 %v18848_v29, %s13215_s18  ;;  %v8549_v56 = vpop.xlane.xlu1 %8548  ;;  %v8534_v23 = vpop.xlane.xlu0 %8533  ;;  %v8622_v2 = vmul.f32 %v13057_v58, %v17370_v40  ;;  %v18854_v40 = vld [vmem:[#allocation82_spill] sm:$0xff] }
 0xaeb   : > { %13066 = vrcp.f32 %v8549_v56  ;;  %12408 = vmatprep.mubr.msk.f32.mxu0 %vm391_vm0, %v8609_v60  ;;  %v18859_v56 = vld [vmem:[#allocation39_spill] sm:$0xff] }
 0xaec   : > { %v13059_v34 = vpop.eup %13058  ;;  %12409 = vmatmul.mubr.msk.f32.vlgmr.msra.gmra.mxu0 %vm391_vm0, %v8610_v17  ;;  %13068 = vrcp.f32 %v8534_v23 }
 0xaed   : > { %9555 = vrot.lane.b32.xlu1 %v18849_v33, %s13215_s18  ;;  %12429 = vmatpush3.msra.mxu0 %v18843_v63  ;;  %v8621_v22 = vmul.f32 %v13059_v34, %v17383_v21  ;;  %v18853_v21 = vld [vmem:[#allocation96_spill] sm:$0xff] }
 0xaee   : > { %9591 = vrot.lane.b32.xlu0 %v18850_v18, %s13215_s18  ;;  %12430 = vmatprep.subr.mxu0 %v18851_v7  ;;  %v8531_v19 = vpop.xlane.xlu1 %8530  ;;  %v8540_v55 = vpop.xlane.xlu0 %8539 }
 0xaef   : > { %12431 = vmatpush3.msra.mxu0 %v18851_v7  ;;  %13070 = vrcp.f32 %v8531_v19  ;;  %12450 = vmatprep.mubr.msk.f32.mxu1 %vm391_vm0, %v8621_v22 }
 0xaf0   : > { %12432 = vmatprep.subr.mxu0 %v18852_v49  ;;  %12451 = vmatmul.mubr.msk.f32.vlgmr.msra.gmra.mxu1 %vm391_vm0, %v8622_v2  ;;  %13072 = vrcp.f32 %v8540_v55  ;;  %v13061_v12 = vpop.eup %13060  ;;  %v18860_v2 = vld [vmem:[#allocation38_spill] sm:$0xff]  ;;  %v18861_v55 = vld [vmem:[#allocation45_spill] sm:$0xff] }
 0xaf1   : > { %9681 = vrot.lane.b32.xlu1 %v18853_v21, %s13216_s19  ;;  %12433 = vmatpush3.msra.mxu0 %v18852_v49  ;;  %v8612_v45 = vmul.f32 %v13061_v12, %v17386_v1  ;;  %v18862_v21 = vld [vmem:[#allocation33_spill] sm:$0xff] }
 0xaf2   : > { %9717 = vrot.lane.b32.xlu0 %v18854_v40, %s13216_s19  ;;  %12434 = vmatprep.subr.mxu0 %v18855_v53  ;;  %v8537_v16 = vpop.xlane.xlu1 %8536  ;;  %v8558_v42 = vpop.xlane.xlu0 %8557 }
 0xaf3   : > { %12435 = vmatpush3.msra.mxu0 %v18855_v53  ;;  %13074 = vrcp.f32 %v8537_v16 }
 0xaf4   : > { %v13063_v62 = vpop.eup %13062  ;;  %12456 = vmatprep.subr.mxu0 %v17528_v43  ;;  %13076 = vrcp.f32 %v8558_v42 }
 0xaf5   : > { %v8611_v24 = vmul.f32 %v13063_v62, %v17400_v25  ;;  %v13065_v26 = vpop.eup %13064  ;;  %v18863_v62 = vld [vmem:[#allocation44_spill] sm:$0xff] }
 0xaf6   : > { %v8555_v28 = vpop.xlane.xlu1 %8554  ;;  %v8564_v51 = vpop.xlane.xlu0 %8563  ;;  %v8624_v27 = vmul.f32 %v13065_v26, %v17392_v10 }
 0xaf7   : > { %13078 = vrcp.f32 %v8555_v28  ;;  %12411 = vmatprep.mubr.msk.f32.mxu0 %vm391_vm0, %v8611_v24 }
 0xaf8   : > { %v13067_v35 = vpop.eup %13066  ;;  %12412 = vmatmul.mubr.msk.f32.gmra.mxu0 %vm391_vm0, %v8612_v45  ;;  %13080 = vrcp.f32 %v8564_v51 }
 0xaf9   : > { %v8623_v0 = vmul.f32 %v13067_v35, %v17404_v20  ;;  %v13069_v25 = vpop.eup %13068 }
 0xafa   : > { %v8561_v41 = vpop.xlane.xlu1 %8560  ;;  %v9393_v44 = vpop.permute.xlu0 %9392  ;;  %v8618_v61 = vmul.f32 %v13069_v25, %v17406_v48 }
 0xafb   : > { %13082 = vrcp.f32 %v8561_v41  ;;  %12453 = vmatprep.mubr.msk.f32.mxu1 %vm391_vm0, %v8623_v0  ;;  %v18864_v0 = vld [vmem:[#allocation57_spill] sm:$0xff] }
 0xafc   : > { %v13071_v47 = vpop.eup %13070  ;;  %12454 = vmatmul.mubr.msk.f32.gmra.mxu1 %vm391_vm0, %v8624_v27 }
 0xafd   : > { %v8617_v1 = vmul.f32 %v13071_v47, %v17412_v37  ;;  %v13073_v8 = vpop.eup %13072  ;;  %v18865_v47 = vld [vmem:[#allocation75_spill] sm:$0xff] }
 0xafe   : > { %v9395_v11 = vpop.permute.xlu1 %9394  ;;  %v9564_v14 = vpop.permute.xlu0 %9563  ;;  %v8620_v63 = vmul.f32 %v13073_v8, %v17414_v32 }
 0xaff   : > { %12436 = vmatprep.mubr.msk.f32.mxu0 %vm391_vm0, %v8617_v1  ;;  %v9900_v59 = vsel %vm761_vm1, %v18856_v52, %v9564_v14  ;;  %v18867_v52 = vld [vmem:[#allocation47_spill] sm:$0xff] }
 0xb00   : > { %v13075_v20 = vpop.eup %13074  ;;  %12437 = vmatmul.mubr.msk.f32.vlgmr.msra.gmra.mxu0 %vm391_vm0, %v8618_v61  ;;  %v18866_v61 = vld [vmem:[#allocation53_spill] sm:$0xff] }
 0xb01   : > { %12457 = vmatpush3.msra.mxu0 %v17528_v43  ;;  %v8619_v10 = vmul.f32 %v13075_v20, %v17416_v31  ;;  %v13077_v30 = vpop.eup %13076 }
 0xb02   : > { %12458 = vmatprep.subr.mxu0 %v17448_v3  ;;  %v9562_v37 = vpop.permute.xlu1 %9561  ;;  %v9692_v48 = vpop.permute.xlu0 %9691  ;;  %v8626_v5 = vmul.f32 %v13077_v30, %v17422_v46 }
 0xb03   : > { %12459 = vmatpush3.msra.mxu0 %v17448_v3  ;;  %v17655_v13 = vsel %vm9917_vm2, %v9900_v59, %v9692_v48  ;;  %12439 = vmatprep.mubr.msk.f32.mxu0 %vm391_vm0, %v8619_v10  ;;  %v9899_v32 = vsel %vm761_vm1, %v18857_v57, %v9562_v37 }
 0xb04   : > { %v13079_v43 = vpop.eup %13078  ;;  %12460 = vmatprep.subr.mxu0 %v9395_v11  ;;  %12440 = vmatmul.mubr.msk.f32.gmra.mxu0 %vm391_vm0, %v8620_v63 }
 0xb05   : > { %12461 = vmatpush3.msra.mxu0 %v9395_v11  ;;  %v8625_v31 = vmul.f32 %v13079_v43, %v17428_v4  ;;  %v13081_v36 = vpop.eup %13080 }
 0xb06   : > { %12462 = vmatprep.subr.mxu0 %v9393_v44  ;;  %v9690_v9 = vpop.permute.xlu1 %9689  ;;  %v9568_v3 = vpop.permute.xlu0 %9567  ;;  %v8628_v17 = vmul.f32 %v13081_v36, %v17430_v38 }
 0xb07   : > { %v17664_v39 = vsel %vm9917_vm2, %v9899_v32, %v9690_v9  ;;  %12463 = vmatpush3.msra.mxu0 %v9393_v44  ;;  %12464 = vmatprep.mubr.msk.f32.mxu0 %vm391_vm0, %v8625_v31  ;;  %v9902_v46 = vsel %vm761_vm1, %v18858_v6, %v9568_v3  ;;  %v18868_v31 = vld [vmem:[#allocation67_spill] sm:$0xff]  ;;  %v18869_v3 = vld [vmem:[#allocation46_spill] sm:$0xff] }
 0xb08   : > { %v13083_v50 = vpop.eup %13082  ;;  %12465 = vmatmul.mubr.msk.f32.vlgmr.msra.gmra.mxu0 %vm391_vm0, %v8626_v5 }
 0xb09   : > { %v8627_v4 = vmul.f32 %v13083_v50, %v17436_v15  ;;  %v18870_v50 = vld [vmem:[#allocation76_spill] sm:$0xff] }
 0xb0a   : > { %v9566_v54 = vpop.permute.xlu1 %9565  ;;  %v9696_v60 = vpop.permute.xlu0 %9695 }
 0xb0b   : > { %v17673_v29 = vsel %vm9917_vm2, %v9902_v46, %v9696_v60  ;;  %12467 = vmatprep.mubr.msk.f32.mxu0 %vm391_vm0, %v8627_v4  ;;  %v9901_v23 = vsel %vm761_vm1, %v18859_v56, %v9566_v54 }
 0xb0c   : > { %12468 = vmatmul.mubr.msk.f32.gmra.mxu0 %vm391_vm0, %v8628_v17  ;;  %v18871_v17 = vld [vmem:[#allocation51_spill] sm:$0xff] }
 0xb0e   : > { %v9694_v58 = vpop.permute.xlu1 %9693  ;;  %v9570_v34 = vpop.permute.xlu0 %9569 }
 0xb0f   : > { %v17680_v15 = vsel %vm9917_vm2, %v9901_v23, %v9694_v58  ;;  %v9903_v38 = vsel %vm761_vm1, %v18860_v2, %v9570_v34  ;;  %v18872_v2 = vld [vmem:[#allocation34_spill] sm:$0xff] }
 0xb12   : > { %v9534_v33 = vpop.permute.xlu1 %9533  ;;  %v9572_v22 = vpop.permute.xlu0 %9571 }
 0xb13   : > { %v9885_v49 = vsel %vm761_vm1, %v18861_v55, %v9534_v33  ;;  %v9904_v40 = vsel %vm761_vm1, %v18862_v21, %v9572_v22 }
 0xb16   : > { %v9536_v18 = vpop.permute.xlu1 %9535  ;;  %v9698_v7 = vpop.permute.xlu0 %9697 }
 0xb17   : > { %v17685_v19 = vsel %vm9917_vm2, %v9903_v38, %v9698_v7  ;;  %v9886_v24 = vsel %vm761_vm1, %v18863_v62, %v9536_v18 }
 0xb1a   : > { %v9662_v53 = vpop.permute.xlu1 %9661  ;;  %v9700_v16 = vpop.permute.xlu0 %9699 }
 0xb1b   : > { %v17692_v42 = vsel %vm9917_vm2, %v9885_v49, %v9662_v53  ;;  %v17695_v12 = vsel %vm9917_vm2, %v9904_v40, %v9700_v16  ;;  %v18873_v49 = vld [vmem:[#allocation48_spill] sm:$0xff]  ;;  %v18874_v40 = vld [vmem:[#allocation42_spill] sm:$0xff] }
 0xb1e   : > { %v9664_v28 = vpop.permute.xlu1 %9663  ;;  %v9574_v51 = vpop.permute.xlu0 %9573 }
 0xb1f   : > { %v17700_v45 = vsel %vm9917_vm2, %v9886_v24, %v9664_v28  ;;  %v9905_v41 = vsel %vm761_vm1, %v18864_v0, %v9574_v51  ;;  %v18875_v51 = vld [vmem:[#allocation59_spill] sm:$0xff] }
 0xb22   : > { %v9538_v26 = vpop.permute.xlu1 %9537  ;;  %v9576_v35 = vpop.permute.xlu0 %9575 }
 0xb23   : > { %v9887_v1 = vsel %vm761_vm1, %v18865_v47, %v9538_v26  ;;  %v9906_v11 = vsel %vm761_vm1, %v18866_v61, %v9576_v35  ;;  %v9986_v47 = vld [vmem:[%s18101_s5 + $0x18] sm:$0xff] }
 0xb24   : > { %12470 = vmatprep.subr.mxu0 %v9986_v47  ;;  %12526 = vmatprep.subr.mxu1 %v9986_v47 }
 0xb25   : > { %12471 = vmatpush3.msra.mxu0 %v9986_v47  ;;  %12530 = vmatpush3.msra.mxu1 %v9986_v47  ;;  %v18880_v47 = vld [vmem:[#allocation24_spill] sm:$0xff] }
 0xb26   : > { %v9540_v44 = vpop.permute.xlu1 %9539  ;;  %v9702_v27 = vpop.permute.xlu0 %9701 }
 0xb27   : > { %v17705_v25 = vsel %vm9917_vm2, %v9905_v41, %v9702_v27  ;;  %v9888_v59 = vsel %vm761_vm1, %v18867_v52, %v9540_v44 }
 0xb2a   : > { %v9666_v14 = vpop.permute.xlu1 %9665  ;;  %v9704_v8 = vpop.permute.xlu0 %9703 }
 0xb2b   : > { %v17712_v20 = vsel %vm9917_vm2, %v9887_v1, %v9666_v14  ;;  %v17715_v10 = vsel %vm9917_vm2, %v9906_v11, %v9704_v8  ;;  %v18876_v1 = vld [vmem:[#allocation43_spill] sm:$0xff]  ;;  %v9985_v8 = vld [vmem:[%s18101_s5 + $0x10] sm:$0xff] }
 0xb2c   : > { %12472 = vmatprep.subr.mxu0 %v9985_v8  ;;  %12527 = vmatprep.subr.mxu1 %v9985_v8 }
 0xb2d   : > { %12473 = vmatpush3.msra.mxu0 %v9985_v8  ;;  %12531 = vmatpush3.msra.mxu1 %v9985_v8 }
 0xb2e   : > { %v9668_v37 = vpop.permute.xlu1 %9667  ;;  %v9578_v48 = vpop.permute.xlu0 %9577 }
 0xb2f   : > { %v17720_v63 = vsel %vm9917_vm2, %v9888_v59, %v9668_v37  ;;  %v9907_v5 = vsel %vm761_vm1, %v18868_v31, %v9578_v48  ;;  %v9984_v59 = vld [vmem:[%s18101_s5 + $0x8] sm:$0xff]  ;;  %v18877_v37 = vld [vmem:[#allocation29_spill] sm:$0xff] }
 0xb30   : > { %12474 = vmatprep.subr.mxu0 %v9984_v59  ;;  %12528 = vmatprep.subr.mxu1 %v9984_v59 }
 0xb31   : > { %12475 = vmatpush3.msra.mxu0 %v9984_v59  ;;  %12532 = vmatpush3.msra.mxu1 %v9984_v59  ;;  %v18884_v59 = vld [vmem:[#allocation98_spill] sm:$0xff] }
 0xb32   : > { %v9542_v30 = vpop.permute.xlu1 %9541  ;;  %v9580_v43 = vpop.permute.xlu0 %9579 }
 0xb33   : > { %v9889_v36 = vsel %vm761_vm1, %v18869_v3, %v9542_v30  ;;  %v9908_v4 = vsel %vm761_vm1, %v18870_v50, %v9580_v43  ;;  %v18878_v30 = vld [vmem:[#allocation41_spill] sm:$0xff] }
 0xb36   : > { %v9544_v57 = vpop.permute.xlu1 %9543  ;;  %v9706_v32 = vpop.permute.xlu0 %9705 }
 0xb37   : > { %v17725_v9 = vsel %vm9917_vm2, %v9907_v5, %v9706_v32  ;;  %v9890_v56 = vsel %vm761_vm1, %v18871_v17, %v9544_v57  ;;  %v9983_v57 = vld [vmem:[%s18101_s5] sm:$0xff] }
 0xb38   : > { %12476 = vmatprep.subr.mxu0 %v9983_v57  ;;  %12529 = vmatprep.subr.mxu1 %v9983_v57 }
 0xb39   : > { %12477 = vmatpush3.msra.mxu0 %v9983_v57  ;;  %12533 = vmatpush3.msra.mxu1 %v9983_v57 }
 0xb3a   : > { %v9670_v6 = vpop.permute.xlu1 %9669  ;;  %v9708_v46 = vpop.permute.xlu0 %9707 }
 0xb3b   : > { %v17732_v54 = vsel %vm9917_vm2, %v9889_v36, %v9670_v6  ;;  %v17735_v60 = vsel %vm9917_vm2, %v9908_v4, %v9708_v46  ;;  %v18879_v36 = vld [vmem:[#allocation37_spill] sm:$0xff] }
 0xb3e   : > { %v9672_v23 = vpop.permute.xlu1 %9671  ;;  %v9582_v58 = vpop.permute.xlu0 %9581 }
 0xb3f   : > { %v17740_v34 = vsel %vm9917_vm2, %v9890_v56, %v9672_v23  ;;  %v9909_v38 = vsel %vm761_vm1, %v18872_v2, %v9582_v58 }
 0xb42   : > { %v9546_v33 = vpop.permute.xlu1 %9545  ;;  %v9584_v22 = vpop.permute.xlu0 %9583 }
 0xb43   : > { %v9891_v21 = vsel %vm761_vm1, %v18873_v49, %v9546_v33  ;;  %v9910_v53 = vsel %vm761_vm1, %v18874_v40, %v9584_v22 }
 0xb46   : > { %v9548_v18 = vpop.permute.xlu1 %9547  ;;  %v9710_v7 = vpop.permute.xlu0 %9709 }
 0xb47   : > { %v17745_v55 = vsel %vm9917_vm2, %v9909_v38, %v9710_v7  ;;  %v9892_v26 = vsel %vm761_vm1, %v18875_v51, %v9548_v18 }
 0xb4a   : > { %v9674_v16 = vpop.permute.xlu1 %9673  ;;  %v9712_v62 = vpop.permute.xlu0 %9711 }
 0xb4b   : > { %v17752_v24 = vsel %vm9917_vm2, %v9891_v21, %v9674_v16  ;;  %v17755_v28 = vsel %vm9917_vm2, %v9910_v53, %v9712_v62 }
 0xb4e   : > { %v9676_v35 = vpop.permute.xlu1 %9675  ;;  %v9586_v0 = vpop.permute.xlu0 %9585 }
 0xb4f   : > { %v17760_v41 = vsel %vm9917_vm2, %v9892_v26, %v9676_v35  ;;  %v9911_v61 = vsel %vm761_vm1, %v18876_v1, %v9586_v0  ;;  %v18881_v1 = vld [vmem:[#allocation84_spill] sm:$0xff] }
 0xb52   : > { %v9550_v44 = vpop.permute.xlu1 %9549  ;;  %v9588_v27 = vpop.permute.xlu0 %9587 }
 0xb53   : > { %v9893_v48 = vsel %vm761_vm1, %v18877_v37, %v9550_v44  ;;  %v9912_v43 = vsel %vm761_vm1, %v18878_v30, %v9588_v27  ;;  %v18885_v37 = vld [vmem:[#allocation89_spill] sm:$0xff] }
 0xb56   : > { %v9552_v11 = vpop.permute.xlu1 %9551  ;;  %v9714_v14 = vpop.permute.xlu0 %9713 }
 0xb57   : > { %v17771_v52 = vsel %vm9917_vm2, %v9911_v61, %v9714_v14  ;;  %v9894_v50 = vsel %vm761_vm1, %v18879_v36, %v9552_v11  ;;  %v18882_v11 = vld [vmem:[#allocation110_spill] sm:$0xff]  ;;  %v18883_v14 = vld [vmem:[#allocation109_spill] sm:$0xff]  ;;  %v18888_v36 = vld [vmem:[#allocation19_spill] sm:$0xff] }
 0xb5a   : > { %v9678_v31 = vpop.permute.xlu1 %9677  ;;  %v9716_v5 = vpop.permute.xlu0 %9715 }
 0xb5b   : > { %v17784_v32 = vsel %vm9917_vm2, %v9893_v48, %v9678_v31  ;;  %v17787_v3 = vsel %vm9917_vm2, %v9912_v43, %v9716_v5  ;;  %v18886_v48 = vld [vmem:[#allocation93_spill] sm:$0xff]  ;;  %v18887_v31 = vld [vmem:[#allocation71_spill] sm:$0xff] }
 0xb5e   : > { %v9680_v4 = vpop.permute.xlu1 %9679 }
 0xb5f   : > { %v17792_v6 = vsel %vm9917_vm2, %v9894_v50, %v9680_v4 }
 0xb62   : > { %v12368_v46 = vpop.f32.mrf.mxu1  ;;  %v17818_v61 = vpop.permute.xlu1 %9553 }
 0xb63   : > { %9791 = vrot.lane.b32.xlu1 %v12368_v46, %s13217_s10 }
 0xb64   : > { %v8719_v17 = vpop.f32.mrf.mxu1 }
 0xb66   : > { %v17825_v8 = vpop.permute.xlu1 %9555 }
 0xb67   : > { %9789 = vrot.lane.b32.xlu1 %v8719_v17, %s13217_s10 }
 0xb6a   : > { %v12371_v56 = vpop.f32.mrf.mxu1  ;;  %v17833_v43 = vpop.permute.xlu1 %9681 }
 0xb6b   : > { %9795 = vrot.lane.b32.xlu1 %v12371_v56, %s13217_s10 }
 0xb6c   : > { %v8729_v23 = vpop.f32.mrf.mxu1 }
 0xb6f   : > { %9793 = vrot.lane.b32.xlu1 %v8729_v23, %s13217_s10 }
 0xb72   : > { %v12396_v58 = vpop.f32.mrf.mxu1 }
 0xb73   : > { %9807 = vrot.lane.b32.xlu1 %v12396_v58, %s13217_s10 }
 0xb74   : > { %v8937_v33 = vpop.f32.mrf.mxu1 }
 0xb77   : > { %9805 = vrot.lane.b32.xlu1 %v8937_v33, %s13217_s10 }
 0xb7a   : > { %v12399_v22 = vpop.f32.mrf.mxu1 }
 0xb7c   : > { %v8947_v2 = vpop.f32.mrf.mxu1 }
 0xb96   : > { %v12424_v38 = vpop.f32.mrf.mxu1 }
 0xb97   : > { %9823 = vrot.lane.b32.xlu0 %v12424_v38, %s13217_s10 }
 0xb98   : > { %v9155_v7 = vpop.f32.mrf.mxu1 }
 0xb99   : > { %v12382_v18 = vpop.f32.mrf.mxu0 }
 0xb9a   : > { %9799 = vrot.lane.b32.xlu1 %v12382_v18, %s13217_s10 }
 0xb9b   : > { %v8828_v49 = vpop.f32.mrf.mxu0 }
 0xb9e   : > { %9821 = vrot.lane.b32.xlu1 %v9155_v7, %s13217_s10 }
 0xba2   : > { %9797 = vrot.lane.b32.xlu1 %v8828_v49, %s13217_s10 }
 0xba3   : > { %v12427_v21 = vpop.f32.mrf.mxu1 }
 0xba4   : > { %9827 = vrot.lane.b32.xlu0 %v12427_v21, %s13217_s10  ;;  %v12385_v40 = vpop.f32.mrf.mxu0 }
 0xba5   : > { %v9165_v53 = vpop.f32.mrf.mxu1 }
 0xba6   : > { %9803 = vrot.lane.b32.xlu1 %v12385_v40, %s13217_s10  ;;  %v8838_v16 = vpop.f32.mrf.mxu0 }
 0xba8   : > { %9825 = vrot.lane.b32.xlu0 %v9165_v53, %s13217_s10 }
 0xbaa   : > { %9801 = vrot.lane.b32.xlu1 %v8838_v16, %s13217_s10 }
 0xbac   : > { %v12410_v51 = vpop.f32.mrf.mxu0 }
 0xbae   : > { %v9046_v35 = vpop.f32.mrf.mxu0 }
 0xbb0   : > { %v12452_v62 = vpop.f32.mrf.mxu1 }
 0xbb1   : > { %9839 = vrot.lane.b32.xlu0 %v12452_v62, %s13217_s10 }
 0xbb2   : > { %v9373_v26 = vpop.f32.mrf.mxu1 }
 0xbb5   : > { %9837 = vrot.lane.b32.xlu0 %v9373_v26, %s13217_s10 }
 0xbb8   : > { %v12413_v0 = vpop.f32.mrf.mxu0 }
 0xbb9   : > { %9819 = vrot.lane.b32.xlu0 %v12413_v0, %s13217_s10 }
 0xbba   : > { %v9056_v44 = vpop.f32.mrf.mxu0 }
 0xbbb   : > { %9817 = vrot.lane.b32.xlu1 %v9056_v44, %s13217_s10 }
 0xbbc   : > { %v12455_v27 = vpop.f32.mrf.mxu1 }
 0xbbd   : > { %9843 = vrot.lane.b32.xlu0 %v12455_v27, %s13217_s10 }
 0xbbe   : > { %v9383_v30 = vpop.f32.mrf.mxu1 }
 0xbbf   : > { %9683 = vrot.lane.b32.xlu1 %v18880_v47, %s13216_s19 }
 0xbc0   : > { %v12438_v5 = vpop.f32.mrf.mxu0 }
 0xbc1   : > { %9719 = vrot.lane.b32.xlu0 %v18881_v1, %s13216_s19 }
 0xbc2   : > { %v9264_v50 = vpop.f32.mrf.mxu0 }
 0xbc3   : > { %9809 = vrot.lane.b32.xlu1 %v8947_v2, %s13217_s10  ;;  %v18889_v2 = vld [vmem:[#allocation6_spill] sm:$0xff] }
 0xbc4   : > { %v12441_v56 = vpop.f32.mrf.mxu0 }
 0xbc5   : > { %9593 = vrot.lane.b32.xlu0 %v18882_v11, %s13215_s18 }
 0xbc6   : > { %v9274_v58 = vpop.f32.mrf.mxu0 }
 0xbc7   : > { %9811 = vrot.lane.b32.xlu1 %v12399_v22, %s13217_s10 }
 0xbc8   : > { %v12466_v22 = vpop.f32.mrf.mxu0 }
 0xbc9   : > { %9595 = vrot.lane.b32.xlu0 %v18883_v14, %s13215_s18 }
 0xbca   : > { %v9482_v38 = vpop.f32.mrf.mxu0 }
 0xbcb   : > { %9557 = vrot.lane.b32.xlu1 %v18884_v59, %s13215_s18 }
 0xbcc   : > { %v12469_v18 = vpop.f32.mrf.mxu0 }
 0xbcd   : > { %9721 = vrot.lane.b32.xlu0 %v18885_v37, %s13216_s19 }
 0xbce   : > { %v9492_v7 = vpop.f32.mrf.mxu0 }
 0xbcf   : > { %9559 = vrot.lane.b32.xlu1 %v18886_v48, %s13215_s18 }
 0xbd1   : > { %9841 = vrot.lane.b32.xlu0 %v9383_v30, %s13217_s10 }
 0xbd3   : > { %9685 = vrot.lane.b32.xlu1 %v18887_v31, %s13216_s19 }
 0xbd5   : > { %v9792_v57 = vpop.permute.xlu1 %9791  ;;  %9831 = vrot.lane.b32.xlu0 %v12438_v5, %s13217_s10 }
 0xbd6   : > { %v9952_v17 = vsel %vm9950_vm3, %v17700_v45, %v9792_v57 }
 0xbd7   : > { %9687 = vrot.lane.b32.xlu1 %v18888_v36, %s13216_s19 }
 0xbd9   : > { %v9790_v4 = vpop.permute.xlu1 %9789  ;;  %9829 = vrot.lane.b32.xlu0 %v9264_v50, %s13217_s10 }
 0xbda   : > { %v9951_v46 = vsel %vm9950_vm3, %v17692_v42, %v9790_v4 }
 0xbdb   : > { %12478 = vmatprep.mubr.msk.f32.mxu0 %vm391_vm0, %v9951_v46  ;;  %9813 = vrot.lane.b32.xlu1 %v9046_v35, %s13217_s10 }
 0xbdc   : > { %12479 = vmatmul.mubr.msk.f32.vlgmr.msra.gmra.mxu0 %vm391_vm0, %v9952_v17 }
 0xbdd   : > { %v9796_v23 = vpop.permute.xlu1 %9795  ;;  %9835 = vrot.lane.b32.xlu0 %v12441_v56, %s13217_s10 }
 0xbde   : > { %v9954_v45 = vsel %vm9950_vm3, %v17720_v63, %v9796_v23  ;;  %v17864_v63 = vpop.permute.xlu0 %9589 }
 0xbdf   : > { %9815 = vrot.lane.b32.xlu1 %v12410_v51, %s13217_s10 }
 0xbe1   : > { %v9794_v33 = vpop.permute.xlu1 %9793  ;;  %9833 = vrot.lane.b32.xlu0 %v9274_v58, %s13217_s10 }
 0xbe2   : > { %v9953_v42 = vsel %vm9950_vm3, %v17712_v20, %v9794_v33  ;;  %v17866_v21 = vpop.permute.xlu0 %9591 }
 0xbe3   : > { %12481 = vmatprep.mubr.msk.f32.mxu0 %vm391_vm0, %v9953_v42 }
 0xbe4   : > { %12482 = vmatmul.mubr.msk.f32.gmra.mxu0 %vm391_vm0, %v9954_v45 }
 0xbe5   : > { %9723 = vrot.lane.b32.xlu0 %v18889_v2, %s13216_s19  ;;  %v9808_v20 = vpop.permute.xlu1 %9807 }
 0xbe6   : > { %v17868_v16 = vpop.permute.xlu0 %9717 }
 0xbe9   : > { %9847 = vrot.lane.b32.xlu0 %v12466_v22, %s13217_s10  ;;  %v9806_v49 = vpop.permute.xlu1 %9805 }
 0xbed   : > { %9845 = vrot.lane.b32.xlu0 %v9482_v38, %s13217_s10  ;;  %v18892_v38 = vld [vmem:[#allocation63_spill] sm:$0xff] }
 0xbf1   : > { %9849 = vrot.lane.b32.xlu0 %v9492_v7, %s13217_s10 }
 0xbf5   : > { %9851 = vrot.lane.b32.xlu0 %v12469_v18, %s13217_s10 }
 0xc09   : > { %v9824_v51 = vpop.permute.xlu0 %9823 }
 0xc0a   : > { %v9968_v31 = vsel %vm9950_vm3, %v17673_v29, %v9824_v51 }
 0xc0c   : > { %v9800_v40 = vpop.permute.xlu1 %9799 }
 0xc0d   : > { %v9956_v35 = vsel %vm9950_vm3, %v17740_v34, %v9800_v40  ;;  %v9960_v34 = vsel %vm9950_vm3, %v17792_v6, %v9808_v20 }
 0xc10   : > { %v9822_v53 = vpop.permute.xlu1 %9821 }
 0xc11   : > { %v9967_v30 = vsel %vm9950_vm3, %v17680_v15, %v9822_v53 }
 0xc14   : > { %v9798_v62 = vpop.permute.xlu1 %9797 }
 0xc15   : > { %v9955_v26 = vsel %vm9950_vm3, %v17732_v54, %v9798_v62  ;;  %v9959_v54 = vsel %vm9950_vm3, %v17784_v32, %v9806_v49  ;;  %v18893_v62 = vld [vmem:[#allocation66_spill] sm:$0xff] }
 0xc16   : > { %12484 = vmatprep.mubr.msk.f32.mxu0 %vm391_vm0, %v9955_v26  ;;  %v9828_v44 = vpop.permute.xlu0 %9827 }
 0xc17   : > { %12485 = vmatmul.mubr.msk.f32.gmra.mxu0 %vm391_vm0, %v9956_v35  ;;  %v9970_v29 = vsel %vm9950_vm3, %v17695_v12, %v9828_v44 }
 0xc18   : > { %v9804_v0 = vpop.permute.xlu1 %9803 }
 0xc19   : > { %v9958_v1 = vsel %vm9950_vm3, %v17760_v41, %v9804_v0 }
 0xc1a   : > { %v9826_v11 = vpop.permute.xlu0 %9825 }
 0xc1c   : > { %v9802_v27 = vpop.permute.xlu1 %9801 }
 0xc1d   : > { %v9957_v47 = vsel %vm9950_vm3, %v17752_v24, %v9802_v27 }
 0xc1e   : > { %12487 = vmatprep.mubr.msk.f32.mxu0 %vm391_vm0, %v9957_v47 }
 0xc1f   : > { %12488 = vmatmul.mubr.msk.f32.gmra.mxu0 %vm391_vm0, %v9958_v1 }
 0xc20   : > { %12490 = vmatprep.mubr.msk.f32.mxu0 %vm391_vm0, %v9959_v54  ;;  %v18894_v54 = vld [vmem:[#allocation68_spill] sm:$0xff] }
 0xc23   : > { %12491 = vmatmul.mubr.msk.f32.gmra.mxu0 %vm391_vm0, %v9960_v34  ;;  %v17888_v14 = vpop.permute.xlu0 %9839  ;;  %v18895_v34 = vld [vmem:[#allocation74_spill] sm:$0xff] }
 0xc24   : > { %v9976_v1 = vsel %vm9950_vm3, %v17755_v28, %v17888_v14  ;;  %v9914_v28 = vsel %vm761_vm1, %v18895_v34, %v17866_v21 }
 0xc27   : > { %v9838_v24 = vpop.permute.xlu0 %9837 }
 0xc28   : > { %v9975_v27 = vsel %vm9950_vm3, %v17745_v55, %v9838_v24 }
 0xc2b   : > { %v9820_v59 = vpop.permute.xlu0 %9819 }
 0xc2c   : > { %v9966_v32 = vsel %vm9950_vm3, %v17655_v13, %v9820_v59  ;;  %v9969_v13 = vsel %vm9950_vm3, %v17685_v19, %v9826_v11  ;;  %v9913_v11 = vsel %vm761_vm1, %v18894_v54, %v17864_v63  ;;  %v18896_v63 = vld [vmem:[#allocation78_spill] sm:$0xff] }
 0xc2d   : > { %v9818_v41 = vpop.permute.xlu1 %9817 }
 0xc2e   : > { %v9965_v37 = vsel %vm9950_vm3, %v17664_v39, %v9818_v41  ;;  %v18890_v39 = vld [vmem:[#allocation31_spill] sm:$0xff] }
 0xc2f   : > { %12499 = vmatprep.mubr.msk.f32.mxu1 %vm391_vm0, %v9965_v37  ;;  %v9844_v48 = vpop.permute.xlu0 %9843  ;;  %v9895_v57 = vsel %vm761_vm1, %v18890_v39, %v17818_v61  ;;  %v18891_v61 = vld [vmem:[#allocation30_spill] sm:$0xff] }
 0xc30   : > { %12500 = vmatmul.mubr.msk.f32.vlgmr.msra.gmra.mxu1 %vm391_vm0, %v9966_v32  ;;  %v9928_v15 = vsel %vm9917_vm2, %v9895_v57, %v17833_v43  ;;  %v9896_v19 = vsel %vm761_vm1, %v18891_v61, %v17825_v8  ;;  %v9978_v55 = vsel %vm9950_vm3, %v17787_v3, %v9844_v48  ;;  %v18897_v32 = vld [vmem:[#allocation73_spill] sm:$0xff] }
 0xc31   : > { %v9684_v6 = vpop.permute.xlu1 %9683  ;;  %12502 = vmatprep.mubr.msk.f32.mxu1 %vm391_vm0, %v9967_v30 }
 0xc32   : > { %v9929_v46 = vsel %vm9917_vm2, %v9896_v19, %v9684_v6 }
 0xc33   : > { %v9720_v5 = vpop.permute.xlu0 %9719 }
 0xc34   : > { %12503 = vmatmul.mubr.msk.f32.gmra.mxu1 %vm391_vm0, %v9968_v31  ;;  %v9947_v24 = vsel %vm9917_vm2, %v9914_v28, %v9720_v5  ;;  %v17982_v5 = vld [vmem:[%s18102_s6] ss:$0 sm:$0xff] }
 0xc35   : > { %v9810_v36 = vpop.permute.xlu1 %9809  ;;  %12505 = vmatprep.mubr.msk.f32.mxu1 %vm391_vm0, %v9969_v13 }
 0xc36   : > { %v9961_v50 = vsel %vm9950_vm3, %v9928_v15, %v9810_v36 }
 0xc37   : > { %12493 = vmatprep.mubr.msk.f32.mxu0 %vm391_vm0, %v9961_v50  ;;  %v9594_v4 = vpop.permute.xlu0 %9593 }
 0xc38   : > { %12506 = vmatmul.mubr.msk.f32.gmra.mxu1 %vm391_vm0, %v9970_v29  ;;  %v9915_v41 = vsel %vm761_vm1, %v18896_v63, %v9594_v4 }
 0xc39   : > { %v9812_v43 = vpop.permute.xlu1 %9811 }
 0xc3a   : > { %v9962_v17 = vsel %vm9950_vm3, %v9929_v46, %v9812_v43 }
 0xc3b   : > { %12494 = vmatmul.mubr.msk.f32.gmra.mxu0 %vm391_vm0, %v9962_v17  ;;  %v9596_v56 = vpop.permute.xlu0 %9595 }
 0xc3c   : > { %v9916_v48 = vsel %vm761_vm1, %v18897_v32, %v9596_v56 }
 0xc3d   : > { %v9558_v23 = vpop.permute.xlu1 %9557 }
 0xc3e   : > { %v9897_v8 = vsel %vm761_vm1, %v18892_v38, %v9558_v23 }
 0xc3f   : > { %v9722_v58 = vpop.permute.xlu0 %9721 }
 0xc40   : > { %v9948_v21 = vsel %vm9917_vm2, %v9915_v41, %v9722_v58 }
 0xc41   : > { %v9560_v12 = vpop.permute.xlu1 %9559 }
 0xc42   : > { %v9898_v51 = vsel %vm761_vm1, %v18893_v62, %v9560_v12 }
 0xc43   : > { %v9842_v33 = vpop.permute.xlu0 %9841 }
 0xc45   : > { %v9686_v42 = vpop.permute.xlu1 %9685 }
 0xc46   : > { %v9930_v7 = vsel %vm9917_vm2, %v9897_v8, %v9686_v42 }
 0xc47   : > { %v9832_v45 = vpop.permute.xlu0 %9831 }
 0xc48   : > { %v9972_v20 = vsel %vm9950_vm3, %v17715_v10, %v9832_v45 }
 0xc49   : > { %v9688_v22 = vpop.permute.xlu1 %9687 }
 0xc4b   : > { %v9830_v2 = vpop.permute.xlu0 %9829 }
 0xc4c   : > { %v9971_v18 = vsel %vm9950_vm3, %v17705_v25, %v9830_v2  ;;  %v9931_v25 = vsel %vm9917_vm2, %v9898_v51, %v9688_v22 }
 0xc4d   : > { %v9814_v49 = vpop.permute.xlu1 %9813  ;;  %12508 = vmatprep.mubr.msk.f32.mxu1 %vm391_vm0, %v9971_v18 }
 0xc4e   : > { %v9963_v40 = vsel %vm9950_vm3, %v9930_v7, %v9814_v49  ;;  %12509 = vmatmul.mubr.msk.f32.gmra.mxu1 %vm391_vm0, %v9972_v20 }
 0xc4f   : > { %12496 = vmatprep.mubr.msk.f32.mxu0 %vm391_vm0, %v9963_v40  ;;  %v9836_v53 = vpop.permute.xlu0 %9835 }
 0xc50   : > { %v9974_v44 = vsel %vm9950_vm3, %v17735_v60, %v9836_v53 }
 0xc51   : > { %v9816_v26 = vpop.permute.xlu1 %9815 }
 0xc52   : > { %v9964_v35 = vsel %vm9950_vm3, %v9931_v25, %v9816_v26 }
 0xc53   : > { %12497 = vmatmul.mubr.msk.f32.gmra.mxu0 %vm391_vm0, %v9964_v35  ;;  %v9834_v10 = vpop.permute.xlu0 %9833 }
 0xc54   : > { %v9973_v0 = vsel %vm9950_vm3, %v17725_v9, %v9834_v10  ;;  %v9977_v9 = vsel %vm9950_vm3, %v17771_v52, %v9842_v33  ;;  %v9946_v52 = vsel %vm9917_vm2, %v9913_v11, %v17868_v16 }
 0xc55   : > { %12511 = vmatprep.mubr.msk.f32.mxu1 %vm391_vm0, %v9973_v0 }
 0xc56   : > { %12512 = vmatmul.mubr.msk.f32.gmra.mxu1 %vm391_vm0, %v9974_v44 }
 0xc57   : > { %12514 = vmatprep.mubr.msk.f32.mxu1 %vm391_vm0, %v9975_v27  ;;  %v9724_v47 = vpop.permute.xlu0 %9723 }
 0xc58   : > { %v9949_v30 = vsel %vm9917_vm2, %v9916_v48, %v9724_v47 }
 0xc5a   : > { %12515 = vmatmul.mubr.msk.f32.gmra.mxu1 %vm391_vm0, %v9976_v1 }
 0xc5b   : > { %12517 = vmatprep.mubr.msk.f32.mxu1 %vm391_vm0, %v9977_v9  ;;  %v9848_v60 = vpop.permute.xlu0 %9847 }
 0xc5c   : > { %v9980_v3 = vsel %vm9950_vm3, %v9947_v24, %v9848_v60 }
 0xc5e   : > { %12518 = vmatmul.mubr.msk.f32.gmra.mxu1 %vm391_vm0, %v9978_v55 }
 0xc5f   : > { %v9846_v14 = vpop.permute.xlu0 %9845 }
 0xc60   : > { %v9979_v59 = vsel %vm9950_vm3, %v9946_v52, %v9846_v14 }
 0xc61   : > { %12520 = vmatprep.mubr.msk.f32.mxu1 %vm391_vm0, %v9979_v59 }
 0xc62   : > { %12521 = vmatmul.mubr.msk.f32.gmra.mxu1 %vm391_vm0, %v9980_v3 }
 0xc63   : > { %v9850_v37 = vpop.permute.xlu0 %9849 }
 0xc64   : > { %v9981_v16 = vsel %vm9950_vm3, %v9948_v21, %v9850_v37 }
 0xc65   : > { %12523 = vmatprep.mubr.msk.f32.mxu1 %vm391_vm0, %v9981_v16 }
 0xc67   : > { %v9852_v6 = vpop.permute.xlu0 %9851 }
 0xc68   : > { %v9982_v31 = vsel %vm9950_vm3, %v9949_v30, %v9852_v6 }
 0xc69   : > { %12524 = vmatmul.mubr.msk.f32.gmra.mxu1 %vm391_vm0, %v9982_v31 }
 0xc9c   : > { %v12480_v39 = vpop.f32.mrf.mxu0 }
 0xc9d   : > { %v10162_v57 = vadd.f32 %v12480_v39, %v17982_v5 }
 0xc9e   : > { %v10156_v13 = vpop.f32.mrf.mxu0 }
 0xc9f   : > { %10316 = vst.msk [vmem:[%s17989_s28 + $0x8] sm:$0xff] %vm391_vm0, %v10162_v57  ;;  %v10157_v15 = vadd.f32 %v17982_v5, %v10156_v13 }
 0xca1   : > { %10315 = vst.msk [vmem:[%s17989_s28] sm:$0xff] %vm391_vm0, %v10157_v15 }
 0xca4   : > { %v12483_v36 = vpop.f32.mrf.mxu0 }
 0xca5   : > { %v10172_v50 = vadd.f32 %v12483_v36, %v17982_v5 }
 0xca6   : > { %v10166_v29 = vpop.f32.mrf.mxu0 }
 0xca7   : > { %10318 = vst.msk [vmem:[%s17989_s28 + $0x18] sm:$0xff] %vm391_vm0, %v10172_v50  ;;  %v10167_v4 = vadd.f32 %v17982_v5, %v10166_v29 }
 0xca9   : > { %10317 = vst.msk [vmem:[%s17989_s28 + $0x10] sm:$0xff] %vm391_vm0, %v10167_v4 }
 0xcd7   : > { %v12486_v61 = vpop.f32.mrf.mxu0 }
 0xcd8   : > { %v10182_v19 = vadd.f32 %v12486_v61, %v17982_v5 }
 0xcd9   : > { %v10176_v46 = vpop.f32.mrf.mxu0 }
 0xcda   : > { %10320 = vst.msk [vmem:[%s17989_s28 + $0x28] sm:$0xff] %vm391_vm0, %v10182_v19  ;;  %v10177_v43 = vadd.f32 %v17982_v5, %v10176_v46 }
 0xcdc   : > { %10319 = vst.msk [vmem:[%s17989_s28 + $0x20] sm:$0xff] %vm391_vm0, %v10177_v43 }
 0xcdf   : > { %v12489_v17 = vpop.f32.mrf.mxu0 }
 0xce0   : > { %v10192_v56 = vadd.f32 %v12489_v17, %v17982_v5 }
 0xce1   : > { %v10186_v23 = vpop.f32.mrf.mxu0 }
 0xce2   : > { %10322 = vst.msk [vmem:[%s17989_s28 + $0x38] sm:$0xff] %vm391_vm0, %v10192_v56  ;;  %v10187_v58 = vadd.f32 %v17982_v5, %v10186_v23 }
 0xce3   : > { %v12492_v12 = vpop.f32.mrf.mxu0 }
 0xce4   : > { %10321 = vst.msk [vmem:[%s17989_s28 + $0x30] sm:$0xff] %vm391_vm0, %v10187_v58  ;;  %v10202_v33 = vadd.f32 %v12492_v12, %v17982_v5 }
 0xce5   : > { %v10196_v42 = vpop.f32.mrf.mxu0 }
 0xce6   : > { %10324 = vst.msk [vmem:[%s17989_s28 + $0x48] sm:$0xff] %vm391_vm0, %v10202_v33  ;;  %v10197_v45 = vadd.f32 %v17982_v5, %v10196_v42 }
 0xce8   : > { %10323 = vst.msk [vmem:[%s17989_s28 + $0x40] sm:$0xff] %vm391_vm0, %v10197_v45 }
 0xcf0   : > { %v12501_v22 = vpop.f32.mrf.mxu1 }
 0xcf1   : > { %v10232_v2 = vadd.f32 %v12501_v22, %v17982_v5 }
 0xcf2   : > { %v10226_v38 = vpop.f32.mrf.mxu1 }
 0xcf3   : > { %10330 = vst.msk [vmem:[%s17989_s28 + $0x78] sm:$0xff] %vm391_vm0, %v10232_v2  ;;  %v10227_v8 = vadd.f32 %v17982_v5, %v10226_v38 }
 0xcf4   : > { %v12504_v18 = vpop.f32.mrf.mxu1 }
 0xcf5   : > { %10329 = vst.msk [vmem:[%s17989_s28 + $0x70] sm:$0xff] %vm391_vm0, %v10227_v8  ;;  %v10242_v7 = vadd.f32 %v12504_v18, %v17982_v5 }
 0xcf6   : > { %v10236_v20 = vpop.f32.mrf.mxu1 }
 0xcf7   : > { %10332 = vst.msk [vmem:[%s17989_s28 + $0x88] sm:$0xff] %vm391_vm0, %v10242_v7  ;;  %v10237_v49 = vadd.f32 %v17982_v5, %v10236_v20 }
 0xcf8   : > { %v12507_v40 = vpop.f32.mrf.mxu1 }
 0xcf9   : > { %10331 = vst.msk [vmem:[%s17989_s28 + $0x80] sm:$0xff] %vm391_vm0, %v10237_v49  ;;  %v10252_v53 = vadd.f32 %v12507_v40, %v17982_v5 }
 0xcfa   : > { %v10246_v62 = vpop.f32.mrf.mxu1 }
 0xcfb   : > { %10334 = vst.msk [vmem:[%s17989_s28 + $0x98] sm:$0xff] %vm391_vm0, %v10252_v53  ;;  %v10247_v51 = vadd.f32 %v17982_v5, %v10246_v62  ;;  %v12495_v25 = vpop.f32.mrf.mxu0 }
 0xcfc   : > { %v10212_v26 = vadd.f32 %v12495_v25, %v17982_v5 }
 0xcfd   : > { %10333 = vst.msk [vmem:[%s17989_s28 + $0x90] sm:$0xff] %vm391_vm0, %v10247_v51  ;;  %v10206_v35 = vpop.f32.mrf.mxu0 }
 0xcfe   : > { %10326 = vst.msk [vmem:[%s17989_s28 + $0x58] sm:$0xff] %vm391_vm0, %v10212_v26  ;;  %v10207_v10 = vadd.f32 %v17982_v5, %v10206_v35 }
 0xd00   : > { %10325 = vst.msk [vmem:[%s17989_s28 + $0x50] sm:$0xff] %vm391_vm0, %v10207_v10 }
 0xd0e   : > { %v12510_v0 = vpop.f32.mrf.mxu1 }
 0xd0f   : > { %v10262_v44 = vadd.f32 %v12510_v0, %v17982_v5 }
 0xd10   : > { %v10256_v27 = vpop.f32.mrf.mxu1 }
 0xd11   : > { %10336 = vst.msk [vmem:[%s17989_s28 + $0xa8] sm:$0xff] %vm391_vm0, %v10262_v44  ;;  %v10257_v47 = vadd.f32 %v17982_v5, %v10256_v27 }
 0xd13   : > { %10335 = vst.msk [vmem:[%s17989_s28 + $0xa0] sm:$0xff] %vm391_vm0, %v10257_v47  ;;  %v12498_v1 = vpop.f32.mrf.mxu0 }
 0xd14   : > { %v10222_v9 = vadd.f32 %v12498_v1, %v17982_v5 }
 0xd15   : > { %v10216_v60 = vpop.f32.mrf.mxu0 }
 0xd16   : > { %10328 = vst.msk [vmem:[%s17989_s28 + $0x68] sm:$0xff] %vm391_vm0, %v10222_v9  ;;  %v10217_v55 = vadd.f32 %v17982_v5, %v10216_v60  ;;  %v12513_v54 = vpop.f32.mrf.mxu1 }
 0xd17   : > { %v10272_v11 = vadd.f32 %v12513_v54, %v17982_v5 }
 0xd18   : > { %10327 = vst.msk [vmem:[%s17989_s28 + $0x60] sm:$0xff] %vm391_vm0, %v10217_v55  ;;  %v10266_v34 = vpop.f32.mrf.mxu1 }
 0xd19   : > { %10338 = vst.msk [vmem:[%s17989_s28 + $0xb8] sm:$0xff] %vm391_vm0, %v10272_v11  ;;  %v10267_v28 = vadd.f32 %v17982_v5, %v10266_v34 }
 0xd1a   : > { %v12516_v52 = vpop.f32.mrf.mxu1 }
 0xd1b   : > { %10337 = vst.msk [vmem:[%s17989_s28 + $0xb0] sm:$0xff] %vm391_vm0, %v10267_v28  ;;  %v10282_v14 = vadd.f32 %v12516_v52, %v17982_v5 }
 0xd1c   : > { %v10276_v24 = vpop.f32.mrf.mxu1 }
 0xd1d   : > { %10340 = vst.msk [vmem:[%s17989_s28 + $0xc8] sm:$0xff] %vm391_vm0, %v10282_v14  ;;  %v10277_v59 = vadd.f32 %v17982_v5, %v10276_v24 }
 0xd1e   : > { %v12519_v3 = vpop.f32.mrf.mxu1 }
 0xd1f   : > { %10339 = vst.msk [vmem:[%s17989_s28 + $0xc0] sm:$0xff] %vm391_vm0, %v10277_v59  ;;  %v10292_v63 = vadd.f32 %v12519_v3, %v17982_v5 }
 0xd20   : > { %v10286_v41 = vpop.f32.mrf.mxu1 }
 0xd21   : > { %10342 = vst.msk [vmem:[%s17989_s28 + $0xd8] sm:$0xff] %vm391_vm0, %v10292_v63  ;;  %v10287_v21 = vadd.f32 %v17982_v5, %v10286_v41 }
 0xd22   : > { %v12522_v37 = vpop.f32.mrf.mxu1 }
 0xd23   : > { %10341 = vst.msk [vmem:[%s17989_s28 + $0xd0] sm:$0xff] %vm391_vm0, %v10287_v21  ;;  %v10302_v16 = vadd.f32 %v12522_v37, %v17982_v5 }
 0xd24   : > { %v10296_v32 = vpop.f32.mrf.mxu1 }
 0xd25   : > { %10344 = vst.msk [vmem:[%s17989_s28 + $0xe8] sm:$0xff] %vm391_vm0, %v10302_v16  ;;  %v10297_v48 = vadd.f32 %v17982_v5, %v10296_v32 }
 0xd27   : > { %10343 = vst.msk [vmem:[%s17989_s28 + $0xe0] sm:$0xff] %vm391_vm0, %v10297_v48 }
 0xd29   : > { %v12525_v30 = vpop.f32.mrf.mxu1 }
 0xd2a   : > { %v10312_v6 = vadd.f32 %v12525_v30, %v17982_v5 }
 0xd2b   : > { %v10306_v31 = vpop.f32.mrf.mxu1 }
 0xd2c   : > { %10346 = vst.msk [vmem:[%s17989_s28 + $0xf8] sm:$0xff] %vm391_vm0, %v10312_v6  ;;  %v10307_v39 = vadd.f32 %v17982_v5, %v10306_v31 }
 0xd2e   : > { %10345 = vst.msk [vmem:[%s17989_s28 + $0xf0] sm:$0xff] %vm391_vm0, %v10307_v39 }
 0xd2f PF: > { %s17_s26 = sadd.s32 1, %s13202_s26   ;;  %s18898_s24 = smov %s13198_s25 }
 0xd30   : > { %p14_p5 = scmp.ge.s32.totalorder %s17_s26, 4   ;;  %s18899_s25 = smov %s18901_s27 }
 0xd32   :  { %16 = sbr.rel (!%p14_p5) target bundleno = 2 (0x2), region = 84 }

</bundles_post_ra>
